<compile_context>
chip_gen: v7x
topology: tpu7x:2x2x1
jax: 0.10.0
libtpu: 0.0.40
codegen_flags: <defaults>
</compile_context>

<pallas_src>
import numpy as np

import jax
import jax.numpy as jnp
from jax.experimental import pallas as pl
from jax.experimental.pallas import tpu as pltpu

LRELU_SLOPE = 0.2
BN_EPS = 1e-5
_VMEM_LIMIT = 32 * 1024 * 1024
_BLOCK_BYTES_BUDGET = 2 * 1024 * 1024


def _round_up(x, m):
    return (x + m - 1) // m * m


def _compiler_params():
    # Batch-block axis carries no cross-step state -> shard across TensorCores.
    return pltpu.CompilerParams(dimension_semantics=("parallel",),
                                vmem_limit_bytes=_VMEM_LIMIT)


# ----------------------------------------------------------------------------
# Kernels
# ----------------------------------------------------------------------------
def _l1_kernel(x_ref, w_ref, b_ref, o_ref):
    """First layer: im2col'd input -> single matmul + bias + LeakyReLU."""
    y = jnp.dot(x_ref[0], w_ref[...], preferred_element_type=jnp.float32)
    y = y + b_ref[...]
    o_ref[0] = jnp.where(y >= 0.0, y, LRELU_SLOPE * y).astype(o_ref.dtype)


def _make_conv_kernel(*, Wq, Lout, apply_affine):
    """4x4 / stride-2 conv on the space-to-depth packed input.

    Packed block: (1, T, 4*Cin) bf16, per-image planes of Hq*Wq rows.  The conv
    is 4 matmuls (tap groups (dr, dc)), each a unit-stride slice of the block
    shifted by dr*Wq + dc, contracted over K = 4*Cin against (4, K, Cout)
    weights.  Emits the pre-BN activation (bf16) and masked partial BN stats.
    """
    taps = [(dr, dc) for dr in range(2) for dc in range(2)]

    def _accumulate(load, w_ref, b_ref):
        acc = None
        for dr, dc in taps:
            lhs = load(dr * Wq + dc)                       # (Lout, K) bf16
            rhs = w_ref[dr * 2 + dc]                       # (K, Cout) bf16
            t = jnp.dot(lhs, rhs, preferred_element_type=jnp.float32)
            acc = t if acc is None else acc + t
        return acc + b_ref[...]

    def _emit(y, vmask_ref, y_ref, s_ref):
        y_ref[0] = y.astype(y_ref.dtype)                   # junk rows kept; sliced on host
        m = vmask_ref[...]                                 # (Lout, 1) f32 valid-row mask
        s1 = jnp.sum(y * m, axis=0, keepdims=True)
        s2 = jnp.sum(y * y * m, axis=0, keepdims=True)
        s_ref[0] = jnp.concatenate([s1, s2], axis=0)

    if apply_affine:
        def kernel(x_ref, w_ref, b_ref, scale_ref, shift_ref, pmask_ref,
                   vmask_ref, y_ref, s_ref, xa_ref):
            # Folded BN + LeakyReLU of the previous layer (f32 epilogue math),
            # then re-zero the padded ring post-affine and cast to bf16.
            xin = x_ref[0].astype(jnp.float32) * scale_ref[...] + shift_ref[...]
            xin = jnp.where(xin >= 0.0, xin, LRELU_SLOPE * xin)
            xa_ref[...] = (xin * pmask_ref[...]).astype(xa_ref.dtype)
            y = _accumulate(lambda off: xa_ref[pl.ds(off, Lout), :], w_ref, b_ref)
            _emit(y, vmask_ref, y_ref, s_ref)
    else:
        def kernel(x_ref, w_ref, b_ref, vmask_ref, y_ref, s_ref):
            y = _accumulate(lambda off: x_ref[0, pl.ds(off, Lout), :], w_ref, b_ref)
            _emit(y, vmask_ref, y_ref, s_ref)
    return kernel


def _head_kernel(y_ref, scale_ref, shift_ref, pool_ref, wfc_ref, bfc_ref, o_ref):
    """BN4 + LeakyReLU + global mean pool + Linear(512,1) + sigmoid (VPU dot)."""
    y = y_ref[0].astype(jnp.float32) * scale_ref[...] + shift_ref[...]
    y = jnp.where(y >= 0.0, y, LRELU_SLOPE * y)
    pooled = jnp.sum(y * pool_ref[...], axis=0, keepdims=True)     # (1, C)
    logit = jnp.sum(pooled * wfc_ref[...], axis=1, keepdims=True) + bfc_ref[...]
    o_ref[0] = 1.0 / (1.0 + jnp.exp(-logit))


# ----------------------------------------------------------------------------
# Host-side layout plumbing (pure reshuffles, fused by XLA)
# ----------------------------------------------------------------------------
def _im2col_l1(x):
    """(N, H, W, Cin) -> (N, H//2, W//2, 16*Cin) patches of a 4x4/s2/p1 conv."""
    N, H, W, Cin = x.shape
    Ho, Wo = H // 2, W // 2
    xp = jnp.pad(x, ((0, 0), (1, 1), (1, 1), (0, 0)))
    cols = [xp[:, kh:kh + 2 * Ho:2, kw:kw + 2 * Wo:2, :]
            for kh in range(4) for kw in range(4)]
    return jnp.concatenate(cols, axis=-1)


def _pack_s2d(y_nhwc, b_blk):
    """Zero-pad (padding=1) + space-to-depth: the next 4x4/s2 conv becomes a
    2x2/s1 conv with 4*C channels.  Returns (num_blocks, T, 4C) + geometry."""
    N, H, W, C = y_nhwc.shape
    Hq, Wq = (H + 2) // 2, (W + 2) // 2
    P = Hq * Wq
    nb = N // b_blk
    T = _round_up(b_blk * P + Wq + 2, 8)
    xp = jnp.pad(y_nhwc, ((0, 0), (1, 1), (1, 1), (0, 0)))
    x = xp.reshape(N, Hq, 2, Wq, 2, C).transpose(0, 1, 3, 2, 4, 5)
    x = x.reshape(nb, b_blk * P, 4 * C)
    x = jnp.pad(x, ((0, 0), (0, T - b_blk * P), (0, 0))).astype(jnp.bfloat16)
    return x, dict(Hq=Hq, Wq=Wq, P=P, T=T, Ho=Hq - 1, Wo=Wq - 1)


def _unpack_conv_out(y_flat, N, geo, C):
    """(nb, B_blk*P, C) flat conv output -> (N, Ho, Wo, C) (drops junk rows)."""
    P, Ho, Wo, Wq = geo["P"], geo["Ho"], geo["Wo"], geo["Wq"]
    y = y_flat.reshape(N, P, C)[:, :Ho * Wq, :]
    return y.reshape(N, Ho, Wq, C)[:, :, :Wo, :]


def _valid_row_mask(b_blk, geo):
    """(B_blk*P, 1) f32: 1 on rows that map to a real output pixel."""
    Hq, Wq, Ho, Wo = geo["Hq"], geo["Wq"], geo["Ho"], geo["Wo"]
    m = np.zeros((Hq, Wq), np.float32)
    m[:Ho, :Wo] = 1.0
    return jnp.asarray(np.tile(m.reshape(-1, 1), (b_blk, 1)))


def _pad_ring_mask(geo, cin, b_blk):
    """(T, 4*cin) f32: 0 on packed positions that belong to the zero-pad ring
    (so the folded affine + LeakyReLU cannot leak non-zeros into padding)."""
    Hq, Wq, P, T = geo["Hq"], geo["Wq"], geo["P"], geo["T"]
    m = np.ones((Hq, Wq, 2, 2), np.float32)
    m[0, :, 0, :] = 0.0
    m[Hq - 1, :, 1, :] = 0.0
    m[:, 0, :, 0] = 0.0
    m[:, Wq - 1, :, 1] = 0.0
    m = np.repeat(m.reshape(P, 4), cin, axis=1)        # slot-major channel layout
    m = np.tile(m, (b_blk, 1))
    m = np.concatenate([m, np.zeros((T - b_blk * P, 4 * cin), np.float32)], 0)
    return jnp.asarray(m)


# ----------------------------------------------------------------------------
# pallas_call wrappers
# ----------------------------------------------------------------------------
def _layer1(x_col_flat, w1, b1, b_blk):
    N, L_img, K = x_col_flat.shape
    nb = N // b_blk
    L1 = b_blk * L_img
    x = x_col_flat.reshape(nb, L1, K).astype(jnp.bfloat16)
    C1 = w1.shape[-1]
    return pl.pallas_call(
        _l1_kernel,
        grid=(nb,),
        in_specs=[pl.BlockSpec((1, L1, K), lambda n: (n, 0, 0)),
                  pl.BlockSpec((K, C1), lambda n: (0, 0)),
                  pl.BlockSpec((1, C1), lambda n: (0, 0))],
        out_specs=pl.BlockSpec((1, L1, C1), lambda n: (n, 0, 0)),
        out_shape=jax.ShapeDtypeStruct((nb, L1, C1), jnp.bfloat16),
        compiler_params=_compiler_params(),
    )(x, w1, b1)


def _conv_layer(x_packed, w4, bias, geo, b_blk, *, affine=None, pad_mask=None):
    nb, T, K = x_packed.shape
    Cout = w4.shape[-1]
    Wq, P = geo["Wq"], geo["P"]
    Lout = b_blk * P
    vmask = _valid_row_mask(b_blk, geo)
    apply_affine = affine is not None
    kernel = _make_conv_kernel(Wq=Wq, Lout=Lout, apply_affine=apply_affine)

    in_specs = [pl.BlockSpec((1, T, K), lambda n: (n, 0, 0)),
                pl.BlockSpec((4, K, Cout), lambda n: (0, 0, 0)),   # resident weights
                pl.BlockSpec((1, Cout), lambda n: (0, 0))]
    args = [x_packed, w4, bias]
    scratch = []
    if apply_affine:
        scale, shift = affine
        in_specs += [pl.BlockSpec((1, K), lambda n: (0, 0)),
                     pl.BlockSpec((1, K), lambda n: (0, 0)),
                     pl.BlockSpec((T, K), lambda n: (0, 0))]
        args += [scale, shift, pad_mask]
        scratch = [pltpu.VMEM((T, K), jnp.bfloat16)]
    in_specs += [pl.BlockSpec((Lout, 1), lambda n: (0, 0))]
    args += [vmask]

    return pl.pallas_call(
        kernel,
        grid=(nb,),
        in_specs=in_specs,
        out_specs=(pl.BlockSpec((1, Lout, Cout), lambda n: (n, 0, 0)),
                   pl.BlockSpec((1, 2, Cout), lambda n: (n, 0, 0))),
        out_shape=(jax.ShapeDtypeStruct((nb, Lout, Cout), jnp.bfloat16),
                   jax.ShapeDtypeStruct((nb, 2, Cout), jnp.float32)),
        scratch_shapes=scratch,
        compiler_params=_compiler_params(),
    )(*args)


def _head(y4_flat, geo4, scale4, shift4, w_fc, b_fc, N):
    C = y4_flat.shape[-1]
    P, Ho, Wo = geo4["P"], geo4["Ho"], geo4["Wo"]
    y = y4_flat.reshape(N, P, C)
    pool = _valid_row_mask(1, geo4) * (1.0 / float(Ho * Wo))
    out = pl.pallas_call(
        _head_kernel,
        grid=(N,),
        in_specs=[pl.BlockSpec((1, P, C), lambda n: (n, 0, 0)),
                  pl.BlockSpec((1, C), lambda n: (0, 0)),
                  pl.BlockSpec((1, C), lambda n: (0, 0)),
                  pl.BlockSpec((P, 1), lambda n: (0, 0)),
                  pl.BlockSpec((1, C), lambda n: (0, 0)),
                  pl.BlockSpec((1, 1), lambda n: (0, 0))],
        out_specs=pl.BlockSpec((1, 1, 1), lambda n: (n, 0, 0)),
        out_shape=jax.ShapeDtypeStruct((N, 1, 1), jnp.float32),
        compiler_params=_compiler_params(),
    )(y, scale4.reshape(1, C), shift4.reshape(1, C), pool, w_fc, b_fc)
    return out.reshape(N, 1)


def _bn_scale_shift(stats, count, gamma, beta):
    """Finalize train-mode BatchNorm batch statistics -> per-channel affine."""
    s = jnp.sum(stats, axis=0)                                 # (2, C)
    mean = s[0] / count
    # NOTE: E[x^2] - E[x]^2 in f32; fine at typical GAN activation scales.
    var = jnp.maximum(s[1] / count - mean * mean, 0.0)
    scale = gamma * jax.lax.rsqrt(var + BN_EPS)
    return scale, beta - mean * scale


# ----------------------------------------------------------------------------
# Batch-block sizing
# ----------------------------------------------------------------------------
def _per_image_block_bytes(H, W, in_channels):
    chans = [in_channels, 64, 128, 256, 512]
    worst, h, w = 1, H, W
    for li in range(4):
        cin, cout = chans[li], chans[li + 1]
        if li == 0:
            worst = max(worst, (h // 2) * (w // 2) * (16 * cin + cout) * 2)
        else:
            worst = max(worst, (h // 2 + 1) * (w // 2 + 1) * (4 * cin + cout) * 2)
        h, w = h // 2, w // 2
    return worst


def _choose_bblk(N, per_image_bytes, budget=_BLOCK_BYTES_BUDGET):
    divisors = [d for d in range(1, N + 1) if N % d == 0]
    for min_steps in (4, 2, 1):       # keep >=2 grid steps when possible (v7x megacore)
        cands = [d for d in divisors
                 if N // d >= min_steps and d * per_image_bytes <= budget]
        if cands:
            return max(cands)
    return 1


# ----------------------------------------------------------------------------
# Full forward pass (matches nn.Module forward: features -> classifier)
# ----------------------------------------------------------------------------
def discriminator_forward(img, params):
    x = jnp.transpose(img.astype(jnp.float32), (0, 2, 3, 1))       # NCHW -> NHWC once
    N, H, W, Cin = x.shape
    assert H % 16 == 0 and W % 16 == 0, "spatial dims must be multiples of 16"
    b_blk = _choose_bblk(N, _per_image_block_bytes(H, W, Cin))

    # --- layer 1: conv(Cin->64) + LeakyReLU (host im2col, K = 16*Cin) -------
    w1, b1 = params["l1"]
    Ho1, Wo1 = H // 2, W // 2
    x_col = _im2col_l1(x).reshape(N, Ho1 * Wo1, 16 * Cin)
    a1 = _layer1(x_col, w1, b1, b_blk).reshape(N, Ho1, Wo1, w1.shape[-1])

    # --- layer 2: conv(64->128) + BN partial stats ---------------------------
    w2, b2, g2, bt2 = params["l2"]
    x2, geo2 = _pack_s2d(a1, b_blk)
    y2, s2 = _conv_layer(x2, w2, b2, geo2, b_blk)
    scale2, shift2 = _bn_scale_shift(s2, float(N * geo2["Ho"] * geo2["Wo"]), g2, bt2)

    # --- layer 3: [BN2 + LReLU folded into prologue] conv(128->256) + stats --
    w3, b3, g3, bt3 = params["l3"]
    c2 = w2.shape[-1]
    x3, geo3 = _pack_s2d(_unpack_conv_out(y2, N, geo2, c2), b_blk)
    aff3 = (jnp.tile(scale2, 4).reshape(1, -1), jnp.tile(shift2, 4).reshape(1, -1))
    y3, s3 = _conv_layer(x3, w3, b3, geo3, b_blk, affine=aff3,
                         pad_mask=_pad_ring_mask(geo3, c2, b_blk))
    scale3, shift3 = _bn_scale_shift(s3, float(N * geo3["Ho"] * geo3["Wo"]), g3, bt3)

    # --- layer 4: [BN3 + LReLU folded] conv(256->512) + stats ----------------
    w4, b4, g4, bt4 = params["l4"]
    c3 = w3.shape[-1]
    x4, geo4 = _pack_s2d(_unpack_conv_out(y3, N, geo3, c3), b_blk)
    aff4 = (jnp.tile(scale3, 4).reshape(1, -1), jnp.tile(shift3, 4).reshape(1, -1))
    y4, s4 = _conv_layer(x4, w4, b4, geo4, b_blk, affine=aff4,
                         pad_mask=_pad_ring_mask(geo4, c3, b_blk))
    scale4, shift4 = _bn_scale_shift(s4, float(N * geo4["Ho"] * geo4["Wo"]), g4, bt4)

    # --- head: BN4 + LReLU + global mean + Linear(512,1) + sigmoid -----------
    w_fc, b_fc = params["fc"]
    return _head(y4, geo4, scale4, shift4, w_fc, b_fc, N)


# ----------------------------------------------------------------------------
# Deterministic parameter initialization (shapes from the nn.Module __init__)
# ----------------------------------------------------------------------------
def _pack_conv_weight_l1(w):
    """(Cout, Cin, 4, 4) -> (16*Cin, Cout), K index = (kh*4+kw)*Cin + ci."""
    c_out, c_in = w.shape[0], w.shape[1]
    return jnp.transpose(w, (2, 3, 1, 0)).reshape(16 * c_in, c_out).astype(jnp.bfloat16)


def _pack_conv_weight(w):
    """(Cout, Cin, 4, 4) -> (4, 4*Cin, Cout) for the space-to-depth conv:
    tap group = 2*(kh//2) + (kw//2); K index = (2*(kh%2) + kw%2)*Cin + ci."""
    c_out, c_in = w.shape[0], w.shape[1]
    w = w.reshape(c_out, c_in, 2, 2, 2, 2)            # (co, ci, dr, pr, dc, pc)
    w = jnp.transpose(w, (2, 4, 3, 5, 1, 0))          # (dr, dc, pr, pc, ci, co)
    return w.reshape(4, 4 * c_in, c_out).astype(jnp.bfloat16)


def init_params(key, in_channels=3):
    chans = [in_channels, 64, 128, 256, 512]
    params = {}
    for li in range(4):
        key, k1, k2 = jax.random.split(key, 3)
        c_in, c_out = chans[li], chans[li + 1]
        w = jax.random.normal(k1, (c_out, c_in, 4, 4), jnp.float32) / np.sqrt(c_in * 16.0)
        b = (jax.random.normal(k2, (c_out,), jnp.float32) * 0.01).reshape(1, c_out)
        if li == 0:
            params["l1"] = (_pack_conv_weight_l1(w), b)
        else:
            params[f"l{li + 1}"] = (_pack_conv_weight(w), b,
                                    jnp.ones((c_out,), jnp.float32),    # BN weight
                                    jnp.zeros((c_out,), jnp.float32))   # BN bias
    key, k1 = jax.random.split(key)
    w_fc = jax.random.normal(k1, (1, 512), jnp.float32) / np.sqrt(512.0)
    params["fc"] = (w_fc, jnp.zeros((1, 1), jnp.float32))
    return params


if __name__ == "__main__":
    key = jax.random.PRNGKey(0)
    k_img, k_par = jax.random.split(key)
    img = jax.random.normal(k_img, (2, 3, 16, 16), jnp.float32)   # NCHW
    params = init_params(k_par, in_channels=3)

    fwd = jax.jit(discriminator_forward)
    out = jax.block_until_ready(fwd(img, params))

    assert out.shape == (2, 1), out.shape
    assert bool(jnp.all(jnp.isfinite(out)))
    assert bool(jnp.all((out >= 0.0) & (out <= 1.0)))
    print("KERNEL_OK")
</pallas_src>

<mosaic_0001>
module attributes {stable_mosaic.version = 11 : i64} {
  func.func @_l1_kernel(%arg0: i32, %arg1: memref<1x64x48xbf16, #tpu.memory_space<vmem>>, %arg2: memref<48x64xbf16, #tpu.memory_space<vmem>>, %arg3: memref<1x64xf32, #tpu.memory_space<vmem>>, %arg4: memref<1x64x64xbf16, #tpu.memory_space<vmem>>) attributes {dimension_semantics = [#tpu.dimension_semantics<parallel>], iteration_bounds = array<i64: 2>, scalar_prefetch = 0 : i64, scratch_operands = 0 : i64, tpu.core_type = #tpu.core_type<tc>, window_params = [{transform_indices = @transform_0, window_bounds = array<i64: 1, 64, 48>}, {pipeline_mode = #tpu.pipeline_mode<synchronous>, transform_indices = @transform_1, window_bounds = array<i64: 48, 64>}, {pipeline_mode = #tpu.pipeline_mode<synchronous>, transform_indices = @transform_2, window_bounds = array<i64: 1, 64>}, {transform_indices = @transform_3, window_bounds = array<i64: 1, 64, 64>}]} {
    %c0 = arith.constant 0 : index
    %c0_0 = arith.constant 0 : index
    %c0_1 = arith.constant 0 : index
    %0 = vector.load %arg1[%c0, %c0_0, %c0_1] : memref<1x64x48xbf16, #tpu.memory_space<vmem>>, vector<1x64x48xbf16>
    %1 = vector.shape_cast %0 : vector<1x64x48xbf16> to vector<64x48xbf16>
    %c0_2 = arith.constant 0 : index
    %c0_3 = arith.constant 0 : index
    %2 = vector.load %arg2[%c0_2, %c0_3] : memref<48x64xbf16, #tpu.memory_space<vmem>>, vector<48x64xbf16>
    %cst = arith.constant dense<0.000000e+00> : vector<64x64xf32>
    %3 = tpu.matmul %1, %2, %cst {dimension_numbers = #tpu.dot_dimension_numbers<[1], [0], [0], [1], [0, 0, 1, 1], [], []>} : vector<64x48xbf16>, vector<48x64xbf16>, vector<64x64xf32> -> vector<64x64xf32>
    %c0_4 = arith.constant 0 : index
    %c0_5 = arith.constant 0 : index
    %4 = vector.load %arg3[%c0_4, %c0_5] : memref<1x64xf32, #tpu.memory_space<vmem>>, vector<1x64xf32>
    %5 = vector.broadcast %4 : vector<1x64xf32> to vector<64x64xf32>
    %6 = arith.addf %3, %5 : vector<64x64xf32>
    %cst_6 = arith.constant 0.000000e+00 : f32
    %7 = vector.broadcast %cst_6 : f32 to vector<64x64xf32>
    %8 = arith.cmpf oge, %6, %7 : vector<64x64xf32>
    %cst_7 = arith.constant 2.000000e-01 : f32
    %9 = vector.broadcast %cst_7 : f32 to vector<64x64xf32>
    %10 = arith.mulf %9, %6 : vector<64x64xf32>
    %11 = arith.select %8, %6, %10 : vector<64x64xi1>, vector<64x64xf32>
    %12 = arith.truncf %11 : vector<64x64xf32> to vector<64x64xbf16>
    %c0_8 = arith.constant 0 : index
    %c0_9 = arith.constant 0 : index
    %c0_10 = arith.constant 0 : index
    %13 = vector.load %arg4[%c0_8, %c0_9, %c0_10] : memref<1x64x64xbf16, #tpu.memory_space<vmem>>, vector<1x64x64xbf16>
    %14 = vector.shape_cast %13 : vector<1x64x64xbf16> to vector<64x64xbf16>
    %15 = vector.shape_cast %12 : vector<64x64xbf16> to vector<1x64x64xbf16>
    tpu.vector_store %arg4[%c0_8, %c0_9, %c0_10], %15 {strides = array<i32>} : memref<1x64x64xbf16, #tpu.memory_space<vmem>>, vector<1x64x64xbf16>,
    return
  }
  func.func @transform_0(%arg0: i32) -> (i32, i32, i32) {
    %c0_i32 = arith.constant 0 : i32
    %c0_i32_0 = arith.constant 0 : i32
    %c0_i32_1 = arith.constant 0 : i32
    return %arg0, %c0_i32, %c0_i32_0 : i32, i32, i32
  }
  func.func @transform_1(%arg0: i32) -> (i32, i32) {
    %c0_i32 = arith.constant 0 : i32
    %c0_i32_0 = arith.constant 0 : i32
    %c0_i32_1 = arith.constant 0 : i32
    return %c0_i32, %c0_i32_0 : i32, i32
  }
  func.func @transform_2(%arg0: i32) -> (i32, i32) {
    %c0_i32 = arith.constant 0 : i32
    %c0_i32_0 = arith.constant 0 : i32
    %c0_i32_1 = arith.constant 0 : i32
    return %c0_i32, %c0_i32_0 : i32, i32
  }
  func.func @transform_3(%arg0: i32) -> (i32, i32, i32) {
    %c0_i32 = arith.constant 0 : i32
    %c0_i32_0 = arith.constant 0 : i32
    %c0_i32_1 = arith.constant 0 : i32
    return %arg0, %c0_i32, %c0_i32_0 : i32, i32, i32
  }
}

module attributes {stable_mosaic.version = 11 : i64} {
  func.func @kernel(%arg0: i32, %arg1: memref<1x32x256xbf16, #tpu.memory_space<vmem>>, %arg2: memref<4x256x128xbf16, #tpu.memory_space<vmem>>, %arg3: memref<1x128xf32, #tpu.memory_space<vmem>>, %arg4: memref<25x1xf32, #tpu.memory_space<vmem>>, %arg5: memref<1x25x128xbf16, #tpu.memory_space<vmem>>, %arg6: memref<1x2x128xf32, #tpu.memory_space<vmem>>) attributes {dimension_semantics = [#tpu.dimension_semantics<parallel>], iteration_bounds = array<i64: 2>, scalar_prefetch = 0 : i64, scratch_operands = 0 : i64, tpu.core_type = #tpu.core_type<tc>, window_params = [{transform_indices = @transform_0, window_bounds = array<i64: 1, 32, 256>}, {pipeline_mode = #tpu.pipeline_mode<synchronous>, transform_indices = @transform_1, window_bounds = array<i64: 4, 256, 128>}, {pipeline_mode = #tpu.pipeline_mode<synchronous>, transform_indices = @transform_2, window_bounds = array<i64: 1, 128>}, {pipeline_mode = #tpu.pipeline_mode<synchronous>, transform_indices = @transform_3, window_bounds = array<i64: 25, 1>}, {transform_indices = @transform_4, window_bounds = array<i64: 1, 25, 128>}, {transform_indices = @transform_5, window_bounds = array<i64: 1, 2, 128>}]} {
    %c0 = arith.constant 0 : index
    %c0_0 = arith.constant 0 : index
    %c0_1 = arith.constant 0 : index
    %0 = vector.load %arg1[%c0, %c0_0, %c0_1] : memref<1x32x256xbf16, #tpu.memory_space<vmem>>, vector<1x25x256xbf16>
    %1 = vector.shape_cast %0 : vector<1x25x256xbf16> to vector<25x256xbf16>
    %c0_2 = arith.constant 0 : index
    %c0_3 = arith.constant 0 : index
    %c0_4 = arith.constant 0 : index
    %2 = vector.load %arg2[%c0_2, %c0_3, %c0_4] : memref<4x256x128xbf16, #tpu.memory_space<vmem>>, vector<1x256x128xbf16>
    %3 = vector.shape_cast %2 : vector<1x256x128xbf16> to vector<256x128xbf16>
    %cst = arith.constant dense<0.000000e+00> : vector<25x128xf32>
    %4 = tpu.matmul %1, %3, %cst {dimension_numbers = #tpu.dot_dimension_numbers<[1], [0], [0], [1], [0, 0, 1, 1], [], []>} : vector<25x256xbf16>, vector<256x128xbf16>, vector<25x128xf32> -> vector<25x128xf32>
    %c0_5 = arith.constant 0 : index
    %c1 = arith.constant 1 : index
    %c0_6 = arith.constant 0 : index
    %5 = vector.load %arg1[%c0_5, %c1, %c0_6] : memref<1x32x256xbf16, #tpu.memory_space<vmem>>, vector<1x25x256xbf16>
    %6 = vector.shape_cast %5 : vector<1x25x256xbf16> to vector<25x256xbf16>
    %c1_7 = arith.constant 1 : index
    %c0_8 = arith.constant 0 : index
    %c0_9 = arith.constant 0 : index
    %7 = vector.load %arg2[%c1_7, %c0_8, %c0_9] : memref<4x256x128xbf16, #tpu.memory_space<vmem>>, vector<1x256x128xbf16>
    %8 = vector.shape_cast %7 : vector<1x256x128xbf16> to vector<256x128xbf16>
    %cst_10 = arith.constant dense<0.000000e+00> : vector<25x128xf32>
    %9 = tpu.matmul %6, %8, %cst_10 {dimension_numbers = #tpu.dot_dimension_numbers<[1], [0], [0], [1], [0, 0, 1, 1], [], []>} : vector<25x256xbf16>, vector<256x128xbf16>, vector<25x128xf32> -> vector<25x128xf32>
    %10 = arith.addf %4, %9 : vector<25x128xf32>
    %c0_11 = arith.constant 0 : index
    %c5 = arith.constant 5 : index
    %c0_12 = arith.constant 0 : index
    %11 = vector.load %arg1[%c0_11, %c5, %c0_12] : memref<1x32x256xbf16, #tpu.memory_space<vmem>>, vector<1x25x256xbf16>
    %12 = vector.shape_cast %11 : vector<1x25x256xbf16> to vector<25x256xbf16>
    %c2 = arith.constant 2 : index
    %c0_13 = arith.constant 0 : index
    %c0_14 = arith.constant 0 : index
    %13 = vector.load %arg2[%c2, %c0_13, %c0_14] : memref<4x256x128xbf16, #tpu.memory_space<vmem>>, vector<1x256x128xbf16>
    %14 = vector.shape_cast %13 : vector<1x256x128xbf16> to vector<256x128xbf16>
    %cst_15 = arith.constant dense<0.000000e+00> : vector<25x128xf32>
    %15 = tpu.matmul %12, %14, %cst_15 {dimension_numbers = #tpu.dot_dimension_numbers<[1], [0], [0], [1], [0, 0, 1, 1], [], []>} : vector<25x256xbf16>, vector<256x128xbf16>, vector<25x128xf32> -> vector<25x128xf32>
    %16 = arith.addf %10, %15 : vector<25x128xf32>
    %c0_16 = arith.constant 0 : index
    %c6 = arith.constant 6 : index
    %c0_17 = arith.constant 0 : index
    %17 = vector.load %arg1[%c0_16, %c6, %c0_17] : memref<1x32x256xbf16, #tpu.memory_space<vmem>>, vector<1x25x256xbf16>
    %18 = vector.shape_cast %17 : vector<1x25x256xbf16> to vector<25x256xbf16>
    %c3 = arith.constant 3 : index
    %c0_18 = arith.constant 0 : index
    %c0_19 = arith.constant 0 : index
    %19 = vector.load %arg2[%c3, %c0_18, %c0_19] : memref<4x256x128xbf16, #tpu.memory_space<vmem>>, vector<1x256x128xbf16>
    %20 = vector.shape_cast %19 : vector<1x256x128xbf16> to vector<256x128xbf16>
    %cst_20 = arith.constant dense<0.000000e+00> : vector<25x128xf32>
    %21 = tpu.matmul %18, %20, %cst_20 {dimension_numbers = #tpu.dot_dimension_numbers<[1], [0], [0], [1], [0, 0, 1, 1], [], []>} : vector<25x256xbf16>, vector<256x128xbf16>, vector<25x128xf32> -> vector<25x128xf32>
    %22 = arith.addf %16, %21 : vector<25x128xf32>
    %c0_21 = arith.constant 0 : index
    %c0_22 = arith.constant 0 : index
    %23 = vector.load %arg3[%c0_21, %c0_22] : memref<1x128xf32, #tpu.memory_space<vmem>>, vector<1x128xf32>
    %24 = vector.broadcast %23 : vector<1x128xf32> to vector<25x128xf32>
    %25 = arith.addf %22, %24 : vector<25x128xf32>
    %26 = arith.truncf %25 : vector<25x128xf32> to vector<25x128xbf16>
    %c0_23 = arith.constant 0 : index
    %c0_24 = arith.constant 0 : index
    %c0_25 = arith.constant 0 : index
    %27 = vector.load %arg5[%c0_23, %c0_24, %c0_25] : memref<1x25x128xbf16, #tpu.memory_space<vmem>>, vector<1x25x128xbf16>
    %28 = vector.shape_cast %27 : vector<1x25x128xbf16> to vector<25x128xbf16>
    %29 = vector.shape_cast %26 : vector<25x128xbf16> to vector<1x25x128xbf16>
    tpu.vector_store %arg5[%c0_23, %c0_24, %c0_25], %29 {strides = array<i32>} : memref<1x25x128xbf16, #tpu.memory_space<vmem>>, vector<1x25x128xbf16>,
    %c0_26 = arith.constant 0 : index
    %c0_27 = arith.constant 0 : index
    %30 = vector.load %arg4[%c0_26, %c0_27] : memref<25x1xf32, #tpu.memory_space<vmem>>, vector<25x1xf32>
    %31 = vector.broadcast %30 : vector<25x1xf32> to vector<25x128xf32>
    %32 = arith.mulf %25, %31 : vector<25x128xf32>
    %cst_28 = arith.constant dense<0.000000e+00> : vector<128xf32>
    %33 = vector.multi_reduction <add>, %32, %cst_28 [0] : vector<25x128xf32> to vector<128xf32>
    %34 = vector.shape_cast %33 : vector<128xf32> to vector<1x128xf32>
    %35 = arith.mulf %25, %25 : vector<25x128xf32>
    %36 = vector.broadcast %30 : vector<25x1xf32> to vector<25x128xf32>
    %37 = arith.mulf %35, %36 : vector<25x128xf32>
    %cst_29 = arith.constant dense<0.000000e+00> : vector<128xf32>
    %38 = vector.multi_reduction <add>, %37, %cst_29 [0] : vector<25x128xf32> to vector<128xf32>
    %39 = vector.shape_cast %38 : vector<128xf32> to vector<1x128xf32>
    %40 = tpu.concatenate %34, %39 in 0 : vector<1x128xf32>, vector<1x128xf32> -> vector<2x128xf32>
    %c0_30 = arith.constant 0 : index
    %c0_31 = arith.constant 0 : index
    %c0_32 = arith.constant 0 : index
    %41 = vector.load %arg6[%c0_30, %c0_31, %c0_32] : memref<1x2x128xf32, #tpu.memory_space<vmem>>, vector<1x2x128xf32>
    %42 = vector.shape_cast %41 : vector<1x2x128xf32> to vector<2x128xf32>
    %43 = vector.shape_cast %40 : vector<2x128xf32> to vector<1x2x128xf32>
    tpu.vector_store %arg6[%c0_30, %c0_31, %c0_32], %43 {strides = array<i32>} : memref<1x2x128xf32, #tpu.memory_space<vmem>>, vector<1x2x128xf32>,
    return
  }
  func.func @transform_0(%arg0: i32) -> (i32, i32, i32) {
    %c0_i32 = arith.constant 0 : i32
    %c0_i32_0 = arith.constant 0 : i32
    %c0_i32_1 = arith.constant 0 : i32
    return %arg0, %c0_i32, %c0_i32_0 : i32, i32, i32
  }
  func.func @transform_1(%arg0: i32) -> (i32, i32, i32) {
    %c0_i32 = arith.constant 0 : i32
    %c0_i32_0 = arith.constant 0 : i32
    %c0_i32_1 = arith.constant 0 : i32
    %c0_i32_2 = arith.constant 0 : i32
    return %c0_i32, %c0_i32_0, %c0_i32_1 : i32, i32, i32
  }
  func.func @transform_2(%arg0: i32) -> (i32, i32) {
    %c0_i32 = arith.constant 0 : i32
    %c0_i32_0 = arith.constant 0 : i32
    %c0_i32_1 = arith.constant 0 : i32
    return %c0_i32, %c0_i32_0 : i32, i32
  }
  func.func @transform_3(%arg0: i32) -> (i32, i32) {
    %c0_i32 = arith.constant 0 : i32
    %c0_i32_0 = arith.constant 0 : i32
    %c0_i32_1 = arith.constant 0 : i32
    return %c0_i32, %c0_i32_0 : i32, i32
  }
  func.func @transform_4(%arg0: i32) -> (i32, i32, i32) {
    %c0_i32 = arith.constant 0 : i32
    %c0_i32_0 = arith.constant 0 : i32
    %c0_i32_1 = arith.constant 0 : i32
    return %arg0, %c0_i32, %c0_i32_0 : i32, i32, i32
  }
  func.func @transform_5(%arg0: i32) -> (i32, i32, i32) {
    %c0_i32 = arith.constant 0 : i32
    %c0_i32_0 = arith.constant 0 : i32
    %c0_i32_1 = arith.constant 0 : i32
    return %arg0, %c0_i32, %c0_i32_0 : i32, i32, i32
  }
}

module attributes {stable_mosaic.version = 11 : i64} {
  func.func @kernel(%arg0: i32, %arg1: memref<1x16x512xbf16, #tpu.memory_space<vmem>>, %arg2: memref<4x512x256xbf16, #tpu.memory_space<vmem>>, %arg3: memref<1x256xf32, #tpu.memory_space<vmem>>, %arg4: memref<1x512xf32, #tpu.memory_space<vmem>>, %arg5: memref<1x512xf32, #tpu.memory_space<vmem>>, %arg6: memref<16x512xf32, #tpu.memory_space<vmem>>, %arg7: memref<9x1xf32, #tpu.memory_space<vmem>>, %arg8: memref<1x9x256xbf16, #tpu.memory_space<vmem>>, %arg9: memref<1x2x256xf32, #tpu.memory_space<vmem>>, %arg10: memref<16x512xbf16, #tpu.memory_space<vmem>>) attributes {dimension_semantics = [#tpu.dimension_semantics<parallel>], iteration_bounds = array<i64: 2>, scalar_prefetch = 0 : i64, scratch_operands = 1 : i64, tpu.core_type = #tpu.core_type<tc>, window_params = [{transform_indices = @transform_0, window_bounds = array<i64: 1, 16, 512>}, {pipeline_mode = #tpu.pipeline_mode<synchronous>, transform_indices = @transform_1, window_bounds = array<i64: 4, 512, 256>}, {pipeline_mode = #tpu.pipeline_mode<synchronous>, transform_indices = @transform_2, window_bounds = array<i64: 1, 256>}, {pipeline_mode = #tpu.pipeline_mode<synchronous>, transform_indices = @transform_3, window_bounds = array<i64: 1, 512>}, {pipeline_mode = #tpu.pipeline_mode<synchronous>, transform_indices = @transform_4, window_bounds = array<i64: 1, 512>}, {pipeline_mode = #tpu.pipeline_mode<synchronous>, transform_indices = @transform_5, window_bounds = array<i64: 16, 512>}, {pipeline_mode = #tpu.pipeline_mode<synchronous>, transform_indices = @transform_6, window_bounds = array<i64: 9, 1>}, {transform_indices = @transform_7, window_bounds = array<i64: 1, 9, 256>}, {transform_indices = @transform_8, window_bounds = array<i64: 1, 2, 256>}]} {
    %c0 = arith.constant 0 : index
    %c0_0 = arith.constant 0 : index
    %c0_1 = arith.constant 0 : index
    %0 = vector.load %arg1[%c0, %c0_0, %c0_1] : memref<1x16x512xbf16, #tpu.memory_space<vmem>>, vector<1x16x512xbf16>
    %1 = vector.shape_cast %0 : vector<1x16x512xbf16> to vector<16x512xbf16>
    %2 = arith.extf %1 : vector<16x512xbf16> to vector<16x512xf32>
    %c0_2 = arith.constant 0 : index
    %c0_3 = arith.constant 0 : index
    %3 = vector.load %arg4[%c0_2, %c0_3] : memref<1x512xf32, #tpu.memory_space<vmem>>, vector<1x512xf32>
    %4 = vector.broadcast %3 : vector<1x512xf32> to vector<16x512xf32>
    %5 = arith.mulf %2, %4 : vector<16x512xf32>
    %c0_4 = arith.constant 0 : index
    %c0_5 = arith.constant 0 : index
    %6 = vector.load %arg5[%c0_4, %c0_5] : memref<1x512xf32, #tpu.memory_space<vmem>>, vector<1x512xf32>
    %7 = vector.broadcast %6 : vector<1x512xf32> to vector<16x512xf32>
    %8 = arith.addf %5, %7 : vector<16x512xf32>
    %cst = arith.constant 0.000000e+00 : f32
    %9 = vector.broadcast %cst : f32 to vector<16x512xf32>
    %10 = arith.cmpf oge, %8, %9 : vector<16x512xf32>
    %cst_6 = arith.constant 2.000000e-01 : f32
    %11 = vector.broadcast %cst_6 : f32 to vector<16x512xf32>
    %12 = arith.mulf %11, %8 : vector<16x512xf32>
    %13 = arith.select %10, %8, %12 : vector<16x512xi1>, vector<16x512xf32>
    %c0_7 = arith.constant 0 : index
    %c0_8 = arith.constant 0 : index
    %14 = vector.load %arg6[%c0_7, %c0_8] : memref<16x512xf32, #tpu.memory_space<vmem>>, vector<16x512xf32>
    %15 = arith.mulf %13, %14 : vector<16x512xf32>
    %16 = arith.truncf %15 : vector<16x512xf32> to vector<16x512xbf16>
    %c0_9 = arith.constant 0 : index
    %c0_10 = arith.constant 0 : index
    %17 = vector.load %arg10[%c0_9, %c0_10] : memref<16x512xbf16, #tpu.memory_space<vmem>>, vector<16x512xbf16>
    tpu.vector_store %arg10[%c0_9, %c0_10], %16 {strides = array<i32>} : memref<16x512xbf16, #tpu.memory_space<vmem>>, vector<16x512xbf16>,
    %c0_11 = arith.constant 0 : index
    %c0_12 = arith.constant 0 : index
    %18 = vector.load %arg10[%c0_11, %c0_12] : memref<16x512xbf16, #tpu.memory_space<vmem>>, vector<9x512xbf16>
    %c0_13 = arith.constant 0 : index
    %c0_14 = arith.constant 0 : index
    %c0_15 = arith.constant 0 : index
    %19 = vector.load %arg2[%c0_13, %c0_14, %c0_15] : memref<4x512x256xbf16, #tpu.memory_space<vmem>>, vector<1x512x256xbf16>
    %20 = vector.shape_cast %19 : vector<1x512x256xbf16> to vector<512x256xbf16>
    %cst_16 = arith.constant dense<0.000000e+00> : vector<9x256xf32>
    %21 = tpu.matmul %18, %20, %cst_16 {dimension_numbers = #tpu.dot_dimension_numbers<[1], [0], [0], [1], [0, 0, 1, 1], [], []>} : vector<9x512xbf16>, vector<512x256xbf16>, vector<9x256xf32> -> vector<9x256xf32>
    %c1 = arith.constant 1 : index
    %c0_17 = arith.constant 0 : index
    %22 = vector.load %arg10[%c1, %c0_17] : memref<16x512xbf16, #tpu.memory_space<vmem>>, vector<9x512xbf16>
    %c1_18 = arith.constant 1 : index
    %c0_19 = arith.constant 0 : index
    %c0_20 = arith.constant 0 : index
    %23 = vector.load %arg2[%c1_18, %c0_19, %c0_20] : memref<4x512x256xbf16, #tpu.memory_space<vmem>>, vector<1x512x256xbf16>
    %24 = vector.shape_cast %23 : vector<1x512x256xbf16> to vector<512x256xbf16>
    %cst_21 = arith.constant dense<0.000000e+00> : vector<9x256xf32>
    %25 = tpu.matmul %22, %24, %cst_21 {dimension_numbers = #tpu.dot_dimension_numbers<[1], [0], [0], [1], [0, 0, 1, 1], [], []>} : vector<9x512xbf16>, vector<512x256xbf16>, vector<9x256xf32> -> vector<9x256xf32>
    %26 = arith.addf %21, %25 : vector<9x256xf32>
    %c3 = arith.constant 3 : index
    %c0_22 = arith.constant 0 : index
    %27 = vector.load %arg10[%c3, %c0_22] : memref<16x512xbf16, #tpu.memory_space<vmem>>, vector<9x512xbf16>
    %c2 = arith.constant 2 : index
    %c0_23 = arith.constant 0 : index
    %c0_24 = arith.constant 0 : index
    %28 = vector.load %arg2[%c2, %c0_23, %c0_24] : memref<4x512x256xbf16, #tpu.memory_space<vmem>>, vector<1x512x256xbf16>
    %29 = vector.shape_cast %28 : vector<1x512x256xbf16> to vector<512x256xbf16>
    %cst_25 = arith.constant dense<0.000000e+00> : vector<9x256xf32>
    %30 = tpu.matmul %27, %29, %cst_25 {dimension_numbers = #tpu.dot_dimension_numbers<[1], [0], [0], [1], [0, 0, 1, 1], [], []>} : vector<9x512xbf16>, vector<512x256xbf16>, vector<9x256xf32> -> vector<9x256xf32>
    %31 = arith.addf %26, %30 : vector<9x256xf32>
    %c4 = arith.constant 4 : index
    %c0_26 = arith.constant 0 : index
    %32 = vector.load %arg10[%c4, %c0_26] : memref<16x512xbf16, #tpu.memory_space<vmem>>, vector<9x512xbf16>
    %c3_27 = arith.constant 3 : index
    %c0_28 = arith.constant 0 : index
    %c0_29 = arith.constant 0 : index
    %33 = vector.load %arg2[%c3_27, %c0_28, %c0_29] : memref<4x512x256xbf16, #tpu.memory_space<vmem>>, vector<1x512x256xbf16>
    %34 = vector.shape_cast %33 : vector<1x512x256xbf16> to vector<512x256xbf16>
    %cst_30 = arith.constant dense<0.000000e+00> : vector<9x256xf32>
    %35 = tpu.matmul %32, %34, %cst_30 {dimension_numbers = #tpu.dot_dimension_numbers<[1], [0], [0], [1], [0, 0, 1, 1], [], []>} : vector<9x512xbf16>, vector<512x256xbf16>, vector<9x256xf32> -> vector<9x256xf32>
    %36 = arith.addf %31, %35 : vector<9x256xf32>
    %c0_31 = arith.constant 0 : index
    %c0_32 = arith.constant 0 : index
    %37 = vector.load %arg3[%c0_31, %c0_32] : memref<1x256xf32, #tpu.memory_space<vmem>>, vector<1x256xf32>
    %38 = vector.broadcast %37 : vector<1x256xf32> to vector<9x256xf32>
    %39 = arith.addf %36, %38 : vector<9x256xf32>
    %40 = arith.truncf %39 : vector<9x256xf32> to vector<9x256xbf16>
    %c0_33 = arith.constant 0 : index
    %c0_34 = arith.constant 0 : index
    %c0_35 = arith.constant 0 : index
    %41 = vector.load %arg8[%c0_33, %c0_34, %c0_35] : memref<1x9x256xbf16, #tpu.memory_space<vmem>>, vector<1x9x256xbf16>
    %42 = vector.shape_cast %41 : vector<1x9x256xbf16> to vector<9x256xbf16>
    %43 = vector.shape_cast %40 : vector<9x256xbf16> to vector<1x9x256xbf16>
    tpu.vector_store %arg8[%c0_33, %c0_34, %c0_35], %43 {strides = array<i32>} : memref<1x9x256xbf16, #tpu.memory_space<vmem>>, vector<1x9x256xbf16>,
    %c0_36 = arith.constant 0 : index
    %c0_37 = arith.constant 0 : index
    %44 = vector.load %arg7[%c0_36, %c0_37] : memref<9x1xf32, #tpu.memory_space<vmem>>, vector<9x1xf32>
    %45 = vector.broadcast %44 : vector<9x1xf32> to vector<9x256xf32>
    %46 = arith.mulf %39, %45 : vector<9x256xf32>
    %cst_38 = arith.constant dense<0.000000e+00> : vector<256xf32>
    %47 = vector.multi_reduction <add>, %46, %cst_38 [0] : vector<9x256xf32> to vector<256xf32>
    %48 = vector.shape_cast %47 : vector<256xf32> to vector<1x256xf32>
    %49 = arith.mulf %39, %39 : vector<9x256xf32>
    %50 = vector.broadcast %44 : vector<9x1xf32> to vector<9x256xf32>
    %51 = arith.mulf %49, %50 : vector<9x256xf32>
    %cst_39 = arith.constant dense<0.000000e+00> : vector<256xf32>
    %52 = vector.multi_reduction <add>, %51, %cst_39 [0] : vector<9x256xf32> to vector<256xf32>
    %53 = vector.shape_cast %52 : vector<256xf32> to vector<1x256xf32>
    %54 = tpu.concatenate %48, %53 in 0 : vector<1x256xf32>, vector<1x256xf32> -> vector<2x256xf32>
    %c0_40 = arith.constant 0 : index
    %c0_41 = arith.constant 0 : index
    %c0_42 = arith.constant 0 : index
    %55 = vector.load %arg9[%c0_40, %c0_41, %c0_42] : memref<1x2x256xf32, #tpu.memory_space<vmem>>, vector<1x2x256xf32>
    %56 = vector.shape_cast %55 : vector<1x2x256xf32> to vector<2x256xf32>
    %57 = vector.shape_cast %54 : vector<2x256xf32> to vector<1x2x256xf32>
    tpu.vector_store %arg9[%c0_40, %c0_41, %c0_42], %57 {strides = array<i32>} : memref<1x2x256xf32, #tpu.memory_space<vmem>>, vector<1x2x256xf32>,
    return
  }
  func.func @transform_0(%arg0: i32) -> (i32, i32, i32) {
    %c0_i32 = arith.constant 0 : i32
    %c0_i32_0 = arith.constant 0 : i32
    %c0_i32_1 = arith.constant 0 : i32
    return %arg0, %c0_i32, %c0_i32_0 : i32, i32, i32
  }
  func.func @transform_1(%arg0: i32) -> (i32, i32, i32) {
    %c0_i32 = arith.constant 0 : i32
    %c0_i32_0 = arith.constant 0 : i32
    %c0_i32_1 = arith.constant 0 : i32
    %c0_i32_2 = arith.constant 0 : i32
    return %c0_i32, %c0_i32_0, %c0_i32_1 : i32, i32, i32
  }
  func.func @transform_2(%arg0: i32) -> (i32, i32) {
    %c0_i32 = arith.constant 0 : i32
    %c0_i32_0 = arith.constant 0 : i32
    %c0_i32_1 = arith.constant 0 : i32
    return %c0_i32, %c0_i32_0 : i32, i32
  }
  func.func @transform_3(%arg0: i32) -> (i32, i32) {
    %c0_i32 = arith.constant 0 : i32
    %c0_i32_0 = arith.constant 0 : i32
    %c0_i32_1 = arith.constant 0 : i32
    return %c0_i32, %c0_i32_0 : i32, i32
  }
  func.func @transform_4(%arg0: i32) -> (i32, i32) {
    %c0_i32 = arith.constant 0 : i32
    %c0_i32_0 = arith.constant 0 : i32
    %c0_i32_1 = arith.constant 0 : i32
    return %c0_i32, %c0_i32_0 : i32, i32
  }
  func.func @transform_5(%arg0: i32) -> (i32, i32) {
    %c0_i32 = arith.constant 0 : i32
    %c0_i32_0 = arith.constant 0 : i32
    %c0_i32_1 = arith.constant 0 : i32
    return %c0_i32, %c0_i32_0 : i32, i32
  }
  func.func @transform_6(%arg0: i32) -> (i32, i32) {
    %c0_i32 = arith.constant 0 : i32
    %c0_i32_0 = arith.constant 0 : i32
    %c0_i32_1 = arith.constant 0 : i32
    return %c0_i32, %c0_i32_0 : i32, i32
  }
  func.func @transform_7(%arg0: i32) -> (i32, i32, i32) {
    %c0_i32 = arith.constant 0 : i32
    %c0_i32_0 = arith.constant 0 : i32
    %c0_i32_1 = arith.constant 0 : i32
    return %arg0, %c0_i32, %c0_i32_0 : i32, i32, i32
  }
  func.func @transform_8(%arg0: i32) -> (i32, i32, i32) {
    %c0_i32 = arith.constant 0 : i32
    %c0_i32_0 = arith.constant 0 : i32
    %c0_i32_1 = arith.constant 0 : i32
    return %arg0, %c0_i32, %c0_i32_0 : i32, i32, i32
  }
}

module attributes {stable_mosaic.version = 11 : i64} {
  func.func @kernel(%arg0: i32, %arg1: memref<1x8x1024xbf16, #tpu.memory_space<vmem>>, %arg2: memref<4x1024x512xbf16, #tpu.memory_space<vmem>>, %arg3: memref<1x512xf32, #tpu.memory_space<vmem>>, %arg4: memref<1x1024xf32, #tpu.memory_space<vmem>>, %arg5: memref<1x1024xf32, #tpu.memory_space<vmem>>, %arg6: memref<8x1024xf32, #tpu.memory_space<vmem>>, %arg7: memref<4x1xf32, #tpu.memory_space<vmem>>, %arg8: memref<1x4x512xbf16, #tpu.memory_space<vmem>>, %arg9: memref<1x2x512xf32, #tpu.memory_space<vmem>>, %arg10: memref<8x1024xbf16, #tpu.memory_space<vmem>>) attributes {dimension_semantics = [#tpu.dimension_semantics<parallel>], iteration_bounds = array<i64: 2>, scalar_prefetch = 0 : i64, scratch_operands = 1 : i64, tpu.core_type = #tpu.core_type<tc>, window_params = [{transform_indices = @transform_0, window_bounds = array<i64: 1, 8, 1024>}, {pipeline_mode = #tpu.pipeline_mode<synchronous>, transform_indices = @transform_1, window_bounds = array<i64: 4, 1024, 512>}, {pipeline_mode = #tpu.pipeline_mode<synchronous>, transform_indices = @transform_2, window_bounds = array<i64: 1, 512>}, {pipeline_mode = #tpu.pipeline_mode<synchronous>, transform_indices = @transform_3, window_bounds = array<i64: 1, 1024>}, {pipeline_mode = #tpu.pipeline_mode<synchronous>, transform_indices = @transform_4, window_bounds = array<i64: 1, 1024>}, {pipeline_mode = #tpu.pipeline_mode<synchronous>, transform_indices = @transform_5, window_bounds = array<i64: 8, 1024>}, {pipeline_mode = #tpu.pipeline_mode<synchronous>, transform_indices = @transform_6, window_bounds = array<i64: 4, 1>}, {transform_indices = @transform_7, window_bounds = array<i64: 1, 4, 512>}, {transform_indices = @transform_8, window_bounds = array<i64: 1, 2, 512>}]} {
    %c0 = arith.constant 0 : index
    %c0_0 = arith.constant 0 : index
    %c0_1 = arith.constant 0 : index
    %0 = vector.load %arg1[%c0, %c0_0, %c0_1] : memref<1x8x1024xbf16, #tpu.memory_space<vmem>>, vector<1x8x1024xbf16>
    %1 = vector.shape_cast %0 : vector<1x8x1024xbf16> to vector<8x1024xbf16>
    %2 = arith.extf %1 : vector<8x1024xbf16> to vector<8x1024xf32>
    %c0_2 = arith.constant 0 : index
    %c0_3 = arith.constant 0 : index
    %3 = vector.load %arg4[%c0_2, %c0_3] : memref<1x1024xf32, #tpu.memory_space<vmem>>, vector<1x1024xf32>
    %4 = vector.broadcast %3 : vector<1x1024xf32> to vector<8x1024xf32>
    %5 = arith.mulf %2, %4 : vector<8x1024xf32>
    %c0_4 = arith.constant 0 : index
    %c0_5 = arith.constant 0 : index
    %6 = vector.load %arg5[%c0_4, %c0_5] : memref<1x1024xf32, #tpu.memory_space<vmem>>, vector<1x1024xf32>
    %7 = vector.broadcast %6 : vector<1x1024xf32> to vector<8x1024xf32>
    %8 = arith.addf %5, %7 : vector<8x1024xf32>
    %cst = arith.constant 0.000000e+00 : f32
    %9 = vector.broadcast %cst : f32 to vector<8x1024xf32>
    %10 = arith.cmpf oge, %8, %9 : vector<8x1024xf32>
    %cst_6 = arith.constant 2.000000e-01 : f32
    %11 = vector.broadcast %cst_6 : f32 to vector<8x1024xf32>
    %12 = arith.mulf %11, %8 : vector<8x1024xf32>
    %13 = arith.select %10, %8, %12 : vector<8x1024xi1>, vector<8x1024xf32>
    %c0_7 = arith.constant 0 : index
    %c0_8 = arith.constant 0 : index
    %14 = vector.load %arg6[%c0_7, %c0_8] : memref<8x1024xf32, #tpu.memory_space<vmem>>, vector<8x1024xf32>
    %15 = arith.mulf %13, %14 : vector<8x1024xf32>
    %16 = arith.truncf %15 : vector<8x1024xf32> to vector<8x1024xbf16>
    %c0_9 = arith.constant 0 : index
    %c0_10 = arith.constant 0 : index
    %17 = vector.load %arg10[%c0_9, %c0_10] : memref<8x1024xbf16, #tpu.memory_space<vmem>>, vector<8x1024xbf16>
    tpu.vector_store %arg10[%c0_9, %c0_10], %16 {strides = array<i32>} : memref<8x1024xbf16, #tpu.memory_space<vmem>>, vector<8x1024xbf16>,
    %c0_11 = arith.constant 0 : index
    %c0_12 = arith.constant 0 : index
    %18 = vector.load %arg10[%c0_11, %c0_12] : memref<8x1024xbf16, #tpu.memory_space<vmem>>, vector<4x1024xbf16>
    %c0_13 = arith.constant 0 : index
    %c0_14 = arith.constant 0 : index
    %c0_15 = arith.constant 0 : index
    %19 = vector.load %arg2[%c0_13, %c0_14, %c0_15] : memref<4x1024x512xbf16, #tpu.memory_space<vmem>>, vector<1x1024x512xbf16>
    %20 = vector.shape_cast %19 : vector<1x1024x512xbf16> to vector<1024x512xbf16>
    %cst_16 = arith.constant dense<0.000000e+00> : vector<4x512xf32>
    %21 = tpu.matmul %18, %20, %cst_16 {dimension_numbers = #tpu.dot_dimension_numbers<[1], [0], [0], [1], [0, 0, 1, 1], [], []>} : vector<4x1024xbf16>, vector<1024x512xbf16>, vector<4x512xf32> -> vector<4x512xf32>
    %c1 = arith.constant 1 : index
    %c0_17 = arith.constant 0 : index
    %22 = vector.load %arg10[%c1, %c0_17] : memref<8x1024xbf16, #tpu.memory_space<vmem>>, vector<4x1024xbf16>
    %c1_18 = arith.constant 1 : index
    %c0_19 = arith.constant 0 : index
    %c0_20 = arith.constant 0 : index
    %23 = vector.load %arg2[%c1_18, %c0_19, %c0_20] : memref<4x1024x512xbf16, #tpu.memory_space<vmem>>, vector<1x1024x512xbf16>
    %24 = vector.shape_cast %23 : vector<1x1024x512xbf16> to vector<1024x512xbf16>
    %cst_21 = arith.constant dense<0.000000e+00> : vector<4x512xf32>
    %25 = tpu.matmul %22, %24, %cst_21 {dimension_numbers = #tpu.dot_dimension_numbers<[1], [0], [0], [1], [0, 0, 1, 1], [], []>} : vector<4x1024xbf16>, vector<1024x512xbf16>, vector<4x512xf32> -> vector<4x512xf32>
    %26 = arith.addf %21, %25 : vector<4x512xf32>
    %c2 = arith.constant 2 : index
    %c0_22 = arith.constant 0 : index
    %27 = vector.load %arg10[%c2, %c0_22] : memref<8x1024xbf16, #tpu.memory_space<vmem>>, vector<4x1024xbf16>
    %c2_23 = arith.constant 2 : index
    %c0_24 = arith.constant 0 : index
    %c0_25 = arith.constant 0 : index
    %28 = vector.load %arg2[%c2_23, %c0_24, %c0_25] : memref<4x1024x512xbf16, #tpu.memory_space<vmem>>, vector<1x1024x512xbf16>
    %29 = vector.shape_cast %28 : vector<1x1024x512xbf16> to vector<1024x512xbf16>
    %cst_26 = arith.constant dense<0.000000e+00> : vector<4x512xf32>
    %30 = tpu.matmul %27, %29, %cst_26 {dimension_numbers = #tpu.dot_dimension_numbers<[1], [0], [0], [1], [0, 0, 1, 1], [], []>} : vector<4x1024xbf16>, vector<1024x512xbf16>, vector<4x512xf32> -> vector<4x512xf32>
    %31 = arith.addf %26, %30 : vector<4x512xf32>
    %c3 = arith.constant 3 : index
    %c0_27 = arith.constant 0 : index
    %32 = vector.load %arg10[%c3, %c0_27] : memref<8x1024xbf16, #tpu.memory_space<vmem>>, vector<4x1024xbf16>
    %c3_28 = arith.constant 3 : index
    %c0_29 = arith.constant 0 : index
    %c0_30 = arith.constant 0 : index
    %33 = vector.load %arg2[%c3_28, %c0_29, %c0_30] : memref<4x1024x512xbf16, #tpu.memory_space<vmem>>, vector<1x1024x512xbf16>
    %34 = vector.shape_cast %33 : vector<1x1024x512xbf16> to vector<1024x512xbf16>
    %cst_31 = arith.constant dense<0.000000e+00> : vector<4x512xf32>
    %35 = tpu.matmul %32, %34, %cst_31 {dimension_numbers = #tpu.dot_dimension_numbers<[1], [0], [0], [1], [0, 0, 1, 1], [], []>} : vector<4x1024xbf16>, vector<1024x512xbf16>, vector<4x512xf32> -> vector<4x512xf32>
    %36 = arith.addf %31, %35 : vector<4x512xf32>
    %c0_32 = arith.constant 0 : index
    %c0_33 = arith.constant 0 : index
    %37 = vector.load %arg3[%c0_32, %c0_33] : memref<1x512xf32, #tpu.memory_space<vmem>>, vector<1x512xf32>
    %38 = vector.broadcast %37 : vector<1x512xf32> to vector<4x512xf32>
    %39 = arith.addf %36, %38 : vector<4x512xf32>
    %40 = arith.truncf %39 : vector<4x512xf32> to vector<4x512xbf16>
    %c0_34 = arith.constant 0 : index
    %c0_35 = arith.constant 0 : index
    %c0_36 = arith.constant 0 : index
    %41 = vector.load %arg8[%c0_34, %c0_35, %c0_36] : memref<1x4x512xbf16, #tpu.memory_space<vmem>>, vector<1x4x512xbf16>
    %42 = vector.shape_cast %41 : vector<1x4x512xbf16> to vector<4x512xbf16>
    %43 = vector.shape_cast %40 : vector<4x512xbf16> to vector<1x4x512xbf16>
    tpu.vector_store %arg8[%c0_34, %c0_35, %c0_36], %43 {strides = array<i32>} : memref<1x4x512xbf16, #tpu.memory_space<vmem>>, vector<1x4x512xbf16>,
    %c0_37 = arith.constant 0 : index
    %c0_38 = arith.constant 0 : index
    %44 = vector.load %arg7[%c0_37, %c0_38] : memref<4x1xf32, #tpu.memory_space<vmem>>, vector<4x1xf32>
    %45 = vector.broadcast %44 : vector<4x1xf32> to vector<4x512xf32>
    %46 = arith.mulf %39, %45 : vector<4x512xf32>
    %cst_39 = arith.constant dense<0.000000e+00> : vector<512xf32>
    %47 = vector.multi_reduction <add>, %46, %cst_39 [0] : vector<4x512xf32> to vector<512xf32>
    %48 = vector.shape_cast %47 : vector<512xf32> to vector<1x512xf32>
    %49 = arith.mulf %39, %39 : vector<4x512xf32>
    %50 = vector.broadcast %44 : vector<4x1xf32> to vector<4x512xf32>
    %51 = arith.mulf %49, %50 : vector<4x512xf32>
    %cst_40 = arith.constant dense<0.000000e+00> : vector<512xf32>
    %52 = vector.multi_reduction <add>, %51, %cst_40 [0] : vector<4x512xf32> to vector<512xf32>
    %53 = vector.shape_cast %52 : vector<512xf32> to vector<1x512xf32>
    %54 = tpu.concatenate %48, %53 in 0 : vector<1x512xf32>, vector<1x512xf32> -> vector<2x512xf32>
    %c0_41 = arith.constant 0 : index
    %c0_42 = arith.constant 0 : index
    %c0_43 = arith.constant 0 : index
    %55 = vector.load %arg9[%c0_41, %c0_42, %c0_43] : memref<1x2x512xf32, #tpu.memory_space<vmem>>, vector<1x2x512xf32>
    %56 = vector.shape_cast %55 : vector<1x2x512xf32> to vector<2x512xf32>
    %57 = vector.shape_cast %54 : vector<2x512xf32> to vector<1x2x512xf32>
    tpu.vector_store %arg9[%c0_41, %c0_42, %c0_43], %57 {strides = array<i32>} : memref<1x2x512xf32, #tpu.memory_space<vmem>>, vector<1x2x512xf32>,
    return
  }
  func.func @transform_0(%arg0: i32) -> (i32, i32, i32) {
    %c0_i32 = arith.constant 0 : i32
    %c0_i32_0 = arith.constant 0 : i32
    %c0_i32_1 = arith.constant 0 : i32
    return %arg0, %c0_i32, %c0_i32_0 : i32, i32, i32
  }
  func.func @transform_1(%arg0: i32) -> (i32, i32, i32) {
    %c0_i32 = arith.constant 0 : i32
    %c0_i32_0 = arith.constant 0 : i32
    %c0_i32_1 = arith.constant 0 : i32
    %c0_i32_2 = arith.constant 0 : i32
    return %c0_i32, %c0_i32_0, %c0_i32_1 : i32, i32, i32
  }
  func.func @transform_2(%arg0: i32) -> (i32, i32) {
    %c0_i32 = arith.constant 0 : i32
    %c0_i32_0 = arith.constant 0 : i32
    %c0_i32_1 = arith.constant 0 : i32
    return %c0_i32, %c0_i32_0 : i32, i32
  }
  func.func @transform_3(%arg0: i32) -> (i32, i32) {
    %c0_i32 = arith.constant 0 : i32
    %c0_i32_0 = arith.constant 0 : i32
    %c0_i32_1 = arith.constant 0 : i32
    return %c0_i32, %c0_i32_0 : i32, i32
  }
  func.func @transform_4(%arg0: i32) -> (i32, i32) {
    %c0_i32 = arith.constant 0 : i32
    %c0_i32_0 = arith.constant 0 : i32
    %c0_i32_1 = arith.constant 0 : i32
    return %c0_i32, %c0_i32_0 : i32, i32
  }
  func.func @transform_5(%arg0: i32) -> (i32, i32) {
    %c0_i32 = arith.constant 0 : i32
    %c0_i32_0 = arith.constant 0 : i32
    %c0_i32_1 = arith.constant 0 : i32
    return %c0_i32, %c0_i32_0 : i32, i32
  }
  func.func @transform_6(%arg0: i32) -> (i32, i32) {
    %c0_i32 = arith.constant 0 : i32
    %c0_i32_0 = arith.constant 0 : i32
    %c0_i32_1 = arith.constant 0 : i32
    return %c0_i32, %c0_i32_0 : i32, i32
  }
  func.func @transform_7(%arg0: i32) -> (i32, i32, i32) {
    %c0_i32 = arith.constant 0 : i32
    %c0_i32_0 = arith.constant 0 : i32
    %c0_i32_1 = arith.constant 0 : i32
    return %arg0, %c0_i32, %c0_i32_0 : i32, i32, i32
  }
  func.func @transform_8(%arg0: i32) -> (i32, i32, i32) {
    %c0_i32 = arith.constant 0 : i32
    %c0_i32_0 = arith.constant 0 : i32
    %c0_i32_1 = arith.constant 0 : i32
    return %arg0, %c0_i32, %c0_i32_0 : i32, i32, i32
  }
}

module attributes {stable_mosaic.version = 11 : i64} {
  func.func @_head_kernel(%arg0: i32, %arg1: memref<1x4x512xbf16, #tpu.memory_space<vmem>>, %arg2: memref<1x512xf32, #tpu.memory_space<vmem>>, %arg3: memref<1x512xf32, #tpu.memory_space<vmem>>, %arg4: memref<4x1xf32, #tpu.memory_space<vmem>>, %arg5: memref<1x512xf32, #tpu.memory_space<vmem>>, %arg6: memref<1x1xf32, #tpu.memory_space<vmem>>, %arg7: memref<1x1x1xf32, #tpu.memory_space<vmem>>) attributes {dimension_semantics = [#tpu.dimension_semantics<parallel>], iteration_bounds = array<i64: 2>, scalar_prefetch = 0 : i64, scratch_operands = 0 : i64, tpu.core_type = #tpu.core_type<tc>, window_params = [{transform_indices = @transform_0, window_bounds = array<i64: 1, 4, 512>}, {pipeline_mode = #tpu.pipeline_mode<synchronous>, transform_indices = @transform_1, window_bounds = array<i64: 1, 512>}, {pipeline_mode = #tpu.pipeline_mode<synchronous>, transform_indices = @transform_2, window_bounds = array<i64: 1, 512>}, {pipeline_mode = #tpu.pipeline_mode<synchronous>, transform_indices = @transform_3, window_bounds = array<i64: 4, 1>}, {pipeline_mode = #tpu.pipeline_mode<synchronous>, transform_indices = @transform_4, window_bounds = array<i64: 1, 512>}, {pipeline_mode = #tpu.pipeline_mode<synchronous>, transform_indices = @transform_5, window_bounds = array<i64: 1, 1>}, {transform_indices = @transform_6, window_bounds = array<i64: 1, 1, 1>}]} {
    %c0 = arith.constant 0 : index
    %c0_0 = arith.constant 0 : index
    %c0_1 = arith.constant 0 : index
    %0 = vector.load %arg1[%c0, %c0_0, %c0_1] : memref<1x4x512xbf16, #tpu.memory_space<vmem>>, vector<1x4x512xbf16>
    %1 = vector.shape_cast %0 : vector<1x4x512xbf16> to vector<4x512xbf16>
    %2 = arith.extf %1 : vector<4x512xbf16> to vector<4x512xf32>
    %c0_2 = arith.constant 0 : index
    %c0_3 = arith.constant 0 : index
    %3 = vector.load %arg2[%c0_2, %c0_3] : memref<1x512xf32, #tpu.memory_space<vmem>>, vector<1x512xf32>
    %4 = vector.broadcast %3 : vector<1x512xf32> to vector<4x512xf32>
    %5 = arith.mulf %2, %4 : vector<4x512xf32>
    %c0_4 = arith.constant 0 : index
    %c0_5 = arith.constant 0 : index
    %6 = vector.load %arg3[%c0_4, %c0_5] : memref<1x512xf32, #tpu.memory_space<vmem>>, vector<1x512xf32>
    %7 = vector.broadcast %6 : vector<1x512xf32> to vector<4x512xf32>
    %8 = arith.addf %5, %7 : vector<4x512xf32>
    %cst = arith.constant 0.000000e+00 : f32
    %9 = vector.broadcast %cst : f32 to vector<4x512xf32>
    %10 = arith.cmpf oge, %8, %9 : vector<4x512xf32>
    %cst_6 = arith.constant 2.000000e-01 : f32
    %11 = vector.broadcast %cst_6 : f32 to vector<4x512xf32>
    %12 = arith.mulf %11, %8 : vector<4x512xf32>
    %13 = arith.select %10, %8, %12 : vector<4x512xi1>, vector<4x512xf32>
    %c0_7 = arith.constant 0 : index
    %c0_8 = arith.constant 0 : index
    %14 = vector.load %arg4[%c0_7, %c0_8] : memref<4x1xf32, #tpu.memory_space<vmem>>, vector<4x1xf32>
    %15 = vector.broadcast %14 : vector<4x1xf32> to vector<4x512xf32>
    %16 = arith.mulf %13, %15 : vector<4x512xf32>
    %cst_9 = arith.constant dense<0.000000e+00> : vector<512xf32>
    %17 = vector.multi_reduction <add>, %16, %cst_9 [0] : vector<4x512xf32> to vector<512xf32>
    %18 = vector.shape_cast %17 : vector<512xf32> to vector<1x512xf32>
    %c0_10 = arith.constant 0 : index
    %c0_11 = arith.constant 0 : index
    %19 = vector.load %arg5[%c0_10, %c0_11] : memref<1x512xf32, #tpu.memory_space<vmem>>, vector<1x512xf32>
    %20 = arith.mulf %18, %19 : vector<1x512xf32>
    %cst_12 = arith.constant dense<0.000000e+00> : vector<1xf32>
    %21 = vector.multi_reduction <add>, %20, %cst_12 [1] : vector<1x512xf32> to vector<1xf32>
    %22 = vector.shape_cast %21 : vector<1xf32> to vector<1x1xf32>
    %c0_13 = arith.constant 0 : index
    %c0_14 = arith.constant 0 : index
    %23 = vector.load %arg6[%c0_13, %c0_14] : memref<1x1xf32, #tpu.memory_space<vmem>>, vector<1x1xf32>
    %24 = arith.addf %22, %23 : vector<1x1xf32>
    %cst_15 = arith.constant 0.000000e+00 : f32
    %25 = vector.broadcast %cst_15 : f32 to vector<1x1xf32>
    %26 = arith.subf %25, %24 : vector<1x1xf32>
    %27 = math.exp %26 : vector<1x1xf32>
    %cst_16 = arith.constant 1.000000e+00 : f32
    %28 = vector.broadcast %cst_16 : f32 to vector<1x1xf32>
    %29 = arith.addf %28, %27 : vector<1x1xf32>
    %cst_17 = arith.constant 1.000000e+00 : f32
    %30 = vector.broadcast %cst_17 : f32 to vector<1x1xf32>
    %31 = arith.divf %30, %29 : vector<1x1xf32>
    %c0_18 = arith.constant 0 : index
    %c0_19 = arith.constant 0 : index
    %c0_20 = arith.constant 0 : index
    %32 = vector.load %arg7[%c0_18, %c0_19, %c0_20] : memref<1x1x1xf32, #tpu.memory_space<vmem>>, vector<1x1x1xf32>
    %33 = vector.shape_cast %32 : vector<1x1x1xf32> to vector<1x1xf32>
    %34 = vector.shape_cast %31 : vector<1x1xf32> to vector<1x1x1xf32>
    tpu.vector_store %arg7[%c0_18, %c0_19, %c0_20], %34 {strides = array<i32>} : memref<1x1x1xf32, #tpu.memory_space<vmem>>, vector<1x1x1xf32>,
    return
  }
  func.func @transform_0(%arg0: i32) -> (i32, i32, i32) {
    %c0_i32 = arith.constant 0 : i32
    %c0_i32_0 = arith.constant 0 : i32
    %c0_i32_1 = arith.constant 0 : i32
    return %arg0, %c0_i32, %c0_i32_0 : i32, i32, i32
  }
  func.func @transform_1(%arg0: i32) -> (i32, i32) {
    %c0_i32 = arith.constant 0 : i32
    %c0_i32_0 = arith.constant 0 : i32
    %c0_i32_1 = arith.constant 0 : i32
    return %c0_i32, %c0_i32_0 : i32, i32
  }
  func.func @transform_2(%arg0: i32) -> (i32, i32) {
    %c0_i32 = arith.constant 0 : i32
    %c0_i32_0 = arith.constant 0 : i32
    %c0_i32_1 = arith.constant 0 : i32
    return %c0_i32, %c0_i32_0 : i32, i32
  }
  func.func @transform_3(%arg0: i32) -> (i32, i32) {
    %c0_i32 = arith.constant 0 : i32
    %c0_i32_0 = arith.constant 0 : i32
    %c0_i32_1 = arith.constant 0 : i32
    return %c0_i32, %c0_i32_0 : i32, i32
  }
  func.func @transform_4(%arg0: i32) -> (i32, i32) {
    %c0_i32 = arith.constant 0 : i32
    %c0_i32_0 = arith.constant 0 : i32
    %c0_i32_1 = arith.constant 0 : i32
    return %c0_i32, %c0_i32_0 : i32, i32
  }
  func.func @transform_5(%arg0: i32) -> (i32, i32) {
    %c0_i32 = arith.constant 0 : i32
    %c0_i32_0 = arith.constant 0 : i32
    %c0_i32_1 = arith.constant 0 : i32
    return %c0_i32, %c0_i32_0 : i32, i32
  }
  func.func @transform_6(%arg0: i32) -> (i32, i32, i32) {
    %c0_i32 = arith.constant 0 : i32
    %c0_i32_0 = arith.constant 0 : i32
    %c0_i32_1 = arith.constant 0 : i32
    return %arg0, %c0_i32, %c0_i32_0 : i32, i32, i32
  }
}

</mosaic_0001>

<bundles_post_ra>
// kernel: discriminator_forward.5
= control target key start
LH: loop header
LB: loop body
LE: loop exit
PB: predicated region body
PF: predicated region fallthrough
CT: control target
= control target key end

     0   :  { %8 = vsyncpa [#allocation3], 0  ;;  %s808_s0 = inlined_call_operand.vmem [shape: bf16[2,64,48], index: 0, kind: input, shape index: {}]   ;;  %s809_s1 = inlined_call_operand.hbm [shape: bf16[48,64], index: 1, kind: input, shape index: {}]   ;;  %s810_s2 = inlined_call_operand.hbm [shape: f32[1,64], index: 2, kind: input, shape index: {}]   ;;  %s811_s3 = inlined_call_operand.vmem [shape: bf16[2,64,64], index: 3, kind: output, shape index: {}]  }
   0x1   :  { %9 = vsyncpa [#allocation5], 0  ;;  %s685_s12 = smov 0  }
   0x2 LB: > { %s691_s13 = sadd.s32 4294967295, %s659_s12   ;;  %p481_p0 = scmp.ge.s32.totalorder %s659_s12, 1  ;;  %s659_s12 = sphi %s685_s12, %s15_s12  }
   0x3   : > { %p114_p1 = scmp.lt.s32.totalorder %s659_s12, 3  ;;  %s661_s14 = smov [#allocation2]  }
   0x4   : > { %s126_s15 = sshll.u32 %s661_s14, 4  ;;  %p812_p3 = scmp.eq.s32.totalorder %s691_s13, 0  ;;  %s127_s15 = int_to_ptr.vmem [resolvable:$true] %s126_s15 }
   0x5   : > { %p695_p2 = pnand %p481_p0, %p114_p1  ;;  %s662_s17 = smov [#allocation4]  }
   0x6   : > { %s140_s18 = sshll.u32 %s662_s17, 4  ;;  %s589_s22 = scalar_lea.hbm %s809_s1, 384  ;;  %s708_s18 = int_to_ptr.vmem [resolvable:$true] %s140_s18 }
   0x7   : > { %s814_s16 = scalar_select %p695_p2, 1, 0 }
   0x8   : > { %p559_p4 = pneg %p695_p2  ;;  %p590_p6 = scmp.ne.s32.totalorder %s809_s1, %s589_s22 }
   0x9   : > { %p596_p10 = scmp.lt.u32.totalorder %s589_s22, %s809_s1 }
   0xa   : > { %p704_p5 = pnand %p812_p3, %p559_p4 }
   0xc   : > { %p591_p7 = pneg %p704_p5 }
   0xe   : > { %p592_p8 = pnand %p591_p7, %p590_p6 }
  0x10   : > { %p593_p9 = pneg %p592_p8 }
  0x12   : > { %p598_p11 = pnand %p596_p10, %p593_p9 }
  0x14   : > { %601 = shalt.err (!%p598_p11)
}
  0x15   : > { %s602_s27 = scalar_lea.vmem %s127_s15, 384  ;;  %p610_p1 = scmp.lt.s32.totalorder %s127_s15, %s127_s15 }
  0x16   : > { %p603_p12 = scmp.ne.s32.totalorder %s127_s15, %s602_s27  ;;  %p611_p4 = scmp.lt.s32.totalorder %s602_s27, %s602_s27 }
  0x18   : > { %p605_p13 = pnand %p603_p12, %p591_p7  ;;  %p612_p3 = por %p611_p4, %p610_p1 }
  0x1a   : > { %p606_p0 = pneg %p605_p13 }
  0x1c   : > { %p613_p2 = pnand %p612_p3, %p606_p0 }
  0x1e   : > { %616 = shalt.err (!%p613_p2)
}
  0x1f   : > { %s663_s28 = smov 64   ;;  %s664_s29 = smov 4  }
  0x20   : > { %562 = dma.hbm_to_vmem [thread:$0]  (!%p704_p5), %s809_s1, 384, %s127_s15, [#allocation3], %s663_s28, %s663_s28, %s664_s29  }
  0x21   : > { %s617_s7 = scalar_lea.hbm %s810_s2, 16 }
  0x22   : > { %p618_p6 = scmp.ne.s32.totalorder %s810_s2, %s617_s7  ;;  %p624_p8 = scmp.lt.u32.totalorder %s617_s7, %s810_s2 }
  0x24   : > { %p620_p2 = pnand %p618_p6, %p591_p7 }
  0x26   : > { %p621_p3 = pneg %p620_p2 }
  0x28   : > { %p626_p9 = pnand %p624_p8, %p621_p3 }
  0x2a   : > { %629 = shalt.err (!%p626_p9)
}
  0x2b   : > { %s630_s14 = scalar_lea.vmem %s708_s18, 16  ;;  %s637_s15 = scalar_lea.vmem %s708_s18, 32 }
  0x2c   : > { %p631_p10 = scmp.ne.s32.totalorder %s708_s18, %s630_s14  ;;  %p638_p13 = scmp.lt.s32.totalorder %s708_s18, %s708_s18 }
  0x2d   : > { %p639_p0 = scmp.lt.s32.totalorder %s637_s15, %s630_s14 }
  0x2e   : > { %p633_p11 = pnand %p631_p10, %p591_p7 }
  0x2f   : > { %p640_p1 = por %p639_p0, %p638_p13 }
  0x30   : > { %p634_p12 = pneg %p633_p11 }
  0x32   : > { %p641_p4 = pnand %p640_p1, %p634_p12 }
  0x34   : > { %644 = shalt.err (!%p641_p4)
}
  0x35   : > { %565 = dma.hbm_to_vmem [thread:$0]  (!%p704_p5), %s810_s2, 16, %s708_s18, [#allocation5]  }
  0x36   : > { %p816_p6 = scmp.ne.s32.totalorder %s814_s16, 0 }
  0x37   : > { %p817_p7 = scmp.eq.s32.totalorder (!%p816_p6), %s691_s13, 0 }
  0x38   : > { %161 = sbr.rel (%p816_p6) target bundleno = 310 (0x136), region = 32 }
  0x3f   : > { %650 = dma.done.wait (%p817_p7), [#allocation3], 384   ;;  %p818_p2 = pmov %p817_p7 }
  0x41   : > { %652 = vsyncadd (%p818_p2), [#allocation3], 4294966912  ;;  %p819_p3 = pmov %p818_p2 }
  0x42   : > { %p820_p8 = pmov %p818_p2 }
  0x43   : > { %654 = dma.done.wait (%p819_p3), [#allocation5], 16  }
  0x44   : > { %656 = vsyncadd (%p820_p8), [#allocation5], 4294967280  ;;  %p189_p9 = scmp.lt.s32.totalorder %s691_s13, 1  ;;  %v582_v0 = vld [vmem:[#allocation2] sm:$0xff]   ;;  %v583_v1 = vld [vmem:[#allocation2 + $0x8] sm:$0xff]   ;;  %vm259_vm0 = vcmask 392192  }
  0x45   : > { %531 = vmatprep.subr.bf16.mxu0 %v582_v0  ;;  %545 = vmatprep.subr.bf16.mxu1 %v582_v0  ;;  %v584_v2 = vld [vmem:[#allocation2 + $0x10] sm:$0xff]   ;;  %v492_v7 = vld [vmem:[#allocation4] ss:$0 sm:$0xff]  ;;  %vm393_vm1 = vcmask 519168  }
  0x46   : > { %s822_s13 = smov (!%p189_p9, %s691_s13), 1  ;;  %532 = vmatpush3.bf16.msra.mxu0 %v582_v0  ;;  %548 = vmatpush3.bf16.msra.mxu1 %v582_v0 }
  0x47   : > { %s514_s16 = sshll.u32 %s822_s13, 5  ;;  %533 = vmatprep.subr.bf16.mxu0 %v583_v1  ;;  %546 = vmatprep.subr.bf16.mxu1 %v583_v1 }
  0x48   : > { %s193_s21 = scalar_lea.vmem %s808_s0, %s514_s16  ;;  %s787_s24 = scalar_lea.vmem %s811_s3, %s514_s16 }
  0x49   : > { %v585_v3 = vld [vmem:[%s193_s21] sm:$0xff]   ;;  %v586_v4 = vld [vmem:[%s193_s21 + $0x10] sm:$0xff]   ;;  %v587_v5 = vld [vmem:[%s193_s21 + $0x8] sm:$0xff]  }
  0x4a   : > { %537 = vmatprep.mubr.msk.bf16.mxu0 %vm259_vm0, %v585_v3  ;;  %541 = vmatprep.mubr.msk.bf16.mxu1 %vm259_vm0, %v586_v4  ;;  %v588_v6 = vld [vmem:[%s193_s21 + $0x18] sm:$0xff]  }
  0x4b   : > { %534 = vmatpush3.bf16.msra.mxu0 %v583_v1  ;;  %549 = vmatpush3.bf16.msra.mxu1 %v583_v1 }
  0x4c   : > { %535 = vmatprep.subr.bf16.mxu0 %v584_v2  ;;  %547 = vmatprep.subr.bf16.mxu1 %v584_v2 }
  0x4f   : > { %536 = vmatpush3.bf16.msra.mxu0 %v584_v2  ;;  %550 = vmatpush3.bf16.msra.mxu1 %v584_v2 }
  0x52   : > { %538 = vmatmul.mubr.msk.bf16.vlgmr.msra.gmra.mrb[0].mxu0 %vm259_vm0, %v587_v5  ;;  %542 = vmatmul.mubr.msk.bf16.vlgmr.msra.gmra.mrb[0].mxu1 %vm259_vm0, %v588_v6 }
 0x125   : > { %v539_v8 = vpop.f32.mrb[0].mxu0  ;;  %v543_v9 = vpop.f32.mrb[0].mxu1 }
 0x126   : > { %v315_v10 = vadd.f32 %v539_v8, %v492_v7  ;;  %v331_v11 = vadd.f32 %v543_v9, %v492_v7  ;;  %v306_v12 = vpop.f32.mrb[1].mxu0  ;;  %v322_v13 = vpop.f32.mrb[1].mxu1 }
 0x127   : > { %v307_v14 = vadd.f32 %v492_v7, %v306_v12  ;;  %v323_v15 = vadd.f32 %v492_v7, %v322_v13  ;;  %v540_v16 = vpop.f32.mrb[2].mxu0  ;;  %v544_v17 = vpop.f32.mrb[2].mxu1 }
 0x128   : > { %vm339_vm2 = vcmp.ge.f32.partialorder %v315_v10, 0.0  ;;  %v347_v18 = vmul.f32 0.2, %v315_v10  ;;  %vm343_vm3 = vcmp.ge.f32.partialorder %v331_v11, 0.0  ;;  %v351_v19 = vmul.f32 0.2, %v331_v11 }
 0x129   : > { %vm337_vm4 = vcmp.ge.f32.partialorder %v307_v14, 0.0  ;;  %v345_v20 = vmul.f32 0.2, %v307_v14  ;;  %vm341_vm5 = vcmp.ge.f32.partialorder %v323_v15, 0.0  ;;  %v349_v21 = vmul.f32 0.2, %v323_v15 }
 0x12a   : > { %v355_v22 = vsel %vm339_vm2, %v315_v10, %v347_v18  ;;  %v359_v23 = vsel %vm343_vm3, %v331_v11, %v351_v19  ;;  %v318_v24 = vadd.f32 %v540_v16, %v492_v7  ;;  %v334_v25 = vadd.f32 %v544_v17, %v492_v7  ;;  %v309_v26 = vpop.f32.mrb[3].mxu0  ;;  %v325_v27 = vpop.f32.mrb[3].mxu1 }
 0x12b   : > { %v518_v28 = vpack.c.bf16 %v355_v22, %v355_v22  ;;  %v522_v29 = vpack.c.bf16 %v359_v23, %v359_v23  ;;  %v353_v30 = vsel %vm337_vm4, %v307_v14, %v345_v20  ;;  %v357_v31 = vsel %vm341_vm5, %v323_v15, %v349_v21 }
 0x12c   : > { %v516_v32 = vpack.c.bf16 %v353_v30, %v353_v30  ;;  %v520_v33 = vpack.c.bf16 %v357_v31, %v357_v31  ;;  %vm340_vm6 = vcmp.ge.f32.partialorder %v318_v24, 0.0  ;;  %v348_v34 = vmul.f32 0.2, %v318_v24 }
 0x12d   : > { %396 = vst.msk [vmem:[%s787_s24 + $0x8] sm:$0xf] %vm393_vm1, %v518_v28  ;;  %400 = vst.msk [vmem:[%s787_s24 + $0x18] sm:$0xf] %vm393_vm1, %v522_v29  ;;  %vm344_vm7 = vcmp.ge.f32.partialorder %v334_v25, 0.0  ;;  %v310_v36 = vadd.f32 %v492_v7, %v309_v26  ;;  %v326_v37 = vadd.f32 %v492_v7, %v325_v27 }
 0x12e   : > { %v352_v35 = vmul.f32 0.2, %v334_v25  ;;  %394 = vst.msk [vmem:[%s787_s24] sm:$0xf] %vm393_vm1, %v516_v32  ;;  %398 = vst.msk [vmem:[%s787_s24 + $0x10] sm:$0xf] %vm393_vm1, %v520_v33  ;;  %v356_v38 = vsel %vm340_vm6, %v318_v24, %v348_v34 }
 0x12f   : > { %v519_v39 = vpack.c.bf16 %v356_v38, %v356_v38  ;;  %vm338_vm8 = vcmp.ge.f32.partialorder %v310_v36, 0.0  ;;  %v346_v41 = vmul.f32 0.2, %v310_v36  ;;  %vm342_vm9 = vcmp.ge.f32.partialorder %v326_v37, 0.0 }
 0x130   : > { %v360_v40 = vsel %vm344_vm7, %v334_v25, %v352_v35  ;;  %v350_v43 = vmul.f32 0.2, %v326_v37 }
 0x131   : > { %v523_v42 = vpack.c.bf16 %v360_v40, %v360_v40  ;;  %397 = vst.msk [vmem:[%s787_s24 + $0xc] sm:$0xf] %vm393_vm1, %v519_v39  ;;  %v354_v44 = vsel %vm338_vm8, %v310_v36, %v346_v41 }
 0x132   : > { %v517_v45 = vpack.c.bf16 %v354_v44, %v354_v44  ;;  %v358_v46 = vsel %vm342_vm9, %v326_v37, %v350_v43 }
 0x133   : > { %401 = vst.msk [vmem:[%s787_s24 + $0x1c] sm:$0xf] %vm393_vm1, %v523_v42  ;;  %v521_v47 = vpack.c.bf16 %v358_v46, %v358_v46 }
 0x134   : > { %395 = vst.msk [vmem:[%s787_s24 + $0x4] sm:$0xf] %vm393_vm1, %v517_v45 }
 0x135   : > { %399 = vst.msk [vmem:[%s787_s24 + $0x14] sm:$0xf] %vm393_vm1, %v521_v47 }
 0x136 PF: > { %s15_s12 = sadd.s32 1, %s659_s12  }
 0x137   : > { %p12_p5 = scmp.ge.s32.totalorder %s15_s12, 4  }
 0x139   :  { %14 = sbr.rel (!%p12_p5) target bundleno = 2 (0x2), region = 71 }
 0x140   :  { %423 = vsyncpa [#allocation3], 1 }
 0x141   :  { %425 = vsyncpa [#allocation3 + $0x1], 1 }
 0x142   :  { %426 = vsyncpa [#allocation5], 1 }

// kernel: tile.23
= control target key start
LH: loop header
LB: loop body
LE: loop exit
PB: predicated region body
PF: predicated region fallthrough
CT: control target
= control target key end

     0   :  { %s22_s0 = inlined_call_operand.vmem [shape: f32[128], index: 0, kind: input, shape index: {}]   ;;  %s23_s1 = inlined_call_operand.vmem [shape: f32[4,128], index: 1, kind: output, shape index: {}]  }
   0x1   :  { %v4_v0 = vld [vmem:[%s22_s0] ss:$0 sm:$0xff] }
   0x2   :  { %5 = vst [vmem:[%s23_s1] sm:$0xf] %v4_v0 }

// kernel: discriminator_forward.6
= control target key start
LH: loop header
LB: loop body
LE: loop exit
PB: predicated region body
PF: predicated region fallthrough
CT: control target
= control target key end

     0   :  { %11 = vsyncpa [#allocation3], 0  ;;  %s1993_s0 = inlined_call_operand.vmem [shape: bf16[2,32,256], index: 0, kind: input, shape index: {}]   ;;  %s1994_s1 = inlined_call_operand.hbm [shape: bf16[4,256,128], index: 1, kind: input, shape index: {}]   ;;  %s1995_s2 = inlined_call_operand.hbm [shape: f32[1,128], index: 2, kind: input, shape index: {}]   ;;  %s1996_s3 = inlined_call_operand.hbm [shape: f32[25,1], index: 3, kind: input, shape index: {}]   ;;  %s1997_s4 = inlined_call_operand.vmem [shape: bf16[2,25,128], index: 4, kind: output, shape index: {0}]   ;;  %s1998_s5 = inlined_call_operand.vmem [shape: f32[2,2,128], index: 5, kind: output, shape index: {1}]  }
   0x1   :  { %12 = vsyncpa [#allocation5], 0  ;;  %s1825_s18 = smov 0  }
   0x2 LB: > { %s1787_s19 = smov [#allocation4]   ;;  %s1831_s21 = sadd.s32 4294967295, %s1785_s18   ;;  %s1785_s18 = sphi %s1825_s18, %s18_s18  }
   0x3   : > { %s190_s20 = sshll.u32 %s1787_s19, 4  ;;  %p1345_p0 = scmp.ge.s32.totalorder %s1785_s18, 1  ;;  %s191_s20 = int_to_ptr.vmem [resolvable:$true] %s190_s20 }
   0x4   : > { %p164_p1 = scmp.lt.s32.totalorder %s1785_s18, 3  ;;  %p1999_p2 = scmp.eq.s32.totalorder %s1831_s21, 0 }
   0x5   : > { %s1788_s23 = smov [#allocation2]   ;;  %s1789_s26 = smov [#allocation6]  }
   0x6   : > { %p1836_p3 = pnand %p1345_p0, %p164_p1  ;;  %s176_s24 = sshll.u32 %s1788_s23, 4  ;;  %s1842_s24 = int_to_ptr.vmem [resolvable:$true] %s176_s24 }
   0x7   : > { %s200_s27 = sshll.u32 %s1789_s26, 4  ;;  %s1687_s30 = scalar_lea.hbm %s1995_s2, 16  ;;  %s1850_s27 = int_to_ptr.vmem [resolvable:$true] %s200_s27 }
   0x8   : > { %s2001_s22 = scalar_select %p1836_p3, 1, 0 }
   0x9   : > { %p1577_p4 = pneg %p1836_p3  ;;  %p1688_p6 = scmp.ne.s32.totalorder %s1995_s2, %s1687_s30 }
   0xa   : > { %p1694_p10 = scmp.lt.u32.totalorder %s1687_s30, %s1995_s2 }
   0xb   : > { %p1846_p5 = pnand %p1999_p2, %p1577_p4 }
   0xd   : > { %p1860_p7 = pneg %p1846_p5 }
   0xf   : > { %p1690_p8 = pnand %p1860_p7, %p1688_p6 }
  0x11   : > { %p1691_p9 = pneg %p1690_p8 }
  0x13   : > { %p1696_p11 = pnand %p1694_p10, %p1691_p9 }
  0x15   : > { %1699 = shalt.err (!%p1696_p11)
}
  0x16   : > { %s1700_s11 = scalar_lea.vmem %s191_s20, 16  ;;  %s1707_s12 = scalar_lea.vmem %s191_s20, 32 }
  0x17   : > { %p1701_p12 = scmp.ne.s32.totalorder %s191_s20, %s1700_s11  ;;  %p1708_p1 = scmp.lt.s32.totalorder %s191_s20, %s191_s20 }
  0x18   : > { %p1709_p4 = scmp.lt.s32.totalorder %s1707_s12, %s1700_s11 }
  0x19   : > { %p1703_p13 = pnand %p1701_p12, %p1860_p7 }
  0x1a   : > { %p1710_p2 = por %p1709_p4, %p1708_p1 }
  0x1b   : > { %p1704_p0 = pneg %p1703_p13 }
  0x1d   : > { %p1711_p3 = pnand %p1710_p2, %p1704_p0 }
  0x1f   : > { %1714 = shalt.err (!%p1711_p3)
}
  0x20   : > { %1583 = dma.hbm_to_vmem [thread:$0]  (!%p1846_p5), %s1995_s2, 16, %s191_s20, [#allocation5]  }
  0x21   : > { %s1715_s17 = scalar_lea.hbm %s1994_s1, 8192 }
  0x22   : > { %p1716_p6 = scmp.ne.s32.totalorder %s1994_s1, %s1715_s17  ;;  %p1722_p2 = scmp.lt.u32.totalorder %s1715_s17, %s1994_s1 }
  0x24   : > { %p1718_p8 = pnand %p1716_p6, %p1860_p7 }
  0x26   : > { %p1719_p9 = pneg %p1718_p8 }
  0x28   : > { %p1724_p3 = pnand %p1722_p2, %p1719_p9 }
  0x2a   : > { %1727 = shalt.err (!%p1724_p3)
}
  0x2b   : > { %s1728_s20 = scalar_lea.vmem %s1842_s24, 8192  ;;  %p1736_p13 = scmp.lt.s32.totalorder %s1842_s24, %s1842_s24 }
  0x2c   : > { %p1729_p10 = scmp.ne.s32.totalorder %s1842_s24, %s1728_s20  ;;  %p1737_p0 = scmp.lt.s32.totalorder %s1728_s20, %s1728_s20 }
  0x2e   : > { %p1731_p11 = pnand %p1729_p10, %p1860_p7  ;;  %p1738_p1 = por %p1737_p0, %p1736_p13 }
  0x30   : > { %p1732_p12 = pneg %p1731_p11 }
  0x32   : > { %p1739_p4 = pnand %p1738_p1, %p1732_p12 }
  0x34   : > { %1742 = shalt.err (!%p1739_p4)
}
  0x35   : > { %s1790_s29 = smov 64   ;;  %s1791_s30 = smov 4  }
  0x36   : > { %1580 = dma.hbm_to_vmem [thread:$0]  (!%p1846_p5), %s1994_s1, 8192, %s1842_s24, [#allocation3], %s1790_s29, %s1790_s29, %s1791_s30  }
  0x37   : > { %s1743_s11 = scalar_lea.hbm %s1996_s3, 512 }
  0x38   : > { %p1744_p6 = scmp.ne.s32.totalorder %s1996_s3, %s1743_s11  ;;  %p1750_p2 = scmp.lt.u32.totalorder %s1743_s11, %s1996_s3 }
  0x3a   : > { %p1746_p8 = pnand %p1744_p6, %p1860_p7 }
  0x3c   : > { %p1747_p9 = pneg %p1746_p8 }
  0x3e   : > { %p1752_p3 = pnand %p1750_p2, %p1747_p9 }
  0x40   : > { %1755 = shalt.err (!%p1752_p3)
}
  0x41   : > { %s1756_s24 = scalar_lea.vmem %s1850_s27, 512  ;;  %p1764_p13 = scmp.lt.s32.totalorder %s1850_s27, %s1850_s27 }
  0x42   : > { %p1757_p10 = scmp.ne.s32.totalorder %s1850_s27, %s1756_s24  ;;  %p1765_p0 = scmp.lt.s32.totalorder %s1756_s24, %s1756_s24 }
  0x44   : > { %p1759_p11 = pnand %p1757_p10, %p1860_p7  ;;  %p1766_p1 = por %p1765_p0, %p1764_p13 }
  0x46   : > { %p1760_p12 = pneg %p1759_p11 }
  0x48   : > { %p1767_p4 = pnand %p1766_p1, %p1760_p12 }
  0x4a   : > { %1770 = shalt.err (!%p1767_p4)
}
  0x4b   : > { %s1792_s16 = smov 128   ;;  %s1793_s17 = smov 8  }
  0x4c   : > { %1586 = dma.hbm_to_vmem [thread:$0]  (!%p1846_p5), %s1996_s3, 512, %s1850_s27, [#allocation5], %s1792_s16, %s1792_s16, %s1793_s17  }
  0x4d   : > { %p2004_p6 = scmp.ne.s32.totalorder %s2001_s22, 0 }
  0x4e   : > { %p2005_p7 = scmp.eq.s32.totalorder (!%p2004_p6), %s1831_s21, 0 }
  0x4f   : > { %224 = sbr.rel (%p2004_p6) target bundleno = 409 (0x199), region = 36 }
  0x56   : > { %1776 = dma.done.wait (%p2005_p7), [#allocation3], 8192   ;;  %p2006_p8 = pmov %p2005_p7 }
  0x57   : > { %p2007_p9 = pmov %p2005_p7 }
  0x58   : > { %1778 = vsyncadd (%p2006_p8), [#allocation3], 4294959104 }
  0x59   : > { %1780 = dma.done.wait (%p2007_p9), [#allocation5], 528   ;;  %p2008_p2 = pmov %p2005_p7 }
  0x5a   : > { %v1794_v0 = vmov 0   ;;  %v1611_v1 = vld [vmem:[#allocation2 + $0xc0] sm:$0xff]   ;;  %v1615_v5 = vld [vmem:[#allocation2 + $0xc8] sm:$0xff]   ;;  %v1619_v9 = vld [vmem:[#allocation2 + $0xd0] sm:$0xff]   ;;  %p264_p5 = scmp.lt.s32.totalorder %s1831_s21, 1  ;;  %vm971_vm1 = vcmask 1044480  }
  0x5b   : > { %1782 = vsyncadd (%p2008_p2), [#allocation5], 4294966768  ;;  %1609 = vset.pattern.permute.xlu0 %v1794_v0  ;;  %1610 = vset.pattern.permute.xlu1 %v1794_v0  ;;  %v1612_v2 = vld [vmem:[#allocation2 + $0x40] sm:$0xff]   ;;  %v1616_v6 = vld [vmem:[#allocation2 + $0x48] sm:$0xff]   ;;  %vm364_vm0 = vsmask.f32 7424 }
  0x5c   : > { %1453 = vmatprep.subr.bf16.mxu0 %v1611_v1  ;;  %v1613_v3 = vld [vmem:[#allocation2 + $0x80] sm:$0xff]   ;;  %1481 = vmatprep.subr.bf16.mxu1 %v1612_v2  ;;  %v1617_v7 = vld [vmem:[#allocation2 + $0x88] sm:$0xff]   ;;  %v1620_v10 = vld [vmem:[#allocation2 + $0x50] sm:$0xff]   ;;  %s2010_s21 = smov (!%p264_p5, %s1831_s21), 1  ;;  %vm738_vm2 = vsmask.f32 5376 }
  0x5d   : > { %v1614_v4 = vld [vmem:[#allocation2] sm:$0xff]   ;;  %1454 = vmatpush3.bf16.msra.mxu0 %v1613_v3  ;;  %v1618_v8 = vld [vmem:[#allocation2 + $0x8] sm:$0xff]   ;;  %v1621_v11 = vld [vmem:[#allocation2 + $0x90] sm:$0xff]   ;;  %s1442_s22 = sshll.u32 %s2010_s21, 5  ;;  %s1443_s26 = sshll.u32 %s2010_s21, 4  ;;  %vm1161_vm3 = vcmask 1040384  }
  0x5e   : > { %1482 = vmatpush3.bf16.msra.mxu1 %v1614_v4  ;;  %1455 = vmatprep.subr.bf16.mxu0 %v1615_v5  ;;  %v1622_v12 = vld [vmem:[#allocation2 + $0x10] sm:$0xff]   ;;  %v1623_v13 = vld [vmem:[#allocation2 + $0xd8] sm:$0xff]   ;;  %v1627_v17 = vld [vmem:[#allocation2 + $0xe0] sm:$0xff]   ;;  %s1940_s8 = scalar_lea.vmem %s1993_s0, %s1442_s22  ;;  %s1976_s29 = scalar_lea.vmem %s1997_s4, %s1443_s26  ;;  %vm1162_vm4 = vsmask.f32 256 }
  0x5f   : > { %1483 = vmatprep.subr.bf16.mxu1 %v1616_v6  ;;  %v1624_v14 = vld [vmem:[#allocation2 + $0x58] sm:$0xff]   ;;  %v1628_v18 = vld [vmem:[#allocation2 + $0x60] sm:$0xff]   ;;  %v1631_v21 = vld [vmem:[#allocation2 + $0xe8] sm:$0xff]   ;;  %s1358_s30 = sshll.u32 %s2010_s21, 1 }
  0x60   : > { %v1625_v15 = vld [vmem:[#allocation2 + $0x98] sm:$0xff]   ;;  %v1629_v19 = vld [vmem:[#allocation2 + $0xa0] sm:$0xff]   ;;  %v1632_v22 = vld [vmem:[#allocation2 + $0x68] sm:$0xff]   ;;  %s277_s9 = scalar_lea.vmem %s1998_s5, %s1358_s30 }
  0x61   : > { %1456 = vmatpush3.bf16.msra.mxu0 %v1617_v7  ;;  %v1626_v16 = vld [vmem:[#allocation2 + $0x18] sm:$0xff]   ;;  %v1630_v20 = vld [vmem:[#allocation2 + $0x20] sm:$0xff]   ;;  %v1633_v23 = vld [vmem:[#allocation2 + $0xa8] sm:$0xff]  }
  0x62   : > { %1484 = vmatpush3.bf16.msra.mxu1 %v1618_v8  ;;  %1457 = vmatprep.subr.bf16.mxu0 %v1619_v9  ;;  %v1634_v24 = vld [vmem:[#allocation2 + $0x28] sm:$0xff]   ;;  %v1635_v25 = vld [vmem:[#allocation2 + $0xf0] sm:$0xff]   ;;  %v1639_v29 = vld [vmem:[#allocation2 + $0xf8] sm:$0xff]  }
  0x63   : > { %1485 = vmatprep.subr.bf16.mxu1 %v1620_v10  ;;  %v1636_v26 = vld [vmem:[#allocation2 + $0x70] sm:$0xff]   ;;  %v1640_v30 = vld [vmem:[#allocation2 + $0x78] sm:$0xff]   ;;  %v279_v33 = vld [vmem:[%s1940_s8] sm:$0xff] }
  0x64   : > { %v1637_v27 = vld [vmem:[#allocation2 + $0xb0] sm:$0xff]   ;;  %v1641_v31 = vld [vmem:[#allocation2 + $0xb8] sm:$0xff]   ;;  %v1944_v34 = vld [vmem:[%s1940_s8 + $0x8] sm:$0xff] }
  0x65   : > { %1458 = vmatpush3.bf16.msra.mxu0 %v1621_v11  ;;  %v1638_v28 = vld [vmem:[#allocation2 + $0x30] sm:$0xff]   ;;  %v1642_v32 = vld [vmem:[#allocation2 + $0x38] sm:$0xff]   ;;  %v1360_v37 = vcombine.high %v279_v33, %v1944_v34  ;;  %v1359_v38 = vcombine.low %v279_v33, %v1944_v34  ;;  %v1647_v41 = vld [vmem:[#allocation2 + $0x140] sm:$0xff]  }
  0x66   : > { %1486 = vmatpush3.bf16.msra.mxu1 %v1622_v12  ;;  %1459 = vmatprep.subr.bf16.mxu0 %v1623_v13  ;;  %v1947_v35 = vld [vmem:[%s1940_s8 + $0x10] sm:$0xff]  ;;  %v282_v36 = vld [vmem:[%s1940_s8 + $0x18] sm:$0x11]  ;;  %v1648_v46 = vld [vmem:[#allocation2 + $0x1c0] sm:$0xff]  }
  0x67   : > { %1487 = vmatprep.subr.bf16.mxu1 %v1624_v14  ;;  %v1362_v39 = vcombine.high %v1947_v35, %v282_v36  ;;  %v1361_v40 = vcombine.low %v1947_v35, %v282_v36  ;;  %v378_v42 = vshrl.u32 %v1360_v37, 16  ;;  %v380_v43 = vshll.u32 %v1360_v37, 16  ;;  %676 = vmatprep.mubr.bf16.mxu1 %v1360_v37  ;;  %v1649_v53 = vld [vmem:[#allocation2 + $0x100] sm:$0xff]   ;;  %v1652_v57 = vld [vmem:[#allocation2 + $0x1c8] sm:$0xff]   ;;  %v1656_v2 = vld [vmem:[#allocation2 + $0x1d0] sm:$0xff]  }
  0x68   : > { %v366_v44 = vshrl.u32 %v1359_v38, 16  ;;  %v368_v45 = vshll.u32 %v1359_v38, 16  ;;  %v1650_v54 = vld [vmem:[#allocation2 + $0x180] sm:$0xff]   ;;  %v1651_v61 = vld [vmem:[#allocation2 + $0x148] sm:$0xff]   ;;  %v1655_v3 = vld [vmem:[#allocation2 + $0x150] sm:$0xff]  }
  0x69   : > { %1460 = vmatpush3.bf16.msra.mxu0 %v1625_v15  ;;  %v385_v47 = vshll.u32 %v1362_v39, 16  ;;  %v373_v48 = vshll.u32 %v1361_v40, 16  ;;  %v382_v49 = vrot.slane %v380_v43, 1  ;;  %v392_v58 = vshrl.u32 %v1362_v39, 16  ;;  %v1654_v62 = vld [vmem:[#allocation2 + $0x188] sm:$0xff]   ;;  %v1658_v4 = vld [vmem:[#allocation2 + $0x190] sm:$0xff]   ;;  %vm1163_vm5 = vmand %vm1161_vm3, %vm1162_vm4 }
  0x6a   : > { %1488 = vmatpush3.bf16.msra.mxu1 %v1626_v16  ;;  %1461 = vmatprep.subr.bf16.mxu0 %v1627_v17  ;;  %v370_v50 = vrot.slane %v368_v45, 1  ;;  %v1653_v0 = vld [vmem:[#allocation2 + $0x108] sm:$0xff]   ;;  %v389_v1 = vshrl.u32 %v1361_v40, 16  ;;  %v1657_v5 = vld [vmem:[#allocation2 + $0x110] sm:$0xff]   ;;  %v1660_v7 = vld [vmem:[#allocation2 + $0x1d8] sm:$0xff]  }
  0x6b   : > { %1489 = vmatprep.subr.bf16.mxu1 %v1628_v18  ;;  %v387_v51 = vrot.slane %v385_v47, 1  ;;  %v375_v52 = vrot.slane %v373_v48, 1  ;;  %v383_v55 = vor.u32 %v382_v49, %v378_v42  ;;  %v1659_v8 = vld [vmem:[#allocation2 + $0x158] sm:$0xff]   ;;  %v1664_v11 = vld [vmem:[#allocation2 + $0x1e0] sm:$0xff]   ;;  %v1668_v15 = vld [vmem:[#allocation2 + $0x1e8] sm:$0xff]  }
  0x6c   : > { %v371_v56 = vor.u32 %v370_v50, %v366_v44  ;;  %v1662_v9 = vld [vmem:[#allocation2 + $0x198] sm:$0xff]   ;;  %v1663_v12 = vld [vmem:[#allocation2 + $0x160] sm:$0xff]   ;;  %v1667_v16 = vld [vmem:[#allocation2 + $0x168] sm:$0xff]  }
  0x6d   : > { %1462 = vmatpush3.bf16.msra.mxu0 %v1629_v19  ;;  %v388_v59 = vsel %vm364_vm0, %v383_v55, %v387_v51  ;;  %v394_v63 = vor.u32 %v392_v58, %v387_v51  ;;  %v391_v6 = vor.u32 %v389_v1, %v375_v52  ;;  %v1661_v10 = vld [vmem:[#allocation2 + $0x118] sm:$0xff]   ;;  %v1666_v13 = vld [vmem:[#allocation2 + $0x1a0] sm:$0xff]   ;;  %v1670_v17 = vld [vmem:[#allocation2 + $0x1a8] sm:$0xff]  }
  0x6e   : > { %1490 = vmatpush3.bf16.msra.mxu1 %v1630_v20  ;;  %1463 = vmatprep.subr.bf16.mxu0 %v1631_v21  ;;  %v376_v60 = vsel %vm364_vm0, %v371_v56, %v375_v52  ;;  %v1665_v14 = vld [vmem:[#allocation2 + $0x120] sm:$0xff]   ;;  %v1669_v18 = vld [vmem:[#allocation2 + $0x128] sm:$0xff]   ;;  %v1672_v19 = vld [vmem:[#allocation2 + $0x1f0] sm:$0xff]  }
  0x6f   : > { %1491 = vmatprep.subr.bf16.mxu1 %v1632_v22  ;;  %527 = vmatprep.mubr.bf16.mxu0 %v388_v59  ;;  %v1671_v20 = vld [vmem:[#allocation2 + $0x170] sm:$0xff]   ;;  %v927_v33 = vld [vmem:[%s1940_s8 + $0x18] sm:$0xff]  ;;  %v1167_v36 = vld [vmem:[#allocation6] sm:$0xff] }
  0x70   : > { %v1674_v21 = vld [vmem:[#allocation2 + $0x1b0] sm:$0xff]   ;;  %v1677_v37 = vld [vmem:[#allocation2 + $0x138] sm:$0xff]   ;;  %1173 = vperm.xlu0 %1609, %v1167_v36  }
  0x71   : > { %1464 = vmatpush3.bf16.msra.mxu0 %v1633_v23  ;;  %v1673_v22 = vld [vmem:[#allocation2 + $0x130] sm:$0xff]   ;;  %v1676_v23 = vld [vmem:[#allocation2 + $0x1f8] sm:$0xff]  }
  0x72   : > { %1492 = vmatpush3.bf16.msra.mxu1 %v1634_v24  ;;  %1465 = vmatprep.subr.bf16.mxu0 %v1635_v25  ;;  %v1675_v24 = vld [vmem:[#allocation2 + $0x178] sm:$0xff]   ;;  %v1168_v50 = vld [vmem:[#allocation6 + $0x8] sm:$0xff] }
  0x73   : > { %1493 = vmatprep.subr.bf16.mxu1 %v1636_v26  ;;  %v1678_v25 = vld [vmem:[#allocation2 + $0x1b8] sm:$0xff]   ;;  %v693_v26 = vld [vmem:[%s1940_s8] sm:$0xcc] }
  0x74   : > { %1178 = vperm.xlu0 %1609, %v1168_v50  }
  0x75   : > { %1466 = vmatpush3.bf16.msra.mxu0 %v1637_v27  ;;  %v694_v27 = vld [vmem:[%s1940_s8 + $0x18] sm:$0x77] }
  0x76   : > { %1494 = vmatpush3.bf16.msra.mxu1 %v1638_v28  ;;  %1467 = vmatprep.subr.bf16.mxu0 %v1639_v29  ;;  %v1395_v28 = vcombine.low %v693_v26, %v1944_v34  ;;  %v1396_v29 = vcombine.high %v693_v26, %v1944_v34 }
  0x77   : > { %1495 = vmatprep.subr.bf16.mxu1 %v1640_v30  ;;  %v1397_v30 = vcombine.low %v1947_v35, %v694_v27 }
  0x78   : > { %v757_v42 = vshrl.u32 %v1396_v29, 16  ;;  %v760_v43 = vshll.u32 %v1396_v29, 16  ;;  %v740_v56 = vshrl.u32 %v1395_v28, 16 }
  0x79   : > { %1468 = vmatpush3.bf16.msra.mxu0 %v1641_v31  ;;  %v1398_v31 = vcombine.high %v1947_v35, %v694_v27  ;;  %v748_v58 = vshrl.u32 %v1397_v30, 16 }
  0x7a   : > { %1496 = vmatpush3.bf16.msra.mxu1 %v1642_v32  ;;  %1509 = vmatprep.subr.bf16.mxu0 %v1647_v41  ;;  %v926_v32 = vld [vmem:[%s1940_s8] sm:$0x88]  ;;  %v1169_v41 = vld [vmem:[#allocation6 + $0x10] sm:$0xff]  ;;  %v759_v51 = vrot.slane %v757_v42, 2  ;;  %v762_v52 = vrot.slane %v760_v43, 3 }
  0x7b   : > { %1537 = vmatprep.subr.bf16.mxu1 %v1648_v46  ;;  %v765_v44 = vshrl.u32 %v1398_v31, 16  ;;  %v768_v45 = vshll.u32 %v1398_v31, 16  ;;  %v1418_v46 = vcombine.high %v1947_v35, %v927_v33  ;;  %1183 = vperm.xlu1 %1610, %v1169_v41   ;;  %v750_v1 = vrot.slane %v748_v58, 2 }
  0x7c   : > { %528 = vmatmul.mubr.bf16.vlgmr.msra.gmra.mrb[0].mxu0 %v376_v60  ;;  %v763_v59 = vor.u32 %v762_v52, %v759_v51  ;;  %v1435_v52 = vld [vmem:[#allocation4] ss:$0 sm:$0xff] }
  0x7d   : > { %677 = vmatmul.mubr.bf16.vlgmr.msra.gmra.mrb[0].mxu1 %v1359_v38  ;;  %1510 = vmatpush3.bf16.msra.mxu0 %v1649_v53  ;;  %v1415_v38 = vcombine.low %v926_v32, %v1944_v34  ;;  %v767_v53 = vrot.slane %v765_v44, 2  ;;  %v976_v55 = vrot.slane %v1418_v46, 3 }
  0x7e   : > { %684 = vmatprep.mubr.bf16.mxu1 %v1362_v39  ;;  %1538 = vmatpush3.bf16.msra.mxu1 %v1650_v54  ;;  %v1416_v39 = vcombine.high %v926_v32, %v1944_v34  ;;  %v770_v34 = vrot.slane %v768_v45, 3  ;;  %v1170_v54 = vld [vmem:[#allocation6 + $0x18] sm:$0x1] }
  0x7f   : > { %1539 = vmatprep.subr.bf16.mxu1 %v1652_v57  ;;  %1511 = vmatprep.subr.bf16.mxu0 %v1651_v61  ;;  %v972_v47 = vrot.slane %v1415_v38, 3  ;;  %v743_v57 = vshll.u32 %v1395_v28, 16  ;;  %v751_v61 = vshll.u32 %v1397_v30, 16 }
  0x80   : > { %535 = vmatprep.mubr.bf16.mxu0 %v394_v63  ;;  %v975_v49 = vrot.slane %v1416_v39, 3  ;;  %v771_v60 = vor.u32 %v770_v34, %v767_v53  ;;  %v742_v63 = vrot.slane %v740_v56, 2  ;;  %1188 = vperm.xlu1 %1610, %v1170_v54  }
  0x81   : > { %1512 = vmatpush3.bf16.msra.mxu0 %v1653_v0  ;;  %v745_v0 = vrot.slane %v743_v57, 3 }
  0x82   : > { %1540 = vmatpush3.bf16.msra.mxu1 %v1654_v62  ;;  %1513 = vmatprep.subr.bf16.mxu0 %v1655_v3  ;;  %v977_v62 = vsel %vm971_vm1, %v975_v49, %v976_v55  ;;  %v753_v3 = vrot.slane %v751_v61, 3 }
  0x83   : > { %1541 = vmatprep.subr.bf16.mxu1 %v1656_v2  ;;  %v772_v2 = vsel %vm738_vm2, %v763_v59, %v771_v60 }
  0x84   : > { %536 = vmatmul.mubr.bf16.gmra.mrb[4].mxu0 %v391_v6 }
  0x85   : > { %685 = vmatmul.mubr.bf16.gmra.mrb[4].mxu1 %v1361_v40  ;;  %1514 = vmatpush3.bf16.msra.mxu0 %v1657_v5  ;;  %v1417_v40 = vcombine.low %v1947_v35, %v927_v33  ;;  %v754_v5 = vor.u32 %v753_v3, %v750_v1 }
  0x86   : > { %1542 = vmatpush3.bf16.msra.mxu1 %v1658_v4  ;;  %1515 = vmatprep.subr.bf16.mxu0 %v1659_v8  ;;  %v746_v4 = vor.u32 %v745_v0, %v742_v63 }
  0x87   : > { %1543 = vmatprep.subr.bf16.mxu1 %v1660_v7  ;;  %v973_v48 = vrot.slane %v1417_v40, 3  ;;  %1110 = vmatprep.mubr.bf16.mxu1 %v977_v62 }
  0x88   : > { %905 = vmatprep.mubr.bf16.mxu0 %v772_v2  ;;  %v755_v6 = vsel %vm738_vm2, %v746_v4, %v754_v5 }
  0x89   : > { %1516 = vmatpush3.bf16.msra.mxu0 %v1661_v10  ;;  %v974_v35 = vsel %vm971_vm1, %v972_v47, %v973_v48 }
  0x8a   : > { %1544 = vmatpush3.bf16.msra.mxu1 %v1662_v9  ;;  %1517 = vmatprep.subr.bf16.mxu0 %v1663_v12 }
  0x8b   : > { %1545 = vmatprep.subr.bf16.mxu1 %v1664_v11 }
  0x8d   : > { %1518 = vmatpush3.bf16.msra.mxu0 %v1665_v14 }
  0x8e   : > { %1546 = vmatpush3.bf16.msra.mxu1 %v1666_v13  ;;  %1519 = vmatprep.subr.bf16.mxu0 %v1667_v16 }
  0x8f   : > { %1547 = vmatprep.subr.bf16.mxu1 %v1668_v15 }
  0x91   : > { %1520 = vmatpush3.bf16.msra.mxu0 %v1669_v18 }
  0x92   : > { %1548 = vmatpush3.bf16.msra.mxu1 %v1670_v17  ;;  %1521 = vmatprep.subr.bf16.mxu0 %v1671_v20 }
  0x93   : > { %1549 = vmatprep.subr.bf16.mxu1 %v1672_v19 }
  0x95   : > { %1522 = vmatpush3.bf16.msra.mxu0 %v1673_v22 }
  0x96   : > { %1550 = vmatpush3.bf16.msra.mxu1 %v1674_v21  ;;  %1523 = vmatprep.subr.bf16.mxu0 %v1675_v24 }
  0x97   : > { %1551 = vmatprep.subr.bf16.mxu1 %v1676_v23 }
  0x99   : > { %1524 = vmatpush3.bf16.msra.mxu0 %v1677_v37 }
  0x9a   : > { %1552 = vmatpush3.bf16.msra.mxu1 %v1678_v25 }
  0x9c   : > { %906 = vmatmul.mubr.bf16.vlgmr.msra.gmra.mrb[8].mxu0 %v755_v6 }
  0x9d   : > { %1111 = vmatmul.mubr.bf16.vlgmr.msra.gmra.mrb[8].mxu1 %v974_v35  ;;  %913 = vmatprep.mubr.bf16.mxu0 %v771_v60 }
  0x9e   : > { %1118 = vmatprep.mubr.bf16.mxu1 %v976_v55 }
  0xa4   : > { %914 = vmatmul.mubr.bf16.gmra.mrb[12].mxu0 %v754_v5 }
  0xa5   : > { %1119 = vmatmul.mubr.bf16.gmra.mrb[12].mxu1 %v973_v48 }
  0xef   : > { %v1174_v48 = vpop.permute.xlu0 %1173 }
  0xf3   : > { %v1179_v62 = vpop.permute.xlu0 %1178 }
 0x14f   : > { %v1469_v13 = vpop.f32.mrb[0].mxu0 }
 0x150   : > { %v1497_v7 = vpop.f32.mrb[0].mxu1  ;;  %v1470_v14 = vpop.f32.mrb[1].mxu0 }
 0x151   : > { %v1498_v8 = vpop.f32.mrb[1].mxu1  ;;  %v1471_v15 = vadd.f32 %v1470_v14, %v1469_v13  ;;  %v1472_v16 = vpop.f32.mrb[2].mxu0 }
 0x152   : > { %v1499_v9 = vadd.f32 %v1498_v8, %v1497_v7  ;;  %v1500_v10 = vpop.f32.mrb[2].mxu1  ;;  %v1473_v17 = vpop.f32.mrb[3].mxu0 }
 0x153   : > { %v1501_v11 = vpop.f32.mrb[3].mxu1  ;;  %v1474_v20 = vadd.f32 %v1473_v17, %v1472_v16 }
 0x154   : > { %v1502_v12 = vadd.f32 %v1501_v11, %v1500_v10  ;;  %v679_v19 = vadd.f32 %v1499_v9, %v1471_v15 }
 0x156   : > { %v682_v24 = vadd.f32 %v1502_v12, %v1474_v20  ;;  %v1184_v12 = vpop.permute.xlu1 %1183 }
 0x157   : > { %v1475_v27 = vpop.f32.mrb[4].mxu0 }
 0x158   : > { %v1503_v18 = vpop.f32.mrb[4].mxu1  ;;  %v1476_v28 = vpop.f32.mrb[5].mxu0 }
 0x159   : > { %v1504_v21 = vpop.f32.mrb[5].mxu1  ;;  %v1477_v29 = vadd.f32 %v1476_v28, %v1475_v27  ;;  %v1478_v30 = vpop.f32.mrb[6].mxu0 }
 0x15a   : > { %v1505_v22 = vadd.f32 %v1504_v21, %v1503_v18  ;;  %v1506_v23 = vpop.f32.mrb[6].mxu1  ;;  %v1479_v31 = vpop.f32.mrb[7].mxu0 }
 0x15b   : > { %v1507_v25 = vpop.f32.mrb[7].mxu1  ;;  %v1480_v33 = vadd.f32 %v1479_v31, %v1478_v30 }
 0x15c   : > { %v1508_v26 = vadd.f32 %v1507_v25, %v1506_v23  ;;  %v687_v32 = vadd.f32 %v1505_v22, %v1477_v29  ;;  %v1189_v25 = vpop.permute.xlu1 %1188 }
 0x15e   : > { %v690_v36 = vadd.f32 %v1508_v26, %v1480_v33  ;;  %v1164_v26 = vld [vmem:[%s1976_s29 + $0xc] sm:$0x1] }
 0x16f   : > { %v1525_v42 = vpop.f32.mrb[8].mxu0 }
 0x170   : > { %v1553_v37 = vpop.f32.mrb[8].mxu1  ;;  %v1526_v44 = vpop.f32.mrb[9].mxu0 }
 0x171   : > { %v1554_v38 = vpop.f32.mrb[9].mxu1  ;;  %v1527_v45 = vadd.f32 %v1526_v44, %v1525_v42  ;;  %v1528_v46 = vpop.f32.mrb[10].mxu0 }
 0x172   : > { %v1555_v39 = vadd.f32 %v1554_v38, %v1553_v37  ;;  %v1556_v40 = vpop.f32.mrb[10].mxu1  ;;  %v1529_v47 = vpop.f32.mrb[11].mxu0 }
 0x173   : > { %v1557_v41 = vpop.f32.mrb[11].mxu1  ;;  %v922_v49 = vadd.f32 %v1527_v45, %v679_v19  ;;  %v1530_v50 = vadd.f32 %v1529_v47, %v1528_v46 }
 0x174   : > { %v1558_v43 = vadd.f32 %v1557_v41, %v1556_v40 }
 0x175   : > { %v1127_v34 = vadd.f32 %v1555_v39, %v922_v49  ;;  %v923_v54 = vadd.f32 %v1530_v50, %v682_v24 }
 0x177   : > { %v1138_v58 = vadd.f32 %v1435_v52, %v1127_v34  ;;  %v1128_v59 = vadd.f32 %v1558_v43, %v923_v54  ;;  %v1531_v60 = vpop.f32.mrb[12].mxu0 }
 0x178   : > { %v1559_v51 = vpop.f32.mrb[12].mxu1  ;;  %v1532_v35 = vpop.f32.mrb[13].mxu0 }
 0x179   : > { %v1560_v53 = vpop.f32.mrb[13].mxu1  ;;  %v1139_v63 = vadd.f32 %v1435_v52, %v1128_v59  ;;  %v1533_v0 = vadd.f32 %v1532_v35, %v1531_v60  ;;  %v1534_v1 = vpop.f32.mrb[14].mxu0  ;;  %v1206_v2 = vmul.f32 %v1138_v58, %v1138_v58  ;;  %v1191_v5 = vmul.f32 %v1174_v48, %v1138_v58 }
 0x17a   : > { %v1561_v55 = vadd.f32 %v1560_v53, %v1559_v51  ;;  %v1562_v56 = vpop.f32.mrb[14].mxu1  ;;  %v1535_v3 = vpop.f32.mrb[15].mxu0 }
 0x17b   : > { %v1563_v57 = vpop.f32.mrb[15].mxu1  ;;  %v1451_v4 = vpack.c.bf16 %v1139_v63, %v1138_v58  ;;  %v924_v6 = vadd.f32 %v1533_v0, %v687_v32  ;;  %v1192_v7 = vmul.f32 %v1179_v62, %v1139_v63  ;;  %v1207_v8 = vmul.f32 %v1139_v63, %v1139_v63 }
 0x17c   : > { %v1564_v61 = vadd.f32 %v1563_v57, %v1562_v56  ;;  %v1536_v9 = vadd.f32 %v1535_v3, %v1534_v1  ;;  %v1210_v13 = vmul.f32 %v1206_v2, %v1174_v48 }
 0x17d   : > { %1452 = vst [vmem:[%s1976_s29] sm:$0xff] %v1451_v4   ;;  %v1129_v10 = vadd.f32 %v1561_v55, %v924_v6  ;;  %v1195_v11 = vadd.f32 %v1192_v7, %v1191_v5  ;;  %v1211_v14 = vmul.f32 %v1207_v8, %v1179_v62 }
 0x17e   : > { %v925_v15 = vadd.f32 %v1536_v9, %v690_v36 }
 0x17f   : > { %v1140_v16 = vadd.f32 %v1435_v52, %v1129_v10  ;;  %v1214_v17 = vadd.f32 %v1211_v14, %v1210_v13 }
 0x180   : > { %v1130_v18 = vadd.f32 %v1564_v61, %v925_v15 }
 0x181   : > { %v1446_v19 = vpack.c.bf16 %v1140_v16, %v1140_v16  ;;  %v1193_v20 = vmul.f32 %v1184_v12, %v1140_v16  ;;  %v1208_v21 = vmul.f32 %v1140_v16, %v1140_v16 }
 0x182   : > { %v1141_v22 = vadd.f32 %v1435_v52, %v1130_v18 }
 0x183   : > { %1160 = vst [vmem:[%s1976_s29 + $0x8] sm:$0xf] %v1446_v19  ;;  %v1196_v23 = vadd.f32 %v1195_v11, %v1193_v20  ;;  %v1212_v24 = vmul.f32 %v1208_v21, %v1184_v12 }
 0x184   : > { %v1447_v27 = vpack.c.bf16 %v1141_v22, %v1141_v22  ;;  %v1194_v28 = vmul.f32 %v1189_v25, %v1141_v22  ;;  %v1209_v29 = vmul.f32 %v1141_v22, %v1141_v22 }
 0x185   : > { %v1215_v30 = vadd.f32 %v1214_v17, %v1212_v24 }
 0x186   : > { %v1165_v31 = vsel %vm1163_vm5, %v1447_v27, %v1164_v26  ;;  %v1198_v32 = vsel %vm1161_vm3, %v1194_v28, 0.0  ;;  %v1213_v33 = vmul.f32 %v1209_v29, %v1189_v25 }
 0x187   : > { %1166 = vst [vmem:[%s1976_s29 + $0xc] sm:$0x1] %v1165_v31  ;;  %v1199_v36 = vadd.f32 %v1198_v32, %v1196_v23 }
 0x188   : > { %v1216_v37 = vsel %vm1161_vm3, %v1213_v33, 0.0 }
 0x189   : > { %v1200_v38 = vrot.slane %v1199_v36, 4  ;;  %v1217_v39 = vadd.f32 %v1216_v37, %v1215_v30 }
 0x18b   : > { %v1201_v40 = vadd.f32 %v1200_v38, %v1199_v36  ;;  %v1218_v41 = vrot.slane %v1217_v39, 4 }
 0x18d   : > { %v1202_v42 = vrot.slane %v1201_v40, 2  ;;  %v1219_v43 = vadd.f32 %v1218_v41, %v1217_v39 }
 0x18f   : > { %v1203_v44 = vadd.f32 %v1202_v42, %v1201_v40  ;;  %v1220_v45 = vrot.slane %v1219_v43, 2 }
 0x191   : > { %v1204_v46 = vrot.slane %v1203_v44, 1  ;;  %v1221_v47 = vadd.f32 %v1220_v45, %v1219_v43 }
 0x193   : > { %v1222_v48 = vrot.slane %v1221_v47, 1  ;;  %v1205_v49 = vadd.f32 %v1204_v46, %v1203_v44 }
 0x195   : > { %v1223_v50 = vadd.f32 %v1222_v48, %v1221_v47 }
 0x197   : > { %v1224_v51 = vsel %vm1161_vm3, %v1205_v49, %v1223_v50 }
 0x198   : > { %1225 = vst [vmem:[%s277_s9] sm:$0x3] %v1224_v51 }
 0x199 PF: > { %s18_s18 = sadd.s32 1, %s1785_s18  }
 0x19a   : > { %p15_p3 = scmp.ge.s32.totalorder %s18_s18, 4  }
 0x19c   :  { %17 = sbr.rel (!%p15_p3) target bundleno = 2 (0x2), region = 94 }
 0x1a3   :  { %1261 = vsyncpa [#allocation3], 1 }
 0x1a4   :  { %1263 = vsyncpa [#allocation3 + $0x1], 1 }
 0x1a5   :  { %1264 = vsyncpa [#allocation5], 1 }

// kernel: discriminator_forward.9
= control target key start
LH: loop header
LB: loop body
LE: loop exit
PB: predicated region body
PF: predicated region fallthrough
CT: control target
= control target key end

     0   :  { %s523_s23 = smov 0   ;;  %s576_s0 = inlined_call_operand.vmem [shape: bf16[2,4,512], index: 0, kind: input, shape index: {}]   ;;  %s577_s1 = inlined_call_operand.vmem [shape: f32[1,512], index: 1, kind: input, shape index: {}]   ;;  %s578_s2 = inlined_call_operand.vmem [shape: f32[1,512], index: 2, kind: input, shape index: {}]   ;;  %s579_s3 = inlined_call_operand.vmem [shape: f32[4,1], index: 3, kind: input, shape index: {}]   ;;  %s580_s4 = inlined_call_operand.vmem [shape: f32[1,512], index: 4, kind: input, shape index: {}]   ;;  %s581_s5 = inlined_call_operand.<no memory space> [shape: f32[1,1], index: 5, kind: input, shape index: {}]   ;;  %s582_s6 = inlined_call_operand.vmem [shape: f32[2,1,1], index: 6, kind: output, shape index: {}]  }
   0x1   :  { %v11_v0 = vstv %s581_s5 }
   0x2   :  { %12 = vst [vmem:[#allocation2] sm:$0x1] %v11_v0 }
   0x3 LB: > { %s450_s24 = sadd.s32 4294967295, %s481_s23   ;;  %p454_p0 = scmp.ge.s32.totalorder %s481_s23, 1  ;;  %s481_s23 = sphi %s523_s23, %s18_s23  }
   0x4   : > { %p214_p1 = scmp.lt.s32.totalorder %s481_s23, 3 }
   0x6   : > { %p215_p2 = pnand %p454_p0, %p214_p1 }
   0x7   : > { %v307_v1 = vld [vmem:[%s579_s3] sm:$0xf] (!%p215_p2)  ;;  %v483_v2 = vmov (!%p215_p2), 0   ;;  %p242_p3 = scmp.lt.s32.totalorder (!%p215_p2), %s450_s24, 1  ;;  %v255_v3 = vlaneseq (!%p215_p2)  ;;  %v484_v28 = vmov (!%p215_p2), 839922192  }
   0x8   : > { %218 = sbr.rel (%p215_p2) target bundleno = 338 (0x152), region = 44  ;;  %470 = vset.pattern.permute.xlu0 (!%p215_p2), %v483_v2  ;;  %v253_v9 = vld [vmem:[%s577_s1] sm:$0xf] (!%p215_p2)  ;;  %v313_v29 = vunpack.c.l.s4 (!%p215_p2), %v484_v28  ;;  %vm328_vm2 = vcmask (!%p215_p2), 1043456   ;;  %vm383_vm3 = vcmask (!%p215_p2), 1040384   ;;  %vm401_vm4 = vcmask (!%p215_p2), 0  }
   0x9   : > { %310 = vperm.xlu0 (!%p215_p2), %470, %v307_v1   ;;  %v256_v4 = vshrl.u32 (!%p215_p2), %v255_v3, 7  ;;  %v277_v14 = vld [vmem:[%s578_s2] sm:$0xf] (!%p215_p2) }
   0xa   : > { %v314_v32 = vunpack.c.0.s8 (!%p215_p2), %v313_v29  ;;  %v357_v58 = vld [vmem:[%s580_s4] sm:$0xf] (!%p215_p2) }
   0xb   : > { %v537_v5 = vsub.s32 (!%p215_p2), 0, %v256_v4  ;;  %v539_v6 = vsub.s32 (!%p215_p2), 1, %v256_v4  ;;  %v541_v7 = vsub.s32 (!%p215_p2), 2, %v256_v4  ;;  %v543_v8 = vsub.s32 (!%p215_p2), 3, %v256_v4 }
   0xc   : > { %v317_v35 = vsub.s32 (!%p215_p2), %v314_v32, %v256_v4 }
   0xd   : > { %v258_v10 = vrot.slane (!%p215_p2), %v253_v9, %v537_v5  ;;  %v262_v11 = vrot.slane (!%p215_p2), %v253_v9, %v539_v6  ;;  %v266_v12 = vrot.slane (!%p215_p2), %v253_v9, %v541_v7  ;;  %v270_v13 = vrot.slane (!%p215_p2), %v253_v9, %v543_v8 }
   0xe   : > { %v282_v16 = vrot.slane (!%p215_p2), %v277_v14, %v537_v5  ;;  %v286_v17 = vrot.slane (!%p215_p2), %v277_v14, %v539_v6  ;;  %v290_v18 = vrot.slane (!%p215_p2), %v277_v14, %v541_v7  ;;  %v294_v19 = vrot.slane (!%p215_p2), %v277_v14, %v543_v8 }
   0xf   : > { %s584_s24 = smov (!%p242_p3, %s450_s24), 1  ;;  %v271_v22 = vcombine.low %v258_v10, %v262_v11  ;;  %v272_v23 = vcombine.low %v266_v12, %v270_v13  ;;  %v362_v63 = vrot.slane %v357_v58, %v537_v5  ;;  %v366_v4 = vrot.slane %v357_v58, %v539_v6 }
  0x10   : > { %s459_s5 = sshll.u32 %s584_s24, 3  ;;  %v295_v26 = vcombine.low %v282_v16, %v286_v17  ;;  %v296_v27 = vcombine.low %v290_v18, %v294_v19  ;;  %v370_v9 = vrot.slane %v357_v58, %v541_v7  ;;  %v374_v16 = vrot.slane %v357_v58, %v543_v8  ;;  %s249_s14 = scalar_lea.vmem %s582_s6, %s584_s24 }
  0x11   : > { %s246_s7 = scalar_lea.vmem %s576_s0, %s459_s5 }
  0x12   : > { %v250_v15 = vld [vmem:[%s246_s7] sm:$0xff] }
  0x13   : > { %v251_v20 = vunpack.c.l.bf16 %v250_v15  ;;  %v252_v21 = vunpack.c.h.bf16 %v250_v15 }
  0x15   : > { %v275_v24 = vmul.f32 %v271_v22, %v251_v20  ;;  %v276_v25 = vmul.f32 %v272_v23, %v252_v21 }
  0x17   : > { %v299_v30 = vadd.f32 %v295_v26, %v275_v24  ;;  %v300_v31 = vadd.f32 %v296_v27, %v276_v25  ;;  %v393_v25 = vld [vmem:[#allocation2] sm:$0x1] }
  0x19   : > { %v303_v33 = vmul.f32 0.2, %v299_v30  ;;  %v304_v34 = vmul.f32 0.2, %v300_v31  ;;  %vm301_vm0 = vcmp.ge.f32.partialorder %v299_v30, 0.0  ;;  %vm302_vm1 = vcmp.ge.f32.partialorder %v300_v31, 0.0 }
  0x1b   : > { %v305_v37 = vsel %vm301_vm0, %v299_v30, %v303_v33  ;;  %v306_v38 = vsel %vm302_vm1, %v300_v31, %v304_v34 }
  0x88   : > { %v311_v36 = vpop.permute.xlu0 %310 }
  0x89   : > { %v318_v39 = vrot.slane %v311_v36, %v317_v35 }
  0x8b   : > { %v320_v40 = vmul.f32 %v318_v39, %v305_v37  ;;  %v321_v41 = vmul.f32 %v318_v39, %v306_v38 }
  0x8d   : > { %v324_v42 = vcombine.high %v320_v40, %v320_v40  ;;  %v325_v43 = vcombine.high %v321_v41, %v321_v41  ;;  %v329_v44 = vsel %vm328_vm2, %v320_v40, 0.0  ;;  %v343_v45 = vsel %vm328_vm2, %v321_v41, 0.0 }
  0x8e   : > { %v330_v46 = vrot.slane %v329_v44, 4  ;;  %v344_v47 = vrot.slane %v343_v45, 4 }
  0x8f   : > { %v336_v48 = vsel %vm328_vm2, %v324_v42, 0.0  ;;  %v350_v49 = vsel %vm328_vm2, %v325_v43, 0.0 }
  0x90   : > { %v331_v50 = vadd.f32 %v330_v46, %v329_v44  ;;  %v337_v51 = vrot.slane %v336_v48, 4  ;;  %v345_v52 = vadd.f32 %v344_v47, %v343_v45  ;;  %v351_v53 = vrot.slane %v350_v49, 4 }
  0x92   : > { %v332_v54 = vrot.slane %v331_v50, 2  ;;  %v338_v55 = vadd.f32 %v337_v51, %v336_v48  ;;  %v346_v56 = vrot.slane %v345_v52, 2  ;;  %v352_v57 = vadd.f32 %v351_v53, %v350_v49 }
  0x94   : > { %v333_v59 = vadd.f32 %v332_v54, %v331_v50  ;;  %v339_v60 = vrot.slane %v338_v55, 2  ;;  %v347_v61 = vadd.f32 %v346_v56, %v345_v52  ;;  %v353_v62 = vrot.slane %v352_v57, 2 }
  0x96   : > { %v334_v0 = vrot.slane %v333_v59, 1  ;;  %v340_v1 = vadd.f32 %v339_v60, %v338_v55  ;;  %v348_v2 = vrot.slane %v347_v61, 1  ;;  %v354_v3 = vadd.f32 %v353_v62, %v352_v57 }
  0x98   : > { %v335_v10 = vadd.f32 %v334_v0, %v333_v59  ;;  %v341_v11 = vrot.slane %v340_v1, 1  ;;  %v349_v12 = vadd.f32 %v348_v2, %v347_v61  ;;  %v355_v13 = vrot.slane %v354_v3, 1 }
  0x9a   : > { %v342_v14 = vadd.f32 %v341_v11, %v340_v1  ;;  %v356_v15 = vadd.f32 %v355_v13, %v354_v3  ;;  %v379_v17 = vmul.f32 %v362_v63, %v335_v10  ;;  %v381_v5 = vmul.f32 %v370_v9, %v349_v12 }
  0x9c   : > { %v380_v18 = vmul.f32 %v366_v4, %v342_v14  ;;  %v382_v19 = vmul.f32 %v374_v16, %v356_v15  ;;  %v384_v20 = vsel %vm383_vm3, %v379_v17, 0.0  ;;  %v387_v6 = vsel %vm383_vm3, %v381_v5, 0.0 }
  0x9e   : > { %v385_v21 = vsel %vm383_vm3, %v380_v18, 0.0  ;;  %v389_v7 = vsel %vm383_vm3, %v382_v19, 0.0 }
  0x9f   : > { %v386_v22 = vadd.f32 %v385_v21, %v384_v20 }
  0xa1   : > { %v388_v23 = vadd.f32 %v387_v6, %v386_v22 }
  0xa3   : > { %v390_v24 = vadd.f32 %v389_v7, %v388_v23 }
  0xa5   : > { %391 = vadd.xlane.f32.xlu0 %v390_v24 }
 0x132   : > { %v392_v26 = vpop.xlane.xlu0 %391 }
 0x133   : > { %v394_v27 = vadd.f32 %v393_v25, %v392_v26 }
 0x135   : > { %v395_v28 = vsub.f32 0.0, %v394_v27 }
 0x137   : > { %v396_v29 = vmul.f32 1.442695, %v395_v28 }
 0x139   : > { %471 = vpow2.f32 %v396_v29 }
 0x143   : > { %v472_v8 = vpop.eup %471 }
 0x144   : > { %v398_v30 = vadd.f32 1.0, %v472_v8 }
 0x146   : > { %473 = vrcp.f32 %v398_v30 }
 0x150   : > { %v474_v31 = vpop.eup %473 }
 0x151   : > { %402 = vst.msk [vmem:[%s249_s14] sm:$0x1] %vm401_vm4, %v474_v31 }
 0x152 PF: > { %s18_s23 = sadd.s32 1, %s481_s23  }
 0x153   : > { %p15_p4 = scmp.ge.s32.totalorder %s18_s23, 4  }
 0x155   :  { %17 = sbr.rel (!%p15_p4) target bundleno = 3 (0x3), region = 74 }

// kernel: discriminator_forward.7
= control target key start
LH: loop header
LB: loop body
LE: loop exit
PB: predicated region body
PF: predicated region fallthrough
CT: control target
= control target key end

     0   :  { %14 = vsyncpa [#allocation4], 0  ;;  %s3887_s0 = inlined_call_operand.vmem [shape: bf16[2,16,512], index: 0, kind: input, shape index: {}]   ;;  %s3888_s1 = inlined_call_operand.hbm [shape: bf16[4,512,256], index: 1, kind: input, shape index: {}]   ;;  %s3889_s2 = inlined_call_operand.hbm [shape: f32[1,256], index: 2, kind: input, shape index: {}]   ;;  %s3890_s3 = inlined_call_operand.vmem [shape: f32[1,512], index: 3, kind: input, shape index: {}]   ;;  %s3891_s4 = inlined_call_operand.vmem [shape: f32[1,512], index: 4, kind: input, shape index: {}]   ;;  %s3892_s5 = inlined_call_operand.hbm [shape: f32[16,512], index: 5, kind: input, shape index: {}]   ;;  %s3893_s6 = inlined_call_operand.hbm [shape: f32[9,1], index: 6, kind: input, shape index: {}]   ;;  %s3894_s7 = inlined_call_operand.vmem [shape: bf16[2,9,256], index: 7, kind: output, shape index: {0}]   ;;  %s3895_s8 = inlined_call_operand.vmem [shape: f32[2,2,256], index: 8, kind: output, shape index: {1}]  }
   0x1   :  { %15 = vsyncpa [#allocation6], 0 }
   0x2   :  { %16 = vsyncpa [#allocation9], 0  ;;  %s3657_s27 = smov 0  }
   0x3 LB: > { %s3603_s28 = smov [#allocation5]   ;;  %s3663_s30 = sadd.s32 4294967295, %s3601_s27   ;;  %s3601_s27 = sphi %s3657_s27, %s22_s27  }
   0x4   : > { %s257_s29 = sshll.u32 %s3603_s28, 4  ;;  %p2720_p0 = scmp.ge.s32.totalorder %s3601_s27, 1  ;;  %s258_s29 = int_to_ptr.vmem [resolvable:$true] %s257_s29 }
   0x5   : > { %p231_p1 = scmp.lt.s32.totalorder %s3601_s27, 3  ;;  %p3896_p2 = scmp.eq.s32.totalorder %s3663_s30, 0 }
   0x6   : > { %s3604_s10 = smov [#allocation3]   ;;  %s3605_s13 = smov [#allocation7]  }
   0x7   : > { %p3668_p3 = pnand %p2720_p0, %p231_p1  ;;  %s243_s11 = sshll.u32 %s3604_s10, 4  ;;  %s3674_s11 = int_to_ptr.vmem [resolvable:$true] %s243_s11 }
   0x8   : > { %s273_s14 = sshll.u32 %s3605_s13, 4  ;;  %s3471_s17 = scalar_lea.hbm %s3889_s2, 32  ;;  %s3682_s14 = int_to_ptr.vmem [resolvable:$true] %s273_s14 }
   0x9   : > { %s3898_s9 = scalar_select %p3668_p3, 1, 0 }
   0xa   : > { %p3047_p4 = pneg %p3668_p3  ;;  %p3472_p6 = scmp.ne.s32.totalorder %s3889_s2, %s3471_s17 }
   0xb   : > { %p3478_p10 = scmp.lt.u32.totalorder %s3471_s17, %s3889_s2 }
   0xc   : > { %p3678_p5 = pnand %p3896_p2, %p3047_p4 }
   0xe   : > { %p3692_p7 = pneg %p3678_p5 }
  0x10   : > { %p3474_p8 = pnand %p3692_p7, %p3472_p6 }
  0x12   : > { %p3475_p9 = pneg %p3474_p8 }
  0x14   : > { %p3480_p11 = pnand %p3478_p10, %p3475_p9 }
  0x16   : > { %3483 = shalt.err (!%p3480_p11)
}
  0x17   : > { %s3484_s23 = scalar_lea.vmem %s258_s29, 32  ;;  %p3492_p1 = scmp.lt.s32.totalorder %s258_s29, %s258_s29 }
  0x18   : > { %p3485_p12 = scmp.ne.s32.totalorder %s258_s29, %s3484_s23  ;;  %p3493_p4 = scmp.lt.s32.totalorder %s3484_s23, %s3484_s23 }
  0x1a   : > { %p3487_p13 = pnand %p3485_p12, %p3692_p7  ;;  %p3494_p2 = por %p3493_p4, %p3492_p1 }
  0x1c   : > { %p3488_p0 = pneg %p3487_p13 }
  0x1e   : > { %p3495_p3 = pnand %p3494_p2, %p3488_p0 }
  0x20   : > { %3498 = shalt.err (!%p3495_p3)
}
  0x21   : > { %3053 = dma.hbm_to_vmem [thread:$0]  (!%p3678_p5), %s3889_s2, 32, %s258_s29, [#allocation6]  }
  0x22   : > { %s3499_s10 = scalar_lea.hbm %s3888_s1, 32768 }
  0x23   : > { %p3500_p6 = scmp.ne.s32.totalorder %s3888_s1, %s3499_s10  ;;  %p3506_p2 = scmp.lt.u32.totalorder %s3499_s10, %s3888_s1 }
  0x25   : > { %p3502_p8 = pnand %p3500_p6, %p3692_p7 }
  0x27   : > { %p3503_p9 = pneg %p3502_p8 }
  0x29   : > { %p3508_p3 = pnand %p3506_p2, %p3503_p9 }
  0x2b   : > { %3511 = shalt.err (!%p3508_p3)
}
  0x2c   : > { %s3512_s29 = scalar_lea.vmem %s3674_s11, 32768  ;;  %p3520_p13 = scmp.lt.s32.totalorder %s3674_s11, %s3674_s11 }
  0x2d   : > { %p3513_p10 = scmp.ne.s32.totalorder %s3674_s11, %s3512_s29  ;;  %p3521_p0 = scmp.lt.s32.totalorder %s3512_s29, %s3512_s29 }
  0x2f   : > { %p3515_p11 = pnand %p3513_p10, %p3692_p7  ;;  %p3522_p1 = por %p3521_p0, %p3520_p13 }
  0x31   : > { %p3516_p12 = pneg %p3515_p11 }
  0x33   : > { %p3523_p4 = pnand %p3522_p1, %p3516_p12 }
  0x35   : > { %3526 = shalt.err (!%p3523_p4)
}
  0x36   : > { %s3606_s18 = smov 128   ;;  %s3607_s19 = smov 8  }
  0x37   : > { %3050 = dma.hbm_to_vmem [thread:$0]  (!%p3678_p5), %s3888_s1, 32768, %s3674_s11, [#allocation4], %s3606_s18, %s3606_s18, %s3607_s19  }
  0x38   : > { %s3527_s25 = scalar_lea.hbm %s3892_s5, 1024 }
  0x39   : > { %p3528_p6 = scmp.ne.s32.totalorder %s3892_s5, %s3527_s25  ;;  %p3534_p2 = scmp.lt.u32.totalorder %s3527_s25, %s3892_s5 }
  0x3b   : > { %p3530_p8 = pnand %p3528_p6, %p3692_p7 }
  0x3d   : > { %p3531_p9 = pneg %p3530_p8 }
  0x3f   : > { %p3536_p3 = pnand %p3534_p2, %p3531_p9 }
  0x41   : > { %3539 = shalt.err (!%p3536_p3)
}
  0x42   : > { %s3540_s11 = scalar_lea.vmem %s3682_s14, 1024  ;;  %p3548_p13 = scmp.lt.s32.totalorder %s3682_s14, %s3682_s14 }
  0x43   : > { %p3541_p10 = scmp.ne.s32.totalorder %s3682_s14, %s3540_s11  ;;  %p3549_p0 = scmp.lt.s32.totalorder %s3540_s11, %s3540_s11 }
  0x45   : > { %p3543_p11 = pnand %p3541_p10, %p3692_p7  ;;  %p3550_p1 = por %p3549_p0, %p3548_p13 }
  0x47   : > { %p3544_p12 = pneg %p3543_p11 }
  0x49   : > { %p3551_p4 = pnand %p3550_p1, %p3544_p12 }
  0x4b   : > { %3554 = shalt.err (!%p3551_p4)
}
  0x4c   : > { %s3608_s15 = smov 512   ;;  %s3609_s16 = smov 32  }
  0x4d   : > { %3056 = dma.hbm_to_vmem [thread:$0]  (!%p3678_p5), %s3892_s5, 1024, %s3682_s14, [#allocation6], %s3608_s15, %s3608_s15, %s3609_s16  }
  0x4e   : > { %s3610_s21 = smov [#allocation8]   ;;  %s3555_s25 = scalar_lea.hbm %s3893_s6, 256 }
  0x4f   : > { %s286_s22 = sshll.u32 %s3610_s21, 4  ;;  %p3556_p6 = scmp.ne.s32.totalorder %s3893_s6, %s3555_s25  ;;  %s287_s22 = int_to_ptr.vmem [resolvable:$true] %s286_s22 }
  0x50   : > { %p3562_p2 = scmp.lt.u32.totalorder %s3555_s25, %s3893_s6 }
  0x51   : > { %p3558_p8 = pnand %p3556_p6, %p3692_p7 }
  0x53   : > { %p3559_p9 = pneg %p3558_p8 }
  0x55   : > { %p3564_p3 = pnand %p3562_p2, %p3559_p9 }
  0x57   : > { %3567 = shalt.err (!%p3564_p3)
}
  0x58   : > { %s3568_s14 = scalar_lea.vmem %s287_s22, 256  ;;  %p3576_p13 = scmp.lt.s32.totalorder %s287_s22, %s287_s22 }
  0x59   : > { %p3569_p10 = scmp.ne.s32.totalorder %s287_s22, %s3568_s14  ;;  %p3577_p0 = scmp.lt.s32.totalorder %s3568_s14, %s3568_s14 }
  0x5b   : > { %p3571_p11 = pnand %p3569_p10, %p3692_p7  ;;  %p3578_p1 = por %p3577_p0, %p3576_p13 }
  0x5d   : > { %p3572_p12 = pneg %p3571_p11 }
  0x5f   : > { %p3579_p4 = pnand %p3578_p1, %p3572_p12 }
  0x61   : > { %3582 = shalt.err (!%p3579_p4)
}
  0x62   : > { %3059 = dma.hbm_to_vmem [thread:$0]  (!%p3678_p5), %s3893_s6, 256, %s287_s22, [#allocation9], %s3606_s18, %s3606_s18, %s3607_s19  }
  0x63   : > { %p3901_p6 = scmp.ne.s32.totalorder %s3898_s9, 0 }
  0x64   : > { %p3902_p7 = scmp.eq.s32.totalorder (!%p3901_p6), %s3663_s30, 0 }
  0x65   : > { %310 = sbr.rel (%p3901_p6) target bundleno = 616 (0x268), region = 48 }
  0x6c   : > { %3588 = dma.done.wait (%p3902_p7), [#allocation4], 32768   ;;  %p3903_p8 = pmov %p3902_p7 }
  0x6d   : > { %p3904_p9 = pmov %p3902_p7 }
  0x6e   : > { %3590 = vsyncadd (%p3903_p8), [#allocation4], 4294934528 }
  0x6f   : > { %3592 = dma.done.wait (%p3904_p9), [#allocation6], 1056   ;;  %p3905_p2 = pmov %p3902_p7 }
  0x71   : > { %3594 = vsyncadd (%p3905_p2), [#allocation6], 4294966240  ;;  %p3906_p3 = pmov %p3905_p2 }
  0x72   : > { %p3907_p5 = pmov %p3905_p2 }
  0x73   : > { %3596 = dma.done.wait (%p3906_p3), [#allocation9], 256  }
  0x74   : > { %3598 = vsyncadd (%p3907_p5), [#allocation9], 4294967040  ;;  %v3086_v0 = vld [vmem:[#allocation3 + $0x204] ss:$8 sps:$4 sm:$0xff]   ;;  %v3090_v2 = vld [vmem:[#allocation3 + $0x200] ss:$8 sps:$4 sm:$0xff]   ;;  %v390_v36 = vlaneseq }
  0x75   : > { %v3088_v1 = vld [vmem:[#allocation3 + $0x404] ss:$8 sps:$4 sm:$0xff]   ;;  %981 = vmatprep.subr.bf16.mxu1 %v3086_v0  ;;  %v3091_v3 = vld [vmem:[#allocation3 + $0x400] ss:$8 sps:$4 sm:$0xff]   ;;  %v3092_v4 = vld [vmem:[#allocation3 + $0x214] ss:$8 sps:$4 sm:$0xff]  }
  0x76   : > { %1898 = vmatprep.subr.bf16.mxu0 %v3088_v1  ;;  %982 = vmatpush1.bf16.msra.mxu1 %v3090_v2  ;;  %v3094_v5 = vld [vmem:[#allocation3 + $0x414] ss:$8 sps:$4 sm:$0xff]   ;;  %v3096_v6 = vld [vmem:[#allocation3 + $0x210] ss:$8 sps:$4 sm:$0xff]   ;;  %v3098_v8 = vld [vmem:[#allocation3 + $0x224] ss:$8 sps:$4 sm:$0xff]  }
  0x77   : > { %1899 = vmatpush1.bf16.msra.mxu0 %v3091_v3  ;;  %983 = vmatprep.subr.bf16.mxu1 %v3092_v4  ;;  %v3097_v7 = vld [vmem:[#allocation3 + $0x410] ss:$8 sps:$4 sm:$0xff]   ;;  %v3100_v9 = vld [vmem:[#allocation3 + $0x424] ss:$8 sps:$4 sm:$0xff]   ;;  %v3102_v10 = vld [vmem:[#allocation3 + $0x220] ss:$8 sps:$4 sm:$0xff]  }
  0x78   : > { %1900 = vmatprep.subr.bf16.mxu0 %v3094_v5  ;;  %v3103_v11 = vld [vmem:[#allocation3 + $0x420] ss:$8 sps:$4 sm:$0xff]   ;;  %v3104_v12 = vld [vmem:[#allocation3 + $0x234] ss:$8 sps:$4 sm:$0xff]   ;;  %v3108_v14 = vld [vmem:[#allocation3 + $0x230] ss:$8 sps:$4 sm:$0xff]  }
  0x79   : > { %v3106_v13 = vld [vmem:[#allocation3 + $0x434] ss:$8 sps:$4 sm:$0xff]   ;;  %v3109_v15 = vld [vmem:[#allocation3 + $0x430] ss:$8 sps:$4 sm:$0xff]   ;;  %v3110_v16 = vld [vmem:[#allocation3 + $0x244] ss:$8 sps:$4 sm:$0xff]  }
  0x7a   : > { %984 = vmatpush1.bf16.msra.mxu1 %v3096_v6  ;;  %v3112_v17 = vld [vmem:[#allocation3 + $0x444] ss:$8 sps:$4 sm:$0xff]   ;;  %v3114_v18 = vld [vmem:[#allocation3 + $0x240] ss:$8 sps:$4 sm:$0xff]   ;;  %v3116_v20 = vld [vmem:[#allocation3 + $0x254] ss:$8 sps:$4 sm:$0xff]  }
  0x7b   : > { %1901 = vmatpush1.bf16.msra.mxu0 %v3097_v7  ;;  %985 = vmatprep.subr.bf16.mxu1 %v3098_v8  ;;  %v3115_v19 = vld [vmem:[#allocation3 + $0x440] ss:$8 sps:$4 sm:$0xff]   ;;  %v3118_v21 = vld [vmem:[#allocation3 + $0x454] ss:$8 sps:$4 sm:$0xff]   ;;  %v3120_v22 = vld [vmem:[#allocation3 + $0x250] ss:$8 sps:$4 sm:$0xff]  }
  0x7c   : > { %1902 = vmatprep.subr.bf16.mxu0 %v3100_v9  ;;  %v3121_v23 = vld [vmem:[#allocation3 + $0x450] ss:$8 sps:$4 sm:$0xff]   ;;  %v3122_v24 = vld [vmem:[#allocation3 + $0x264] ss:$8 sps:$4 sm:$0xff]   ;;  %v3126_v26 = vld [vmem:[#allocation3 + $0x260] ss:$8 sps:$4 sm:$0xff]  }
  0x7d   : > { %v3124_v25 = vld [vmem:[#allocation3 + $0x464] ss:$8 sps:$4 sm:$0xff]   ;;  %v3127_v27 = vld [vmem:[#allocation3 + $0x460] ss:$8 sps:$4 sm:$0xff]   ;;  %v3128_v28 = vld [vmem:[#allocation3 + $0x274] ss:$8 sps:$4 sm:$0xff]  }
  0x7e   : > { %986 = vmatpush1.bf16.msra.mxu1 %v3102_v10  ;;  %v3130_v29 = vld [vmem:[#allocation3 + $0x474] ss:$8 sps:$4 sm:$0xff]   ;;  %v3132_v30 = vld [vmem:[#allocation3 + $0x270] ss:$8 sps:$4 sm:$0xff]   ;;  %v3134_v32 = vld [vmem:[#allocation3 + $0x284] ss:$8 sps:$4 sm:$0xff]  }
  0x7f   : > { %1903 = vmatpush1.bf16.msra.mxu0 %v3103_v11  ;;  %987 = vmatprep.subr.bf16.mxu1 %v3104_v12  ;;  %v3133_v31 = vld [vmem:[#allocation3 + $0x470] ss:$8 sps:$4 sm:$0xff]   ;;  %p361_p10 = scmp.lt.s32.totalorder %s3663_s30, 1  ;;  %v3136_v33 = vld [vmem:[#allocation3 + $0x484] ss:$8 sps:$4 sm:$0xff]   ;;  %v3796_v40 = vshrl.u32 %v390_v36, 7 }
  0x80   : > { %1904 = vmatprep.subr.bf16.mxu0 %v3106_v13  ;;  %v3138_v34 = vld [vmem:[#allocation3 + $0x280] ss:$8 sps:$4 sm:$0xff]   ;;  %v3140_v37 = vld [vmem:[#allocation3 + $0x294] ss:$8 sps:$4 sm:$0xff]   ;;  %v3144_v39 = vld [vmem:[#allocation3 + $0x290] ss:$8 sps:$4 sm:$0xff]  }
  0x81   : > { %v3139_v35 = vld [vmem:[#allocation3 + $0x480] ss:$8 sps:$4 sm:$0xff]   ;;  %s3913_s30 = smov (!%p361_p10, %s3663_s30), 1  ;;  %v3142_v38 = vld [vmem:[#allocation3 + $0x494] ss:$8 sps:$4 sm:$0xff]   ;;  %v3805_v47 = vsub.s32 1, %v3796_v40 }
  0x82   : > { %988 = vmatpush1.bf16.msra.mxu1 %v3108_v14  ;;  %v3145_v41 = vld [vmem:[#allocation3 + $0x490] ss:$8 sps:$4 sm:$0xff]   ;;  %v3146_v42 = vld [vmem:[#allocation3 + $0x2a4] ss:$8 sps:$4 sm:$0xff]   ;;  %s2998_s9 = sshll.u32 %s3913_s30, 5  ;;  %v3808_v49 = vsub.s32 0, %v3796_v40 }
  0x83   : > { %1905 = vmatpush1.bf16.msra.mxu0 %v3109_v15  ;;  %989 = vmatprep.subr.bf16.mxu1 %v3110_v16  ;;  %v3148_v43 = vld [vmem:[#allocation3 + $0x4a4] ss:$8 sps:$4 sm:$0xff]   ;;  %v3150_v44 = vld [vmem:[#allocation3 + $0x2a0] ss:$8 sps:$4 sm:$0xff]   ;;  %s3802_s18 = scalar_lea.vmem %s3887_s0, %s2998_s9  ;;  %v3152_v46 = vld [vmem:[#allocation3 + $0x2b4] ss:$8 sps:$4 sm:$0xff]  }
  0x84   : > { %1906 = vmatprep.subr.bf16.mxu0 %v3112_v17  ;;  %v3151_v45 = vld [vmem:[#allocation3 + $0x4a0] ss:$8 sps:$4 sm:$0xff]   ;;  %v3154_v48 = vld [vmem:[#allocation3 + $0x4b4] ss:$8 sps:$4 sm:$0xff]   ;;  %v3156_v56 = vld [vmem:[#allocation3 + $0x2b0] ss:$8 sps:$4 sm:$0xff]  }
  0x85   : > { %v376_v50 = vld [vmem:[%s3802_s18] sm:$0xff]  ;;  %v378_v51 = vld [vmem:[%s3802_s18 + $0x10] sm:$0xff]  ;;  %vm2508_vm8 = vcmask 1040384   ;;  %vm2509_vm9 = vsmask.f32 256  ;;  %s2999_s21 = sshll.u32 %s3913_s30, 4 }
  0x86   : > { %990 = vmatpush1.bf16.msra.mxu1 %v3114_v18  ;;  %v380_v52 = vunpack.c.l.bf16 %v376_v50  ;;  %v381_v53 = vunpack.c.h.bf16 %v376_v50  ;;  %v3815_v54 = vld [vmem:[%s3890_s3] sm:$0xf]  ;;  %v3157_v57 = vld [vmem:[#allocation3 + $0x4b0] ss:$8 sps:$4 sm:$0xff]   ;;  %v384_v58 = vunpack.c.l.bf16 %v378_v51  ;;  %v385_v59 = vunpack.c.h.bf16 %v378_v51  ;;  %v3158_v62 = vld [vmem:[#allocation3 + $0x2c4] ss:$8 sps:$4 sm:$0xff]   ;;  %s370_s24 = scalar_lea.vmem %s3894_s7, %s2999_s21 }
  0x87   : > { %1907 = vmatpush1.bf16.msra.mxu0 %v3115_v19  ;;  %991 = vmatprep.subr.bf16.mxu1 %v3116_v20  ;;  %v3820_v55 = vld [vmem:[%s3891_s4] sm:$0xf]  ;;  %v397_v60 = vrot.slane %v3815_v54, %v3805_v47  ;;  %v3160_v63 = vld [vmem:[#allocation3 + $0x4c4] ss:$8 sps:$4 sm:$0xff]   ;;  %v393_v0 = vrot.slane %v3815_v54, %v3808_v49  ;;  %v3164_v6 = vld [vmem:[#allocation3 + $0x2d4] ss:$8 sps:$4 sm:$0xff]  }
  0x88   : > { %1908 = vmatprep.subr.bf16.mxu0 %v3118_v21  ;;  %v427_v61 = vrot.slane %v3820_v55, %v3805_v47  ;;  %v423_v1 = vrot.slane %v3820_v55, %v3808_v49  ;;  %v3162_v2 = vld [vmem:[#allocation3 + $0x2c0] ss:$8 sps:$4 sm:$0xff]   ;;  %v3166_v7 = vld [vmem:[#allocation3 + $0x4d4] ss:$8 sps:$4 sm:$0xff]   ;;  %v3168_v17 = vld [vmem:[#allocation3 + $0x2d0] ss:$8 sps:$4 sm:$0xff]  }
  0x89   : > { %v411_v3 = vmul.f32 %v397_v60, %v381_v53  ;;  %v415_v4 = vmul.f32 %v397_v60, %v385_v59  ;;  %v3163_v5 = vld [vmem:[#allocation3 + $0x4c0] ss:$8 sps:$4 sm:$0xff]   ;;  %v410_v8 = vmul.f32 %v393_v0, %v380_v52  ;;  %v414_v9 = vmul.f32 %v393_v0, %v384_v58  ;;  %vm3859_vm12 = vmand %vm2508_vm8, %vm2509_vm9  ;;  %s3000_s25 = sshll.u32 %s3913_s30, 2 }
  0x8a   : > { %992 = vmatpush1.bf16.msra.mxu1 %v3120_v22  ;;  %v473_v12 = vld [vmem:[#allocation7 + $0x8] sm:$0xff]  ;;  %v472_v16 = vld [vmem:[#allocation7] sm:$0xff]  ;;  %vm2511_vm10 = vcmask 1044484   ;;  %vm2512_vm11 = vsmask.f32 4352  ;;  %s375_s10 = scalar_lea.vmem %s3895_s8, %s3000_s25 }
  0x8b   : > { %1909 = vmatpush1.bf16.msra.mxu0 %v3121_v23  ;;  %993 = vmatprep.subr.bf16.mxu1 %v3122_v24  ;;  %v441_v10 = vadd.f32 %v427_v61, %v411_v3  ;;  %v445_v11 = vadd.f32 %v427_v61, %v415_v4  ;;  %v477_v13 = vld [vmem:[#allocation7 + $0x28] sm:$0xff]  ;;  %v440_v14 = vadd.f32 %v423_v1, %v410_v8  ;;  %vm3866_vm13 = vmand %vm2511_vm10, %vm2512_vm11 }
  0x8c   : > { %1910 = vmatprep.subr.bf16.mxu0 %v3124_v25  ;;  %v444_v15 = vadd.f32 %v423_v1, %v414_v9  ;;  %v3169_v22 = vld [vmem:[#allocation3 + $0x4d0] ss:$8 sps:$4 sm:$0xff]   ;;  %v476_v25 = vld [vmem:[#allocation7 + $0x20] sm:$0xff]  ;;  %v3190_v9 = vld [vmem:[#allocation3 + $0x314] ss:$8 sps:$4 sm:$0xff]  }
  0x8d   : > { %vm449_vm0 = vcmp.ge.f32.partialorder %v441_v10, 0.0  ;;  %vm453_vm1 = vcmp.ge.f32.partialorder %v445_v11, 0.0  ;;  %v457_v18 = vmul.f32 0.2, %v441_v10  ;;  %v461_v19 = vmul.f32 0.2, %v445_v11  ;;  %vm2514_vm14 = vmor %vm3866_vm13, %vm3859_vm12 }
  0x8e   : > { %994 = vmatpush1.bf16.msra.mxu1 %v3126_v26  ;;  %vm448_vm2 = vcmp.ge.f32.partialorder %v440_v14, 0.0  ;;  %vm452_vm3 = vcmp.ge.f32.partialorder %v444_v15, 0.0  ;;  %v456_v20 = vmul.f32 0.2, %v440_v14  ;;  %v460_v21 = vmul.f32 0.2, %v444_v15 }
  0x8f   : > { %1911 = vmatpush1.bf16.msra.mxu0 %v3127_v27  ;;  %995 = vmatprep.subr.bf16.mxu1 %v3128_v28  ;;  %v465_v23 = vsel %vm449_vm0, %v441_v10, %v457_v18  ;;  %v469_v24 = vsel %vm453_vm1, %v445_v11, %v461_v19  ;;  %v3170_v26 = vld [vmem:[#allocation3 + $0x2e4] ss:$8 sps:$4 sm:$0xff]   ;;  %v3175_v36 = vld [vmem:[#allocation3 + $0x4e0] ss:$8 sps:$4 sm:$0xff]   ;;  %v3193_v10 = vld [vmem:[#allocation3 + $0x514] ss:$8 sps:$4 sm:$0xff]  }
  0x90   : > { %1912 = vmatprep.subr.bf16.mxu0 %v3130_v29  ;;  %v3172_v27 = vld [vmem:[#allocation3 + $0x4e4] ss:$8 sps:$4 sm:$0xff]   ;;  %v481_v28 = vmul.f32 %v473_v12, %v465_v23  ;;  %v485_v29 = vmul.f32 %v477_v13, %v469_v24  ;;  %v3188_v11 = vld [vmem:[#allocation3 + $0x310] ss:$8 sps:$4 sm:$0xff]   ;;  %v3205_v18 = vld [vmem:[#allocation3 + $0x534] ss:$8 sps:$4 sm:$0xff]  }
  0x91   : > { %v3191_v12 = vld [vmem:[#allocation3 + $0x510] ss:$8 sps:$4 sm:$0xff]   ;;  %v3196_v13 = vld [vmem:[#allocation3 + $0x324] ss:$8 sps:$4 sm:$0xff]   ;;  %v3206_v23 = vld [vmem:[#allocation3 + $0x340] ss:$8 sps:$4 sm:$0xff]  }
  0x92   : > { %996 = vmatpush1.bf16.msra.mxu1 %v3132_v30  ;;  %v464_v30 = vsel %vm448_vm2, %v440_v14, %v456_v20  ;;  %v3199_v14 = vld [vmem:[#allocation3 + $0x524] ss:$8 sps:$4 sm:$0xff]   ;;  %v3200_v19 = vld [vmem:[#allocation3 + $0x330] ss:$8 sps:$4 sm:$0xff]   ;;  %v3209_v24 = vld [vmem:[#allocation3 + $0x540] ss:$8 sps:$4 sm:$0xff]  }
  0x93   : > { %1913 = vmatpush1.bf16.msra.mxu0 %v3133_v31  ;;  %997 = vmatprep.subr.bf16.mxu1 %v3134_v32  ;;  %v468_v31 = vsel %vm452_vm3, %v444_v15, %v460_v21  ;;  %v480_v32 = vmul.f32 %v472_v16, %v464_v30  ;;  %v3194_v15 = vld [vmem:[#allocation3 + $0x320] ss:$8 sps:$4 sm:$0xff]   ;;  %v3203_v20 = vld [vmem:[#allocation3 + $0x530] ss:$8 sps:$4 sm:$0xff]   ;;  %v3208_v21 = vld [vmem:[#allocation3 + $0x344] ss:$8 sps:$4 sm:$0xff]  }
  0x94   : > { %1914 = vmatprep.subr.bf16.mxu0 %v3136_v33  ;;  %v489_v33 = vpack.c.bf16 %v485_v29, %v481_v28  ;;  %v3197_v16 = vld [vmem:[#allocation3 + $0x520] ss:$8 sps:$4 sm:$0xff]   ;;  %v3217_v28 = vld [vmem:[#allocation3 + $0x554] ss:$8 sps:$4 sm:$0xff]   ;;  %v3212_v29 = vld [vmem:[#allocation3 + $0x350] ss:$8 sps:$4 sm:$0xff]  }
  0x95   : > { %v3215_v30 = vld [vmem:[#allocation3 + $0x550] ss:$8 sps:$4 sm:$0xff]  }
  0x96   : > { %998 = vmatpush1.bf16.msra.mxu1 %v3138_v34  ;;  %v484_v34 = vmul.f32 %v476_v25, %v468_v31  ;;  %493 = vst [vmem:[#allocation2 + $0x8] sm:$0xff] %v489_v33  ;;  %v404_v25 = vsub.s32 3, %v3796_v40  ;;  %v3220_v33 = vld [vmem:[#allocation3 + $0x364] ss:$8 sps:$4 sm:$0xff]  }
  0x97   : > { %1915 = vmatpush1.bf16.msra.mxu0 %v3139_v35  ;;  %999 = vmatprep.subr.bf16.mxu1 %v3140_v37  ;;  %v3174_v35 = vld [vmem:[#allocation3 + $0x2e0] ss:$8 sps:$4 sm:$0xff]   ;;  %v3176_v37 = vld [vmem:[#allocation3 + $0x2f4] ss:$8 sps:$4 sm:$0xff]  }
  0x98   : > { %1916 = vmatprep.subr.bf16.mxu0 %v3142_v38  ;;  %v3178_v38 = vld [vmem:[#allocation3 + $0x4f4] ss:$8 sps:$4 sm:$0xff]   ;;  %v405_v31 = vrot.slane %v3815_v54, %v404_v25 }
  0x9a   : > { %1000 = vmatpush1.bf16.msra.mxu1 %v3144_v39  ;;  %v488_v39 = vpack.c.bf16 %v484_v34, %v480_v32  ;;  %v3223_v34 = vld [vmem:[#allocation3 + $0x564] ss:$8 sps:$4 sm:$0xff]  }
  0x9b   : > { %1917 = vmatpush1.bf16.msra.mxu0 %v3145_v41  ;;  %1001 = vmatprep.subr.bf16.mxu1 %v3146_v42  ;;  %v3180_v41 = vld [vmem:[#allocation3 + $0x2f0] ss:$8 sps:$4 sm:$0xff]  }
  0x9c   : > { %1918 = vmatprep.subr.bf16.mxu0 %v3148_v43  ;;  %492 = vst [vmem:[#allocation2] sm:$0xff] %v488_v39  ;;  %v3181_v42 = vld [vmem:[#allocation3 + $0x4f0] ss:$8 sps:$4 sm:$0xff]   ;;  %v3184_v43 = vld [vmem:[#allocation3 + $0x304] ss:$8 sps:$4 sm:$0xff]  }
  0x9e   : > { %1002 = vmatpush1.bf16.msra.mxu1 %v3150_v44  ;;  %v3187_v44 = vld [vmem:[#allocation3 + $0x504] ss:$8 sps:$4 sm:$0xff]  }
  0x9f   : > { %1919 = vmatpush1.bf16.msra.mxu0 %v3151_v45  ;;  %1003 = vmatprep.subr.bf16.mxu1 %v3152_v46  ;;  %v3832_v45 = vld [vmem:[#allocation2 + $0x8] sm:$0x1f] }
  0xa0   : > { %1920 = vmatprep.subr.bf16.mxu0 %v3154_v48  ;;  %v1474_v46 = vld [vmem:[#allocation2 + $0x8] sm:$0x3e]  ;;  %v637_v48 = vshrl.u32 %v3832_v45, 16  ;;  %v639_v50 = vshll.u32 %v3832_v45, 16 }
  0xa1   : > { %v1551_v51 = vshrl.u32 %v1474_v46, 16  ;;  %v1554_v52 = vshll.u32 %v1474_v46, 16 }
  0xa2   : > { %1004 = vmatpush1.bf16.msra.mxu1 %v3156_v56 }
  0xa3   : > { %1921 = vmatpush1.bf16.msra.mxu0 %v3157_v57  ;;  %1005 = vmatprep.subr.bf16.mxu1 %v3158_v62  ;;  %v496_v53 = vld [vmem:[#allocation2] sm:$0x1f]  ;;  %v641_v57 = vrot.slane %v639_v50, 1  ;;  %v1553_v58 = vrot.slane %v1551_v51, 1  ;;  %v1556_v59 = vrot.slane %v1554_v52, 2 }
  0xa4   : > { %1922 = vmatprep.subr.bf16.mxu0 %v3160_v63  ;;  %v1473_v56 = vld [vmem:[#allocation2] sm:$0x3e]  ;;  %v630_v60 = vshrl.u32 %v496_v53, 16  ;;  %v632_v61 = vshll.u32 %v496_v53, 16  ;;  %v3229_v50 = vld [vmem:[#allocation3 + $0x574] ss:$8 sps:$4 sm:$0xff]  }
  0xa5   : > { %v1543_v62 = vshrl.u32 %v1473_v56, 16  ;;  %v1546_v63 = vshll.u32 %v1473_v56, 16  ;;  %v642_v0 = vor.u32 %v641_v57, %v637_v48  ;;  %v1557_v1 = vor.u32 %v1556_v59, %v1553_v58  ;;  %v3226_v48 = vld [vmem:[#allocation3 + $0x374] ss:$8 sps:$4 sm:$0xff]   ;;  %v3224_v53 = vld [vmem:[#allocation3 + $0x370] ss:$8 sps:$4 sm:$0xff]  }
  0xa6   : > { %1006 = vmatpush1.bf16.msra.mxu1 %v3162_v2  ;;  %v634_v2 = vrot.slane %v632_v61, 1  ;;  %v3227_v56 = vld [vmem:[#allocation3 + $0x570] ss:$8 sps:$4 sm:$0xff]  }
  0xa7   : > { %1923 = vmatpush1.bf16.msra.mxu0 %v3163_v5  ;;  %1007 = vmatprep.subr.bf16.mxu1 %v3164_v6  ;;  %v1545_v3 = vrot.slane %v1543_v62, 1  ;;  %v1548_v4 = vrot.slane %v1546_v63, 2  ;;  %v3182_v5 = vld [vmem:[#allocation3 + $0x300] ss:$8 sps:$4 sm:$0xff]  }
  0xa8   : > { %1924 = vmatprep.subr.bf16.mxu0 %v3166_v7  ;;  %1013 = vmatprep.mubr.bf16.mxu1 %v642_v0  ;;  %v3185_v6 = vld [vmem:[#allocation3 + $0x500] ss:$8 sps:$4 sm:$0xff]   ;;  %v635_v7 = vor.u32 %v634_v2, %v630_v60  ;;  %v3235_v60 = vld [vmem:[#allocation3 + $0x584] ss:$8 sps:$4 sm:$0xff]   ;;  %v474_v0 = vld [vmem:[#allocation7 + $0x10] sm:$0xff] }
  0xa9   : > { %1930 = vmatprep.mubr.bf16.mxu0 %v1557_v1  ;;  %v1549_v8 = vor.u32 %v1548_v4, %v1545_v3  ;;  %v475_v58 = vld [vmem:[#allocation7 + $0x18] sm:$0xff]  ;;  %v478_v1 = vld [vmem:[#allocation7 + $0x30] sm:$0xff] }
  0xaa   : > { %1008 = vmatpush1.bf16.msra.mxu1 %v3168_v17  ;;  %v3202_v17 = vld [vmem:[#allocation3 + $0x334] ss:$8 sps:$4 sm:$0xff]  }
  0xab   : > { %1925 = vmatpush1.bf16.msra.mxu0 %v3169_v22  ;;  %1009 = vmatprep.subr.bf16.mxu1 %v3170_v26  ;;  %v3211_v22 = vld [vmem:[#allocation3 + $0x544] ss:$8 sps:$4 sm:$0xff]   ;;  %v400_v26 = vsub.s32 2, %v3796_v40  ;;  %v479_v62 = vld [vmem:[#allocation7 + $0x38] sm:$0xff] }
  0xac   : > { %1926 = vmatprep.subr.bf16.mxu0 %v3172_v27  ;;  %v3214_v27 = vld [vmem:[#allocation3 + $0x354] ss:$8 sps:$4 sm:$0xff]  }
  0xad   : > { %v401_v32 = vrot.slane %v3815_v54, %v400_v26  ;;  %v431_v39 = vrot.slane %v3820_v55, %v400_v26  ;;  %v3250_v26 = vld [vmem:[#allocation3 + $0x3b4] ss:$8 sps:$4 sm:$0xff]  }
  0xae   : > { %1010 = vmatpush1.bf16.msra.mxu1 %v3174_v35  ;;  %v377_v35 = vld [vmem:[%s3802_s18 + $0x8] sm:$0xff] }
  0xaf   : > { %1927 = vmatpush1.bf16.msra.mxu0 %v3175_v36  ;;  %1011 = vmatprep.subr.bf16.mxu1 %v3176_v37  ;;  %v379_v36 = vld [vmem:[%s3802_s18 + $0x18] sm:$0xff]  ;;  %v382_v40 = vunpack.c.l.bf16 %v377_v35  ;;  %v383_v37 = vunpack.c.h.bf16 %v377_v35 }
  0xb0   : > { %1928 = vmatprep.subr.bf16.mxu0 %v3178_v38  ;;  %v435_v38 = vrot.slane %v3820_v55, %v404_v25  ;;  %v3232_v55 = vld [vmem:[#allocation3 + $0x384] ss:$8 sps:$4 sm:$0xff]   ;;  %v3245_v25 = vld [vmem:[#allocation3 + $0x5a0] ss:$8 sps:$4 sm:$0xff]  }
  0xb1   : > { %v413_v46 = vmul.f32 %v405_v31, %v383_v37  ;;  %v412_v54 = vmul.f32 %v401_v32, %v382_v40  ;;  %v3259_v40 = vld [vmem:[#allocation3 + $0x5c4] ss:$8 sps:$4 sm:$0xff]  }
  0xb2   : > { %1012 = vmatpush1.bf16.msra.mxu1 %v3180_v41  ;;  %v3218_v41 = vld [vmem:[#allocation3 + $0x360] ss:$8 sps:$4 sm:$0xff]  }
  0xb3   : > { %1929 = vmatpush1.bf16.msra.mxu0 %v3181_v42  ;;  %1024 = vmatprep.subr.bf16.mxu1 %v3184_v43  ;;  %v386_v42 = vunpack.c.l.bf16 %v379_v36  ;;  %v387_v43 = vunpack.c.h.bf16 %v379_v36  ;;  %v443_v57 = vadd.f32 %v435_v38, %v413_v46  ;;  %v442_v59 = vadd.f32 %v431_v39, %v412_v54  ;;  %v3262_v46 = vld [vmem:[#allocation3 + $0x3d4] ss:$8 sps:$4 sm:$0xff]  }
  0xb4   : > { %1941 = vmatprep.subr.bf16.mxu0 %v3187_v44  ;;  %v3221_v44 = vld [vmem:[#allocation3 + $0x560] ss:$8 sps:$4 sm:$0xff]   ;;  %v3265_v54 = vld [vmem:[#allocation3 + $0x5d4] ss:$8 sps:$4 sm:$0xff]  }
  0xb5   : > { %1014 = vmatmul.mubr.bf16.vlgmr.msra.gmra.mrb[0].mxu1 %v635_v7  ;;  %v417_v51 = vmul.f32 %v405_v31, %v387_v43  ;;  %v416_v52 = vmul.f32 %v401_v32, %v386_v42  ;;  %vm451_vm4 = vcmp.ge.f32.partialorder %v443_v57, 0.0  ;;  %v459_v2 = vmul.f32 0.2, %v443_v57  ;;  %v3256_v32 = vld [vmem:[#allocation3 + $0x3c4] ss:$8 sps:$4 sm:$0xff]  }
  0xb6   : > { %1931 = vmatmul.mubr.bf16.vlgmr.msra.gmra.mrb[0].mxu0 %v1549_v8  ;;  %1025 = vmatpush1.bf16.msra.mxu1 %v3182_v5  ;;  %vm450_vm5 = vcmp.ge.f32.partialorder %v442_v59, 0.0  ;;  %v458_v3 = vmul.f32 0.2, %v442_v59  ;;  %v3230_v8 = vld [vmem:[#allocation3 + $0x380] ss:$8 sps:$4 sm:$0xff]  }
  0xb7   : > { %1942 = vmatpush1.bf16.msra.mxu0 %v3185_v6  ;;  %1026 = vmatprep.subr.bf16.mxu1 %v3190_v9  ;;  %v447_v61 = vadd.f32 %v435_v38, %v417_v51  ;;  %v446_v63 = vadd.f32 %v431_v39, %v416_v52  ;;  %v467_v6 = vsel %vm451_vm4, %v443_v57, %v459_v2  ;;  %v3257_v42 = vld [vmem:[#allocation3 + $0x5c0] ss:$8 sps:$4 sm:$0xff]  }
  0xb8   : > { %1943 = vmatprep.subr.bf16.mxu0 %v3193_v10  ;;  %v466_v7 = vsel %vm450_vm5, %v442_v59, %v458_v3  ;;  %v483_v10 = vmul.f32 %v475_v58, %v467_v6  ;;  %v3272_v3 = vld [vmem:[#allocation3 + $0x3f0] ss:$8 sps:$4 sm:$0xff]   ;;  %v3283_v6 = vld [vmem:[#allocation3 + $0x604] ss:$8 sps:$4 sm:$0xff]  }
  0xb9   : > { %vm455_vm6 = vcmp.ge.f32.partialorder %v447_v61, 0.0  ;;  %v463_v4 = vmul.f32 0.2, %v447_v61  ;;  %vm454_vm7 = vcmp.ge.f32.partialorder %v446_v63, 0.0  ;;  %v462_v5 = vmul.f32 0.2, %v446_v63 }
  0xba   : > { %1027 = vmatpush1.bf16.msra.mxu1 %v3188_v11 }
  0xbb   : > { %1944 = vmatpush1.bf16.msra.mxu0 %v3191_v12  ;;  %1028 = vmatprep.subr.bf16.mxu1 %v3196_v13  ;;  %v471_v9 = vsel %vm455_vm6, %v447_v61, %v463_v4  ;;  %v470_v11 = vsel %vm454_vm7, %v446_v63, %v462_v5  ;;  %v482_v12 = vmul.f32 %v474_v0, %v466_v7  ;;  %v3233_v13 = vld [vmem:[#allocation3 + $0x580] ss:$8 sps:$4 sm:$0xff]   ;;  %v3274_v61 = vld [vmem:[#allocation3 + $0x3f4] ss:$8 sps:$4 sm:$0xff]   ;;  %v3275_v4 = vld [vmem:[#allocation3 + $0x5f0] ss:$8 sps:$4 sm:$0xff]  }
  0xbc   : > { %1945 = vmatprep.subr.bf16.mxu0 %v3199_v14  ;;  %v487_v14 = vmul.f32 %v479_v62, %v471_v9  ;;  %v3277_v62 = vld [vmem:[#allocation3 + $0x5f4] ss:$8 sps:$4 sm:$0xff]   ;;  %v3280_v5 = vld [vmem:[#allocation3 + $0x4] ss:$8 sps:$4 sm:$0xff]   ;;  %v3278_v9 = vld [vmem:[#allocation3] ss:$8 sps:$4 sm:$0xff]  }
  0xbe   : > { %1029 = vmatpush1.bf16.msra.mxu1 %v3194_v15  ;;  %v486_v15 = vmul.f32 %v478_v1, %v470_v11  ;;  %v3286_v11 = vld [vmem:[#allocation3 + $0x14] ss:$8 sps:$4 sm:$0xff]  }
  0xbf   : > { %1946 = vmatpush1.bf16.msra.mxu0 %v3197_v16  ;;  %1030 = vmatprep.subr.bf16.mxu1 %v3202_v17  ;;  %v3238_v16 = vld [vmem:[#allocation3 + $0x394] ss:$8 sps:$4 sm:$0xff]  }
  0xc0   : > { %1947 = vmatprep.subr.bf16.mxu0 %v3205_v18  ;;  %v3241_v17 = vld [vmem:[#allocation3 + $0x594] ss:$8 sps:$4 sm:$0xff]   ;;  %v491_v18 = vpack.c.bf16 %v487_v14, %v483_v10  ;;  %v3281_v10 = vld [vmem:[#allocation3 + $0x600] ss:$8 sps:$4 sm:$0xff]   ;;  %v3287_v14 = vld [vmem:[#allocation3 + $0x610] ss:$8 sps:$4 sm:$0xff]  }
  0xc2   : > { %1031 = vmatpush1.bf16.msra.mxu1 %v3200_v19  ;;  %v490_v19 = vpack.c.bf16 %v486_v15, %v482_v12  ;;  %495 = vst [vmem:[#allocation2 + $0x18] sm:$0xff] %v491_v18  ;;  %v3289_v12 = vld [vmem:[#allocation3 + $0x614] ss:$8 sps:$4 sm:$0xff]   ;;  %v3292_v15 = vld [vmem:[#allocation3 + $0x24] ss:$8 sps:$4 sm:$0xff]  }
  0xc3   : > { %1948 = vmatpush1.bf16.msra.mxu0 %v3203_v20  ;;  %1032 = vmatprep.subr.bf16.mxu1 %v3208_v21  ;;  %v3236_v20 = vld [vmem:[#allocation3 + $0x390] ss:$8 sps:$4 sm:$0xff]   ;;  %v3290_v18 = vld [vmem:[#allocation3 + $0x20] ss:$8 sps:$4 sm:$0xff]  }
  0xc4   : > { %1949 = vmatprep.subr.bf16.mxu0 %v3211_v22  ;;  %v3239_v21 = vld [vmem:[#allocation3 + $0x590] ss:$8 sps:$4 sm:$0xff]   ;;  %494 = vst [vmem:[#allocation2 + $0x10] sm:$0xff] %v490_v19  ;;  %v3244_v22 = vld [vmem:[#allocation3 + $0x3a4] ss:$8 sps:$4 sm:$0xff]  }
  0xc5   : > { %v3293_v19 = vld [vmem:[#allocation3 + $0x620] ss:$8 sps:$4 sm:$0xff]  }
  0xc6   : > { %1033 = vmatpush1.bf16.msra.mxu1 %v3206_v23  ;;  %v3247_v23 = vld [vmem:[#allocation3 + $0x5a4] ss:$8 sps:$4 sm:$0xff]  }
  0xc7   : > { %1950 = vmatpush1.bf16.msra.mxu0 %v3209_v24  ;;  %1034 = vmatprep.subr.bf16.mxu1 %v3214_v27  ;;  %v3242_v24 = vld [vmem:[#allocation3 + $0x3a0] ss:$8 sps:$4 sm:$0xff]   ;;  %v3253_v27 = vld [vmem:[#allocation3 + $0x5b4] ss:$8 sps:$4 sm:$0xff]  }
  0xc8   : > { %1951 = vmatprep.subr.bf16.mxu0 %v3217_v28  ;;  %v3248_v28 = vld [vmem:[#allocation3 + $0x3b0] ss:$8 sps:$4 sm:$0xff]  }
  0xc9   : > { %v1476_v31 = vld [vmem:[#allocation2 + $0x18] sm:$0x3e] }
  0xca   : > { %1035 = vmatpush1.bf16.msra.mxu1 %v3212_v29  ;;  %v3251_v29 = vld [vmem:[#allocation3 + $0x5b0] ss:$8 sps:$4 sm:$0xff]   ;;  %v1567_v35 = vshrl.u32 %v1476_v31, 16  ;;  %v1570_v36 = vshll.u32 %v1476_v31, 16  ;;  %v3313_v31 = vld [vmem:[#allocation3 + $0x654] ss:$8 sps:$4 sm:$0xff]  }
  0xcb   : > { %1952 = vmatpush1.bf16.msra.mxu0 %v3215_v30  ;;  %1036 = vmatprep.subr.bf16.mxu1 %v3220_v33  ;;  %v3844_v30 = vld [vmem:[#allocation2 + $0x18] sm:$0x1f]  ;;  %v3848_v51 = vld [vmem:[#allocation2 + $0x10] sm:$0x1f] }
  0xcc   : > { %1953 = vmatprep.subr.bf16.mxu0 %v3223_v34  ;;  %v651_v33 = vshrl.u32 %v3844_v30, 16  ;;  %v653_v34 = vshll.u32 %v3844_v30, 16  ;;  %v1569_v38 = vrot.slane %v1567_v35, 1  ;;  %v1572_v39 = vrot.slane %v1570_v36, 2  ;;  %v1475_v52 = vld [vmem:[#allocation2 + $0x10] sm:$0x3e] }
  0xcd   : > { %v646_v57 = vshll.u32 %v3848_v51, 16  ;;  %v1559_v58 = vshrl.u32 %v1475_v52, 16  ;;  %v1562_v59 = vshll.u32 %v1475_v52, 16  ;;  %v644_v63 = vshrl.u32 %v3848_v51, 16  ;;  %v3319_v35 = vld [vmem:[#allocation3 + $0x664] ss:$8 sps:$4 sm:$0xff]  }
  0xce   : > { %1037 = vmatpush1.bf16.msra.mxu1 %v3218_v41  ;;  %v655_v37 = vrot.slane %v653_v34, 1  ;;  %v3254_v41 = vld [vmem:[#allocation3 + $0x3c0] ss:$8 sps:$4 sm:$0xff]   ;;  %v3316_v34 = vld [vmem:[#allocation3 + $0x64] ss:$8 sps:$4 sm:$0xff]  }
  0xcf   : > { %1954 = vmatpush1.bf16.msra.mxu0 %v3221_v44  ;;  %1038 = vmatprep.subr.bf16.mxu1 %v3226_v48  ;;  %v1573_v44 = vor.u32 %v1572_v39, %v1569_v38  ;;  %v3260_v48 = vld [vmem:[#allocation3 + $0x3d0] ss:$8 sps:$4 sm:$0xff]   ;;  %v648_v0 = vrot.slane %v646_v57, 1  ;;  %v1561_v1 = vrot.slane %v1559_v58, 1  ;;  %v1564_v2 = vrot.slane %v1562_v59, 2 }
  0xd0   : > { %1955 = vmatprep.subr.bf16.mxu0 %v3229_v50  ;;  %v656_v43 = vor.u32 %v655_v37, %v651_v33  ;;  %v3263_v50 = vld [vmem:[#allocation3 + $0x5d0] ss:$8 sps:$4 sm:$0xff]   ;;  %v3314_v36 = vld [vmem:[#allocation3 + $0x60] ss:$8 sps:$4 sm:$0xff]   ;;  %v3322_v37 = vld [vmem:[#allocation3 + $0x74] ss:$8 sps:$4 sm:$0xff]  }
  0xd1   : > { %1973 = vmatprep.mubr.bf16.mxu0 %v1573_v44  ;;  %v649_v7 = vor.u32 %v648_v0, %v644_v63  ;;  %v3311_v33 = vld [vmem:[#allocation3 + $0x650] ss:$8 sps:$4 sm:$0xff]   ;;  %v3325_v38 = vld [vmem:[#allocation3 + $0x674] ss:$8 sps:$4 sm:$0xff]   ;;  %v3326_v44 = vld [vmem:[#allocation3 + $0x80] ss:$8 sps:$4 sm:$0xff]  }
  0xd2   : > { %1039 = vmatpush1.bf16.msra.mxu1 %v3224_v53  ;;  %1056 = vmatprep.mubr.bf16.mxu1 %v656_v43  ;;  %v3268_v53 = vld [vmem:[#allocation3 + $0x3e4] ss:$8 sps:$4 sm:$0xff]   ;;  %v3320_v39 = vld [vmem:[#allocation3 + $0x70] ss:$8 sps:$4 sm:$0xff]   ;;  %v3338_v57 = vld [vmem:[#allocation3 + $0xa0] ss:$8 sps:$4 sm:$0xff]  }
  0xd3   : > { %1956 = vmatpush1.bf16.msra.mxu0 %v3227_v56  ;;  %1040 = vmatprep.subr.bf16.mxu1 %v3232_v55  ;;  %v3271_v56 = vld [vmem:[#allocation3 + $0x5e4] ss:$8 sps:$4 sm:$0xff]   ;;  %v3266_v55 = vld [vmem:[#allocation3 + $0x3e0] ss:$8 sps:$4 sm:$0xff]   ;;  %v3335_v52 = vld [vmem:[#allocation3 + $0x690] ss:$8 sps:$4 sm:$0xff]  }
  0xd4   : > { %1957 = vmatprep.subr.bf16.mxu0 %v3235_v60  ;;  %v3269_v60 = vld [vmem:[#allocation3 + $0x5e0] ss:$8 sps:$4 sm:$0xff]   ;;  %v3331_v43 = vld [vmem:[#allocation3 + $0x684] ss:$8 sps:$4 sm:$0xff]   ;;  %v3346_v59 = vld [vmem:[#allocation3 + $0xb4] ss:$8 sps:$4 sm:$0xff]  }
  0xd5   : > { %v3341_v58 = vld [vmem:[#allocation3 + $0x6a0] ss:$8 sps:$4 sm:$0xff]   ;;  %v3355_v63 = vld [vmem:[#allocation3 + $0x6c4] ss:$8 sps:$4 sm:$0xff]  }
  0xd6   : > { %1041 = vmatpush1.bf16.msra.mxu1 %v3230_v8  ;;  %v1565_v8 = vor.u32 %v1564_v2, %v1561_v1  ;;  %v3350_v0 = vld [vmem:[#allocation3 + $0xc0] ss:$8 sps:$4 sm:$0xff]   ;;  %v3358_v2 = vld [vmem:[#allocation3 + $0xd4] ss:$8 sps:$4 sm:$0xff]  }
  0xd7   : > { %1958 = vmatpush1.bf16.msra.mxu0 %v3233_v13  ;;  %1042 = vmatprep.subr.bf16.mxu1 %v3238_v16  ;;  %v3284_v13 = vld [vmem:[#allocation3 + $0x10] ss:$8 sps:$4 sm:$0xff]   ;;  %v3295_v16 = vld [vmem:[#allocation3 + $0x624] ss:$8 sps:$4 sm:$0xff]   ;;  %v3353_v1 = vld [vmem:[#allocation3 + $0x6c0] ss:$8 sps:$4 sm:$0xff]  }
  0xd8   : > { %1959 = vmatprep.subr.bf16.mxu0 %v3241_v17  ;;  %v3611_v17 = vmov 0  }
  0xd9   : > { %3085 = vset.pattern.permute.xlu0 %v3611_v17  ;;  %v3376_v17 = vld [vmem:[#allocation3 + $0x104] ss:$8 sps:$4 sm:$0xff]  }
  0xda   : > { %1043 = vmatpush1.bf16.msra.mxu1 %v3236_v20  ;;  %v3298_v20 = vld [vmem:[#allocation3 + $0x34] ss:$8 sps:$4 sm:$0xff]  }
  0xdb   : > { %1960 = vmatpush1.bf16.msra.mxu0 %v3239_v21  ;;  %1044 = vmatprep.subr.bf16.mxu1 %v3244_v22  ;;  %v1989_v21 = vld [vmem:[#allocation2 + $0x8] sm:$0x7c]  ;;  %v3301_v22 = vld [vmem:[#allocation3 + $0x634] ss:$8 sps:$4 sm:$0xff]  }
  0xdc   : > { %1961 = vmatprep.subr.bf16.mxu0 %v3247_v23  ;;  %v2062_v23 = vrot.slane %v1989_v21, 2  ;;  %v3374_v21 = vld [vmem:[#allocation3 + $0x100] ss:$8 sps:$4 sm:$0xff]  }
  0xde   : > { %1045 = vmatpush1.bf16.msra.mxu1 %v3242_v24  ;;  %v3296_v24 = vld [vmem:[#allocation3 + $0x30] ss:$8 sps:$4 sm:$0xff]  }
  0xdf   : > { %1962 = vmatpush1.bf16.msra.mxu0 %v3245_v25  ;;  %1046 = vmatprep.subr.bf16.mxu1 %v3250_v26  ;;  %v3299_v25 = vld [vmem:[#allocation3 + $0x630] ss:$8 sps:$4 sm:$0xff]   ;;  %v3304_v26 = vld [vmem:[#allocation3 + $0x44] ss:$8 sps:$4 sm:$0xff]  }
  0xe0   : > { %1963 = vmatprep.subr.bf16.mxu0 %v3253_v27  ;;  %v3302_v27 = vld [vmem:[#allocation3 + $0x40] ss:$8 sps:$4 sm:$0xff]  }
  0xe2   : > { %1047 = vmatpush1.bf16.msra.mxu1 %v3248_v28  ;;  %v3305_v28 = vld [vmem:[#allocation3 + $0x640] ss:$8 sps:$4 sm:$0xff]  }
  0xe3   : > { %1964 = vmatpush1.bf16.msra.mxu0 %v3251_v29  ;;  %1048 = vmatprep.subr.bf16.mxu1 %v3256_v32  ;;  %v3310_v29 = vld [vmem:[#allocation3 + $0x54] ss:$8 sps:$4 sm:$0xff]   ;;  %v3308_v32 = vld [vmem:[#allocation3 + $0x50] ss:$8 sps:$4 sm:$0xff]  }
  0xe4   : > { %1965 = vmatprep.subr.bf16.mxu0 %v3259_v40  ;;  %v3317_v40 = vld [vmem:[#allocation3 + $0x660] ss:$8 sps:$4 sm:$0xff]  }
  0xe6   : > { %1049 = vmatpush1.bf16.msra.mxu1 %v3254_v41  ;;  %v3323_v41 = vld [vmem:[#allocation3 + $0x670] ss:$8 sps:$4 sm:$0xff]  }
  0xe7   : > { %1966 = vmatpush1.bf16.msra.mxu0 %v3257_v42  ;;  %1050 = vmatprep.subr.bf16.mxu1 %v3262_v46  ;;  %v3328_v42 = vld [vmem:[#allocation3 + $0x84] ss:$8 sps:$4 sm:$0xff]   ;;  %v3329_v46 = vld [vmem:[#allocation3 + $0x680] ss:$8 sps:$4 sm:$0xff]  }
  0xe8   : > { %1967 = vmatprep.subr.bf16.mxu0 %v3265_v54  ;;  %v3334_v54 = vld [vmem:[#allocation3 + $0x94] ss:$8 sps:$4 sm:$0xff]  }
  0xea   : > { %1051 = vmatpush1.bf16.msra.mxu1 %v3260_v48  ;;  %v3337_v48 = vld [vmem:[#allocation3 + $0x694] ss:$8 sps:$4 sm:$0xff]  }
  0xeb   : > { %1968 = vmatpush1.bf16.msra.mxu0 %v3263_v50  ;;  %1052 = vmatprep.subr.bf16.mxu1 %v3268_v53  ;;  %v3332_v50 = vld [vmem:[#allocation3 + $0x90] ss:$8 sps:$4 sm:$0xff]   ;;  %v3340_v53 = vld [vmem:[#allocation3 + $0xa4] ss:$8 sps:$4 sm:$0xff]  }
  0xec   : > { %1969 = vmatprep.subr.bf16.mxu0 %v3271_v56  ;;  %v3343_v56 = vld [vmem:[#allocation3 + $0x6a4] ss:$8 sps:$4 sm:$0xff]  }
  0xee   : > { %1053 = vmatpush1.bf16.msra.mxu1 %v3266_v55  ;;  %v3349_v55 = vld [vmem:[#allocation3 + $0x6b4] ss:$8 sps:$4 sm:$0xff]  }
  0xef   : > { %1970 = vmatpush1.bf16.msra.mxu0 %v3269_v60  ;;  %1054 = vmatprep.subr.bf16.mxu1 %v3274_v61  ;;  %v3344_v60 = vld [vmem:[#allocation3 + $0xb0] ss:$8 sps:$4 sm:$0xff]  }
  0xf0   : > { %1971 = vmatprep.subr.bf16.mxu0 %v3277_v62  ;;  %v3347_v61 = vld [vmem:[#allocation3 + $0x6b0] ss:$8 sps:$4 sm:$0xff]   ;;  %v3352_v62 = vld [vmem:[#allocation3 + $0xc4] ss:$8 sps:$4 sm:$0xff]  }
  0xf2   : > { %1055 = vmatpush1.bf16.msra.mxu1 %v3272_v3  ;;  %v3361_v3 = vld [vmem:[#allocation3 + $0x6d4] ss:$8 sps:$4 sm:$0xff]  }
  0xf3   : > { %1972 = vmatpush1.bf16.msra.mxu0 %v3275_v4  ;;  %1387 = vmatprep.subr.bf16.mxu1 %v3280_v5  ;;  %v2519_v4 = vld [vmem:[#allocation8 + $0x8] sm:$0x1]  ;;  %v3356_v5 = vld [vmem:[#allocation3 + $0xd0] ss:$8 sps:$4 sm:$0xff]  }
  0xf4   : > { %2389 = vmatprep.subr.bf16.mxu0 %v3283_v6  ;;  %v3359_v6 = vld [vmem:[#allocation3 + $0x6d0] ss:$8 sps:$4 sm:$0xff]   ;;  %2527 = vperm.xlu0 %3085, %v2519_v4   ;;  %v3442_v4 = vld [vmem:[#allocation3 + $0x1b4] ss:$8 sps:$4 sm:$0xff]  }
  0xf5   : > { %1057 = vmatmul.mubr.bf16.vlgmr.msra.gmra.mrb[0].mxu1 %v649_v7  ;;  %v3364_v7 = vld [vmem:[#allocation3 + $0xe4] ss:$8 sps:$4 sm:$0xff]  }
  0xf6   : > { %1974 = vmatmul.mubr.bf16.vlgmr.msra.gmra.mrb[0].mxu0 %v1565_v8  ;;  %1388 = vmatpush1.bf16.msra.mxu1 %v3278_v9  ;;  %v3367_v8 = vld [vmem:[#allocation3 + $0x6e4] ss:$8 sps:$4 sm:$0xff]  }
  0xf7   : > { %2390 = vmatpush1.bf16.msra.mxu0 %v3281_v10  ;;  %1389 = vmatprep.subr.bf16.mxu1 %v3286_v11  ;;  %v2518_v9 = vld [vmem:[#allocation8] sm:$0xff] }
  0xf8   : > { %2391 = vmatprep.subr.bf16.mxu0 %v3289_v12  ;;  %1419 = vmatprep.mubr.bf16.mxu1 %v3832_v45  ;;  %v3307_v45 = vld [vmem:[#allocation3 + $0x644] ss:$8 sps:$4 sm:$0xff]   ;;  %v3362_v10 = vld [vmem:[#allocation3 + $0xe0] ss:$8 sps:$4 sm:$0xff]   ;;  %v3370_v12 = vld [vmem:[#allocation3 + $0xf4] ss:$8 sps:$4 sm:$0xff]  }
  0xf9   : > { %2421 = vmatprep.mubr.bf16.mxu0 %v2062_v23  ;;  %v3365_v11 = vld [vmem:[#allocation3 + $0x6e0] ss:$8 sps:$4 sm:$0xff]   ;;  %2522 = vperm.xlu0 %3085, %v2518_v9   ;;  %v3382_v23 = vld [vmem:[#allocation3 + $0x114] ss:$8 sps:$4 sm:$0xff]   ;;  %v3451_v9 = vld [vmem:[#allocation3 + $0x7c4] ss:$8 sps:$4 sm:$0xff]  }
  0xfa   : > { %1390 = vmatpush1.bf16.msra.mxu1 %v3284_v13  ;;  %v3373_v13 = vld [vmem:[#allocation3 + $0x6f4] ss:$8 sps:$4 sm:$0xff]  }
  0xfb   : > { %2392 = vmatpush1.bf16.msra.mxu0 %v3287_v14  ;;  %1391 = vmatprep.subr.bf16.mxu1 %v3292_v15  ;;  %v3368_v14 = vld [vmem:[#allocation3 + $0xf0] ss:$8 sps:$4 sm:$0xff]  }
  0xfc   : > { %2393 = vmatprep.subr.bf16.mxu0 %v3295_v16  ;;  %v3371_v15 = vld [vmem:[#allocation3 + $0x6f0] ss:$8 sps:$4 sm:$0xff]   ;;  %v1988_v16 = vld [vmem:[#allocation2] sm:$0x7c] }
  0xfe   : > { %1392 = vmatpush1.bf16.msra.mxu1 %v3290_v18  ;;  %v3379_v18 = vld [vmem:[#allocation3 + $0x704] ss:$8 sps:$4 sm:$0xff]  }
  0xff   : > { %2394 = vmatpush1.bf16.msra.mxu0 %v3293_v19  ;;  %1393 = vmatprep.subr.bf16.mxu1 %v3298_v20  ;;  %v2061_v19 = vrot.slane %v1988_v16, 2  ;;  %v1991_v20 = vld [vmem:[#allocation2 + $0x18] sm:$0x7c]  ;;  %v3460_v16 = vld [vmem:[#allocation3 + $0x1e4] ss:$8 sps:$4 sm:$0xff]  }
 0x100   : > { %2395 = vmatprep.subr.bf16.mxu0 %v3301_v22  ;;  %v3377_v22 = vld [vmem:[#allocation3 + $0x700] ss:$8 sps:$4 sm:$0xff]  }
 0x102   : > { %1394 = vmatpush1.bf16.msra.mxu1 %v3296_v24  ;;  %v3385_v24 = vld [vmem:[#allocation3 + $0x714] ss:$8 sps:$4 sm:$0xff]  }
 0x103   : > { %2396 = vmatpush1.bf16.msra.mxu0 %v3299_v25  ;;  %1395 = vmatprep.subr.bf16.mxu1 %v3304_v26  ;;  %v2064_v25 = vrot.slane %v1991_v20, 2  ;;  %v3470_v26 = vld [vmem:[#allocation2] sm:$0x1f]  ;;  %v3466_v20 = vld [vmem:[#allocation3 + $0x1f4] ss:$8 sps:$4 sm:$0xff]  }
 0x104   : > { %2397 = vmatprep.subr.bf16.mxu0 %v3307_v45  ;;  %v3380_v45 = vld [vmem:[#allocation3 + $0x110] ss:$8 sps:$4 sm:$0xff]  }
 0x106   : > { %1396 = vmatpush1.bf16.msra.mxu1 %v3302_v27  ;;  %v3383_v27 = vld [vmem:[#allocation3 + $0x710] ss:$8 sps:$4 sm:$0xff]  }
 0x107   : > { %2398 = vmatpush1.bf16.msra.mxu0 %v3305_v28  ;;  %1397 = vmatprep.subr.bf16.mxu1 %v3310_v29  ;;  %v3388_v28 = vld [vmem:[#allocation3 + $0x124] ss:$8 sps:$4 sm:$0xff]  }
 0x108   : > { %2399 = vmatprep.subr.bf16.mxu0 %v3313_v31  ;;  %v3391_v29 = vld [vmem:[#allocation3 + $0x724] ss:$8 sps:$4 sm:$0xff]   ;;  %v3386_v31 = vld [vmem:[#allocation3 + $0x120] ss:$8 sps:$4 sm:$0xff]  }
 0x10a   : > { %1398 = vmatpush1.bf16.msra.mxu1 %v3308_v32  ;;  %v3389_v32 = vld [vmem:[#allocation3 + $0x720] ss:$8 sps:$4 sm:$0xff]  }
 0x10b   : > { %2400 = vmatpush1.bf16.msra.mxu0 %v3311_v33  ;;  %1399 = vmatprep.subr.bf16.mxu1 %v3316_v34  ;;  %v3394_v33 = vld [vmem:[#allocation3 + $0x134] ss:$8 sps:$4 sm:$0xff]  }
 0x10c   : > { %2401 = vmatprep.subr.bf16.mxu0 %v3319_v35  ;;  %v3397_v34 = vld [vmem:[#allocation3 + $0x734] ss:$8 sps:$4 sm:$0xff]   ;;  %v3392_v35 = vld [vmem:[#allocation3 + $0x130] ss:$8 sps:$4 sm:$0xff]  }
 0x10e   : > { %1400 = vmatpush1.bf16.msra.mxu1 %v3314_v36  ;;  %v3395_v36 = vld [vmem:[#allocation3 + $0x730] ss:$8 sps:$4 sm:$0xff]  }
 0x10f   : > { %2402 = vmatpush1.bf16.msra.mxu0 %v3317_v40  ;;  %1401 = vmatprep.subr.bf16.mxu1 %v3322_v37  ;;  %v3400_v40 = vld [vmem:[#allocation3 + $0x144] ss:$8 sps:$4 sm:$0xff]  }
 0x110   : > { %2403 = vmatprep.subr.bf16.mxu0 %v3325_v38  ;;  %v3403_v37 = vld [vmem:[#allocation3 + $0x744] ss:$8 sps:$4 sm:$0xff]   ;;  %v3401_v38 = vld [vmem:[#allocation3 + $0x740] ss:$8 sps:$4 sm:$0xff]  }
 0x112   : > { %1402 = vmatpush1.bf16.msra.mxu1 %v3320_v39  ;;  %v3406_v39 = vld [vmem:[#allocation3 + $0x154] ss:$8 sps:$4 sm:$0xff]  }
 0x113   : > { %2404 = vmatpush1.bf16.msra.mxu0 %v3323_v41  ;;  %1403 = vmatprep.subr.bf16.mxu1 %v3328_v42  ;;  %v3409_v41 = vld [vmem:[#allocation3 + $0x754] ss:$8 sps:$4 sm:$0xff]   ;;  %v3404_v42 = vld [vmem:[#allocation3 + $0x150] ss:$8 sps:$4 sm:$0xff]  }
 0x114   : > { %2405 = vmatprep.subr.bf16.mxu0 %v3331_v43  ;;  %v3407_v43 = vld [vmem:[#allocation3 + $0x750] ss:$8 sps:$4 sm:$0xff]  }
 0x116   : > { %1404 = vmatpush1.bf16.msra.mxu1 %v3326_v44  ;;  %v3412_v44 = vld [vmem:[#allocation3 + $0x164] ss:$8 sps:$4 sm:$0xff]  }
 0x117   : > { %2406 = vmatpush1.bf16.msra.mxu0 %v3329_v46  ;;  %1405 = vmatprep.subr.bf16.mxu1 %v3334_v54  ;;  %v3415_v46 = vld [vmem:[#allocation3 + $0x764] ss:$8 sps:$4 sm:$0xff]   ;;  %v3410_v54 = vld [vmem:[#allocation3 + $0x160] ss:$8 sps:$4 sm:$0xff]  }
 0x118   : > { %2407 = vmatprep.subr.bf16.mxu0 %v3337_v48  ;;  %v3413_v48 = vld [vmem:[#allocation3 + $0x760] ss:$8 sps:$4 sm:$0xff]  }
 0x11a   : > { %1406 = vmatpush1.bf16.msra.mxu1 %v3332_v50  ;;  %v3418_v50 = vld [vmem:[#allocation3 + $0x174] ss:$8 sps:$4 sm:$0xff]  }
 0x11b   : > { %2408 = vmatpush1.bf16.msra.mxu0 %v3335_v52  ;;  %1407 = vmatprep.subr.bf16.mxu1 %v3340_v53  ;;  %v3421_v52 = vld [vmem:[#allocation3 + $0x774] ss:$8 sps:$4 sm:$0xff]   ;;  %v3416_v53 = vld [vmem:[#allocation3 + $0x170] ss:$8 sps:$4 sm:$0xff]  }
 0x11c   : > { %2409 = vmatprep.subr.bf16.mxu0 %v3343_v56  ;;  %v3419_v56 = vld [vmem:[#allocation3 + $0x770] ss:$8 sps:$4 sm:$0xff]  }
 0x11e   : > { %1408 = vmatpush1.bf16.msra.mxu1 %v3338_v57  ;;  %v3424_v57 = vld [vmem:[#allocation3 + $0x184] ss:$8 sps:$4 sm:$0xff]  }
 0x11f   : > { %2410 = vmatpush1.bf16.msra.mxu0 %v3341_v58  ;;  %1409 = vmatprep.subr.bf16.mxu1 %v3346_v59  ;;  %v3427_v58 = vld [vmem:[#allocation3 + $0x784] ss:$8 sps:$4 sm:$0xff]   ;;  %v3422_v59 = vld [vmem:[#allocation3 + $0x180] ss:$8 sps:$4 sm:$0xff]  }
 0x120   : > { %2411 = vmatprep.subr.bf16.mxu0 %v3349_v55  ;;  %v3425_v55 = vld [vmem:[#allocation3 + $0x780] ss:$8 sps:$4 sm:$0xff]  }
 0x122   : > { %1410 = vmatpush1.bf16.msra.mxu1 %v3344_v60  ;;  %v3430_v60 = vld [vmem:[#allocation3 + $0x194] ss:$8 sps:$4 sm:$0xff]  }
 0x123   : > { %2412 = vmatpush1.bf16.msra.mxu0 %v3347_v61  ;;  %1411 = vmatprep.subr.bf16.mxu1 %v3352_v62  ;;  %v3433_v61 = vld [vmem:[#allocation3 + $0x794] ss:$8 sps:$4 sm:$0xff]   ;;  %v3428_v62 = vld [vmem:[#allocation3 + $0x190] ss:$8 sps:$4 sm:$0xff]  }
 0x124   : > { %2413 = vmatprep.subr.bf16.mxu0 %v3355_v63  ;;  %v3431_v63 = vld [vmem:[#allocation3 + $0x790] ss:$8 sps:$4 sm:$0xff]  }
 0x126   : > { %1412 = vmatpush1.bf16.msra.mxu1 %v3350_v0  ;;  %v3436_v0 = vld [vmem:[#allocation3 + $0x1a4] ss:$8 sps:$4 sm:$0xff]  }
 0x127   : > { %2414 = vmatpush1.bf16.msra.mxu0 %v3353_v1  ;;  %1413 = vmatprep.subr.bf16.mxu1 %v3358_v2  ;;  %v3439_v1 = vld [vmem:[#allocation3 + $0x7a4] ss:$8 sps:$4 sm:$0xff]   ;;  %v3434_v2 = vld [vmem:[#allocation3 + $0x1a0] ss:$8 sps:$4 sm:$0xff]  }
 0x128   : > { %2415 = vmatprep.subr.bf16.mxu0 %v3361_v3  ;;  %v3437_v3 = vld [vmem:[#allocation3 + $0x7a0] ss:$8 sps:$4 sm:$0xff]  }
 0x12a   : > { %1414 = vmatpush1.bf16.msra.mxu1 %v3356_v5  ;;  %v3445_v5 = vld [vmem:[#allocation3 + $0x7b4] ss:$8 sps:$4 sm:$0xff]  }
 0x12b   : > { %2416 = vmatpush1.bf16.msra.mxu0 %v3359_v6  ;;  %1415 = vmatprep.subr.bf16.mxu1 %v3364_v7  ;;  %v3440_v6 = vld [vmem:[#allocation3 + $0x1b0] ss:$8 sps:$4 sm:$0xff]  }
 0x12c   : > { %2417 = vmatprep.subr.bf16.mxu0 %v3367_v8  ;;  %v3443_v7 = vld [vmem:[#allocation3 + $0x7b0] ss:$8 sps:$4 sm:$0xff]   ;;  %v3448_v8 = vld [vmem:[#allocation3 + $0x1c4] ss:$8 sps:$4 sm:$0xff]  }
 0x12e   : > { %1416 = vmatpush1.bf16.msra.mxu1 %v3362_v10  ;;  %v3446_v10 = vld [vmem:[#allocation3 + $0x1c0] ss:$8 sps:$4 sm:$0xff]  }
 0x12f   : > { %2418 = vmatpush1.bf16.msra.mxu0 %v3365_v11  ;;  %1417 = vmatprep.subr.bf16.mxu1 %v3370_v12  ;;  %v3449_v11 = vld [vmem:[#allocation3 + $0x7c0] ss:$8 sps:$4 sm:$0xff]   ;;  %v3454_v12 = vld [vmem:[#allocation3 + $0x1d4] ss:$8 sps:$4 sm:$0xff]  }
 0x130   : > { %2419 = vmatprep.subr.bf16.mxu0 %v3373_v13  ;;  %v3457_v13 = vld [vmem:[#allocation3 + $0x7d4] ss:$8 sps:$4 sm:$0xff]  }
 0x132   : > { %1418 = vmatpush1.bf16.msra.mxu1 %v3368_v14  ;;  %v3452_v14 = vld [vmem:[#allocation3 + $0x1d0] ss:$8 sps:$4 sm:$0xff]  }
 0x133   : > { %2420 = vmatpush1.bf16.msra.mxu0 %v3371_v15  ;;  %1430 = vmatprep.subr.bf16.mxu1 %v3376_v17  ;;  %v3455_v15 = vld [vmem:[#allocation3 + $0x7d0] ss:$8 sps:$4 sm:$0xff]   ;;  %v3463_v17 = vld [vmem:[#allocation3 + $0x7e4] ss:$8 sps:$4 sm:$0xff]  }
 0x134   : > { %2432 = vmatprep.subr.bf16.mxu0 %v3379_v18  ;;  %v3458_v18 = vld [vmem:[#allocation3 + $0x1e0] ss:$8 sps:$4 sm:$0xff]  }
 0x135   : > { %1420 = vmatmul.mubr.bf16.vlgmr.msra.gmra.mrb[0].mxu1 %v3470_v26  ;;  %v2479_v26 = vld [vmem:[#allocation5] sm:$0x3] }
 0x136   : > { %2422 = vmatmul.mubr.bf16.vlgmr.msra.gmra.mrb[0].mxu0 %v2061_v19  ;;  %1431 = vmatpush1.bf16.msra.mxu1 %v3374_v21  ;;  %v3461_v19 = vld [vmem:[#allocation3 + $0x7e0] ss:$8 sps:$4 sm:$0xff]   ;;  %v3469_v21 = vld [vmem:[#allocation3 + $0x7f4] ss:$8 sps:$4 sm:$0xff]  }
 0x137   : > { %2433 = vmatpush1.bf16.msra.mxu0 %v3377_v22  ;;  %1432 = vmatprep.subr.bf16.mxu1 %v3382_v23  ;;  %v3464_v22 = vld [vmem:[#allocation3 + $0x1f0] ss:$8 sps:$4 sm:$0xff]  }
 0x138   : > { %2434 = vmatprep.subr.bf16.mxu0 %v3385_v24  ;;  %1462 = vmatprep.mubr.bf16.mxu1 %v3844_v30  ;;  %v3398_v30 = vld [vmem:[#allocation3 + $0x140] ss:$8 sps:$4 sm:$0xff]   ;;  %v3467_v23 = vld [vmem:[#allocation3 + $0x7f0] ss:$8 sps:$4 sm:$0xff]  }
 0x139   : > { %2464 = vmatprep.mubr.bf16.mxu0 %v2064_v25  ;;  %v1990_v24 = vld [vmem:[#allocation2 + $0x10] sm:$0x7c] }
 0x13a   : > { %1433 = vmatpush1.bf16.msra.mxu1 %v3380_v45  ;;  %v2063_v25 = vrot.slane %v1990_v24, 2 }
 0x13b   : > { %2435 = vmatpush1.bf16.msra.mxu0 %v3383_v27  ;;  %1434 = vmatprep.subr.bf16.mxu1 %v3388_v28  ;;  %v2484_v27 = vrot.slane %v2479_v26, %v3808_v49 }
 0x13c   : > { %2436 = vmatprep.subr.bf16.mxu0 %v3391_v29 }
 0x13e   : > { %1435 = vmatpush1.bf16.msra.mxu1 %v3386_v31  ;;  %v2488_v31 = vrot.slane %v2479_v26, %v3805_v47 }
 0x13f   : > { %2437 = vmatpush1.bf16.msra.mxu0 %v3389_v32  ;;  %1436 = vmatprep.subr.bf16.mxu1 %v3394_v33 }
 0x140   : > { %2438 = vmatprep.subr.bf16.mxu0 %v3397_v34 }
 0x142   : > { %1437 = vmatpush1.bf16.msra.mxu1 %v3392_v35 }
 0x143   : > { %2439 = vmatpush1.bf16.msra.mxu0 %v3395_v36  ;;  %1438 = vmatprep.subr.bf16.mxu1 %v3400_v40 }
 0x144   : > { %2440 = vmatprep.subr.bf16.mxu0 %v3403_v37 }
 0x146   : > { %1439 = vmatpush1.bf16.msra.mxu1 %v3398_v30 }
 0x147   : > { %2441 = vmatpush1.bf16.msra.mxu0 %v3401_v38  ;;  %1440 = vmatprep.subr.bf16.mxu1 %v3406_v39 }
 0x148   : > { %2442 = vmatprep.subr.bf16.mxu0 %v3409_v41 }
 0x14a   : > { %1441 = vmatpush1.bf16.msra.mxu1 %v3404_v42 }
 0x14b   : > { %2443 = vmatpush1.bf16.msra.mxu0 %v3407_v43  ;;  %1442 = vmatprep.subr.bf16.mxu1 %v3412_v44 }
 0x14c   : > { %2444 = vmatprep.subr.bf16.mxu0 %v3415_v46 }
 0x14e   : > { %1443 = vmatpush1.bf16.msra.mxu1 %v3410_v54 }
 0x14f   : > { %2445 = vmatpush1.bf16.msra.mxu0 %v3413_v48  ;;  %1444 = vmatprep.subr.bf16.mxu1 %v3418_v50 }
 0x150   : > { %2446 = vmatprep.subr.bf16.mxu0 %v3421_v52  ;;  %v2515_v52 = vld [vmem:[%s370_s24 + $0x8] sm:$0x11] }
 0x152   : > { %1445 = vmatpush1.bf16.msra.mxu1 %v3416_v53 }
 0x153   : > { %2447 = vmatpush1.bf16.msra.mxu0 %v3419_v56  ;;  %1446 = vmatprep.subr.bf16.mxu1 %v3424_v57 }
 0x154   : > { %2448 = vmatprep.subr.bf16.mxu0 %v3427_v58 }
 0x156   : > { %1447 = vmatpush1.bf16.msra.mxu1 %v3422_v59 }
 0x157   : > { %2449 = vmatpush1.bf16.msra.mxu0 %v3425_v55  ;;  %1448 = vmatprep.subr.bf16.mxu1 %v3430_v60 }
 0x158   : > { %2450 = vmatprep.subr.bf16.mxu0 %v3433_v61 }
 0x15a   : > { %1449 = vmatpush1.bf16.msra.mxu1 %v3428_v62 }
 0x15b   : > { %2451 = vmatpush1.bf16.msra.mxu0 %v3431_v63  ;;  %1450 = vmatprep.subr.bf16.mxu1 %v3436_v0 }
 0x15c   : > { %2452 = vmatprep.subr.bf16.mxu0 %v3439_v1 }
 0x15e   : > { %1451 = vmatpush1.bf16.msra.mxu1 %v3434_v2 }
 0x15f   : > { %2453 = vmatpush1.bf16.msra.mxu0 %v3437_v3  ;;  %1452 = vmatprep.subr.bf16.mxu1 %v3442_v4 }
 0x160   : > { %2454 = vmatprep.subr.bf16.mxu0 %v3445_v5 }
 0x162   : > { %1453 = vmatpush1.bf16.msra.mxu1 %v3440_v6 }
 0x163   : > { %2455 = vmatpush1.bf16.msra.mxu0 %v3443_v7  ;;  %1454 = vmatprep.subr.bf16.mxu1 %v3448_v8 }
 0x164   : > { %2456 = vmatprep.subr.bf16.mxu0 %v3451_v9 }
 0x166   : > { %1455 = vmatpush1.bf16.msra.mxu1 %v3446_v10 }
 0x167   : > { %2457 = vmatpush1.bf16.msra.mxu0 %v3449_v11  ;;  %1456 = vmatprep.subr.bf16.mxu1 %v3454_v12 }
 0x168   : > { %2458 = vmatprep.subr.bf16.mxu0 %v3457_v13 }
 0x16a   : > { %1457 = vmatpush1.bf16.msra.mxu1 %v3452_v14 }
 0x16b   : > { %2459 = vmatpush1.bf16.msra.mxu0 %v3455_v15  ;;  %1458 = vmatprep.subr.bf16.mxu1 %v3460_v16 }
 0x16c   : > { %2460 = vmatprep.subr.bf16.mxu0 %v3463_v17 }
 0x16e   : > { %1459 = vmatpush1.bf16.msra.mxu1 %v3458_v18 }
 0x16f   : > { %2461 = vmatpush1.bf16.msra.mxu0 %v3461_v19  ;;  %1460 = vmatprep.subr.bf16.mxu1 %v3466_v20 }
 0x170   : > { %2462 = vmatprep.subr.bf16.mxu0 %v3469_v21 }
 0x172   : > { %1461 = vmatpush1.bf16.msra.mxu1 %v3464_v22 }
 0x173   : > { %2463 = vmatpush1.bf16.msra.mxu0 %v3467_v23  ;;  %v2528_v45 = vpop.permute.xlu0 %2527 }
 0x175   : > { %1463 = vmatmul.mubr.bf16.vlgmr.msra.gmra.mrb[0].mxu1 %v3848_v51 }
 0x176   : > { %2465 = vmatmul.mubr.bf16.vlgmr.msra.gmra.mrb[0].mxu0 %v2063_v25 }
 0x178   : > { %v2523_v43 = vpop.permute.xlu0 %2522 }
 0x248   : > { %v1464_v28 = vpop.f32.mrb[0].mxu1 }
 0x249   : > { %v2466_v29 = vpop.f32.mrb[0].mxu0  ;;  %v1466_v33 = vpop.f32.mrb[1].mxu1 }
 0x24a   : > { %v3003_v32 = vadd.f32 %v2466_v29, %v1464_v28  ;;  %v2468_v34 = vpop.f32.mrb[1].mxu0  ;;  %v1468_v36 = vpop.f32.mrb[2].mxu1 }
 0x24b   : > { %v3004_v35 = vadd.f32 %v2468_v34, %v1466_v33  ;;  %v2470_v51 = vpop.f32.mrb[2].mxu0  ;;  %v1470_v30 = vpop.f32.mrb[3].mxu1 }
 0x24c   : > { %v2491_v40 = vadd.f32 %v3003_v32, %v2484_v27  ;;  %v3005_v37 = vadd.f32 %v2470_v51, %v1468_v36  ;;  %v2472_v38 = vpop.f32.mrb[3].mxu0 }
 0x24d   : > { %v2492_v47 = vadd.f32 %v3004_v35, %v2488_v31  ;;  %v3006_v39 = vadd.f32 %v2472_v38, %v1470_v30 }
 0x24e   : > { %v2493_v42 = vadd.f32 %v3005_v37, %v2484_v27  ;;  %v2551_v44 = vmul.f32 %v2491_v40, %v2491_v40  ;;  %v2530_v59 = vmul.f32 %v2523_v43, %v2491_v40 }
 0x24f   : > { %v3001_v46 = vpack.c.bf16 %v2492_v47, %v2491_v40  ;;  %v2494_v54 = vadd.f32 %v3006_v39, %v2488_v31  ;;  %v2552_v53 = vmul.f32 %v2492_v47, %v2492_v47  ;;  %v2531_v55 = vmul.f32 %v2523_v43, %v2492_v47 }
 0x250   : > { %v2532_v48 = vmul.f32 %v2528_v45, %v2493_v42  ;;  %v2553_v50 = vmul.f32 %v2493_v42, %v2493_v42  ;;  %v2555_v61 = vmul.f32 %v2551_v44, %v2523_v43 }
 0x251   : > { %2507 = vst [vmem:[%s370_s24] sm:$0xff] %v3001_v46  ;;  %v3002_v56 = vpack.c.bf16 %v2494_v54, %v2493_v42  ;;  %v2533_v57 = vmul.f32 %v2528_v45, %v2494_v54  ;;  %v2554_v58 = vmul.f32 %v2494_v54, %v2494_v54  ;;  %v2556_v4 = vmul.f32 %v2552_v53, %v2523_v43 }
 0x252   : > { %v2535_v60 = vsel %vm2508_vm8, %v2532_v48, 0.0  ;;  %v2557_v62 = vmul.f32 %v2553_v50, %v2528_v45 }
 0x253   : > { %v2516_v63 = vsel %vm2514_vm14, %v3002_v56, %v2515_v52  ;;  %v2536_v0 = vadd.f32 %v2535_v60, %v2530_v59  ;;  %v2543_v1 = vsel %vm2508_vm8, %v2533_v57, 0.0  ;;  %v2558_v2 = vmul.f32 %v2554_v58, %v2528_v45 }
 0x254   : > { %2517 = vst [vmem:[%s370_s24 + $0x8] sm:$0x11] %v2516_v63  ;;  %v2544_v3 = vadd.f32 %v2543_v1, %v2531_v55  ;;  %v2559_v5 = vsel %vm2508_vm8, %v2557_v62, 0.0 }
 0x255   : > { %v2537_v6 = vrot.slane %v2536_v0, 4  ;;  %v2560_v7 = vadd.f32 %v2559_v5, %v2555_v61  ;;  %v2567_v8 = vsel %vm2508_vm8, %v2558_v2, 0.0 }
 0x256   : > { %v2545_v9 = vrot.slane %v2544_v3, 4  ;;  %v2568_v10 = vadd.f32 %v2567_v8, %v2556_v4 }
 0x257   : > { %v2538_v11 = vadd.f32 %v2537_v6, %v2536_v0  ;;  %v2561_v12 = vrot.slane %v2560_v7, 4 }
 0x258   : > { %v2546_v13 = vadd.f32 %v2545_v9, %v2544_v3  ;;  %v2569_v14 = vrot.slane %v2568_v10, 4 }
 0x259   : > { %v2539_v15 = vrot.slane %v2538_v11, 2  ;;  %v2562_v16 = vadd.f32 %v2561_v12, %v2560_v7 }
 0x25a   : > { %v2547_v17 = vrot.slane %v2546_v13, 2  ;;  %v2570_v18 = vadd.f32 %v2569_v14, %v2568_v10 }
 0x25b   : > { %v2540_v19 = vadd.f32 %v2539_v15, %v2538_v11  ;;  %v2563_v20 = vrot.slane %v2562_v16, 2 }
 0x25c   : > { %v2548_v21 = vadd.f32 %v2547_v17, %v2546_v13  ;;  %v2571_v22 = vrot.slane %v2570_v18, 2 }
 0x25d   : > { %v2541_v23 = vrot.slane %v2540_v19, 1  ;;  %v2564_v24 = vadd.f32 %v2563_v20, %v2562_v16 }
 0x25e   : > { %v2549_v25 = vrot.slane %v2548_v21, 1  ;;  %v2572_v26 = vadd.f32 %v2571_v22, %v2570_v18 }
 0x25f   : > { %v2565_v45 = vrot.slane %v2564_v24, 1  ;;  %v2542_v28 = vadd.f32 %v2541_v23, %v2540_v19 }
 0x260   : > { %v2573_v27 = vrot.slane %v2572_v26, 1  ;;  %v2550_v31 = vadd.f32 %v2549_v25, %v2548_v21 }
 0x261   : > { %v2566_v29 = vadd.f32 %v2565_v45, %v2564_v24 }
 0x262   : > { %v2574_v32 = vadd.f32 %v2573_v27, %v2572_v26 }
 0x263   : > { %v2575_v33 = vsel %vm2508_vm8, %v2542_v28, %v2566_v29 }
 0x264   : > { %v2576_v34 = vsel %vm2508_vm8, %v2550_v31, %v2574_v32 }
 0x265   : > { %v2579_v35 = vcombine.low %v2575_v33, %v2576_v34 }
 0x267   : > { %2995 = vst.sshfl [vmem:[%s375_s10] sm:$0x33 pattern:$0x76325410] %v2579_v35 }
 0x268 PF: > { %s22_s27 = sadd.s32 1, %s3601_s27  }
 0x269   : > { %p19_p11 = scmp.ge.s32.totalorder %s22_s27, 4  }
 0x26b   :  { %21 = sbr.rel (!%p19_p11) target bundleno = 3 (0x3), region = 110 }
 0x272   :  { %2626 = vsyncpa [#allocation4], 1 }
 0x273   :  { %2628 = vsyncpa [#allocation4 + $0x1], 1 }
 0x274   :  { %2629 = vsyncpa [#allocation6], 1 }
 0x275   :  { %2630 = vsyncpa [#allocation9], 1 }

// kernel: discriminator_forward.8
= control target key start
LH: loop header
LB: loop body
LE: loop exit
PB: predicated region body
PF: predicated region fallthrough
CT: control target
= control target key end

     0   :  { %s11958_s27 = smov 0   ;;  %s15479_s0 = inlined_call_operand.vmem [shape: bf16[2,8,1024], index: 0, kind: input, shape index: {}]   ;;  %s15480_s1 = inlined_call_operand.vmem [shape: bf16[4,1024,512], index: 1, kind: input, shape index: {}]   ;;  %s15481_s2 = inlined_call_operand.vmem [shape: f32[1,512], index: 2, kind: input, shape index: {}]   ;;  %s15482_s3 = inlined_call_operand.vmem [shape: f32[1,1024], index: 3, kind: input, shape index: {}]   ;;  %s15483_s4 = inlined_call_operand.vmem [shape: f32[1,1024], index: 4, kind: input, shape index: {}]   ;;  %s15484_s5 = inlined_call_operand.vmem [shape: f32[8,1024], index: 5, kind: input, shape index: {}]   ;;  %s15485_s6 = inlined_call_operand.vmem [shape: f32[4,1], index: 6, kind: input, shape index: {}]   ;;  %s15486_s7 = inlined_call_operand.vmem [shape: bf16[2,4,512], index: 7, kind: output, shape index: {0}]   ;;  %s15487_s8 = inlined_call_operand.vmem [shape: f32[2,2,512], index: 8, kind: output, shape index: {1}]  }
   0x1 LB: > { %s8474_s28 = sadd.s32 4294967295, %s11909_s27   ;;  %p8478_p0 = scmp.ge.s32.totalorder %s11909_s27, 1  ;;  %s11909_s27 = sphi %s11958_s27, %s19_s27  }
   0x2   : > { %p265_p1 = scmp.lt.s32.totalorder %s11909_s27, 3 }
   0x4   : > { %p266_p2 = pnand %p8478_p0, %p265_p1 }
   0x5   : > { %v10335_v0 = vld [vmem:[%s15480_s1 + $0x804] ss:$16 sps:$4 sm:$0xff] (!%p266_p2)   ;;  %v10339_v2 = vld [vmem:[%s15480_s1 + $0x800] ss:$16 sps:$4 sm:$0xff] (!%p266_p2)   ;;  %p304_p3 = scmp.lt.s32.totalorder (!%p266_p2), %s8474_s28, 1  ;;  %v333_v36 = vlaneseq (!%p266_p2)  ;;  %vm8293_vm8 = vcmask (!%p266_p2), 1043456  }
   0x6   : > { %269 = sbr.rel (%p266_p2) target bundleno = 1276 (0x4fc), region = 48  ;;  %v10337_v1 = vld [vmem:[%s15480_s1 + $0xa04] ss:$16 sps:$4 sm:$0xff] (!%p266_p2)   ;;  %2392 = vmatprep.subr.bf16.mxu0 (!%p266_p2), %v10335_v0  ;;  %v10340_v3 = vld [vmem:[%s15480_s1 + $0xa00] ss:$16 sps:$4 sm:$0xff] (!%p266_p2)   ;;  %vm8358_vm9 = vcmask (!%p266_p2), 1040384  }
   0x7   : > { %2433 = vmatprep.subr.bf16.mxu1 (!%p266_p2), %v10337_v1  ;;  %v10341_v4 = vld [vmem:[%s15480_s1 + $0x824] ss:$16 sps:$4 sm:$0xff] (!%p266_p2)   ;;  %2393 = vmatpush1.bf16.msra.mxu0 (!%p266_p2), %v10339_v2  ;;  %v10345_v6 = vld [vmem:[%s15480_s1 + $0x820] ss:$16 sps:$4 sm:$0xff] (!%p266_p2)   ;;  %v12089_v40 = vshrl.u32 (!%p266_p2), %v333_v36, 7 }
   0x8   : > { %2434 = vmatpush1.bf16.msra.mxu1 (!%p266_p2), %v10340_v3  ;;  %v10343_v5 = vld [vmem:[%s15480_s1 + $0xa24] ss:$16 sps:$4 sm:$0xff] (!%p266_p2)   ;;  %2394 = vmatprep.subr.bf16.mxu0 (!%p266_p2), %v10341_v4  ;;  %v10346_v7 = vld [vmem:[%s15480_s1 + $0xa20] ss:$16 sps:$4 sm:$0xff] (!%p266_p2)  }
   0x9   : > { %2435 = vmatprep.subr.bf16.mxu1 (!%p266_p2), %v10343_v5  ;;  %v10347_v8 = vld [vmem:[%s15480_s1 + $0x844] ss:$16 sps:$4 sm:$0xff] (!%p266_p2)   ;;  %v10351_v10 = vld [vmem:[%s15480_s1 + $0x840] ss:$16 sps:$4 sm:$0xff] (!%p266_p2)   ;;  %v12116_v47 = vsub.s32 (!%p266_p2), 0, %v12089_v40  ;;  %v12119_v48 = vsub.s32 (!%p266_p2), 1, %v12089_v40 }
   0xa   : > { %v10349_v9 = vld [vmem:[%s15480_s1 + $0xa44] ss:$16 sps:$4 sm:$0xff] (!%p266_p2)   ;;  %v10352_v11 = vld [vmem:[%s15480_s1 + $0xa40] ss:$16 sps:$4 sm:$0xff] (!%p266_p2)   ;;  %v12125_v50 = vsub.s32 (!%p266_p2), 2, %v12089_v40  ;;  %v12129_v52 = vsub.s32 (!%p266_p2), 3, %v12089_v40 }
   0xb   : > { %2395 = vmatpush1.bf16.msra.mxu0 (!%p266_p2), %v10345_v6  ;;  %v10353_v12 = vld [vmem:[%s15480_s1 + $0x864] ss:$16 sps:$4 sm:$0xff] (!%p266_p2)   ;;  %v10357_v14 = vld [vmem:[%s15480_s1 + $0x860] ss:$16 sps:$4 sm:$0xff] (!%p266_p2)  }
   0xc   : > { %2436 = vmatpush1.bf16.msra.mxu1 (!%p266_p2), %v10346_v7  ;;  %2396 = vmatprep.subr.bf16.mxu0 (!%p266_p2), %v10347_v8  ;;  %v10355_v13 = vld [vmem:[%s15480_s1 + $0xa64] ss:$16 sps:$4 sm:$0xff] (!%p266_p2)   ;;  %v10358_v15 = vld [vmem:[%s15480_s1 + $0xa60] ss:$16 sps:$4 sm:$0xff] (!%p266_p2)  }
   0xd   : > { %2437 = vmatprep.subr.bf16.mxu1 %v10349_v9  ;;  %v10359_v16 = vld [vmem:[%s15480_s1 + $0x884] ss:$16 sps:$4 sm:$0xff]   ;;  %v10363_v18 = vld [vmem:[%s15480_s1 + $0x880] ss:$16 sps:$4 sm:$0xff]   ;;  %s15489_s28 = smov (!%p304_p3, %s8474_s28), 1 }
   0xe   : > { %v10361_v17 = vld [vmem:[%s15480_s1 + $0xa84] ss:$16 sps:$4 sm:$0xff]   ;;  %v10364_v19 = vld [vmem:[%s15480_s1 + $0xa80] ss:$16 sps:$4 sm:$0xff]   ;;  %s10317_s9 = sshll.u32 %s15489_s28, 5  ;;  %s10318_s30 = sshll.u32 %s15489_s28, 3 }
   0xf   : > { %2397 = vmatpush1.bf16.msra.mxu0 %v10351_v10  ;;  %v10365_v20 = vld [vmem:[%s15480_s1 + $0x8a4] ss:$16 sps:$4 sm:$0xff]   ;;  %v10369_v22 = vld [vmem:[%s15480_s1 + $0x8a0] ss:$16 sps:$4 sm:$0xff]   ;;  %s12110_s18 = scalar_lea.vmem %s15479_s0, %s10317_s9  ;;  %s313_s10 = scalar_lea.vmem %s15486_s7, %s10318_s30 }
  0x10   : > { %2438 = vmatpush1.bf16.msra.mxu1 %v10352_v11  ;;  %2398 = vmatprep.subr.bf16.mxu0 %v10353_v12  ;;  %v10367_v21 = vld [vmem:[%s15480_s1 + $0xaa4] ss:$16 sps:$4 sm:$0xff]   ;;  %v10370_v23 = vld [vmem:[%s15480_s1 + $0xaa0] ss:$16 sps:$4 sm:$0xff]   ;;  %v320_v63 = vld [vmem:[%s12110_s18 + $0x8] sm:$0xff]  ;;  %s318_s13 = scalar_lea.vmem %s15487_s8, %s10318_s30 }
  0x11   : > { %2439 = vmatprep.subr.bf16.mxu1 %v10355_v13  ;;  %v10371_v24 = vld [vmem:[%s15480_s1 + $0x8c4] ss:$16 sps:$4 sm:$0xff]   ;;  %v10375_v26 = vld [vmem:[%s15480_s1 + $0x8c0] ss:$16 sps:$4 sm:$0xff]   ;;  %v325_v2 = vunpack.c.l.bf16 %v320_v63  ;;  %v326_v3 = vunpack.c.h.bf16 %v320_v63 }
  0x12   : > { %v10373_v25 = vld [vmem:[%s15480_s1 + $0xac4] ss:$16 sps:$4 sm:$0xff]   ;;  %v10376_v27 = vld [vmem:[%s15480_s1 + $0xac0] ss:$16 sps:$4 sm:$0xff]  }
  0x13   : > { %2399 = vmatpush1.bf16.msra.mxu0 %v10357_v14  ;;  %v10377_v28 = vld [vmem:[%s15480_s1 + $0x8e4] ss:$16 sps:$4 sm:$0xff]   ;;  %v10381_v30 = vld [vmem:[%s15480_s1 + $0x8e0] ss:$16 sps:$4 sm:$0xff]  }
  0x14   : > { %2440 = vmatpush1.bf16.msra.mxu1 %v10358_v15  ;;  %2400 = vmatprep.subr.bf16.mxu0 %v10359_v16  ;;  %v10379_v29 = vld [vmem:[%s15480_s1 + $0xae4] ss:$16 sps:$4 sm:$0xff]   ;;  %v10382_v31 = vld [vmem:[%s15480_s1 + $0xae0] ss:$16 sps:$4 sm:$0xff]  }
  0x15   : > { %2441 = vmatprep.subr.bf16.mxu1 %v10361_v17  ;;  %v10383_v32 = vld [vmem:[%s15480_s1 + $0x904] ss:$16 sps:$4 sm:$0xff]   ;;  %v10387_v34 = vld [vmem:[%s15480_s1 + $0x900] ss:$16 sps:$4 sm:$0xff]  }
  0x16   : > { %v10385_v33 = vld [vmem:[%s15480_s1 + $0xb04] ss:$16 sps:$4 sm:$0xff]   ;;  %v10388_v35 = vld [vmem:[%s15480_s1 + $0xb00] ss:$16 sps:$4 sm:$0xff]  }
  0x17   : > { %2401 = vmatpush1.bf16.msra.mxu0 %v10363_v18  ;;  %v10389_v37 = vld [vmem:[%s15480_s1 + $0x924] ss:$16 sps:$4 sm:$0xff]   ;;  %v10393_v39 = vld [vmem:[%s15480_s1 + $0x920] ss:$16 sps:$4 sm:$0xff]  }
  0x18   : > { %2442 = vmatpush1.bf16.msra.mxu1 %v10364_v19  ;;  %2402 = vmatprep.subr.bf16.mxu0 %v10365_v20  ;;  %v10391_v38 = vld [vmem:[%s15480_s1 + $0xb24] ss:$16 sps:$4 sm:$0xff]   ;;  %v10394_v41 = vld [vmem:[%s15480_s1 + $0xb20] ss:$16 sps:$4 sm:$0xff]   ;;  %v456_v19 = vld [vmem:[%s15484_s5 + $0x8] sm:$0xff] }
  0x19   : > { %2443 = vmatprep.subr.bf16.mxu1 %v10367_v21  ;;  %v10395_v42 = vld [vmem:[%s15480_s1 + $0x944] ss:$16 sps:$4 sm:$0xff]   ;;  %v10399_v44 = vld [vmem:[%s15480_s1 + $0x940] ss:$16 sps:$4 sm:$0xff]  }
  0x1a   : > { %v10397_v43 = vld [vmem:[%s15480_s1 + $0xb44] ss:$16 sps:$4 sm:$0xff]   ;;  %v10400_v45 = vld [vmem:[%s15480_s1 + $0xb40] ss:$16 sps:$4 sm:$0xff]  }
  0x1b   : > { %2403 = vmatpush1.bf16.msra.mxu0 %v10369_v22  ;;  %v10401_v46 = vld [vmem:[%s15480_s1 + $0x964] ss:$16 sps:$4 sm:$0xff]   ;;  %v10405_v53 = vld [vmem:[%s15480_s1 + $0x960] ss:$16 sps:$4 sm:$0xff]  }
  0x1c   : > { %2444 = vmatpush1.bf16.msra.mxu1 %v10370_v23  ;;  %2404 = vmatprep.subr.bf16.mxu0 %v10371_v24  ;;  %v10403_v49 = vld [vmem:[%s15480_s1 + $0xb64] ss:$16 sps:$4 sm:$0xff]   ;;  %v10406_v58 = vld [vmem:[%s15480_s1 + $0xb60] ss:$16 sps:$4 sm:$0xff]  }
  0x1d   : > { %2445 = vmatprep.subr.bf16.mxu1 %v10373_v25  ;;  %v319_v51 = vld [vmem:[%s12110_s18] sm:$0xff] }
  0x1e   : > { %v323_v54 = vunpack.c.l.bf16 %v319_v51  ;;  %v324_v55 = vunpack.c.h.bf16 %v319_v51  ;;  %v12137_v56 = vld [vmem:[%s15482_s3] sm:$0xff] }
  0x1f   : > { %2405 = vmatpush1.bf16.msra.mxu0 %v10375_v26  ;;  %v12142_v57 = vld [vmem:[%s15483_s4] sm:$0xff]  ;;  %v336_v60 = vrot.slane %v12137_v56, %v12116_v47  ;;  %v340_v61 = vrot.slane %v12137_v56, %v12119_v48  ;;  %v344_v4 = vrot.slane %v12137_v56, %v12125_v50  ;;  %v348_v9 = vrot.slane %v12137_v56, %v12129_v52 }
  0x20   : > { %2446 = vmatpush1.bf16.msra.mxu1 %v10376_v27  ;;  %2406 = vmatprep.subr.bf16.mxu0 %v10377_v28  ;;  %v10407_v59 = vld [vmem:[%s15480_s1 + $0x984] ss:$16 sps:$4 sm:$0xff]   ;;  %v386_v62 = vrot.slane %v12142_v57, %v12116_v47  ;;  %v390_v1 = vrot.slane %v12142_v57, %v12119_v48  ;;  %v10411_v5 = vld [vmem:[%s15480_s1 + $0x980] ss:$16 sps:$4 sm:$0xff]   ;;  %v394_v10 = vrot.slane %v12142_v57, %v12125_v50 }
  0x21   : > { %2447 = vmatprep.subr.bf16.mxu1 %v10379_v29  ;;  %v10409_v0 = vld [vmem:[%s15480_s1 + $0xb84] ss:$16 sps:$4 sm:$0xff]   ;;  %v10412_v6 = vld [vmem:[%s15480_s1 + $0xb80] ss:$16 sps:$4 sm:$0xff]   ;;  %v373_v7 = vmul.f32 %v336_v60, %v323_v54  ;;  %v374_v8 = vmul.f32 %v340_v61, %v324_v55  ;;  %v375_v13 = vmul.f32 %v344_v4, %v325_v2  ;;  %v398_v14 = vrot.slane %v12142_v57, %v12129_v52 }
  0x22   : > { %v10413_v11 = vld [vmem:[%s15480_s1 + $0x9a4] ss:$16 sps:$4 sm:$0xff]   ;;  %v376_v18 = vmul.f32 %v348_v9, %v326_v3  ;;  %v10417_v21 = vld [vmem:[%s15480_s1 + $0x9a0] ss:$16 sps:$4 sm:$0xff]  }
  0x23   : > { %2407 = vmatpush1.bf16.msra.mxu0 %v10381_v30  ;;  %v10415_v12 = vld [vmem:[%s15480_s1 + $0xba4] ss:$16 sps:$4 sm:$0xff]   ;;  %v423_v15 = vadd.f32 %v386_v62, %v373_v7  ;;  %v424_v16 = vadd.f32 %v390_v1, %v374_v8  ;;  %v425_v20 = vadd.f32 %v394_v10, %v375_v13  ;;  %v10418_v22 = vld [vmem:[%s15480_s1 + $0xba0] ss:$16 sps:$4 sm:$0xff]  }
  0x24   : > { %2448 = vmatpush1.bf16.msra.mxu1 %v10382_v31  ;;  %2408 = vmatprep.subr.bf16.mxu0 %v10383_v32  ;;  %v455_v17 = vld [vmem:[%s15484_s5] sm:$0xff]  ;;  %v426_v26 = vadd.f32 %v398_v14, %v376_v18  ;;  %v457_v31 = vld [vmem:[%s15484_s5 + $0x10] sm:$0xff] }
  0x25   : > { %2449 = vmatprep.subr.bf16.mxu1 %v10385_v33  ;;  %vm431_vm0 = vcmp.ge.f32.partialorder %v423_v15, 0.0  ;;  %vm432_vm1 = vcmp.ge.f32.partialorder %v424_v16, 0.0  ;;  %v439_v23 = vmul.f32 0.2, %v423_v15  ;;  %v440_v24 = vmul.f32 0.2, %v424_v16 }
  0x26   : > { %v10419_v25 = vld [vmem:[%s15480_s1 + $0x9c4] ss:$16 sps:$4 sm:$0xff]   ;;  %vm433_vm2 = vcmp.ge.f32.partialorder %v425_v20, 0.0  ;;  %v441_v27 = vmul.f32 0.2, %v425_v20  ;;  %vm434_vm3 = vcmp.ge.f32.partialorder %v426_v26, 0.0 }
  0x27   : > { %2409 = vmatpush1.bf16.msra.mxu0 %v10387_v34  ;;  %v10421_v28 = vld [vmem:[%s15480_s1 + $0xbc4] ss:$16 sps:$4 sm:$0xff]   ;;  %v447_v29 = vsel %vm431_vm0, %v423_v15, %v439_v23  ;;  %v448_v30 = vsel %vm432_vm1, %v424_v16, %v440_v24  ;;  %v442_v34 = vmul.f32 0.2, %v426_v26  ;;  %v10430_v51 = vld [vmem:[%s15480_s1 + $0xbe0] ss:$16 sps:$4 sm:$0xff]  }
  0x28   : > { %2450 = vmatpush1.bf16.msra.mxu1 %v10388_v35  ;;  %2410 = vmatprep.subr.bf16.mxu0 %v10389_v37  ;;  %v463_v32 = vmul.f32 %v455_v17, %v447_v29  ;;  %v464_v33 = vmul.f32 %v456_v19, %v448_v30  ;;  %v458_v35 = vld [vmem:[%s15484_s5 + $0x18] sm:$0xff]  ;;  %v449_v36 = vsel %vm433_vm2, %v425_v20, %v441_v27  ;;  %v10423_v37 = vld [vmem:[%s15480_s1 + $0x9c0] ss:$16 sps:$4 sm:$0xff]   ;;  %v10440_v54 = vld [vmem:[%s15480_s1 + $0xe04] ss:$16 sps:$4 sm:$0xff]   ;;  %v351_v29 = vsub.s32 4, %v12089_v40 }
  0x29   : > { %2451 = vmatprep.subr.bf16.mxu1 %v10391_v38  ;;  %v10443_v14 = vld [vmem:[%s15480_s1 + $0xc24] ss:$16 sps:$4 sm:$0xff]   ;;  %v10438_v17 = vld [vmem:[%s15480_s1 + $0xe00] ss:$16 sps:$4 sm:$0xff]  }
  0x2a   : > { %v10320_v38 = vpack.c.bf16 %v464_v33, %v463_v32  ;;  %v10441_v18 = vld [vmem:[%s15480_s1 + $0xc20] ss:$16 sps:$4 sm:$0xff]   ;;  %v10446_v19 = vld [vmem:[%s15480_s1 + $0xe24] ss:$16 sps:$4 sm:$0xff]   ;;  %v359_v32 = vsub.s32 6, %v12089_v40 }
  0x2b   : > { %2411 = vmatpush1.bf16.msra.mxu0 %v10393_v39  ;;  %v450_v39 = vsel %vm434_vm3, %v426_v26, %v442_v34  ;;  %v10449_v20 = vld [vmem:[%s15480_s1 + $0xc44] ss:$16 sps:$4 sm:$0xff]   ;;  %v10453_v26 = vld [vmem:[%s15480_s1 + $0xc60] ss:$16 sps:$4 sm:$0xff]  }
  0x2c   : > { %2452 = vmatpush1.bf16.msra.mxu1 %v10394_v41  ;;  %2412 = vmatprep.subr.bf16.mxu0 %v10395_v42  ;;  %v465_v41 = vmul.f32 %v457_v31, %v449_v36  ;;  %v10424_v42 = vld [vmem:[%s15480_s1 + $0xbc0] ss:$16 sps:$4 sm:$0xff]   ;;  %503 = vst [vmem:[#allocation2] sm:$0xff] %v10320_v38  ;;  %v10452_v23 = vld [vmem:[%s15480_s1 + $0xe44] ss:$16 sps:$4 sm:$0xff]   ;;  %v355_v31 = vsub.s32 5, %v12089_v40  ;;  %v352_v38 = vrot.slane %v12137_v56, %v351_v29 }
  0x2d   : > { %2453 = vmatprep.subr.bf16.mxu1 %v10397_v43  ;;  %v466_v43 = vmul.f32 %v458_v35, %v450_v39  ;;  %v10455_v24 = vld [vmem:[%s15480_s1 + $0xc64] ss:$16 sps:$4 sm:$0xff]   ;;  %v10456_v30 = vld [vmem:[%s15480_s1 + $0xe60] ss:$16 sps:$4 sm:$0xff]   ;;  %v363_v35 = vsub.s32 7, %v12089_v40 }
  0x2e   : > { %v10458_v27 = vld [vmem:[%s15480_s1 + $0xe64] ss:$16 sps:$4 sm:$0xff]   ;;  %v10459_v33 = vld [vmem:[%s15480_s1 + $0xc80] ss:$16 sps:$4 sm:$0xff]   ;;  %v356_v39 = vrot.slane %v12137_v56, %v355_v31 }
  0x2f   : > { %2413 = vmatpush1.bf16.msra.mxu0 %v10399_v44  ;;  %v10425_v44 = vld [vmem:[%s15480_s1 + $0x9e4] ss:$16 sps:$4 sm:$0xff]  }
  0x30   : > { %2454 = vmatpush1.bf16.msra.mxu1 %v10400_v45  ;;  %2414 = vmatprep.subr.bf16.mxu0 %v10401_v46  ;;  %v10427_v45 = vld [vmem:[%s15480_s1 + $0xbe4] ss:$16 sps:$4 sm:$0xff]   ;;  %v10321_v46 = vpack.c.bf16 %v466_v43, %v465_v41  ;;  %v10465_v41 = vld [vmem:[%s15480_s1 + $0xca0] ss:$16 sps:$4 sm:$0xff]  }
  0x31   : > { %2455 = vmatprep.subr.bf16.mxu1 %v10403_v49  ;;  %v10429_v49 = vld [vmem:[%s15480_s1 + $0x9e0] ss:$16 sps:$4 sm:$0xff]   ;;  %v10464_v34 = vld [vmem:[%s15480_s1 + $0xe84] ss:$16 sps:$4 sm:$0xff]  }
  0x32   : > { %504 = vst [vmem:[#allocation2 + $0x8] sm:$0xff] %v10321_v46  ;;  %v10467_v36 = vld [vmem:[%s15480_s1 + $0xca4] ss:$16 sps:$4 sm:$0xff]  }
  0x33   : > { %2415 = vmatpush1.bf16.msra.mxu0 %v10405_v53  ;;  %v10437_v53 = vld [vmem:[%s15480_s1 + $0xc04] ss:$16 sps:$4 sm:$0xff]  }
  0x34   : > { %2456 = vmatpush1.bf16.msra.mxu1 %v10406_v58  ;;  %2416 = vmatprep.subr.bf16.mxu0 %v10407_v59  ;;  %v767_v55 = vld [vmem:[#allocation2] sm:$0x77]  ;;  %v321_v43 = vld [vmem:[%s12110_s18 + $0x10] sm:$0xff] }
  0x35   : > { %2457 = vmatprep.subr.bf16.mxu1 %v10409_v0  ;;  %v8745_v58 = vcombine.low %v767_v55, %v767_v55  ;;  %v8746_v59 = vcombine.high %v767_v55, %v767_v55  ;;  %v10473_v46 = vld [vmem:[%s15480_s1 + $0xcc4] ss:$16 sps:$4 sm:$0xff]   ;;  %v322_v55 = vld [vmem:[%s12110_s18 + $0x18] sm:$0xff] }
  0x37   : > { %2417 = vmatpush1.bf16.msra.mxu0 %v10411_v5  ;;  %v1056_v60 = vshrl.u32 %v8746_v59, 16  ;;  %v1058_v61 = vshll.u32 %v8746_v59, 16  ;;  %v1049_v63 = vshrl.u32 %v8745_v58, 16  ;;  %v1051_v0 = vshll.u32 %v8745_v58, 16  ;;  %v10468_v58 = vld [vmem:[%s15480_s1 + $0xea0] ss:$16 sps:$4 sm:$0xff]  }
  0x38   : > { %2458 = vmatpush1.bf16.msra.mxu1 %v10412_v6  ;;  %2418 = vmatprep.subr.bf16.mxu0 %v10413_v11  ;;  %v10435_v11 = vld [vmem:[%s15480_s1 + $0xc00] ss:$16 sps:$4 sm:$0xff]   ;;  %v329_v59 = vunpack.c.l.bf16 %v322_v55 }
  0x39   : > { %2459 = vmatprep.subr.bf16.mxu1 %v10415_v12  ;;  %v768_v62 = vld [vmem:[#allocation2 + $0x8] sm:$0x77]  ;;  %v1060_v3 = vrot.slane %v1058_v61, 1  ;;  %v1053_v4 = vrot.slane %v1051_v0, 1  ;;  %v414_v61 = vrot.slane %v12142_v57, %v363_v35 }
  0x3a   : > { %v8747_v1 = vcombine.low %v768_v62, %v768_v62  ;;  %v8748_v2 = vcombine.high %v768_v62, %v768_v62  ;;  %v10471_v62 = vld [vmem:[%s15480_s1 + $0xcc0] ss:$16 sps:$4 sm:$0xff]  }
  0x3b   : > { %2419 = vmatpush1.bf16.msra.mxu0 %v10417_v21  ;;  %v12230_v9 = vor.u32 %v1060_v3, %v1056_v60  ;;  %v12232_v10 = vor.u32 %v1053_v4, %v1049_v63  ;;  %v10444_v21 = vld [vmem:[%s15480_s1 + $0xe20] ss:$16 sps:$4 sm:$0xff]   ;;  %v330_v60 = vunpack.c.h.bf16 %v322_v55  ;;  %v10476_v63 = vld [vmem:[%s15480_s1 + $0xec4] ss:$16 sps:$4 sm:$0xff]  }
  0x3c   : > { %2460 = vmatpush1.bf16.msra.mxu1 %v10418_v22  ;;  %2420 = vmatprep.subr.bf16.mxu0 %v10419_v25  ;;  %v1070_v5 = vshrl.u32 %v8748_v2, 16  ;;  %v1072_v6 = vshll.u32 %v8748_v2, 16  ;;  %v1063_v7 = vshrl.u32 %v8747_v1, 16  ;;  %v1065_v8 = vshll.u32 %v8747_v1, 16  ;;  %v10447_v22 = vld [vmem:[%s15480_s1 + $0xc40] ss:$16 sps:$4 sm:$0xff]  }
  0x3d   : > { %2461 = vmatprep.subr.bf16.mxu1 %v10421_v28  ;;  %2424 = vmatprep.mubr.bf16.mxu0 %v12230_v9  ;;  %v10450_v25 = vld [vmem:[%s15480_s1 + $0xe40] ss:$16 sps:$4 sm:$0xff]   ;;  %v10461_v28 = vld [vmem:[%s15480_s1 + $0xc84] ss:$16 sps:$4 sm:$0xff]  }
  0x3e   : > { %v1074_v12 = vrot.slane %v1072_v6, 1  ;;  %v1067_v13 = vrot.slane %v1065_v8, 1  ;;  %v10479_v2 = vld [vmem:[%s15480_s1 + $0xce4] ss:$16 sps:$4 sm:$0xff]   ;;  %v460_v8 = vld [vmem:[%s15484_s5 + $0x28] sm:$0xff] }
  0x3f   : > { %2421 = vmatpush1.bf16.msra.mxu0 %v10423_v37  ;;  %v10462_v37 = vld [vmem:[%s15480_s1 + $0xe80] ss:$16 sps:$4 sm:$0xff]  }
  0x40   : > { %2462 = vmatpush1.bf16.msra.mxu1 %v10424_v42  ;;  %2422 = vmatprep.subr.bf16.mxu0 %v10425_v44  ;;  %v12241_v15 = vor.u32 %v1074_v12, %v1070_v5  ;;  %v12244_v16 = vor.u32 %v1067_v13, %v1063_v7  ;;  %v10470_v42 = vld [vmem:[%s15480_s1 + $0xea4] ss:$16 sps:$4 sm:$0xff]   ;;  %v360_v44 = vrot.slane %v12137_v56, %v359_v32  ;;  %v10501_v55 = vld [vmem:[%s15480_s1 + $0xd60] ss:$16 sps:$4 sm:$0xff]  }
  0x41   : > { %2463 = vmatprep.subr.bf16.mxu1 %v10427_v45  ;;  %v364_v45 = vrot.slane %v12137_v56, %v363_v35  ;;  %v410_v56 = vrot.slane %v12142_v57, %v359_v32  ;;  %v459_v7 = vld [vmem:[%s15484_s5 + $0x20] sm:$0xff] }
  0x42   : > { %2465 = vmatprep.mubr.bf16.mxu1 %v12241_v15  ;;  %v379_v3 = vmul.f32 %v360_v44, %v329_v59  ;;  %v10482_v12 = vld [vmem:[%s15480_s1 + $0xee4] ss:$16 sps:$4 sm:$0xff]   ;;  %v10495_v44 = vld [vmem:[%s15480_s1 + $0xd40] ss:$16 sps:$4 sm:$0xff]  }
  0x43   : > { %2423 = vmatpush1.bf16.msra.mxu0 %v10429_v49  ;;  %v327_v49 = vunpack.c.l.bf16 %v321_v43  ;;  %v380_v4 = vmul.f32 %v364_v45, %v330_v60  ;;  %v10500_v45 = vld [vmem:[%s15480_s1 + $0xf44] ss:$16 sps:$4 sm:$0xff]  }
  0x44   : > { %2464 = vmatpush1.bf16.msra.mxu1 %v10430_v51  ;;  %2474 = vmatprep.subr.bf16.mxu0 %v10437_v53  ;;  %v328_v51 = vunpack.c.h.bf16 %v321_v43  ;;  %v402_v53 = vrot.slane %v12142_v57, %v351_v29  ;;  %v429_v13 = vadd.f32 %v410_v56, %v379_v3  ;;  %v10492_v43 = vld [vmem:[%s15480_s1 + $0xf20] ss:$16 sps:$4 sm:$0xff]   ;;  %v10506_v59 = vld [vmem:[%s15480_s1 + $0xf64] ss:$16 sps:$4 sm:$0xff]  }
  0x45   : > { %2515 = vmatprep.subr.bf16.mxu1 %v10440_v54  ;;  %v406_v54 = vrot.slane %v12142_v57, %v355_v31  ;;  %v377_v0 = vmul.f32 %v352_v38, %v327_v49  ;;  %v10474_v57 = vld [vmem:[%s15480_s1 + $0xec0] ss:$16 sps:$4 sm:$0xff]  }
  0x46   : > { %2425 = vmatmul.mubr.bf16.vlgmr.msra.gmra.mrb[0].mxu0 %v12232_v10  ;;  %v378_v1 = vmul.f32 %v356_v39, %v328_v51  ;;  %vm437_vm6 = vcmp.ge.f32.partialorder %v429_v13, 0.0  ;;  %v10486_v38 = vld [vmem:[%s15480_s1 + $0xf00] ss:$16 sps:$4 sm:$0xff]  }
  0x47   : > { %2475 = vmatpush1.bf16.msra.mxu0 %v10435_v11  ;;  %2466 = vmatmul.mubr.bf16.vlgmr.msra.gmra.mrb[0].mxu1 %v12244_v16  ;;  %v427_v5 = vadd.f32 %v402_v53, %v377_v0  ;;  %v10477_v11 = vld [vmem:[%s15480_s1 + $0xce0] ss:$16 sps:$4 sm:$0xff]  }
  0x48   : > { %2476 = vmatprep.subr.bf16.mxu0 %v10443_v14  ;;  %2516 = vmatpush1.bf16.msra.mxu1 %v10438_v17  ;;  %v428_v6 = vadd.f32 %v406_v54, %v378_v1  ;;  %v430_v14 = vadd.f32 %v414_v61, %v380_v4  ;;  %v461_v17 = vld [vmem:[%s15484_s5 + $0x30] sm:$0xff] }
  0x49   : > { %2517 = vmatprep.subr.bf16.mxu1 %v10446_v19  ;;  %vm435_vm4 = vcmp.ge.f32.partialorder %v427_v5, 0.0  ;;  %v443_v19 = vmul.f32 0.2, %v427_v5  ;;  %v10489_v39 = vld [vmem:[%s15480_s1 + $0xd20] ss:$16 sps:$4 sm:$0xff]  }
  0x4a   : > { %vm436_vm5 = vcmp.ge.f32.partialorder %v428_v6, 0.0  ;;  %vm438_vm7 = vcmp.ge.f32.partialorder %v430_v14, 0.0  ;;  %v10498_v54 = vld [vmem:[%s15480_s1 + $0xf40] ss:$16 sps:$4 sm:$0xff]   ;;  %v10509_v61 = vld [vmem:[%s15480_s1 + $0xd84] ss:$16 sps:$4 sm:$0xff]  }
  0x4b   : > { %2477 = vmatpush1.bf16.msra.mxu0 %v10441_v18  ;;  %v462_v18 = vld [vmem:[%s15484_s5 + $0x38] sm:$0xff]  ;;  %v10504_v1 = vld [vmem:[%s15480_s1 + $0xf60] ss:$16 sps:$4 sm:$0xff]   ;;  %v10512_v4 = vld [vmem:[%s15480_s1 + $0xf84] ss:$16 sps:$4 sm:$0xff]  }
  0x4c   : > { %2478 = vmatprep.subr.bf16.mxu0 %v10449_v20  ;;  %2518 = vmatpush1.bf16.msra.mxu1 %v10444_v21  ;;  %v444_v20 = vmul.f32 0.2, %v428_v6  ;;  %v445_v21 = vmul.f32 0.2, %v429_v13 }
  0x4d   : > { %2519 = vmatprep.subr.bf16.mxu1 %v10452_v23  ;;  %v10485_v23 = vld [vmem:[%s15480_s1 + $0xd04] ss:$16 sps:$4 sm:$0xff]  }
  0x4f   : > { %2479 = vmatpush1.bf16.msra.mxu0 %v10447_v22  ;;  %v446_v22 = vmul.f32 0.2, %v430_v14 }
  0x50   : > { %2480 = vmatprep.subr.bf16.mxu0 %v10455_v24  ;;  %2520 = vmatpush1.bf16.msra.mxu1 %v10450_v25  ;;  %v451_v24 = vsel %vm435_vm4, %v427_v5, %v443_v19  ;;  %v452_v25 = vsel %vm436_vm5, %v428_v6, %v444_v20  ;;  %v10515_v5 = vld [vmem:[%s15480_s1 + $0xda4] ss:$16 sps:$4 sm:$0xff]  }
  0x51   : > { %2521 = vmatprep.subr.bf16.mxu1 %v10458_v27  ;;  %v468_v27 = vmul.f32 %v460_v8, %v452_v25  ;;  %v454_v29 = vsel %vm438_vm7, %v430_v14, %v446_v22  ;;  %v10513_v8 = vld [vmem:[%s15480_s1 + $0xda0] ss:$16 sps:$4 sm:$0xff]   ;;  %v10524_v20 = vld [vmem:[%s15480_s1 + $0xfc4] ss:$16 sps:$4 sm:$0xff]  }
  0x52   : > { %v470_v32 = vmul.f32 %v462_v18, %v454_v29  ;;  %v10519_v18 = vld [vmem:[%s15480_s1 + $0xdc0] ss:$16 sps:$4 sm:$0xff]  }
  0x53   : > { %2481 = vmatpush1.bf16.msra.mxu0 %v10453_v26  ;;  %v467_v26 = vmul.f32 %v459_v7, %v451_v24  ;;  %v10510_v7 = vld [vmem:[%s15480_s1 + $0xf80] ss:$16 sps:$4 sm:$0xff]  }
  0x54   : > { %2482 = vmatprep.subr.bf16.mxu0 %v10461_v28  ;;  %2522 = vmatpush1.bf16.msra.mxu1 %v10456_v30  ;;  %v453_v28 = vsel %vm437_vm6, %v429_v13, %v445_v21  ;;  %v10480_v30 = vld [vmem:[%s15480_s1 + $0xee0] ss:$16 sps:$4 sm:$0xff]   ;;  %v10521_v13 = vld [vmem:[%s15480_s1 + $0xdc4] ss:$16 sps:$4 sm:$0xff]  }
  0x55   : > { %2523 = vmatprep.subr.bf16.mxu1 %v10464_v34  ;;  %v469_v31 = vmul.f32 %v461_v17, %v453_v28  ;;  %v10488_v34 = vld [vmem:[%s15480_s1 + $0xf04] ss:$16 sps:$4 sm:$0xff]   ;;  %v10322_v35 = vpack.c.bf16 %v468_v27, %v467_v26  ;;  %v10516_v17 = vld [vmem:[%s15480_s1 + $0xfa0] ss:$16 sps:$4 sm:$0xff]   ;;  %v10537_v28 = vld [vmem:[%s15480_s1 + $0x80c] ss:$16 sps:$4 sm:$0xff]  }
  0x56   : > { %v10527_v21 = vld [vmem:[%s15480_s1 + $0xde4] ss:$16 sps:$4 sm:$0xff]   ;;  %v10522_v22 = vld [vmem:[%s15480_s1 + $0xfc0] ss:$16 sps:$4 sm:$0xff]  }
  0x57   : > { %2483 = vmatpush1.bf16.msra.mxu0 %v10459_v33  ;;  %v10483_v33 = vld [vmem:[%s15480_s1 + $0xd00] ss:$16 sps:$4 sm:$0xff]   ;;  %505 = vst [vmem:[#allocation2 + $0x10] sm:$0xff] %v10322_v35  ;;  %v10530_v27 = vld [vmem:[%s15480_s1 + $0xfe4] ss:$16 sps:$4 sm:$0xff]  }
  0x58   : > { %2484 = vmatprep.subr.bf16.mxu0 %v10467_v36  ;;  %2524 = vmatpush1.bf16.msra.mxu1 %v10462_v37  ;;  %v10491_v36 = vld [vmem:[%s15480_s1 + $0xd24] ss:$16 sps:$4 sm:$0xff]   ;;  %v10323_v37 = vpack.c.bf16 %v470_v32, %v469_v31  ;;  %v10525_v24 = vld [vmem:[%s15480_s1 + $0xde0] ss:$16 sps:$4 sm:$0xff]   ;;  %v10543_v35 = vld [vmem:[%s15480_s1 + $0x82c] ss:$16 sps:$4 sm:$0xff]  }
  0x59   : > { %2525 = vmatprep.subr.bf16.mxu1 %v10470_v42  ;;  %v10497_v42 = vld [vmem:[%s15480_s1 + $0xd44] ss:$16 sps:$4 sm:$0xff]   ;;  %v10528_v31 = vld [vmem:[%s15480_s1 + $0xfe0] ss:$16 sps:$4 sm:$0xff]  }
  0x5a   : > { %506 = vst [vmem:[#allocation2 + $0x18] sm:$0xff] %v10323_v37  ;;  %v10538_v37 = vld [vmem:[%s15480_s1 + $0xa08] ss:$16 sps:$4 sm:$0xff]  }
  0x5b   : > { %2485 = vmatpush1.bf16.msra.mxu0 %v10465_v41  ;;  %v10494_v41 = vld [vmem:[%s15480_s1 + $0xf24] ss:$16 sps:$4 sm:$0xff]  }
  0x5c   : > { %2486 = vmatprep.subr.bf16.mxu0 %v10473_v46  ;;  %2526 = vmatpush1.bf16.msra.mxu1 %v10468_v58  ;;  %v10503_v46 = vld [vmem:[%s15480_s1 + $0xd64] ss:$16 sps:$4 sm:$0xff]  }
  0x5d   : > { %2527 = vmatprep.subr.bf16.mxu1 %v10476_v63 }
  0x5e   : > { %v769_v49 = vld [vmem:[#allocation2 + $0x10] sm:$0x77] }
  0x5f   : > { %2487 = vmatpush1.bf16.msra.mxu0 %v10471_v62  ;;  %v8750_v51 = vcombine.high %v769_v49, %v769_v49 }
  0x60   : > { %2488 = vmatprep.subr.bf16.mxu0 %v10479_v2  ;;  %2528 = vmatpush1.bf16.msra.mxu1 %v10474_v57  ;;  %v10507_v2 = vld [vmem:[%s15480_s1 + $0xd80] ss:$16 sps:$4 sm:$0xff]  }
  0x61   : > { %2529 = vmatprep.subr.bf16.mxu1 %v10482_v12  ;;  %v770_v53 = vld [vmem:[#allocation2 + $0x18] sm:$0x77]  ;;  %v1084_v60 = vshrl.u32 %v8750_v51, 16  ;;  %v1086_v56 = vshll.u32 %v8750_v51, 16  ;;  %v10518_v12 = vld [vmem:[%s15480_s1 + $0xfa4] ss:$16 sps:$4 sm:$0xff]  }
  0x62   : > { %v8752_v58 = vcombine.high %v770_v53, %v770_v53  ;;  %v8751_v14 = vcombine.low %v770_v53, %v770_v53  ;;  %v10556_v51 = vld [vmem:[%s15480_s1 + $0xa68] ss:$16 sps:$4 sm:$0xff]  }
  0x63   : > { %2489 = vmatpush1.bf16.msra.mxu0 %v10477_v11  ;;  %v1088_v0 = vrot.slane %v1086_v56, 1  ;;  %v8749_v11 = vcombine.low %v769_v49, %v769_v49  ;;  %v10561_v49 = vld [vmem:[%s15480_s1 + $0x88c] ss:$16 sps:$4 sm:$0xff]   ;;  %v10559_v53 = vld [vmem:[%s15480_s1 + $0x888] ss:$16 sps:$4 sm:$0xff]  }
  0x64   : > { %2490 = vmatprep.subr.bf16.mxu0 %v10485_v23  ;;  %2530 = vmatpush1.bf16.msra.mxu1 %v10480_v30  ;;  %v1098_v62 = vshrl.u32 %v8752_v58, 16  ;;  %v1100_v63 = vshll.u32 %v8752_v58, 16  ;;  %v1093_v23 = vshll.u32 %v8751_v14, 16  ;;  %v1091_v29 = vshrl.u32 %v8751_v14, 16  ;;  %v10562_v58 = vld [vmem:[%s15480_s1 + $0xa88] ss:$16 sps:$4 sm:$0xff]  }
  0x65   : > { %2531 = vmatprep.subr.bf16.mxu1 %v10488_v34  ;;  %v12415_v57 = vor.u32 %v1088_v0, %v1084_v60  ;;  %v1079_v19 = vshll.u32 %v8749_v11, 16  ;;  %v1077_v25 = vshrl.u32 %v8749_v11, 16  ;;  %v10540_v34 = vld [vmem:[%s15480_s1 + $0xa0c] ss:$16 sps:$4 sm:$0xff]  }
  0x66   : > { %v1102_v3 = vrot.slane %v1100_v63, 1  ;;  %v1095_v30 = vrot.slane %v1093_v23, 1  ;;  %v10570_v60 = vld [vmem:[%s15480_s1 + $0xaac] ss:$16 sps:$4 sm:$0xff]   ;;  %v10601_v23 = vld [vmem:[%s15480_s1 + $0x968] ss:$16 sps:$4 sm:$0xff]  }
  0x67   : > { %2491 = vmatpush1.bf16.msra.mxu0 %v10483_v33  ;;  %2506 = vmatprep.mubr.bf16.mxu0 %v12415_v57  ;;  %v1081_v26 = vrot.slane %v1079_v19, 1  ;;  %v10535_v33 = vld [vmem:[%s15480_s1 + $0x808] ss:$16 sps:$4 sm:$0xff]   ;;  %v10573_v56 = vld [vmem:[%s15480_s1 + $0x8cc] ss:$16 sps:$4 sm:$0xff]  }
  0x68   : > { %2492 = vmatprep.subr.bf16.mxu0 %v10491_v36  ;;  %2532 = vmatpush1.bf16.msra.mxu1 %v10486_v38  ;;  %v12420_v6 = vor.u32 %v1102_v3, %v1098_v62  ;;  %v12474_v36 = vor.u32 %v1095_v30, %v1091_v29  ;;  %v10541_v38 = vld [vmem:[%s15480_s1 + $0x828] ss:$16 sps:$4 sm:$0xff]   ;;  %v10576_v63 = vld [vmem:[%s15480_s1 + $0xacc] ss:$16 sps:$4 sm:$0xff]  }
  0x69   : > { %2533 = vmatprep.subr.bf16.mxu1 %v10494_v41  ;;  %v12463_v32 = vor.u32 %v1081_v26, %v1077_v25  ;;  %v10549_v41 = vld [vmem:[%s15480_s1 + $0x84c] ss:$16 sps:$4 sm:$0xff]   ;;  %v10571_v62 = vld [vmem:[%s15480_s1 + $0x8c8] ss:$16 sps:$4 sm:$0xff]  }
  0x6a   : > { %2547 = vmatprep.mubr.bf16.mxu1 %v12420_v6  ;;  %v10579_v0 = vld [vmem:[%s15480_s1 + $0x8ec] ss:$16 sps:$4 sm:$0xff]   ;;  %v10595_v19 = vld [vmem:[%s15480_s1 + $0x948] ss:$16 sps:$4 sm:$0xff]  }
  0x6b   : > { %2493 = vmatpush1.bf16.msra.mxu0 %v10489_v39  ;;  %v10546_v39 = vld [vmem:[%s15480_s1 + $0xa2c] ss:$16 sps:$4 sm:$0xff]   ;;  %v10604_v26 = vld [vmem:[%s15480_s1 + $0xb68] ss:$16 sps:$4 sm:$0xff]  }
  0x6c   : > { %2494 = vmatprep.subr.bf16.mxu0 %v10497_v42  ;;  %2534 = vmatpush1.bf16.msra.mxu1 %v10492_v43  ;;  %v10544_v42 = vld [vmem:[%s15480_s1 + $0xa28] ss:$16 sps:$4 sm:$0xff]   ;;  %v10582_v3 = vld [vmem:[%s15480_s1 + $0xaec] ss:$16 sps:$4 sm:$0xff]  }
  0x6d   : > { %2535 = vmatprep.subr.bf16.mxu1 %v10500_v45  ;;  %v10547_v43 = vld [vmem:[%s15480_s1 + $0x848] ss:$16 sps:$4 sm:$0xff]   ;;  %v10591_v11 = vld [vmem:[%s15480_s1 + $0x92c] ss:$16 sps:$4 sm:$0xff]  }
  0x6e   : > { %v10550_v45 = vld [vmem:[%s15480_s1 + $0xa48] ss:$16 sps:$4 sm:$0xff]   ;;  %v10594_v14 = vld [vmem:[%s15480_s1 + $0xb2c] ss:$16 sps:$4 sm:$0xff]  }
  0x6f   : > { %2495 = vmatpush1.bf16.msra.mxu0 %v10495_v44  ;;  %v10552_v44 = vld [vmem:[%s15480_s1 + $0xa4c] ss:$16 sps:$4 sm:$0xff]   ;;  %v10610_v30 = vld [vmem:[%s15480_s1 + $0xb88] ss:$16 sps:$4 sm:$0xff]  }
  0x70   : > { %2496 = vmatprep.subr.bf16.mxu0 %v10503_v46  ;;  %2536 = vmatpush1.bf16.msra.mxu1 %v10498_v54  ;;  %v10558_v46 = vld [vmem:[%s15480_s1 + $0xa6c] ss:$16 sps:$4 sm:$0xff]  }
  0x71   : > { %2537 = vmatprep.subr.bf16.mxu1 %v10506_v59  ;;  %v10564_v54 = vld [vmem:[%s15480_s1 + $0xa8c] ss:$16 sps:$4 sm:$0xff]   ;;  %v10565_v59 = vld [vmem:[%s15480_s1 + $0x8a8] ss:$16 sps:$4 sm:$0xff]  }
  0x72   : > { %v10609_v25 = vld [vmem:[%s15480_s1 + $0x98c] ss:$16 sps:$4 sm:$0xff]  }
  0x73   : > { %2497 = vmatpush1.bf16.msra.mxu0 %v10501_v55  ;;  %v10567_v55 = vld [vmem:[%s15480_s1 + $0x8ac] ss:$16 sps:$4 sm:$0xff]  }
  0x74   : > { %2498 = vmatprep.subr.bf16.mxu0 %v10509_v61  ;;  %2538 = vmatpush1.bf16.msra.mxu1 %v10504_v1  ;;  %v10568_v61 = vld [vmem:[%s15480_s1 + $0xaa8] ss:$16 sps:$4 sm:$0xff]   ;;  %v10615_v29 = vld [vmem:[%s15480_s1 + $0x9ac] ss:$16 sps:$4 sm:$0xff]  }
  0x75   : > { %2539 = vmatprep.subr.bf16.mxu1 %v10512_v4  ;;  %v10574_v1 = vld [vmem:[%s15480_s1 + $0xac8] ss:$16 sps:$4 sm:$0xff]   ;;  %v10585_v4 = vld [vmem:[%s15480_s1 + $0x90c] ss:$16 sps:$4 sm:$0xff]  }
  0x77   : > { %2499 = vmatpush1.bf16.msra.mxu0 %v10507_v2  ;;  %v10577_v2 = vld [vmem:[%s15480_s1 + $0x8e8] ss:$16 sps:$4 sm:$0xff]  }
  0x78   : > { %2500 = vmatprep.subr.bf16.mxu0 %v10515_v5  ;;  %2540 = vmatpush1.bf16.msra.mxu1 %v10510_v7  ;;  %v10580_v5 = vld [vmem:[%s15480_s1 + $0xae8] ss:$16 sps:$4 sm:$0xff]  }
  0x79   : > { %2541 = vmatprep.subr.bf16.mxu1 %v10518_v12  ;;  %v10583_v7 = vld [vmem:[%s15480_s1 + $0x908] ss:$16 sps:$4 sm:$0xff]  }
  0x7a   : > { %v10586_v12 = vld [vmem:[%s15480_s1 + $0xb08] ss:$16 sps:$4 sm:$0xff]  }
  0x7b   : > { %2501 = vmatpush1.bf16.msra.mxu0 %v10513_v8  ;;  %v10588_v8 = vld [vmem:[%s15480_s1 + $0xb0c] ss:$16 sps:$4 sm:$0xff]  }
  0x7c   : > { %2502 = vmatprep.subr.bf16.mxu0 %v10521_v13  ;;  %2542 = vmatpush1.bf16.msra.mxu1 %v10516_v17  ;;  %v10589_v13 = vld [vmem:[%s15480_s1 + $0x928] ss:$16 sps:$4 sm:$0xff]   ;;  %v10597_v17 = vld [vmem:[%s15480_s1 + $0x94c] ss:$16 sps:$4 sm:$0xff]  }
  0x7d   : > { %2543 = vmatprep.subr.bf16.mxu1 %v10524_v20  ;;  %v10600_v20 = vld [vmem:[%s15480_s1 + $0xb4c] ss:$16 sps:$4 sm:$0xff]  }
  0x7f   : > { %2503 = vmatpush1.bf16.msra.mxu0 %v10519_v18  ;;  %v10592_v18 = vld [vmem:[%s15480_s1 + $0xb28] ss:$16 sps:$4 sm:$0xff]  }
  0x80   : > { %2504 = vmatprep.subr.bf16.mxu0 %v10527_v21  ;;  %2544 = vmatpush1.bf16.msra.mxu1 %v10522_v22  ;;  %v10603_v21 = vld [vmem:[%s15480_s1 + $0x96c] ss:$16 sps:$4 sm:$0xff]   ;;  %v10598_v22 = vld [vmem:[%s15480_s1 + $0xb48] ss:$16 sps:$4 sm:$0xff]  }
  0x81   : > { %2545 = vmatprep.subr.bf16.mxu1 %v10530_v27  ;;  %v10607_v27 = vld [vmem:[%s15480_s1 + $0x988] ss:$16 sps:$4 sm:$0xff]  }
  0x83   : > { %2505 = vmatpush1.bf16.msra.mxu0 %v10525_v24  ;;  %v10606_v24 = vld [vmem:[%s15480_s1 + $0xb6c] ss:$16 sps:$4 sm:$0xff]  }
  0x84   : > { %2556 = vmatprep.subr.bf16.mxu0 %v10537_v28  ;;  %2546 = vmatpush1.bf16.msra.mxu1 %v10528_v31  ;;  %v10612_v28 = vld [vmem:[%s15480_s1 + $0xb8c] ss:$16 sps:$4 sm:$0xff]   ;;  %v10613_v31 = vld [vmem:[%s15480_s1 + $0x9a8] ss:$16 sps:$4 sm:$0xff]  }
  0x85   : > { %2597 = vmatprep.subr.bf16.mxu1 %v10540_v34  ;;  %v10621_v34 = vld [vmem:[%s15480_s1 + $0x9cc] ss:$16 sps:$4 sm:$0xff]  }
  0x86   : > { %2507 = vmatmul.mubr.bf16.vlgmr.msra.gmra.mrb[4].mxu0 %v12463_v32 }
  0x87   : > { %2557 = vmatpush1.bf16.msra.mxu0 %v10535_v33  ;;  %2588 = vmatprep.mubr.bf16.mxu0 %v12230_v9  ;;  %v10555_v9 = vld [vmem:[%s15480_s1 + $0x86c] ss:$16 sps:$4 sm:$0xff]  }
  0x88   : > { %2558 = vmatprep.subr.bf16.mxu0 %v10543_v35  ;;  %2548 = vmatmul.mubr.bf16.vlgmr.msra.gmra.mrb[4].mxu1 %v12474_v36  ;;  %v10618_v33 = vld [vmem:[%s15480_s1 + $0xbac] ss:$16 sps:$4 sm:$0xff]   ;;  %v10616_v35 = vld [vmem:[%s15480_s1 + $0xba8] ss:$16 sps:$4 sm:$0xff]  }
  0x89   : > { %2598 = vmatpush1.bf16.msra.mxu1 %v10538_v37  ;;  %2629 = vmatprep.mubr.bf16.mxu1 %v12241_v15  ;;  %v10553_v15 = vld [vmem:[%s15480_s1 + $0x868] ss:$16 sps:$4 sm:$0xff]  }
  0x8a   : > { %2599 = vmatprep.subr.bf16.mxu1 %v10546_v39  ;;  %v10619_v37 = vld [vmem:[%s15480_s1 + $0x9c8] ss:$16 sps:$4 sm:$0xff]   ;;  %v10627_v39 = vld [vmem:[%s15480_s1 + $0x9ec] ss:$16 sps:$4 sm:$0xff]  }
  0x8b   : > { %2559 = vmatpush1.bf16.msra.mxu0 %v10541_v38  ;;  %v10624_v38 = vld [vmem:[%s15480_s1 + $0xbcc] ss:$16 sps:$4 sm:$0xff]  }
  0x8c   : > { %2560 = vmatprep.subr.bf16.mxu0 %v10549_v41  ;;  %v10622_v41 = vld [vmem:[%s15480_s1 + $0xbc8] ss:$16 sps:$4 sm:$0xff]  }
  0x8d   : > { %2600 = vmatpush1.bf16.msra.mxu1 %v10544_v42  ;;  %v10625_v42 = vld [vmem:[%s15480_s1 + $0x9e8] ss:$16 sps:$4 sm:$0xff]  }
  0x8e   : > { %2601 = vmatprep.subr.bf16.mxu1 %v10552_v44  ;;  %v10633_v44 = vld [vmem:[%s15480_s1 + $0xc0c] ss:$16 sps:$4 sm:$0xff]  }
  0x8f   : > { %2561 = vmatpush1.bf16.msra.mxu0 %v10547_v43  ;;  %v10630_v43 = vld [vmem:[%s15480_s1 + $0xbec] ss:$16 sps:$4 sm:$0xff]  }
  0x90   : > { %2562 = vmatprep.subr.bf16.mxu0 %v10555_v9  ;;  %v10628_v9 = vld [vmem:[%s15480_s1 + $0xbe8] ss:$16 sps:$4 sm:$0xff]  }
  0x91   : > { %2602 = vmatpush1.bf16.msra.mxu1 %v10550_v45  ;;  %v10631_v45 = vld [vmem:[%s15480_s1 + $0xc08] ss:$16 sps:$4 sm:$0xff]  }
  0x92   : > { %2603 = vmatprep.subr.bf16.mxu1 %v10558_v46  ;;  %v10639_v46 = vld [vmem:[%s15480_s1 + $0xc2c] ss:$16 sps:$4 sm:$0xff]  }
  0x93   : > { %2563 = vmatpush1.bf16.msra.mxu0 %v10553_v15  ;;  %v10636_v15 = vld [vmem:[%s15480_s1 + $0xe0c] ss:$16 sps:$4 sm:$0xff]  }
  0x94   : > { %2564 = vmatprep.subr.bf16.mxu0 %v10561_v49  ;;  %v10634_v49 = vld [vmem:[%s15480_s1 + $0xe08] ss:$16 sps:$4 sm:$0xff]  }
  0x95   : > { %2604 = vmatpush1.bf16.msra.mxu1 %v10556_v51  ;;  %v10637_v51 = vld [vmem:[%s15480_s1 + $0xc28] ss:$16 sps:$4 sm:$0xff]  }
  0x96   : > { %2605 = vmatprep.subr.bf16.mxu1 %v10564_v54  ;;  %v10645_v54 = vld [vmem:[%s15480_s1 + $0xc4c] ss:$16 sps:$4 sm:$0xff]  }
  0x97   : > { %2565 = vmatpush1.bf16.msra.mxu0 %v10559_v53  ;;  %v10642_v53 = vld [vmem:[%s15480_s1 + $0xe2c] ss:$16 sps:$4 sm:$0xff]  }
  0x98   : > { %2566 = vmatprep.subr.bf16.mxu0 %v10567_v55  ;;  %v10643_v55 = vld [vmem:[%s15480_s1 + $0xc48] ss:$16 sps:$4 sm:$0xff]  }
  0x99   : > { %2606 = vmatpush1.bf16.msra.mxu1 %v10562_v58  ;;  %v10648_v58 = vld [vmem:[%s15480_s1 + $0xe4c] ss:$16 sps:$4 sm:$0xff]  }
  0x9a   : > { %2607 = vmatprep.subr.bf16.mxu1 %v10570_v60  ;;  %v10657_v60 = vld [vmem:[%s15480_s1 + $0xc8c] ss:$16 sps:$4 sm:$0xff]  }
  0x9b   : > { %2567 = vmatpush1.bf16.msra.mxu0 %v10565_v59  ;;  %v10654_v59 = vld [vmem:[%s15480_s1 + $0xe6c] ss:$16 sps:$4 sm:$0xff]  }
  0x9c   : > { %2568 = vmatprep.subr.bf16.mxu0 %v10573_v56  ;;  %v10652_v56 = vld [vmem:[%s15480_s1 + $0xe68] ss:$16 sps:$4 sm:$0xff]  }
  0x9d   : > { %2608 = vmatpush1.bf16.msra.mxu1 %v10568_v61  ;;  %v10655_v61 = vld [vmem:[%s15480_s1 + $0xc88] ss:$16 sps:$4 sm:$0xff]  }
  0x9e   : > { %2609 = vmatprep.subr.bf16.mxu1 %v10576_v63  ;;  %v10663_v63 = vld [vmem:[%s15480_s1 + $0xcac] ss:$16 sps:$4 sm:$0xff]  }
  0x9f   : > { %2569 = vmatpush1.bf16.msra.mxu0 %v10571_v62  ;;  %v10660_v62 = vld [vmem:[%s15480_s1 + $0xe8c] ss:$16 sps:$4 sm:$0xff]  }
  0xa0   : > { %2570 = vmatprep.subr.bf16.mxu0 %v10579_v0  ;;  %v10658_v0 = vld [vmem:[%s15480_s1 + $0xe88] ss:$16 sps:$4 sm:$0xff]  }
  0xa1   : > { %2610 = vmatpush1.bf16.msra.mxu1 %v10574_v1  ;;  %v10661_v1 = vld [vmem:[%s15480_s1 + $0xca8] ss:$16 sps:$4 sm:$0xff]  }
  0xa2   : > { %2611 = vmatprep.subr.bf16.mxu1 %v10582_v3  ;;  %v10669_v3 = vld [vmem:[%s15480_s1 + $0xccc] ss:$16 sps:$4 sm:$0xff]  }
  0xa3   : > { %2571 = vmatpush1.bf16.msra.mxu0 %v10577_v2  ;;  %v10666_v2 = vld [vmem:[%s15480_s1 + $0xeac] ss:$16 sps:$4 sm:$0xff]  }
  0xa4   : > { %2572 = vmatprep.subr.bf16.mxu0 %v10585_v4  ;;  %v10664_v4 = vld [vmem:[%s15480_s1 + $0xea8] ss:$16 sps:$4 sm:$0xff]  }
  0xa5   : > { %2612 = vmatpush1.bf16.msra.mxu1 %v10580_v5  ;;  %v10667_v5 = vld [vmem:[%s15480_s1 + $0xcc8] ss:$16 sps:$4 sm:$0xff]  }
  0xa6   : > { %2613 = vmatprep.subr.bf16.mxu1 %v10588_v8  ;;  %v10675_v8 = vld [vmem:[%s15480_s1 + $0xcec] ss:$16 sps:$4 sm:$0xff]  }
  0xa7   : > { %2573 = vmatpush1.bf16.msra.mxu0 %v10583_v7  ;;  %v10672_v7 = vld [vmem:[%s15480_s1 + $0xecc] ss:$16 sps:$4 sm:$0xff]  }
  0xa8   : > { %2574 = vmatprep.subr.bf16.mxu0 %v10591_v11  ;;  %v10670_v11 = vld [vmem:[%s15480_s1 + $0xec8] ss:$16 sps:$4 sm:$0xff]  }
  0xa9   : > { %2614 = vmatpush1.bf16.msra.mxu1 %v10586_v12  ;;  %v10673_v12 = vld [vmem:[%s15480_s1 + $0xce8] ss:$16 sps:$4 sm:$0xff]  }
  0xaa   : > { %2615 = vmatprep.subr.bf16.mxu1 %v10594_v14  ;;  %v10681_v14 = vld [vmem:[%s15480_s1 + $0xd0c] ss:$16 sps:$4 sm:$0xff]  }
  0xab   : > { %2575 = vmatpush1.bf16.msra.mxu0 %v10589_v13  ;;  %v10678_v13 = vld [vmem:[%s15480_s1 + $0xeec] ss:$16 sps:$4 sm:$0xff]  }
  0xac   : > { %2576 = vmatprep.subr.bf16.mxu0 %v10597_v17  ;;  %v10676_v17 = vld [vmem:[%s15480_s1 + $0xee8] ss:$16 sps:$4 sm:$0xff]  }
  0xad   : > { %2616 = vmatpush1.bf16.msra.mxu1 %v10592_v18  ;;  %v10679_v18 = vld [vmem:[%s15480_s1 + $0xd08] ss:$16 sps:$4 sm:$0xff]  }
  0xae   : > { %2617 = vmatprep.subr.bf16.mxu1 %v10600_v20  ;;  %v10687_v20 = vld [vmem:[%s15480_s1 + $0xd2c] ss:$16 sps:$4 sm:$0xff]  }
  0xaf   : > { %2577 = vmatpush1.bf16.msra.mxu0 %v10595_v19  ;;  %v10684_v19 = vld [vmem:[%s15480_s1 + $0xf0c] ss:$16 sps:$4 sm:$0xff]  }
  0xb0   : > { %2578 = vmatprep.subr.bf16.mxu0 %v10603_v21  ;;  %v10682_v21 = vld [vmem:[%s15480_s1 + $0xf08] ss:$16 sps:$4 sm:$0xff]  }
  0xb1   : > { %2618 = vmatpush1.bf16.msra.mxu1 %v10598_v22  ;;  %v10685_v22 = vld [vmem:[%s15480_s1 + $0xd28] ss:$16 sps:$4 sm:$0xff]  }
  0xb2   : > { %2619 = vmatprep.subr.bf16.mxu1 %v10606_v24  ;;  %v10693_v24 = vld [vmem:[%s15480_s1 + $0xd4c] ss:$16 sps:$4 sm:$0xff]  }
  0xb3   : > { %2579 = vmatpush1.bf16.msra.mxu0 %v10601_v23  ;;  %v10690_v23 = vld [vmem:[%s15480_s1 + $0xf2c] ss:$16 sps:$4 sm:$0xff]  }
  0xb4   : > { %2580 = vmatprep.subr.bf16.mxu0 %v10609_v25  ;;  %v10688_v25 = vld [vmem:[%s15480_s1 + $0xf28] ss:$16 sps:$4 sm:$0xff]  }
  0xb5   : > { %2620 = vmatpush1.bf16.msra.mxu1 %v10604_v26  ;;  %v10691_v26 = vld [vmem:[%s15480_s1 + $0xd48] ss:$16 sps:$4 sm:$0xff]  }
  0xb6   : > { %2621 = vmatprep.subr.bf16.mxu1 %v10612_v28  ;;  %v10699_v28 = vld [vmem:[%s15480_s1 + $0xd6c] ss:$16 sps:$4 sm:$0xff]  }
  0xb7   : > { %2581 = vmatpush1.bf16.msra.mxu0 %v10607_v27  ;;  %v10696_v27 = vld [vmem:[%s15480_s1 + $0xf4c] ss:$16 sps:$4 sm:$0xff]  }
  0xb8   : > { %2582 = vmatprep.subr.bf16.mxu0 %v10615_v29  ;;  %v10694_v29 = vld [vmem:[%s15480_s1 + $0xf48] ss:$16 sps:$4 sm:$0xff]  }
  0xb9   : > { %2622 = vmatpush1.bf16.msra.mxu1 %v10610_v30  ;;  %v10697_v30 = vld [vmem:[%s15480_s1 + $0xd68] ss:$16 sps:$4 sm:$0xff]  }
  0xba   : > { %2623 = vmatprep.subr.bf16.mxu1 %v10618_v33  ;;  %v10705_v33 = vld [vmem:[%s15480_s1 + $0xd8c] ss:$16 sps:$4 sm:$0xff]  }
  0xbb   : > { %2583 = vmatpush1.bf16.msra.mxu0 %v10613_v31  ;;  %v10702_v31 = vld [vmem:[%s15480_s1 + $0xf6c] ss:$16 sps:$4 sm:$0xff]  }
  0xbc   : > { %2584 = vmatprep.subr.bf16.mxu0 %v10621_v34  ;;  %v10700_v34 = vld [vmem:[%s15480_s1 + $0xf68] ss:$16 sps:$4 sm:$0xff]  }
  0xbd   : > { %2624 = vmatpush1.bf16.msra.mxu1 %v10616_v35  ;;  %v10703_v35 = vld [vmem:[%s15480_s1 + $0xd88] ss:$16 sps:$4 sm:$0xff]  }
  0xbe   : > { %2625 = vmatprep.subr.bf16.mxu1 %v10624_v38  ;;  %v10711_v38 = vld [vmem:[%s15480_s1 + $0xdac] ss:$16 sps:$4 sm:$0xff]  }
  0xbf   : > { %2585 = vmatpush1.bf16.msra.mxu0 %v10619_v37  ;;  %v10708_v37 = vld [vmem:[%s15480_s1 + $0xf8c] ss:$16 sps:$4 sm:$0xff]  }
  0xc0   : > { %2586 = vmatprep.subr.bf16.mxu0 %v10627_v39  ;;  %v10706_v39 = vld [vmem:[%s15480_s1 + $0xf88] ss:$16 sps:$4 sm:$0xff]  }
  0xc1   : > { %2626 = vmatpush1.bf16.msra.mxu1 %v10622_v41  ;;  %v10709_v41 = vld [vmem:[%s15480_s1 + $0xda8] ss:$16 sps:$4 sm:$0xff]  }
  0xc2   : > { %2627 = vmatprep.subr.bf16.mxu1 %v10630_v43  ;;  %v10717_v43 = vld [vmem:[%s15480_s1 + $0xdcc] ss:$16 sps:$4 sm:$0xff]  }
  0xc3   : > { %2587 = vmatpush1.bf16.msra.mxu0 %v10625_v42  ;;  %v10714_v42 = vld [vmem:[%s15480_s1 + $0xfac] ss:$16 sps:$4 sm:$0xff]  }
  0xc4   : > { %2638 = vmatprep.subr.bf16.mxu0 %v10633_v44  ;;  %v10712_v44 = vld [vmem:[%s15480_s1 + $0xfa8] ss:$16 sps:$4 sm:$0xff]  }
  0xc5   : > { %2628 = vmatpush1.bf16.msra.mxu1 %v10628_v9  ;;  %v10715_v9 = vld [vmem:[%s15480_s1 + $0xdc8] ss:$16 sps:$4 sm:$0xff]  }
  0xc6   : > { %2589 = vmatmul.mubr.bf16.vlgmr.msra.gmra.mrb[8].mxu0 %v12232_v10  ;;  %2679 = vmatprep.subr.bf16.mxu1 %v10636_v15  ;;  %v10640_v10 = vld [vmem:[%s15480_s1 + $0xe28] ss:$16 sps:$4 sm:$0xff]   ;;  %v10723_v15 = vld [vmem:[%s15480_s1 + $0xdec] ss:$16 sps:$4 sm:$0xff]  }
  0xc7   : > { %2639 = vmatpush1.bf16.msra.mxu0 %v10631_v45  ;;  %2670 = vmatprep.mubr.bf16.mxu0 %v12415_v57  ;;  %v10646_v57 = vld [vmem:[%s15480_s1 + $0xe48] ss:$16 sps:$4 sm:$0xff]   ;;  %v10720_v45 = vld [vmem:[%s15480_s1 + $0xfcc] ss:$16 sps:$4 sm:$0xff]  }
  0xc8   : > { %2640 = vmatprep.subr.bf16.mxu0 %v10639_v46  ;;  %2630 = vmatmul.mubr.bf16.vlgmr.msra.gmra.mrb[8].mxu1 %v12244_v16  ;;  %v10651_v16 = vld [vmem:[%s15480_s1 + $0xc6c] ss:$16 sps:$4 sm:$0xff]   ;;  %v10718_v46 = vld [vmem:[%s15480_s1 + $0xfc8] ss:$16 sps:$4 sm:$0xff]  }
  0xc9   : > { %2680 = vmatpush1.bf16.msra.mxu1 %v10634_v49  ;;  %2711 = vmatprep.mubr.bf16.mxu1 %v12420_v6  ;;  %v10649_v6 = vld [vmem:[%s15480_s1 + $0xc68] ss:$16 sps:$4 sm:$0xff]  }
  0xca   : > { %2681 = vmatprep.subr.bf16.mxu1 %v10642_v53  ;;  %v10721_v49 = vld [vmem:[%s15480_s1 + $0xde8] ss:$16 sps:$4 sm:$0xff]  }
  0xcb   : > { %2641 = vmatpush1.bf16.msra.mxu0 %v10637_v51  ;;  %v10726_v51 = vld [vmem:[%s15480_s1 + $0xfec] ss:$16 sps:$4 sm:$0xff]   ;;  %v10724_v53 = vld [vmem:[%s15480_s1 + $0xfe8] ss:$16 sps:$4 sm:$0xff]  }
  0xcc   : > { %2642 = vmatprep.subr.bf16.mxu0 %v10645_v54  ;;  %v10729_v54 = vld [vmem:[%s15480_s1 + $0x4] ss:$16 sps:$4 sm:$0xff]  }
  0xcd   : > { %2682 = vmatpush1.bf16.msra.mxu1 %v10640_v10  ;;  %v12859_v10 = vld [vmem:[#allocation2] sm:$0x33] }
  0xce   : > { %2683 = vmatprep.subr.bf16.mxu1 %v10648_v58  ;;  %v10732_v58 = vld [vmem:[%s15480_s1 + $0x204] ss:$16 sps:$4 sm:$0xff]  }
  0xcf   : > { %2643 = vmatpush1.bf16.msra.mxu0 %v10643_v55  ;;  %v10727_v55 = vld [vmem:[%s15480_s1] ss:$16 sps:$4 sm:$0xff]  }
  0xd0   : > { %2644 = vmatprep.subr.bf16.mxu0 %v10651_v16  ;;  %v12867_v16 = vld [vmem:[#allocation2 + $0x8] sm:$0x33] }
  0xd1   : > { %2684 = vmatpush1.bf16.msra.mxu1 %v10646_v57  ;;  %v10735_v57 = vld [vmem:[%s15480_s1 + $0x24] ss:$16 sps:$4 sm:$0xff]  }
  0xd2   : > { %2685 = vmatprep.subr.bf16.mxu1 %v10654_v59  ;;  %v10730_v59 = vld [vmem:[%s15480_s1 + $0x200] ss:$16 sps:$4 sm:$0xff]  }
  0xd3   : > { %2645 = vmatpush1.bf16.msra.mxu0 %v10649_v6  ;;  %v12874_v6 = vcombine.high %v12859_v10, %v12859_v10 }
  0xd4   : > { %2646 = vmatprep.subr.bf16.mxu0 %v10657_v60  ;;  %v12882_v60 = vcombine.high %v12867_v16, %v12867_v16 }
  0xd5   : > { %2686 = vmatpush1.bf16.msra.mxu1 %v10652_v56  ;;  %v10733_v56 = vld [vmem:[%s15480_s1 + $0x20] ss:$16 sps:$4 sm:$0xff]  }
  0xd6   : > { %2687 = vmatprep.subr.bf16.mxu1 %v10660_v62  ;;  %v10736_v62 = vld [vmem:[%s15480_s1 + $0x220] ss:$16 sps:$4 sm:$0xff]  }
  0xd7   : > { %2647 = vmatpush1.bf16.msra.mxu0 %v10655_v61  ;;  %v10738_v61 = vld [vmem:[%s15480_s1 + $0x224] ss:$16 sps:$4 sm:$0xff]  }
  0xd8   : > { %2648 = vmatprep.subr.bf16.mxu0 %v10663_v63  ;;  %v10739_v63 = vld [vmem:[%s15480_s1 + $0x40] ss:$16 sps:$4 sm:$0xff]  }
  0xd9   : > { %2688 = vmatpush1.bf16.msra.mxu1 %v10658_v0  ;;  %v10744_v0 = vld [vmem:[%s15480_s1 + $0x244] ss:$16 sps:$4 sm:$0xff]  }
  0xda   : > { %2689 = vmatprep.subr.bf16.mxu1 %v10666_v2  ;;  %v10745_v2 = vld [vmem:[%s15480_s1 + $0x60] ss:$16 sps:$4 sm:$0xff]  }
  0xdb   : > { %2649 = vmatpush1.bf16.msra.mxu0 %v10661_v1  ;;  %v10742_v1 = vld [vmem:[%s15480_s1 + $0x240] ss:$16 sps:$4 sm:$0xff]  }
  0xdc   : > { %2650 = vmatprep.subr.bf16.mxu0 %v10669_v3  ;;  %v10750_v3 = vld [vmem:[%s15480_s1 + $0x264] ss:$16 sps:$4 sm:$0xff]  }
  0xdd   : > { %2690 = vmatpush1.bf16.msra.mxu1 %v10664_v4  ;;  %v10753_v4 = vld [vmem:[%s15480_s1 + $0x84] ss:$16 sps:$4 sm:$0xff]  }
  0xde   : > { %2691 = vmatprep.subr.bf16.mxu1 %v10672_v7  ;;  %v10751_v7 = vld [vmem:[%s15480_s1 + $0x80] ss:$16 sps:$4 sm:$0xff]  }
  0xdf   : > { %2651 = vmatpush1.bf16.msra.mxu0 %v10667_v5  ;;  %v10748_v5 = vld [vmem:[%s15480_s1 + $0x260] ss:$16 sps:$4 sm:$0xff]  }
  0xe0   : > { %2652 = vmatprep.subr.bf16.mxu0 %v10675_v8  ;;  %v10756_v8 = vld [vmem:[%s15480_s1 + $0x284] ss:$16 sps:$4 sm:$0xff]  }
  0xe1   : > { %2692 = vmatpush1.bf16.msra.mxu1 %v10670_v11  ;;  %v10759_v11 = vld [vmem:[%s15480_s1 + $0xa4] ss:$16 sps:$4 sm:$0xff]  }
  0xe2   : > { %2693 = vmatprep.subr.bf16.mxu1 %v10678_v13  ;;  %v10757_v13 = vld [vmem:[%s15480_s1 + $0xa0] ss:$16 sps:$4 sm:$0xff]  }
  0xe3   : > { %2653 = vmatpush1.bf16.msra.mxu0 %v10673_v12  ;;  %v10754_v12 = vld [vmem:[%s15480_s1 + $0x280] ss:$16 sps:$4 sm:$0xff]  }
  0xe4   : > { %2654 = vmatprep.subr.bf16.mxu0 %v10681_v14  ;;  %v10762_v14 = vld [vmem:[%s15480_s1 + $0x2a4] ss:$16 sps:$4 sm:$0xff]  }
  0xe5   : > { %2694 = vmatpush1.bf16.msra.mxu1 %v10676_v17  ;;  %v10765_v17 = vld [vmem:[%s15480_s1 + $0xc4] ss:$16 sps:$4 sm:$0xff]  }
  0xe6   : > { %2695 = vmatprep.subr.bf16.mxu1 %v10684_v19 }
  0xe7   : > { %2655 = vmatpush1.bf16.msra.mxu0 %v10679_v18  ;;  %v10760_v18 = vld [vmem:[%s15480_s1 + $0x2a0] ss:$16 sps:$4 sm:$0xff]  }
  0xe8   : > { %2656 = vmatprep.subr.bf16.mxu0 %v10687_v20 }
  0xe9   : > { %2696 = vmatpush1.bf16.msra.mxu1 %v10682_v21 }
  0xea   : > { %2697 = vmatprep.subr.bf16.mxu1 %v10690_v23  ;;  %v10768_v23 = vld [vmem:[%s15480_s1 + $0x2c4] ss:$16 sps:$4 sm:$0xff]  }
  0xeb   : > { %2657 = vmatpush1.bf16.msra.mxu0 %v10685_v22  ;;  %v10763_v22 = vld [vmem:[%s15480_s1 + $0xc0] ss:$16 sps:$4 sm:$0xff]  }
  0xec   : > { %2658 = vmatprep.subr.bf16.mxu0 %v10693_v24 }
  0xed   : > { %2698 = vmatpush1.bf16.msra.mxu1 %v10688_v25 }
  0xee   : > { %2699 = vmatprep.subr.bf16.mxu1 %v10696_v27  ;;  %v10771_v27 = vld [vmem:[%s15480_s1 + $0xe4] ss:$16 sps:$4 sm:$0xff]  }
  0xef   : > { %2659 = vmatpush1.bf16.msra.mxu0 %v10691_v26  ;;  %v10766_v26 = vld [vmem:[%s15480_s1 + $0x2c0] ss:$16 sps:$4 sm:$0xff]  }
  0xf0   : > { %2660 = vmatprep.subr.bf16.mxu0 %v10699_v28 }
  0xf1   : > { %2700 = vmatpush1.bf16.msra.mxu1 %v10694_v29 }
  0xf2   : > { %2701 = vmatprep.subr.bf16.mxu1 %v10702_v31 }
  0xf3   : > { %2661 = vmatpush1.bf16.msra.mxu0 %v10697_v30 }
  0xf4   : > { %2662 = vmatprep.subr.bf16.mxu0 %v10705_v33 }
  0xf5   : > { %2702 = vmatpush1.bf16.msra.mxu1 %v10700_v34  ;;  %v10769_v34 = vld [vmem:[%s15480_s1 + $0xe0] ss:$16 sps:$4 sm:$0xff]  }
  0xf6   : > { %2703 = vmatprep.subr.bf16.mxu1 %v10708_v37  ;;  %v10777_v37 = vld [vmem:[%s15480_s1 + $0x104] ss:$16 sps:$4 sm:$0xff]  }
  0xf7   : > { %2663 = vmatpush1.bf16.msra.mxu0 %v10703_v35  ;;  %v10774_v35 = vld [vmem:[%s15480_s1 + $0x2e4] ss:$16 sps:$4 sm:$0xff]  }
  0xf8   : > { %2664 = vmatprep.subr.bf16.mxu0 %v10711_v38  ;;  %v10772_v38 = vld [vmem:[%s15480_s1 + $0x2e0] ss:$16 sps:$4 sm:$0xff]  }
  0xf9   : > { %2704 = vmatpush1.bf16.msra.mxu1 %v10706_v39  ;;  %v10775_v39 = vld [vmem:[%s15480_s1 + $0x100] ss:$16 sps:$4 sm:$0xff]  }
  0xfa   : > { %2705 = vmatprep.subr.bf16.mxu1 %v10714_v42  ;;  %v10783_v42 = vld [vmem:[%s15480_s1 + $0x124] ss:$16 sps:$4 sm:$0xff]  }
  0xfb   : > { %2665 = vmatpush1.bf16.msra.mxu0 %v10709_v41  ;;  %v10780_v41 = vld [vmem:[%s15480_s1 + $0x304] ss:$16 sps:$4 sm:$0xff]  }
  0xfc   : > { %2666 = vmatprep.subr.bf16.mxu0 %v10717_v43  ;;  %v10778_v43 = vld [vmem:[%s15480_s1 + $0x300] ss:$16 sps:$4 sm:$0xff]  }
  0xfd   : > { %2706 = vmatpush1.bf16.msra.mxu1 %v10712_v44  ;;  %v10781_v44 = vld [vmem:[%s15480_s1 + $0x120] ss:$16 sps:$4 sm:$0xff]  }
  0xfe   : > { %2707 = vmatprep.subr.bf16.mxu1 %v10720_v45  ;;  %v10789_v45 = vld [vmem:[%s15480_s1 + $0x144] ss:$16 sps:$4 sm:$0xff]  }
  0xff   : > { %2667 = vmatpush1.bf16.msra.mxu0 %v10715_v9  ;;  %v10786_v9 = vld [vmem:[%s15480_s1 + $0x324] ss:$16 sps:$4 sm:$0xff]  }
 0x100   : > { %2668 = vmatprep.subr.bf16.mxu0 %v10723_v15  ;;  %v10784_v15 = vld [vmem:[%s15480_s1 + $0x320] ss:$16 sps:$4 sm:$0xff]  }
 0x101   : > { %2708 = vmatpush1.bf16.msra.mxu1 %v10718_v46  ;;  %v10787_v46 = vld [vmem:[%s15480_s1 + $0x140] ss:$16 sps:$4 sm:$0xff]  }
 0x102   : > { %2709 = vmatprep.subr.bf16.mxu1 %v10726_v51  ;;  %v10795_v51 = vld [vmem:[%s15480_s1 + $0x164] ss:$16 sps:$4 sm:$0xff]  }
 0x103   : > { %2669 = vmatpush1.bf16.msra.mxu0 %v10721_v49  ;;  %v10792_v49 = vld [vmem:[%s15480_s1 + $0x344] ss:$16 sps:$4 sm:$0xff]  }
 0x104   : > { %4028 = vmatprep.subr.bf16.mxu0 %v10729_v54  ;;  %v10793_v54 = vld [vmem:[%s15480_s1 + $0x160] ss:$16 sps:$4 sm:$0xff]  }
 0x105   : > { %2710 = vmatpush1.bf16.msra.mxu1 %v10724_v53  ;;  %v10790_v53 = vld [vmem:[%s15480_s1 + $0x340] ss:$16 sps:$4 sm:$0xff]  }
 0x106   : > { %2671 = vmatmul.mubr.bf16.vlgmr.msra.gmra.mrb[12].mxu0 %v12463_v32  ;;  %4069 = vmatprep.subr.bf16.mxu1 %v10732_v58  ;;  %v10741_v32 = vld [vmem:[%s15480_s1 + $0x44] ss:$16 sps:$4 sm:$0xff]  }
 0x107   : > { %4029 = vmatpush1.bf16.msra.mxu0 %v10727_v55  ;;  %4060 = vmatprep.mubr.bf16.mxu0 %v12874_v6  ;;  %v10798_v55 = vld [vmem:[%s15480_s1 + $0x364] ss:$16 sps:$4 sm:$0xff]  }
 0x108   : > { %4030 = vmatprep.subr.bf16.mxu0 %v10735_v57  ;;  %2712 = vmatmul.mubr.bf16.vlgmr.msra.gmra.mrb[12].mxu1 %v12474_v36  ;;  %v10747_v36 = vld [vmem:[%s15480_s1 + $0x64] ss:$16 sps:$4 sm:$0xff]   ;;  %v10796_v57 = vld [vmem:[%s15480_s1 + $0x360] ss:$16 sps:$4 sm:$0xff]  }
 0x109   : > { %4070 = vmatpush1.bf16.msra.mxu1 %v10730_v59  ;;  %4101 = vmatprep.mubr.bf16.mxu1 %v12882_v60  ;;  %v10801_v58 = vld [vmem:[%s15480_s1 + $0x184] ss:$16 sps:$4 sm:$0xff]   ;;  %v10799_v59 = vld [vmem:[%s15480_s1 + $0x180] ss:$16 sps:$4 sm:$0xff]  }
 0x10a   : > { %4071 = vmatprep.subr.bf16.mxu1 %v10738_v61  ;;  %v10807_v61 = vld [vmem:[%s15480_s1 + $0x1a4] ss:$16 sps:$4 sm:$0xff]  }
 0x10b   : > { %4031 = vmatpush1.bf16.msra.mxu0 %v10733_v56  ;;  %v10804_v56 = vld [vmem:[%s15480_s1 + $0x384] ss:$16 sps:$4 sm:$0xff]  }
 0x10c   : > { %4032 = vmatprep.subr.bf16.mxu0 %v10741_v32  ;;  %v10802_v32 = vld [vmem:[%s15480_s1 + $0x380] ss:$16 sps:$4 sm:$0xff]  }
 0x10d   : > { %4072 = vmatpush1.bf16.msra.mxu1 %v10736_v62  ;;  %v10805_v62 = vld [vmem:[%s15480_s1 + $0x1a0] ss:$16 sps:$4 sm:$0xff]  }
 0x10e   : > { %4073 = vmatprep.subr.bf16.mxu1 %v10744_v0  ;;  %v10813_v0 = vld [vmem:[%s15480_s1 + $0x1c4] ss:$16 sps:$4 sm:$0xff]  }
 0x10f   : > { %4033 = vmatpush1.bf16.msra.mxu0 %v10739_v63  ;;  %v10810_v63 = vld [vmem:[%s15480_s1 + $0x3a4] ss:$16 sps:$4 sm:$0xff]  }
 0x110   : > { %4034 = vmatprep.subr.bf16.mxu0 %v10747_v36  ;;  %v10808_v36 = vld [vmem:[%s15480_s1 + $0x3a0] ss:$16 sps:$4 sm:$0xff]  }
 0x111   : > { %4074 = vmatpush1.bf16.msra.mxu1 %v10742_v1  ;;  %v10811_v1 = vld [vmem:[%s15480_s1 + $0x1c0] ss:$16 sps:$4 sm:$0xff]  }
 0x112   : > { %4075 = vmatprep.subr.bf16.mxu1 %v10750_v3  ;;  %v10819_v3 = vld [vmem:[%s15480_s1 + $0x1e4] ss:$16 sps:$4 sm:$0xff]  }
 0x113   : > { %4035 = vmatpush1.bf16.msra.mxu0 %v10745_v2  ;;  %v10816_v2 = vld [vmem:[%s15480_s1 + $0x3c4] ss:$16 sps:$4 sm:$0xff]  }
 0x114   : > { %4036 = vmatprep.subr.bf16.mxu0 %v10753_v4  ;;  %v10814_v4 = vld [vmem:[%s15480_s1 + $0x3c0] ss:$16 sps:$4 sm:$0xff]  }
 0x115   : > { %4076 = vmatpush1.bf16.msra.mxu1 %v10748_v5  ;;  %v10817_v5 = vld [vmem:[%s15480_s1 + $0x1e0] ss:$16 sps:$4 sm:$0xff]  }
 0x116   : > { %4077 = vmatprep.subr.bf16.mxu1 %v10756_v8  ;;  %v10829_v8 = vld [vmem:[%s15480_s1 + $0x404] ss:$16 sps:$4 sm:$0xff]  }
 0x117   : > { %4037 = vmatpush1.bf16.msra.mxu0 %v10751_v7  ;;  %v10822_v7 = vld [vmem:[%s15480_s1 + $0x3e4] ss:$16 sps:$4 sm:$0xff]  }
 0x118   : > { %4038 = vmatprep.subr.bf16.mxu0 %v10759_v11  ;;  %v13068_v11 = vld [vmem:[#allocation2 + $0x10] sm:$0x33] }
 0x119   : > { %v2426_v19 = vpop.f32.mrb[0].mxu0  ;;  %4078 = vmatpush1.bf16.msra.mxu1 %v10754_v12  ;;  %v10820_v12 = vld [vmem:[%s15480_s1 + $0x3e0] ss:$16 sps:$4 sm:$0xff]  }
 0x11a   : > { %v2428_v20 = vpop.f32.mrb[1].mxu0  ;;  %4079 = vmatprep.subr.bf16.mxu1 %v10762_v14  ;;  %v2467_v24 = vpop.f32.mrb[0].mxu1  ;;  %v10827_v14 = vld [vmem:[%s15480_s1 + $0x400] ss:$16 sps:$4 sm:$0xff]  }
 0x11b   : > { %v2430_v21 = vpop.f32.mrb[2].mxu0  ;;  %4039 = vmatpush1.bf16.msra.mxu0 %v10757_v13  ;;  %v12959_v28 = vadd.f32 %v2467_v24, %v2426_v19  ;;  %v2469_v29 = vpop.f32.mrb[1].mxu1  ;;  %v13075_v13 = vcombine.low %v12859_v10, %v12859_v10  ;;  %v13086_v19 = vld [vmem:[#allocation2 + $0x18] sm:$0x33]  ;;  %v10830_v10 = vld [vmem:[%s15480_s1 + $0x600] ss:$16 sps:$4 sm:$0xff]  }
 0x11c   : > { %v2431_v25 = vpop.f32.mrb[3].mxu0  ;;  %4040 = vmatprep.subr.bf16.mxu0 %v10765_v17  ;;  %v12961_v30 = vadd.f32 %v2469_v29, %v2428_v20  ;;  %v2471_v31 = vpop.f32.mrb[2].mxu1  ;;  %v10832_v17 = vld [vmem:[%s15480_s1 + $0x604] ss:$16 sps:$4 sm:$0xff]   ;;  %v13093_v20 = vcombine.high %v13068_v11, %v13068_v11  ;;  %v13097_v21 = vcombine.low %v12867_v16, %v12867_v16 }
 0x11d   : > { %4080 = vmatpush1.bf16.msra.mxu1 %v10760_v18  ;;  %v2472_v33 = vpop.f32.mrb[3].mxu1  ;;  %v10835_v18 = vld [vmem:[%s15480_s1 + $0x424] ss:$16 sps:$4 sm:$0xff]   ;;  %v10836_v25 = vld [vmem:[%s15480_s1 + $0x620] ss:$16 sps:$4 sm:$0xff]  }
 0x11e   : > { %4081 = vmatprep.subr.bf16.mxu1 %v10768_v23  ;;  %v10833_v23 = vld [vmem:[%s15480_s1 + $0x420] ss:$16 sps:$4 sm:$0xff]   ;;  %v10838_v24 = vld [vmem:[%s15480_s1 + $0x624] ss:$16 sps:$4 sm:$0xff]  }
 0x11f   : > { %4041 = vmatpush1.bf16.msra.mxu0 %v10763_v22  ;;  %v13102_v22 = vcombine.high %v13086_v19, %v13086_v19  ;;  %v10841_v16 = vld [vmem:[%s15480_s1 + $0x444] ss:$16 sps:$4 sm:$0xff]   ;;  %v10842_v31 = vld [vmem:[%s15480_s1 + $0x640] ss:$16 sps:$4 sm:$0xff]  }
 0x120   : > { %4042 = vmatprep.subr.bf16.mxu0 %v10771_v27  ;;  %v10844_v27 = vld [vmem:[%s15480_s1 + $0x644] ss:$16 sps:$4 sm:$0xff]   ;;  %v10845_v33 = vld [vmem:[%s15480_s1 + $0x460] ss:$16 sps:$4 sm:$0xff]  }
 0x121   : > { %4082 = vmatpush1.bf16.msra.mxu1 %v10766_v26  ;;  %v10839_v26 = vld [vmem:[%s15480_s1 + $0x440] ss:$16 sps:$4 sm:$0xff]   ;;  %v10847_v29 = vld [vmem:[%s15480_s1 + $0x464] ss:$16 sps:$4 sm:$0xff]  }
 0x122   : > { %4083 = vmatprep.subr.bf16.mxu1 %v10774_v35  ;;  %v10853_v35 = vld [vmem:[%s15480_s1 + $0x484] ss:$16 sps:$4 sm:$0xff]  }
 0x123   : > { %4043 = vmatpush1.bf16.msra.mxu0 %v10769_v34  ;;  %v10850_v34 = vld [vmem:[%s15480_s1 + $0x664] ss:$16 sps:$4 sm:$0xff]  }
 0x124   : > { %4044 = vmatprep.subr.bf16.mxu0 %v10777_v37  ;;  %v10848_v37 = vld [vmem:[%s15480_s1 + $0x660] ss:$16 sps:$4 sm:$0xff]  }
 0x125   : > { %4084 = vmatpush1.bf16.msra.mxu1 %v10772_v38  ;;  %v10851_v38 = vld [vmem:[%s15480_s1 + $0x480] ss:$16 sps:$4 sm:$0xff]  }
 0x126   : > { %4085 = vmatprep.subr.bf16.mxu1 %v10780_v41  ;;  %v10859_v41 = vld [vmem:[%s15480_s1 + $0x4a4] ss:$16 sps:$4 sm:$0xff]  }
 0x127   : > { %4045 = vmatpush1.bf16.msra.mxu0 %v10775_v39  ;;  %v10856_v39 = vld [vmem:[%s15480_s1 + $0x684] ss:$16 sps:$4 sm:$0xff]  }
 0x128   : > { %4046 = vmatprep.subr.bf16.mxu0 %v10783_v42  ;;  %v10854_v42 = vld [vmem:[%s15480_s1 + $0x680] ss:$16 sps:$4 sm:$0xff]  }
 0x129   : > { %4086 = vmatpush1.bf16.msra.mxu1 %v10778_v43  ;;  %v10857_v43 = vld [vmem:[%s15480_s1 + $0x4a0] ss:$16 sps:$4 sm:$0xff]  }
 0x12a   : > { %4087 = vmatprep.subr.bf16.mxu1 %v10786_v9  ;;  %v10865_v9 = vld [vmem:[%s15480_s1 + $0x4c4] ss:$16 sps:$4 sm:$0xff]  }
 0x12b   : > { %4047 = vmatpush1.bf16.msra.mxu0 %v10781_v44  ;;  %v10862_v44 = vld [vmem:[%s15480_s1 + $0x6a4] ss:$16 sps:$4 sm:$0xff]  }
 0x12c   : > { %4048 = vmatprep.subr.bf16.mxu0 %v10789_v45  ;;  %v10860_v45 = vld [vmem:[%s15480_s1 + $0x6a0] ss:$16 sps:$4 sm:$0xff]  }
 0x12d   : > { %4088 = vmatpush1.bf16.msra.mxu1 %v10784_v15 }
 0x12e   : > { %4089 = vmatprep.subr.bf16.mxu1 %v10792_v49 }
 0x12f   : > { %4049 = vmatpush1.bf16.msra.mxu0 %v10787_v46 }
 0x130   : > { %4050 = vmatprep.subr.bf16.mxu0 %v10795_v51 }
 0x131   : > { %4090 = vmatpush1.bf16.msra.mxu1 %v10790_v53 }
 0x132   : > { %4091 = vmatprep.subr.bf16.mxu1 %v10798_v55  ;;  %v10868_v55 = vld [vmem:[%s15480_s1 + $0x6c4] ss:$16 sps:$4 sm:$0xff]  }
 0x133   : > { %4051 = vmatpush1.bf16.msra.mxu0 %v10793_v54  ;;  %v10863_v54 = vld [vmem:[%s15480_s1 + $0x4c0] ss:$16 sps:$4 sm:$0xff]  }
 0x134   : > { %4052 = vmatprep.subr.bf16.mxu0 %v10801_v58 }
 0x135   : > { %4092 = vmatpush1.bf16.msra.mxu1 %v10796_v57 }
 0x136   : > { %4093 = vmatprep.subr.bf16.mxu1 %v10804_v56 }
 0x137   : > { %4053 = vmatpush1.bf16.msra.mxu0 %v10799_v59 }
 0x138   : > { %4054 = vmatprep.subr.bf16.mxu0 %v10807_v61 }
 0x139   : > { %4094 = vmatpush1.bf16.msra.mxu1 %v10802_v32 }
 0x13a   : > { %4095 = vmatprep.subr.bf16.mxu1 %v10810_v63  ;;  %v10869_v63 = vld [vmem:[%s15480_s1 + $0x4e0] ss:$16 sps:$4 sm:$0xff]  }
 0x13b   : > { %4055 = vmatpush1.bf16.msra.mxu0 %v10805_v62 }
 0x13c   : > { %4056 = vmatprep.subr.bf16.mxu0 %v10813_v0  ;;  %v10874_v0 = vld [vmem:[%s15480_s1 + $0x6e4] ss:$16 sps:$4 sm:$0xff]  }
 0x13d   : > { %4096 = vmatpush1.bf16.msra.mxu1 %v10808_v36  ;;  %v10877_v36 = vld [vmem:[%s15480_s1 + $0x504] ss:$16 sps:$4 sm:$0xff]  }
 0x13e   : > { %4097 = vmatprep.subr.bf16.mxu1 %v10816_v2  ;;  %v10875_v2 = vld [vmem:[%s15480_s1 + $0x500] ss:$16 sps:$4 sm:$0xff]  }
 0x13f   : > { %4057 = vmatpush1.bf16.msra.mxu0 %v10811_v1  ;;  %v10872_v1 = vld [vmem:[%s15480_s1 + $0x6e0] ss:$16 sps:$4 sm:$0xff]  }
 0x140   : > { %4058 = vmatprep.subr.bf16.mxu0 %v10819_v3  ;;  %v10880_v3 = vld [vmem:[%s15480_s1 + $0x704] ss:$16 sps:$4 sm:$0xff]  }
 0x141   : > { %4098 = vmatpush1.bf16.msra.mxu1 %v10814_v4  ;;  %v10883_v4 = vld [vmem:[%s15480_s1 + $0x524] ss:$16 sps:$4 sm:$0xff]  }
 0x142   : > { %4099 = vmatprep.subr.bf16.mxu1 %v10822_v7  ;;  %v10881_v7 = vld [vmem:[%s15480_s1 + $0x520] ss:$16 sps:$4 sm:$0xff]  }
 0x143   : > { %4059 = vmatpush1.bf16.msra.mxu0 %v10817_v5  ;;  %v10878_v5 = vld [vmem:[%s15480_s1 + $0x700] ss:$16 sps:$4 sm:$0xff]  }
 0x144   : > { %4110 = vmatprep.subr.bf16.mxu0 %v10829_v8  ;;  %v10886_v8 = vld [vmem:[%s15480_s1 + $0x724] ss:$16 sps:$4 sm:$0xff]  }
 0x145   : > { %4100 = vmatpush1.bf16.msra.mxu1 %v10820_v12  ;;  %v10889_v12 = vld [vmem:[%s15480_s1 + $0x544] ss:$16 sps:$4 sm:$0xff]  }
 0x146   : > { %4061 = vmatmul.mubr.bf16.vlgmr.msra.gmra.mrb[16].mxu0 %v13075_v13  ;;  %4151 = vmatprep.subr.bf16.mxu1 %v10832_v17  ;;  %v10887_v17 = vld [vmem:[%s15480_s1 + $0x540] ss:$16 sps:$4 sm:$0xff]  }
 0x147   : > { %4111 = vmatpush1.bf16.msra.mxu0 %v10827_v14  ;;  %4142 = vmatprep.mubr.bf16.mxu0 %v13093_v20  ;;  %v10884_v14 = vld [vmem:[%s15480_s1 + $0x720] ss:$16 sps:$4 sm:$0xff]  }
 0x148   : > { %4112 = vmatprep.subr.bf16.mxu0 %v10835_v18  ;;  %4102 = vmatmul.mubr.bf16.vlgmr.msra.gmra.mrb[16].mxu1 %v13097_v21  ;;  %v10892_v18 = vld [vmem:[%s15480_s1 + $0x744] ss:$16 sps:$4 sm:$0xff]  }
 0x149   : > { %4152 = vmatpush1.bf16.msra.mxu1 %v10830_v10  ;;  %4183 = vmatprep.mubr.bf16.mxu1 %v13102_v22  ;;  %v10895_v10 = vld [vmem:[%s15480_s1 + $0x564] ss:$16 sps:$4 sm:$0xff]  }
 0x14a   : > { %4153 = vmatprep.subr.bf16.mxu1 %v10838_v24  ;;  %v10893_v24 = vld [vmem:[%s15480_s1 + $0x560] ss:$16 sps:$4 sm:$0xff]  }
 0x14b   : > { %4113 = vmatpush1.bf16.msra.mxu0 %v10833_v23  ;;  %v10890_v23 = vld [vmem:[%s15480_s1 + $0x740] ss:$16 sps:$4 sm:$0xff]  }
 0x14c   : > { %4114 = vmatprep.subr.bf16.mxu0 %v10841_v16  ;;  %v10898_v16 = vld [vmem:[%s15480_s1 + $0x764] ss:$16 sps:$4 sm:$0xff]  }
 0x14d   : > { %4154 = vmatpush1.bf16.msra.mxu1 %v10836_v25  ;;  %v10901_v25 = vld [vmem:[%s15480_s1 + $0x584] ss:$16 sps:$4 sm:$0xff]  }
 0x14e   : > { %4155 = vmatprep.subr.bf16.mxu1 %v10844_v27  ;;  %v10899_v27 = vld [vmem:[%s15480_s1 + $0x580] ss:$16 sps:$4 sm:$0xff]  }
 0x14f   : > { %4115 = vmatpush1.bf16.msra.mxu0 %v10839_v26  ;;  %v10896_v26 = vld [vmem:[%s15480_s1 + $0x760] ss:$16 sps:$4 sm:$0xff]  }
 0x150   : > { %4116 = vmatprep.subr.bf16.mxu0 %v10847_v29  ;;  %v10904_v29 = vld [vmem:[%s15480_s1 + $0x784] ss:$16 sps:$4 sm:$0xff]  }
 0x151   : > { %4156 = vmatpush1.bf16.msra.mxu1 %v10842_v31  ;;  %v10907_v31 = vld [vmem:[%s15480_s1 + $0x5a4] ss:$16 sps:$4 sm:$0xff]  }
 0x152   : > { %4157 = vmatprep.subr.bf16.mxu1 %v10850_v34  ;;  %v10905_v34 = vld [vmem:[%s15480_s1 + $0x5a0] ss:$16 sps:$4 sm:$0xff]  }
 0x153   : > { %4117 = vmatpush1.bf16.msra.mxu0 %v10845_v33  ;;  %v10902_v33 = vld [vmem:[%s15480_s1 + $0x780] ss:$16 sps:$4 sm:$0xff]  }
 0x154   : > { %4118 = vmatprep.subr.bf16.mxu0 %v10853_v35  ;;  %v10910_v35 = vld [vmem:[%s15480_s1 + $0x7a4] ss:$16 sps:$4 sm:$0xff]  }
 0x155   : > { %4158 = vmatpush1.bf16.msra.mxu1 %v10848_v37  ;;  %v10913_v37 = vld [vmem:[%s15480_s1 + $0x5c4] ss:$16 sps:$4 sm:$0xff]  }
 0x156   : > { %4159 = vmatprep.subr.bf16.mxu1 %v10856_v39  ;;  %v10911_v39 = vld [vmem:[%s15480_s1 + $0x5c0] ss:$16 sps:$4 sm:$0xff]  }
 0x157   : > { %4119 = vmatpush1.bf16.msra.mxu0 %v10851_v38  ;;  %v10908_v38 = vld [vmem:[%s15480_s1 + $0x7a0] ss:$16 sps:$4 sm:$0xff]  }
 0x158   : > { %4120 = vmatprep.subr.bf16.mxu0 %v10859_v41  ;;  %v10916_v41 = vld [vmem:[%s15480_s1 + $0x7c4] ss:$16 sps:$4 sm:$0xff]  }
 0x159   : > { %v2508_v15 = vpop.f32.mrb[4].mxu0  ;;  %4160 = vmatpush1.bf16.msra.mxu1 %v10854_v42  ;;  %v10919_v42 = vld [vmem:[%s15480_s1 + $0x5e4] ss:$16 sps:$4 sm:$0xff]  }
 0x15a   : > { %v2509_v46 = vadd.f32 %v2508_v15, %v12959_v28  ;;  %v2510_v49 = vpop.f32.mrb[5].mxu0  ;;  %4161 = vmatprep.subr.bf16.mxu1 %v10862_v44  ;;  %v10866_v28 = vld [vmem:[%s15480_s1 + $0x6c0] ss:$16 sps:$4 sm:$0xff]  }
 0x15b   : > { %v2511_v51 = vadd.f32 %v2510_v49, %v12961_v30  ;;  %v2512_v53 = vpop.f32.mrb[6].mxu0  ;;  %4121 = vmatpush1.bf16.msra.mxu0 %v10857_v43  ;;  %v2549_v58 = vpop.f32.mrb[4].mxu1  ;;  %v10871_v30 = vld [vmem:[%s15480_s1 + $0x4e4] ss:$16 sps:$4 sm:$0xff]   ;;  %v10914_v43 = vld [vmem:[%s15480_s1 + $0x7c0] ss:$16 sps:$4 sm:$0xff]  }
 0x15c   : > { %v2513_v57 = vpop.f32.mrb[7].mxu0  ;;  %4122 = vmatprep.subr.bf16.mxu0 %v10865_v9  ;;  %v13181_v59 = vadd.f32 %v2549_v58, %v2509_v46  ;;  %v2551_v56 = vpop.f32.mrb[5].mxu1  ;;  %v10917_v44 = vld [vmem:[%s15480_s1 + $0x5e0] ss:$16 sps:$4 sm:$0xff]   ;;  %v10922_v9 = vld [vmem:[%s15480_s1 + $0x7e4] ss:$16 sps:$4 sm:$0xff]   ;;  %v13295_v46 = vcombine.low %v13068_v11, %v13068_v11 }
 0x15d   : > { %v13183_v61 = vadd.f32 %v2551_v56, %v2511_v51  ;;  %v2553_v32 = vpop.f32.mrb[6].mxu1  ;;  %4162 = vmatpush1.bf16.msra.mxu1 %v10860_v45  ;;  %v10929_v45 = vld [vmem:[%s15480_s1 + $0xc] ss:$16 sps:$4 sm:$0xff]   ;;  %v10920_v15 = vld [vmem:[%s15480_s1 + $0x7e0] ss:$16 sps:$4 sm:$0xff]  }
 0x15e   : > { %v2554_v62 = vpop.f32.mrb[7].mxu1  ;;  %4163 = vmatprep.subr.bf16.mxu1 %v10868_v55  ;;  %v10927_v49 = vld [vmem:[%s15480_s1 + $0x8] ss:$16 sps:$4 sm:$0xff]   ;;  %v10932_v51 = vld [vmem:[%s15480_s1 + $0x20c] ss:$16 sps:$4 sm:$0xff]  }
 0x15f   : > { %4123 = vmatpush1.bf16.msra.mxu0 %v10863_v54  ;;  %v10935_v53 = vld [vmem:[%s15480_s1 + $0x2c] ss:$16 sps:$4 sm:$0xff]   ;;  %v10930_v11 = vld [vmem:[%s15480_s1 + $0x208] ss:$16 sps:$4 sm:$0xff]   ;;  %v13311_v54 = vcombine.low %v13086_v19, %v13086_v19 }
 0x160   : > { %4124 = vmatprep.subr.bf16.mxu0 %v10871_v30  ;;  %v10933_v55 = vld [vmem:[%s15480_s1 + $0x28] ss:$16 sps:$4 sm:$0xff]   ;;  %v10938_v58 = vld [vmem:[%s15480_s1 + $0x22c] ss:$16 sps:$4 sm:$0xff]  }
 0x161   : > { %4164 = vmatpush1.bf16.msra.mxu1 %v10866_v28  ;;  %v10941_v57 = vld [vmem:[%s15480_s1 + $0x4c] ss:$16 sps:$4 sm:$0xff]   ;;  %v10936_v19 = vld [vmem:[%s15480_s1 + $0x228] ss:$16 sps:$4 sm:$0xff]  }
 0x162   : > { %4165 = vmatprep.subr.bf16.mxu1 %v10874_v0  ;;  %v10939_v28 = vld [vmem:[%s15480_s1 + $0x48] ss:$16 sps:$4 sm:$0xff]   ;;  %v10944_v30 = vld [vmem:[%s15480_s1 + $0x24c] ss:$16 sps:$4 sm:$0xff]  }
 0x163   : > { %4125 = vmatpush1.bf16.msra.mxu0 %v10869_v63  ;;  %v10942_v56 = vld [vmem:[%s15480_s1 + $0x248] ss:$16 sps:$4 sm:$0xff]   ;;  %v10953_v62 = vld [vmem:[%s15480_s1 + $0x8c] ss:$16 sps:$4 sm:$0xff]  }
 0x164   : > { %4126 = vmatprep.subr.bf16.mxu0 %v10877_v36  ;;  %v10945_v32 = vld [vmem:[%s15480_s1 + $0x68] ss:$16 sps:$4 sm:$0xff]   ;;  %v10956_v36 = vld [vmem:[%s15480_s1 + $0x28c] ss:$16 sps:$4 sm:$0xff]  }
 0x165   : > { %4166 = vmatpush1.bf16.msra.mxu1 %v10872_v1  ;;  %v10948_v63 = vld [vmem:[%s15480_s1 + $0x268] ss:$16 sps:$4 sm:$0xff]   ;;  %v10959_v1 = vld [vmem:[%s15480_s1 + $0xac] ss:$16 sps:$4 sm:$0xff]  }
 0x166   : > { %4167 = vmatprep.subr.bf16.mxu1 %v10880_v3  ;;  %v10951_v0 = vld [vmem:[%s15480_s1 + $0x88] ss:$16 sps:$4 sm:$0xff]  }
 0x167   : > { %4127 = vmatpush1.bf16.msra.mxu0 %v10875_v2  ;;  %v10954_v2 = vld [vmem:[%s15480_s1 + $0x288] ss:$16 sps:$4 sm:$0xff]  }
 0x168   : > { %4128 = vmatprep.subr.bf16.mxu0 %v10883_v4  ;;  %v10957_v3 = vld [vmem:[%s15480_s1 + $0xa8] ss:$16 sps:$4 sm:$0xff]   ;;  %v10962_v4 = vld [vmem:[%s15480_s1 + $0x2ac] ss:$16 sps:$4 sm:$0xff]  }
 0x169   : > { %4168 = vmatpush1.bf16.msra.mxu1 %v10878_v5  ;;  %v10965_v5 = vld [vmem:[%s15480_s1 + $0xcc] ss:$16 sps:$4 sm:$0xff]  }
 0x16a   : > { %4169 = vmatprep.subr.bf16.mxu1 %v10886_v8 }
 0x16b   : > { %4129 = vmatpush1.bf16.msra.mxu0 %v10881_v7  ;;  %v10960_v7 = vld [vmem:[%s15480_s1 + $0x2a8] ss:$16 sps:$4 sm:$0xff]  }
 0x16c   : > { %4130 = vmatprep.subr.bf16.mxu0 %v10889_v12 }
 0x16d   : > { %4170 = vmatpush1.bf16.msra.mxu1 %v10884_v14 }
 0x16e   : > { %4171 = vmatprep.subr.bf16.mxu1 %v10892_v18  ;;  %v10968_v18 = vld [vmem:[%s15480_s1 + $0x2cc] ss:$16 sps:$4 sm:$0xff]  }
 0x16f   : > { %4131 = vmatpush1.bf16.msra.mxu0 %v10887_v17  ;;  %v10963_v17 = vld [vmem:[%s15480_s1 + $0xc8] ss:$16 sps:$4 sm:$0xff]  }
 0x170   : > { %4132 = vmatprep.subr.bf16.mxu0 %v10895_v10 }
 0x171   : > { %4172 = vmatpush1.bf16.msra.mxu1 %v10890_v23 }
 0x172   : > { %4173 = vmatprep.subr.bf16.mxu1 %v10898_v16  ;;  %v10971_v16 = vld [vmem:[%s15480_s1 + $0xec] ss:$16 sps:$4 sm:$0xff]  }
 0x173   : > { %4133 = vmatpush1.bf16.msra.mxu0 %v10893_v24  ;;  %v10966_v24 = vld [vmem:[%s15480_s1 + $0x2c8] ss:$16 sps:$4 sm:$0xff]  }
 0x174   : > { %4134 = vmatprep.subr.bf16.mxu0 %v10901_v25 }
 0x175   : > { %4174 = vmatpush1.bf16.msra.mxu1 %v10896_v26 }
 0x176   : > { %4175 = vmatprep.subr.bf16.mxu1 %v10904_v29 }
 0x177   : > { %4135 = vmatpush1.bf16.msra.mxu0 %v10899_v27 }
 0x178   : > { %4136 = vmatprep.subr.bf16.mxu0 %v10907_v31 }
 0x179   : > { %4176 = vmatpush1.bf16.msra.mxu1 %v10902_v33  ;;  %v10969_v33 = vld [vmem:[%s15480_s1 + $0xe8] ss:$16 sps:$4 sm:$0xff]  }
 0x17a   : > { %4177 = vmatprep.subr.bf16.mxu1 %v10910_v35  ;;  %v10977_v35 = vld [vmem:[%s15480_s1 + $0x10c] ss:$16 sps:$4 sm:$0xff]  }
 0x17b   : > { %4137 = vmatpush1.bf16.msra.mxu0 %v10905_v34  ;;  %v10974_v34 = vld [vmem:[%s15480_s1 + $0x2ec] ss:$16 sps:$4 sm:$0xff]  }
 0x17c   : > { %4138 = vmatprep.subr.bf16.mxu0 %v10913_v37  ;;  %v10972_v37 = vld [vmem:[%s15480_s1 + $0x2e8] ss:$16 sps:$4 sm:$0xff]  }
 0x17d   : > { %4178 = vmatpush1.bf16.msra.mxu1 %v10908_v38  ;;  %v10975_v38 = vld [vmem:[%s15480_s1 + $0x108] ss:$16 sps:$4 sm:$0xff]  }
 0x17e   : > { %4179 = vmatprep.subr.bf16.mxu1 %v10916_v41  ;;  %v10983_v41 = vld [vmem:[%s15480_s1 + $0x12c] ss:$16 sps:$4 sm:$0xff]  }
 0x17f   : > { %4139 = vmatpush1.bf16.msra.mxu0 %v10911_v39  ;;  %v10980_v39 = vld [vmem:[%s15480_s1 + $0x30c] ss:$16 sps:$4 sm:$0xff]  }
 0x180   : > { %4140 = vmatprep.subr.bf16.mxu0 %v10919_v42  ;;  %v10978_v42 = vld [vmem:[%s15480_s1 + $0x308] ss:$16 sps:$4 sm:$0xff]  }
 0x181   : > { %4180 = vmatpush1.bf16.msra.mxu1 %v10914_v43  ;;  %v10981_v43 = vld [vmem:[%s15480_s1 + $0x128] ss:$16 sps:$4 sm:$0xff]  }
 0x182   : > { %4181 = vmatprep.subr.bf16.mxu1 %v10922_v9  ;;  %v10989_v9 = vld [vmem:[%s15480_s1 + $0x14c] ss:$16 sps:$4 sm:$0xff]  }
 0x183   : > { %4141 = vmatpush1.bf16.msra.mxu0 %v10917_v44  ;;  %v10986_v44 = vld [vmem:[%s15480_s1 + $0x32c] ss:$16 sps:$4 sm:$0xff]  }
 0x184   : > { %4192 = vmatprep.subr.bf16.mxu0 %v10929_v45  ;;  %v10984_v45 = vld [vmem:[%s15480_s1 + $0x328] ss:$16 sps:$4 sm:$0xff]  }
 0x185   : > { %4182 = vmatpush1.bf16.msra.mxu1 %v10920_v15  ;;  %v10987_v15 = vld [vmem:[%s15480_s1 + $0x148] ss:$16 sps:$4 sm:$0xff]  }
 0x186   : > { %4143 = vmatmul.mubr.bf16.vlgmr.msra.gmra.mrb[20].mxu0 %v13295_v46  ;;  %4233 = vmatprep.subr.bf16.mxu1 %v10932_v51  ;;  %v10995_v51 = vld [vmem:[%s15480_s1 + $0x16c] ss:$16 sps:$4 sm:$0xff]  }
 0x187   : > { %4193 = vmatpush1.bf16.msra.mxu0 %v10927_v49  ;;  %4224 = vmatprep.mubr.bf16.mxu0 %v12874_v6  ;;  %v10947_v6 = vld [vmem:[%s15480_s1 + $0x6c] ss:$16 sps:$4 sm:$0xff]  }
 0x188   : > { %4194 = vmatprep.subr.bf16.mxu0 %v10935_v53  ;;  %4184 = vmatmul.mubr.bf16.vlgmr.msra.gmra.mrb[20].mxu1 %v13311_v54  ;;  %v10992_v49 = vld [vmem:[%s15480_s1 + $0x34c] ss:$16 sps:$4 sm:$0xff]   ;;  %v10990_v53 = vld [vmem:[%s15480_s1 + $0x348] ss:$16 sps:$4 sm:$0xff]  }
 0x189   : > { %4234 = vmatpush1.bf16.msra.mxu1 %v10930_v11  ;;  %4265 = vmatprep.mubr.bf16.mxu1 %v12882_v60  ;;  %v10950_v60 = vld [vmem:[%s15480_s1 + $0x26c] ss:$16 sps:$4 sm:$0xff]   ;;  %v10993_v11 = vld [vmem:[%s15480_s1 + $0x168] ss:$16 sps:$4 sm:$0xff]  }
 0x18a   : > { %4235 = vmatprep.subr.bf16.mxu1 %v10938_v58  ;;  %v11001_v58 = vld [vmem:[%s15480_s1 + $0x18c] ss:$16 sps:$4 sm:$0xff]  }
 0x18b   : > { %4195 = vmatpush1.bf16.msra.mxu0 %v10933_v55  ;;  %v10998_v55 = vld [vmem:[%s15480_s1 + $0x36c] ss:$16 sps:$4 sm:$0xff]  }
 0x18c   : > { %4196 = vmatprep.subr.bf16.mxu0 %v10941_v57  ;;  %v10996_v57 = vld [vmem:[%s15480_s1 + $0x368] ss:$16 sps:$4 sm:$0xff]  }
 0x18d   : > { %4236 = vmatpush1.bf16.msra.mxu1 %v10936_v19  ;;  %v10999_v19 = vld [vmem:[%s15480_s1 + $0x188] ss:$16 sps:$4 sm:$0xff]  }
 0x18e   : > { %4237 = vmatprep.subr.bf16.mxu1 %v10944_v30  ;;  %v11007_v30 = vld [vmem:[%s15480_s1 + $0x1ac] ss:$16 sps:$4 sm:$0xff]  }
 0x18f   : > { %4197 = vmatpush1.bf16.msra.mxu0 %v10939_v28  ;;  %v11004_v28 = vld [vmem:[%s15480_s1 + $0x38c] ss:$16 sps:$4 sm:$0xff]  }
 0x190   : > { %4198 = vmatprep.subr.bf16.mxu0 %v10947_v6  ;;  %v11002_v6 = vld [vmem:[%s15480_s1 + $0x388] ss:$16 sps:$4 sm:$0xff]  }
 0x191   : > { %4238 = vmatpush1.bf16.msra.mxu1 %v10942_v56  ;;  %v11005_v56 = vld [vmem:[%s15480_s1 + $0x1a8] ss:$16 sps:$4 sm:$0xff]  }
 0x192   : > { %4239 = vmatprep.subr.bf16.mxu1 %v10950_v60  ;;  %v11013_v60 = vld [vmem:[%s15480_s1 + $0x1cc] ss:$16 sps:$4 sm:$0xff]  }
 0x193   : > { %4199 = vmatpush1.bf16.msra.mxu0 %v10945_v32  ;;  %v11010_v32 = vld [vmem:[%s15480_s1 + $0x3ac] ss:$16 sps:$4 sm:$0xff]  }
 0x194   : > { %4200 = vmatprep.subr.bf16.mxu0 %v10953_v62  ;;  %v11008_v62 = vld [vmem:[%s15480_s1 + $0x3a8] ss:$16 sps:$4 sm:$0xff]  }
 0x195   : > { %4240 = vmatpush1.bf16.msra.mxu1 %v10948_v63  ;;  %v11011_v63 = vld [vmem:[%s15480_s1 + $0x1c8] ss:$16 sps:$4 sm:$0xff]  }
 0x196   : > { %4241 = vmatprep.subr.bf16.mxu1 %v10956_v36  ;;  %v11019_v36 = vld [vmem:[%s15480_s1 + $0x1ec] ss:$16 sps:$4 sm:$0xff]  }
 0x197   : > { %4201 = vmatpush1.bf16.msra.mxu0 %v10951_v0  ;;  %v11016_v0 = vld [vmem:[%s15480_s1 + $0x3cc] ss:$16 sps:$4 sm:$0xff]  }
 0x198   : > { %4202 = vmatprep.subr.bf16.mxu0 %v10959_v1  ;;  %v11014_v1 = vld [vmem:[%s15480_s1 + $0x3c8] ss:$16 sps:$4 sm:$0xff]  }
 0x199   : > { %v2590_v8 = vpop.f32.mrb[8].mxu0  ;;  %4242 = vmatpush1.bf16.msra.mxu1 %v10954_v2  ;;  %v11017_v2 = vld [vmem:[%s15480_s1 + $0x1e8] ss:$16 sps:$4 sm:$0xff]  }
 0x19a   : > { %v2592_v12 = vpop.f32.mrb[9].mxu0  ;;  %4243 = vmatprep.subr.bf16.mxu1 %v10962_v4  ;;  %v11025_v4 = vld [vmem:[%s15480_s1 + $0x40c] ss:$16 sps:$4 sm:$0xff]  }
 0x19b   : > { %v2594_v14 = vpop.f32.mrb[10].mxu0  ;;  %4203 = vmatpush1.bf16.msra.mxu0 %v10957_v3  ;;  %v2631_v10 = vpop.f32.mrb[8].mxu1  ;;  %v11022_v3 = vld [vmem:[%s15480_s1 + $0x3ec] ss:$16 sps:$4 sm:$0xff]  }
 0x19c   : > { %v2595_v23 = vpop.f32.mrb[11].mxu0  ;;  %4204 = vmatprep.subr.bf16.mxu0 %v10965_v5  ;;  %v13389_v25 = vadd.f32 %v2631_v10, %v2590_v8  ;;  %v2633_v26 = vpop.f32.mrb[9].mxu1  ;;  %v11020_v5 = vld [vmem:[%s15480_s1 + $0x3e8] ss:$16 sps:$4 sm:$0xff]   ;;  %v11028_v8 = vld [vmem:[%s15480_s1 + $0x60c] ss:$16 sps:$4 sm:$0xff]  }
 0x19d   : > { %v13391_v27 = vadd.f32 %v2633_v26, %v2592_v12  ;;  %v2635_v29 = vpop.f32.mrb[10].mxu1  ;;  %4244 = vmatpush1.bf16.msra.mxu1 %v10960_v7  ;;  %v11023_v7 = vld [vmem:[%s15480_s1 + $0x408] ss:$16 sps:$4 sm:$0xff]   ;;  %v11031_v12 = vld [vmem:[%s15480_s1 + $0x42c] ss:$16 sps:$4 sm:$0xff]  }
 0x19e   : > { %v2636_v31 = vpop.f32.mrb[11].mxu1  ;;  %4245 = vmatprep.subr.bf16.mxu1 %v10968_v18  ;;  %v11026_v14 = vld [vmem:[%s15480_s1 + $0x608] ss:$16 sps:$4 sm:$0xff]   ;;  %v11034_v18 = vld [vmem:[%s15480_s1 + $0x62c] ss:$16 sps:$4 sm:$0xff]  }
 0x19f   : > { %4205 = vmatpush1.bf16.msra.mxu0 %v10963_v17  ;;  %v11029_v17 = vld [vmem:[%s15480_s1 + $0x428] ss:$16 sps:$4 sm:$0xff]   ;;  %v11037_v10 = vld [vmem:[%s15480_s1 + $0x44c] ss:$16 sps:$4 sm:$0xff]  }
 0x1a0   : > { %4206 = vmatprep.subr.bf16.mxu0 %v10971_v16  ;;  %v11035_v23 = vld [vmem:[%s15480_s1 + $0x448] ss:$16 sps:$4 sm:$0xff]   ;;  %v11049_v26 = vld [vmem:[%s15480_s1 + $0x48c] ss:$16 sps:$4 sm:$0xff]  }
 0x1a1   : > { %4246 = vmatpush1.bf16.msra.mxu1 %v10966_v24  ;;  %v11040_v24 = vld [vmem:[%s15480_s1 + $0x64c] ss:$16 sps:$4 sm:$0xff]   ;;  %v11041_v16 = vld [vmem:[%s15480_s1 + $0x468] ss:$16 sps:$4 sm:$0xff]  }
 0x1a2   : > { %4247 = vmatprep.subr.bf16.mxu1 %v10974_v34  ;;  %v11044_v29 = vld [vmem:[%s15480_s1 + $0x668] ss:$16 sps:$4 sm:$0xff]   ;;  %v11055_v34 = vld [vmem:[%s15480_s1 + $0x4ac] ss:$16 sps:$4 sm:$0xff]  }
 0x1a3   : > { %4207 = vmatpush1.bf16.msra.mxu0 %v10969_v33  ;;  %v11047_v31 = vld [vmem:[%s15480_s1 + $0x488] ss:$16 sps:$4 sm:$0xff]   ;;  %v11052_v33 = vld [vmem:[%s15480_s1 + $0x68c] ss:$16 sps:$4 sm:$0xff]  }
 0x1a4   : > { %4208 = vmatprep.subr.bf16.mxu0 %v10977_v35  ;;  %v11050_v35 = vld [vmem:[%s15480_s1 + $0x688] ss:$16 sps:$4 sm:$0xff]  }
 0x1a5   : > { %4248 = vmatpush1.bf16.msra.mxu1 %v10972_v37  ;;  %v11053_v37 = vld [vmem:[%s15480_s1 + $0x4a8] ss:$16 sps:$4 sm:$0xff]  }
 0x1a6   : > { %4249 = vmatprep.subr.bf16.mxu1 %v10980_v39  ;;  %v11061_v39 = vld [vmem:[%s15480_s1 + $0x4cc] ss:$16 sps:$4 sm:$0xff]  }
 0x1a7   : > { %4209 = vmatpush1.bf16.msra.mxu0 %v10975_v38  ;;  %v11058_v38 = vld [vmem:[%s15480_s1 + $0x6ac] ss:$16 sps:$4 sm:$0xff]  }
 0x1a8   : > { %4210 = vmatprep.subr.bf16.mxu0 %v10983_v41  ;;  %v11056_v41 = vld [vmem:[%s15480_s1 + $0x6a8] ss:$16 sps:$4 sm:$0xff]  }
 0x1a9   : > { %4250 = vmatpush1.bf16.msra.mxu1 %v10978_v42 }
 0x1aa   : > { %4251 = vmatprep.subr.bf16.mxu1 %v10986_v44 }
 0x1ab   : > { %4211 = vmatpush1.bf16.msra.mxu0 %v10981_v43 }
 0x1ac   : > { %4212 = vmatprep.subr.bf16.mxu0 %v10989_v9 }
 0x1ad   : > { %4252 = vmatpush1.bf16.msra.mxu1 %v10984_v45 }
 0x1ae   : > { %4253 = vmatprep.subr.bf16.mxu1 %v10992_v49  ;;  %v11064_v49 = vld [vmem:[%s15480_s1 + $0x6cc] ss:$16 sps:$4 sm:$0xff]  }
 0x1af   : > { %4213 = vmatpush1.bf16.msra.mxu0 %v10987_v15  ;;  %v11059_v15 = vld [vmem:[%s15480_s1 + $0x4c8] ss:$16 sps:$4 sm:$0xff]  }
 0x1b0   : > { %4214 = vmatprep.subr.bf16.mxu0 %v10995_v51 }
 0x1b1   : > { %4254 = vmatpush1.bf16.msra.mxu1 %v10990_v53 }
 0x1b2   : > { %4255 = vmatprep.subr.bf16.mxu1 %v10998_v55 }
 0x1b3   : > { %4215 = vmatpush1.bf16.msra.mxu0 %v10993_v11 }
 0x1b4   : > { %4216 = vmatprep.subr.bf16.mxu0 %v11001_v58 }
 0x1b5   : > { %4256 = vmatpush1.bf16.msra.mxu1 %v10996_v57 }
 0x1b6   : > { %4257 = vmatprep.subr.bf16.mxu1 %v11004_v28  ;;  %v11065_v28 = vld [vmem:[%s15480_s1 + $0x4e8] ss:$16 sps:$4 sm:$0xff]  }
 0x1b7   : > { %4217 = vmatpush1.bf16.msra.mxu0 %v10999_v19 }
 0x1b8   : > { %4218 = vmatprep.subr.bf16.mxu0 %v11007_v30  ;;  %v11070_v30 = vld [vmem:[%s15480_s1 + $0x6ec] ss:$16 sps:$4 sm:$0xff]  }
 0x1b9   : > { %4258 = vmatpush1.bf16.msra.mxu1 %v11002_v6  ;;  %v11073_v6 = vld [vmem:[%s15480_s1 + $0x50c] ss:$16 sps:$4 sm:$0xff]  }
 0x1ba   : > { %4259 = vmatprep.subr.bf16.mxu1 %v11010_v32  ;;  %v11071_v32 = vld [vmem:[%s15480_s1 + $0x508] ss:$16 sps:$4 sm:$0xff]  }
 0x1bb   : > { %4219 = vmatpush1.bf16.msra.mxu0 %v11005_v56  ;;  %v11068_v56 = vld [vmem:[%s15480_s1 + $0x6e8] ss:$16 sps:$4 sm:$0xff]  }
 0x1bc   : > { %4220 = vmatprep.subr.bf16.mxu0 %v11013_v60  ;;  %v11076_v60 = vld [vmem:[%s15480_s1 + $0x70c] ss:$16 sps:$4 sm:$0xff]  }
 0x1bd   : > { %4260 = vmatpush1.bf16.msra.mxu1 %v11008_v62  ;;  %v11079_v62 = vld [vmem:[%s15480_s1 + $0x52c] ss:$16 sps:$4 sm:$0xff]  }
 0x1be   : > { %4261 = vmatprep.subr.bf16.mxu1 %v11016_v0  ;;  %v11077_v0 = vld [vmem:[%s15480_s1 + $0x528] ss:$16 sps:$4 sm:$0xff]  }
 0x1bf   : > { %4221 = vmatpush1.bf16.msra.mxu0 %v11011_v63  ;;  %v11074_v63 = vld [vmem:[%s15480_s1 + $0x708] ss:$16 sps:$4 sm:$0xff]  }
 0x1c0   : > { %4222 = vmatprep.subr.bf16.mxu0 %v11019_v36  ;;  %v11082_v36 = vld [vmem:[%s15480_s1 + $0x72c] ss:$16 sps:$4 sm:$0xff]  }
 0x1c1   : > { %4262 = vmatpush1.bf16.msra.mxu1 %v11014_v1  ;;  %v11085_v1 = vld [vmem:[%s15480_s1 + $0x54c] ss:$16 sps:$4 sm:$0xff]  }
 0x1c2   : > { %4263 = vmatprep.subr.bf16.mxu1 %v11022_v3  ;;  %v11083_v3 = vld [vmem:[%s15480_s1 + $0x548] ss:$16 sps:$4 sm:$0xff]  }
 0x1c3   : > { %4223 = vmatpush1.bf16.msra.mxu0 %v11017_v2  ;;  %v11080_v2 = vld [vmem:[%s15480_s1 + $0x728] ss:$16 sps:$4 sm:$0xff]  }
 0x1c4   : > { %4274 = vmatprep.subr.bf16.mxu0 %v11025_v4  ;;  %v11088_v4 = vld [vmem:[%s15480_s1 + $0x74c] ss:$16 sps:$4 sm:$0xff]  }
 0x1c5   : > { %4264 = vmatpush1.bf16.msra.mxu1 %v11020_v5  ;;  %v11091_v5 = vld [vmem:[%s15480_s1 + $0x56c] ss:$16 sps:$4 sm:$0xff]  }
 0x1c6   : > { %4225 = vmatmul.mubr.bf16.vlgmr.msra.gmra.mrb[24].mxu0 %v13075_v13  ;;  %4315 = vmatprep.subr.bf16.mxu1 %v11028_v8  ;;  %v11032_v13 = vld [vmem:[%s15480_s1 + $0x628] ss:$16 sps:$4 sm:$0xff]  }
 0x1c7   : > { %4275 = vmatpush1.bf16.msra.mxu0 %v11023_v7  ;;  %4306 = vmatprep.mubr.bf16.mxu0 %v13093_v20  ;;  %v11043_v20 = vld [vmem:[%s15480_s1 + $0x46c] ss:$16 sps:$4 sm:$0xff]   ;;  %v11086_v7 = vld [vmem:[%s15480_s1 + $0x748] ss:$16 sps:$4 sm:$0xff]  }
 0x1c8   : > { %4276 = vmatprep.subr.bf16.mxu0 %v11031_v12  ;;  %4266 = vmatmul.mubr.bf16.vlgmr.msra.gmra.mrb[24].mxu1 %v13097_v21  ;;  %v11038_v21 = vld [vmem:[%s15480_s1 + $0x648] ss:$16 sps:$4 sm:$0xff]   ;;  %v11094_v12 = vld [vmem:[%s15480_s1 + $0x76c] ss:$16 sps:$4 sm:$0xff]  }
 0x1c9   : > { %4316 = vmatpush1.bf16.msra.mxu1 %v11026_v14  ;;  %4347 = vmatprep.mubr.bf16.mxu1 %v13102_v22  ;;  %v11046_v22 = vld [vmem:[%s15480_s1 + $0x66c] ss:$16 sps:$4 sm:$0xff]   ;;  %v11089_v8 = vld [vmem:[%s15480_s1 + $0x568] ss:$16 sps:$4 sm:$0xff]  }
 0x1ca   : > { %4317 = vmatprep.subr.bf16.mxu1 %v11034_v18  ;;  %v11097_v14 = vld [vmem:[%s15480_s1 + $0x58c] ss:$16 sps:$4 sm:$0xff]   ;;  %v11095_v18 = vld [vmem:[%s15480_s1 + $0x588] ss:$16 sps:$4 sm:$0xff]  }
 0x1cb   : > { %4277 = vmatpush1.bf16.msra.mxu0 %v11029_v17  ;;  %v11092_v17 = vld [vmem:[%s15480_s1 + $0x768] ss:$16 sps:$4 sm:$0xff]  }
 0x1cc   : > { %4278 = vmatprep.subr.bf16.mxu0 %v11037_v10  ;;  %v11100_v10 = vld [vmem:[%s15480_s1 + $0x78c] ss:$16 sps:$4 sm:$0xff]  }
 0x1cd   : > { %4318 = vmatpush1.bf16.msra.mxu1 %v11032_v13  ;;  %v11103_v13 = vld [vmem:[%s15480_s1 + $0x5ac] ss:$16 sps:$4 sm:$0xff]  }
 0x1ce   : > { %4319 = vmatprep.subr.bf16.mxu1 %v11040_v24  ;;  %v11101_v24 = vld [vmem:[%s15480_s1 + $0x5a8] ss:$16 sps:$4 sm:$0xff]  }
 0x1cf   : > { %4279 = vmatpush1.bf16.msra.mxu0 %v11035_v23  ;;  %v11098_v23 = vld [vmem:[%s15480_s1 + $0x788] ss:$16 sps:$4 sm:$0xff]  }
 0x1d0   : > { %4280 = vmatprep.subr.bf16.mxu0 %v11043_v20  ;;  %v11106_v20 = vld [vmem:[%s15480_s1 + $0x7ac] ss:$16 sps:$4 sm:$0xff]  }
 0x1d1   : > { %4320 = vmatpush1.bf16.msra.mxu1 %v11038_v21  ;;  %v11109_v21 = vld [vmem:[%s15480_s1 + $0x5cc] ss:$16 sps:$4 sm:$0xff]  }
 0x1d2   : > { %4321 = vmatprep.subr.bf16.mxu1 %v11046_v22  ;;  %v11107_v22 = vld [vmem:[%s15480_s1 + $0x5c8] ss:$16 sps:$4 sm:$0xff]  }
 0x1d3   : > { %4281 = vmatpush1.bf16.msra.mxu0 %v11041_v16  ;;  %v11104_v16 = vld [vmem:[%s15480_s1 + $0x7a8] ss:$16 sps:$4 sm:$0xff]  }
 0x1d4   : > { %4282 = vmatprep.subr.bf16.mxu0 %v11049_v26  ;;  %v11112_v26 = vld [vmem:[%s15480_s1 + $0x7cc] ss:$16 sps:$4 sm:$0xff]  }
 0x1d5   : > { %4322 = vmatpush1.bf16.msra.mxu1 %v11044_v29  ;;  %v11115_v29 = vld [vmem:[%s15480_s1 + $0x5ec] ss:$16 sps:$4 sm:$0xff]  }
 0x1d6   : > { %4323 = vmatprep.subr.bf16.mxu1 %v11052_v33  ;;  %v11110_v33 = vld [vmem:[%s15480_s1 + $0x7c8] ss:$16 sps:$4 sm:$0xff]  }
 0x1d7   : > { %4283 = vmatpush1.bf16.msra.mxu0 %v11047_v31  ;;  %v13688_v31 = vld [vmem:[#allocation2] sm:$0x66] }
 0x1d8   : > { %4284 = vmatprep.subr.bf16.mxu0 %v11055_v34  ;;  %v11113_v34 = vld [vmem:[%s15480_s1 + $0x5e8] ss:$16 sps:$4 sm:$0xff]  }
 0x1d9   : > { %v2672_v42 = vpop.f32.mrb[12].mxu0  ;;  %4324 = vmatpush1.bf16.msra.mxu1 %v11050_v35  ;;  %v11118_v35 = vld [vmem:[%s15480_s1 + $0x7ec] ss:$16 sps:$4 sm:$0xff]  }
 0x1da   : > { %v2673_v43 = vadd.f32 %v2672_v42, %v13389_v25  ;;  %v2674_v44 = vpop.f32.mrb[13].mxu0  ;;  %4325 = vmatprep.subr.bf16.mxu1 %v11058_v38  ;;  %v11062_v25 = vld [vmem:[%s15480_s1 + $0x6c8] ss:$16 sps:$4 sm:$0xff]  }
 0x1db   : > { %v2675_v9 = vadd.f32 %v2674_v44, %v13391_v27  ;;  %v2676_v45 = vpop.f32.mrb[14].mxu0  ;;  %4285 = vmatpush1.bf16.msra.mxu0 %v11053_v37  ;;  %v2713_v51 = vpop.f32.mrb[12].mxu1  ;;  %v11067_v27 = vld [vmem:[%s15480_s1 + $0x4ec] ss:$16 sps:$4 sm:$0xff]   ;;  %v11121_v37 = vld [vmem:[%s15480_s1 + $0x1004] ss:$16 sps:$4 sm:$0xff]  }
 0x1dc   : > { %v2677_v53 = vpop.f32.mrb[15].mxu0  ;;  %4286 = vmatprep.subr.bf16.mxu0 %v11061_v39  ;;  %v13591_v11 = vadd.f32 %v2713_v51, %v2673_v43  ;;  %v2715_v55 = vpop.f32.mrb[13].mxu1  ;;  %v13702_v38 = vld [vmem:[#allocation2 + $0x8] sm:$0x66]  ;;  %v9530_v39 = vcombine.high %v13688_v31, %v13688_v31  ;;  %v11119_v43 = vld [vmem:[%s15480_s1 + $0x1000] ss:$16 sps:$4 sm:$0xff]  }
 0x1dd   : > { %v13593_v58 = vadd.f32 %v2715_v55, %v2675_v9  ;;  %v2717_v57 = vpop.f32.mrb[14].mxu1  ;;  %4326 = vmatpush1.bf16.msra.mxu1 %v11056_v41  ;;  %v11116_v41 = vld [vmem:[%s15480_s1 + $0x7e8] ss:$16 sps:$4 sm:$0xff]   ;;  %v9532_v42 = vcombine.high %v13702_v38, %v13702_v38  ;;  %v11124_v44 = vld [vmem:[%s15480_s1 + $0x1204] ss:$16 sps:$4 sm:$0xff]  }
 0x1de   : > { %v2718_v19 = vpop.f32.mrb[15].mxu1  ;;  %4327 = vmatprep.subr.bf16.mxu1 %v11064_v49  ;;  %v11127_v9 = vld [vmem:[%s15480_s1 + $0x1024] ss:$16 sps:$4 sm:$0xff]   ;;  %v11122_v45 = vld [vmem:[%s15480_s1 + $0x1200] ss:$16 sps:$4 sm:$0xff]  }
 0x1df   : > { %4287 = vmatpush1.bf16.msra.mxu0 %v11059_v15  ;;  %v13723_v15 = vrot.slane %v9530_v39, 1  ;;  %v13726_v49 = vrot.slane %v9532_v42, 1  ;;  %v11125_v51 = vld [vmem:[%s15480_s1 + $0x1020] ss:$16 sps:$4 sm:$0xff]   ;;  %v11130_v53 = vld [vmem:[%s15480_s1 + $0x1224] ss:$16 sps:$4 sm:$0xff]  }
 0x1e0   : > { %4288 = vmatprep.subr.bf16.mxu0 %v11067_v27  ;;  %v11131_v27 = vld [vmem:[%s15480_s1 + $0x1040] ss:$16 sps:$4 sm:$0xff]   ;;  %v11136_v55 = vld [vmem:[%s15480_s1 + $0x1244] ss:$16 sps:$4 sm:$0xff]  }
 0x1e1   : > { %4328 = vmatpush1.bf16.msra.mxu1 %v11062_v25  ;;  %v11133_v25 = vld [vmem:[%s15480_s1 + $0x1044] ss:$16 sps:$4 sm:$0xff]   ;;  %v11134_v57 = vld [vmem:[%s15480_s1 + $0x1240] ss:$16 sps:$4 sm:$0xff]  }
 0x1e2   : > { %4329 = vmatprep.subr.bf16.mxu1 %v11070_v30  ;;  %v11137_v19 = vld [vmem:[%s15480_s1 + $0x1060] ss:$16 sps:$4 sm:$0xff]   ;;  %v11145_v30 = vld [vmem:[%s15480_s1 + $0x1084] ss:$16 sps:$4 sm:$0xff]  }
 0x1e3   : > { %4289 = vmatpush1.bf16.msra.mxu0 %v11065_v28  ;;  %v11142_v28 = vld [vmem:[%s15480_s1 + $0x1264] ss:$16 sps:$4 sm:$0xff]   ;;  %v11179_v42 = vld [vmem:[%s15480_s1 + $0x1140] ss:$16 sps:$4 sm:$0xff]  }
 0x1e4   : > { %4290 = vmatprep.subr.bf16.mxu0 %v11073_v6  ;;  %v11140_v6 = vld [vmem:[%s15480_s1 + $0x1260] ss:$16 sps:$4 sm:$0xff]   ;;  %v11181_v39 = vld [vmem:[%s15480_s1 + $0x1144] ss:$16 sps:$4 sm:$0xff]  }
 0x1e5   : > { %4330 = vmatpush1.bf16.msra.mxu1 %v11068_v56  ;;  %v11143_v56 = vld [vmem:[%s15480_s1 + $0x1080] ss:$16 sps:$4 sm:$0xff]  }
 0x1e6   : > { %4331 = vmatprep.subr.bf16.mxu1 %v11076_v60  ;;  %v11151_v60 = vld [vmem:[%s15480_s1 + $0x10a4] ss:$16 sps:$4 sm:$0xff]  }
 0x1e7   : > { %4291 = vmatpush1.bf16.msra.mxu0 %v11071_v32  ;;  %v11148_v32 = vld [vmem:[%s15480_s1 + $0x1284] ss:$16 sps:$4 sm:$0xff]  }
 0x1e8   : > { %4292 = vmatprep.subr.bf16.mxu0 %v11079_v62  ;;  %v11146_v62 = vld [vmem:[%s15480_s1 + $0x1280] ss:$16 sps:$4 sm:$0xff]  }
 0x1e9   : > { %4332 = vmatpush1.bf16.msra.mxu1 %v11074_v63  ;;  %v11149_v63 = vld [vmem:[%s15480_s1 + $0x10a0] ss:$16 sps:$4 sm:$0xff]  }
 0x1ea   : > { %4333 = vmatprep.subr.bf16.mxu1 %v11082_v36  ;;  %v11157_v36 = vld [vmem:[%s15480_s1 + $0x10c4] ss:$16 sps:$4 sm:$0xff]  }
 0x1eb   : > { %4293 = vmatpush1.bf16.msra.mxu0 %v11077_v0  ;;  %v11154_v0 = vld [vmem:[%s15480_s1 + $0x12a4] ss:$16 sps:$4 sm:$0xff]  }
 0x1ec   : > { %4294 = vmatprep.subr.bf16.mxu0 %v11085_v1  ;;  %v11152_v1 = vld [vmem:[%s15480_s1 + $0x12a0] ss:$16 sps:$4 sm:$0xff]  }
 0x1ed   : > { %4334 = vmatpush1.bf16.msra.mxu1 %v11080_v2 }
 0x1ee   : > { %4335 = vmatprep.subr.bf16.mxu1 %v11088_v4 }
 0x1ef   : > { %4295 = vmatpush1.bf16.msra.mxu0 %v11083_v3 }
 0x1f0   : > { %4296 = vmatprep.subr.bf16.mxu0 %v11091_v5 }
 0x1f1   : > { %4336 = vmatpush1.bf16.msra.mxu1 %v11086_v7 }
 0x1f2   : > { %4337 = vmatprep.subr.bf16.mxu1 %v11094_v12  ;;  %v11160_v12 = vld [vmem:[%s15480_s1 + $0x12c4] ss:$16 sps:$4 sm:$0xff]  }
 0x1f3   : > { %4297 = vmatpush1.bf16.msra.mxu0 %v11089_v8  ;;  %v11155_v8 = vld [vmem:[%s15480_s1 + $0x10c0] ss:$16 sps:$4 sm:$0xff]  }
 0x1f4   : > { %4298 = vmatprep.subr.bf16.mxu0 %v11097_v14 }
 0x1f5   : > { %4338 = vmatpush1.bf16.msra.mxu1 %v11092_v17 }
 0x1f6   : > { %4339 = vmatprep.subr.bf16.mxu1 %v11100_v10 }
 0x1f7   : > { %4299 = vmatpush1.bf16.msra.mxu0 %v11095_v18 }
 0x1f8   : > { %4300 = vmatprep.subr.bf16.mxu0 %v11103_v13 }
 0x1f9   : > { %4340 = vmatpush1.bf16.msra.mxu1 %v11098_v23 }
 0x1fa   : > { %4341 = vmatprep.subr.bf16.mxu1 %v11106_v20  ;;  %v11161_v20 = vld [vmem:[%s15480_s1 + $0x10e0] ss:$16 sps:$4 sm:$0xff]  }
 0x1fb   : > { %4301 = vmatpush1.bf16.msra.mxu0 %v11101_v24 }
 0x1fc   : > { %4302 = vmatprep.subr.bf16.mxu0 %v11109_v21  ;;  %v11166_v21 = vld [vmem:[%s15480_s1 + $0x12e4] ss:$16 sps:$4 sm:$0xff]  }
 0x1fd   : > { %4342 = vmatpush1.bf16.msra.mxu1 %v11104_v16  ;;  %v11169_v16 = vld [vmem:[%s15480_s1 + $0x1104] ss:$16 sps:$4 sm:$0xff]  }
 0x1fe   : > { %4343 = vmatprep.subr.bf16.mxu1 %v11112_v26  ;;  %v11167_v26 = vld [vmem:[%s15480_s1 + $0x1100] ss:$16 sps:$4 sm:$0xff]  }
 0x1ff   : > { %4303 = vmatpush1.bf16.msra.mxu0 %v11107_v22  ;;  %v11164_v22 = vld [vmem:[%s15480_s1 + $0x12e0] ss:$16 sps:$4 sm:$0xff]  }
 0x200   : > { %4304 = vmatprep.subr.bf16.mxu0 %v11115_v29  ;;  %v11172_v29 = vld [vmem:[%s15480_s1 + $0x1304] ss:$16 sps:$4 sm:$0xff]  }
 0x201   : > { %4344 = vmatpush1.bf16.msra.mxu1 %v11110_v33  ;;  %v11175_v33 = vld [vmem:[%s15480_s1 + $0x1124] ss:$16 sps:$4 sm:$0xff]  }
 0x202   : > { %4345 = vmatprep.subr.bf16.mxu1 %v11118_v35  ;;  %v11173_v35 = vld [vmem:[%s15480_s1 + $0x1120] ss:$16 sps:$4 sm:$0xff]  }
 0x203   : > { %4305 = vmatpush1.bf16.msra.mxu0 %v11113_v34  ;;  %v11170_v34 = vld [vmem:[%s15480_s1 + $0x1300] ss:$16 sps:$4 sm:$0xff]  }
 0x204   : > { %5933 = vmatprep.subr.bf16.mxu0 %v11121_v37  ;;  %v11178_v37 = vld [vmem:[%s15480_s1 + $0x1324] ss:$16 sps:$4 sm:$0xff]  }
 0x205   : > { %4346 = vmatpush1.bf16.msra.mxu1 %v11116_v41  ;;  %v11176_v41 = vld [vmem:[%s15480_s1 + $0x1320] ss:$16 sps:$4 sm:$0xff]  }
 0x206   : > { %4307 = vmatmul.mubr.bf16.vlgmr.msra.gmra.mrb[28].mxu0 %v13295_v46  ;;  %5974 = vmatprep.subr.bf16.mxu1 %v11124_v44  ;;  %v11128_v46 = vld [vmem:[%s15480_s1 + $0x1220] ss:$16 sps:$4 sm:$0xff]   ;;  %v11187_v44 = vld [vmem:[%s15480_s1 + $0x1164] ss:$16 sps:$4 sm:$0xff]  }
 0x207   : > { %5934 = vmatpush1.bf16.msra.mxu0 %v11119_v43  ;;  %5965 = vmatprep.mubr.bf16.mxu0 %v13723_v15  ;;  %v11184_v43 = vld [vmem:[%s15480_s1 + $0x1344] ss:$16 sps:$4 sm:$0xff]  }
 0x208   : > { %5935 = vmatprep.subr.bf16.mxu0 %v11127_v9  ;;  %4348 = vmatmul.mubr.bf16.vlgmr.msra.gmra.mrb[28].mxu1 %v13311_v54  ;;  %v11139_v54 = vld [vmem:[%s15480_s1 + $0x1064] ss:$16 sps:$4 sm:$0xff]   ;;  %v11182_v9 = vld [vmem:[%s15480_s1 + $0x1340] ss:$16 sps:$4 sm:$0xff]  }
 0x209   : > { %5975 = vmatpush1.bf16.msra.mxu1 %v11122_v45  ;;  %6006 = vmatprep.mubr.bf16.mxu1 %v13726_v49  ;;  %v11185_v45 = vld [vmem:[%s15480_s1 + $0x1160] ss:$16 sps:$4 sm:$0xff]  }
 0x20a   : > { %5976 = vmatprep.subr.bf16.mxu1 %v11130_v53  ;;  %v11193_v53 = vld [vmem:[%s15480_s1 + $0x1184] ss:$16 sps:$4 sm:$0xff]  }
 0x20b   : > { %5936 = vmatpush1.bf16.msra.mxu0 %v11125_v51  ;;  %v11190_v51 = vld [vmem:[%s15480_s1 + $0x1364] ss:$16 sps:$4 sm:$0xff]  }
 0x20c   : > { %5937 = vmatprep.subr.bf16.mxu0 %v11133_v25  ;;  %v11188_v25 = vld [vmem:[%s15480_s1 + $0x1360] ss:$16 sps:$4 sm:$0xff]  }
 0x20d   : > { %5977 = vmatpush1.bf16.msra.mxu1 %v11128_v46  ;;  %v11191_v46 = vld [vmem:[%s15480_s1 + $0x1180] ss:$16 sps:$4 sm:$0xff]  }
 0x20e   : > { %5978 = vmatprep.subr.bf16.mxu1 %v11136_v55  ;;  %v11199_v55 = vld [vmem:[%s15480_s1 + $0x11a4] ss:$16 sps:$4 sm:$0xff]  }
 0x20f   : > { %5938 = vmatpush1.bf16.msra.mxu0 %v11131_v27  ;;  %v11196_v27 = vld [vmem:[%s15480_s1 + $0x1384] ss:$16 sps:$4 sm:$0xff]  }
 0x210   : > { %5939 = vmatprep.subr.bf16.mxu0 %v11139_v54  ;;  %v11194_v54 = vld [vmem:[%s15480_s1 + $0x1380] ss:$16 sps:$4 sm:$0xff]  }
 0x211   : > { %5979 = vmatpush1.bf16.msra.mxu1 %v11134_v57  ;;  %v11197_v57 = vld [vmem:[%s15480_s1 + $0x11a0] ss:$16 sps:$4 sm:$0xff]  }
 0x212   : > { %5980 = vmatprep.subr.bf16.mxu1 %v11142_v28  ;;  %v11205_v28 = vld [vmem:[%s15480_s1 + $0x11c4] ss:$16 sps:$4 sm:$0xff]  }
 0x213   : > { %5940 = vmatpush1.bf16.msra.mxu0 %v11137_v19  ;;  %v11202_v19 = vld [vmem:[%s15480_s1 + $0x13a4] ss:$16 sps:$4 sm:$0xff]  }
 0x214   : > { %5941 = vmatprep.subr.bf16.mxu0 %v11145_v30  ;;  %v11200_v30 = vld [vmem:[%s15480_s1 + $0x13a0] ss:$16 sps:$4 sm:$0xff]  }
 0x215   : > { %5981 = vmatpush1.bf16.msra.mxu1 %v11140_v6  ;;  %v11203_v6 = vld [vmem:[%s15480_s1 + $0x11c0] ss:$16 sps:$4 sm:$0xff]  }
 0x216   : > { %5982 = vmatprep.subr.bf16.mxu1 %v11148_v32  ;;  %v11211_v32 = vld [vmem:[%s15480_s1 + $0x11e4] ss:$16 sps:$4 sm:$0xff]  }
 0x217   : > { %5942 = vmatpush1.bf16.msra.mxu0 %v11143_v56  ;;  %v11208_v56 = vld [vmem:[%s15480_s1 + $0x13c4] ss:$16 sps:$4 sm:$0xff]  }
 0x218   : > { %5943 = vmatprep.subr.bf16.mxu0 %v11151_v60  ;;  %v13902_v60 = vld [vmem:[#allocation2 + $0x10] sm:$0x66] }
 0x219   : > { %v4062_v2 = vpop.f32.mrb[16].mxu0  ;;  %5983 = vmatpush1.bf16.msra.mxu1 %v11146_v62  ;;  %v11206_v62 = vld [vmem:[%s15480_s1 + $0x13c0] ss:$16 sps:$4 sm:$0xff]  }
 0x21a   : > { %v4063_v3 = vadd.f32 %v4062_v2, %v13181_v59  ;;  %v4064_v4 = vpop.f32.mrb[17].mxu0  ;;  %5984 = vmatprep.subr.bf16.mxu1 %v11154_v0  ;;  %v11158_v59 = vld [vmem:[%s15480_s1 + $0x12c0] ss:$16 sps:$4 sm:$0xff]   ;;  %v11214_v0 = vld [vmem:[%s15480_s1 + $0x13e4] ss:$16 sps:$4 sm:$0xff]  }
 0x21b   : > { %v4065_v5 = vadd.f32 %v4064_v4, %v13183_v61  ;;  %v4066_v7 = vpop.f32.mrb[18].mxu0  ;;  %5944 = vmatpush1.bf16.msra.mxu0 %v11149_v63  ;;  %v4103_v14 = vpop.f32.mrb[16].mxu1  ;;  %v11163_v61 = vld [vmem:[%s15480_s1 + $0x10e4] ss:$16 sps:$4 sm:$0xff]   ;;  %v11209_v63 = vld [vmem:[%s15480_s1 + $0x11e0] ss:$16 sps:$4 sm:$0xff]   ;;  %v9534_v4 = vcombine.high %v13902_v60, %v13902_v60 }
 0x21c   : > { %v4067_v17 = vpop.f32.mrb[19].mxu0  ;;  %5945 = vmatprep.subr.bf16.mxu0 %v11157_v36  ;;  %v13805_v18 = vadd.f32 %v4103_v14, %v4063_v3  ;;  %v4105_v10 = vpop.f32.mrb[17].mxu1  ;;  %v9529_v36 = vcombine.low %v13688_v31, %v13688_v31  ;;  %v13918_v2 = vld [vmem:[#allocation2 + $0x18] sm:$0x66]  ;;  %v11212_v3 = vld [vmem:[%s15480_s1 + $0x13e0] ss:$16 sps:$4 sm:$0xff]  }
 0x21d   : > { %v13807_v13 = vadd.f32 %v4105_v10, %v4065_v5  ;;  %v4107_v23 = vpop.f32.mrb[18].mxu1  ;;  %5985 = vmatpush1.bf16.msra.mxu1 %v11152_v1  ;;  %v11221_v1 = vld [vmem:[%s15480_s1 + $0x1404] ss:$16 sps:$4 sm:$0xff]   ;;  %v9531_v5 = vcombine.low %v13702_v38, %v13702_v38  ;;  %v11219_v7 = vld [vmem:[%s15480_s1 + $0x1400] ss:$16 sps:$4 sm:$0xff]   ;;  %v13943_v17 = vrot.slane %v9534_v4, 1 }
 0x21e   : > { %v4108_v24 = vpop.f32.mrb[19].mxu1  ;;  %5986 = vmatprep.subr.bf16.mxu1 %v11160_v12  ;;  %v13927_v31 = vrot.slane %v9529_v36, 1  ;;  %v9536_v12 = vcombine.high %v13918_v2, %v13918_v2  ;;  %v11227_v38 = vld [vmem:[%s15480_s1 + $0x1424] ss:$16 sps:$4 sm:$0xff]   ;;  %v11222_v14 = vld [vmem:[%s15480_s1 + $0x1600] ss:$16 sps:$4 sm:$0xff]  }
 0x21f   : > { %5946 = vmatpush1.bf16.msra.mxu0 %v11155_v8  ;;  %v11224_v8 = vld [vmem:[%s15480_s1 + $0x1604] ss:$16 sps:$4 sm:$0xff]   ;;  %v11225_v10 = vld [vmem:[%s15480_s1 + $0x1420] ss:$16 sps:$4 sm:$0xff]  }
 0x220   : > { %5947 = vmatprep.subr.bf16.mxu0 %v11163_v61  ;;  %v13948_v61 = vrot.slane %v9536_v12, 1  ;;  %v11230_v23 = vld [vmem:[%s15480_s1 + $0x1624] ss:$16 sps:$4 sm:$0xff]   ;;  %v11264_v36 = vld [vmem:[%s15480_s1 + $0x16e0] ss:$16 sps:$4 sm:$0xff]  }
 0x221   : > { %5987 = vmatpush1.bf16.msra.mxu1 %v11158_v59  ;;  %v13945_v59 = vrot.slane %v9531_v5, 1  ;;  %v11233_v24 = vld [vmem:[%s15480_s1 + $0x1444] ss:$16 sps:$4 sm:$0xff]   ;;  %v11270_v5 = vld [vmem:[%s15480_s1 + $0x1700] ss:$16 sps:$4 sm:$0xff]  }
 0x222   : > { %5988 = vmatprep.subr.bf16.mxu1 %v11166_v21  ;;  %v11231_v21 = vld [vmem:[%s15480_s1 + $0x1440] ss:$16 sps:$4 sm:$0xff]   ;;  %v11275_v4 = vld [vmem:[%s15480_s1 + $0x1524] ss:$16 sps:$4 sm:$0xff]  }
 0x223   : > { %5948 = vmatpush1.bf16.msra.mxu0 %v11161_v20  ;;  %v11228_v20 = vld [vmem:[%s15480_s1 + $0x1620] ss:$16 sps:$4 sm:$0xff]   ;;  %v11281_v12 = vld [vmem:[%s15480_s1 + $0x1544] ss:$16 sps:$4 sm:$0xff]  }
 0x224   : > { %5949 = vmatprep.subr.bf16.mxu0 %v11169_v16  ;;  %v11236_v16 = vld [vmem:[%s15480_s1 + $0x1644] ss:$16 sps:$4 sm:$0xff]  }
 0x225   : > { %5989 = vmatpush1.bf16.msra.mxu1 %v11164_v22  ;;  %v11239_v22 = vld [vmem:[%s15480_s1 + $0x1464] ss:$16 sps:$4 sm:$0xff]  }
 0x226   : > { %5990 = vmatprep.subr.bf16.mxu1 %v11172_v29  ;;  %v11237_v29 = vld [vmem:[%s15480_s1 + $0x1460] ss:$16 sps:$4 sm:$0xff]  }
 0x227   : > { %5950 = vmatpush1.bf16.msra.mxu0 %v11167_v26  ;;  %v11234_v26 = vld [vmem:[%s15480_s1 + $0x1640] ss:$16 sps:$4 sm:$0xff]  }
 0x228   : > { %5951 = vmatprep.subr.bf16.mxu0 %v11175_v33  ;;  %v11242_v33 = vld [vmem:[%s15480_s1 + $0x1664] ss:$16 sps:$4 sm:$0xff]  }
 0x229   : > { %5991 = vmatpush1.bf16.msra.mxu1 %v11170_v34  ;;  %v11245_v34 = vld [vmem:[%s15480_s1 + $0x1484] ss:$16 sps:$4 sm:$0xff]  }
 0x22a   : > { %5992 = vmatprep.subr.bf16.mxu1 %v11178_v37  ;;  %v11243_v37 = vld [vmem:[%s15480_s1 + $0x1480] ss:$16 sps:$4 sm:$0xff]  }
 0x22b   : > { %5952 = vmatpush1.bf16.msra.mxu0 %v11173_v35  ;;  %v11240_v35 = vld [vmem:[%s15480_s1 + $0x1660] ss:$16 sps:$4 sm:$0xff]  }
 0x22c   : > { %5953 = vmatprep.subr.bf16.mxu0 %v11181_v39  ;;  %v11248_v39 = vld [vmem:[%s15480_s1 + $0x1684] ss:$16 sps:$4 sm:$0xff]  }
 0x22d   : > { %5993 = vmatpush1.bf16.msra.mxu1 %v11176_v41  ;;  %v11251_v41 = vld [vmem:[%s15480_s1 + $0x14a4] ss:$16 sps:$4 sm:$0xff]  }
 0x22e   : > { %5994 = vmatprep.subr.bf16.mxu1 %v11184_v43  ;;  %v11249_v43 = vld [vmem:[%s15480_s1 + $0x14a0] ss:$16 sps:$4 sm:$0xff]  }
 0x22f   : > { %5954 = vmatpush1.bf16.msra.mxu0 %v11179_v42  ;;  %v11246_v42 = vld [vmem:[%s15480_s1 + $0x1680] ss:$16 sps:$4 sm:$0xff]  }
 0x230   : > { %5955 = vmatprep.subr.bf16.mxu0 %v11187_v44  ;;  %v11254_v44 = vld [vmem:[%s15480_s1 + $0x16a4] ss:$16 sps:$4 sm:$0xff]  }
 0x231   : > { %5995 = vmatpush1.bf16.msra.mxu1 %v11182_v9  ;;  %v11257_v9 = vld [vmem:[%s15480_s1 + $0x14c4] ss:$16 sps:$4 sm:$0xff]  }
 0x232   : > { %5996 = vmatprep.subr.bf16.mxu1 %v11190_v51 }
 0x233   : > { %5956 = vmatpush1.bf16.msra.mxu0 %v11185_v45 }
 0x234   : > { %5957 = vmatprep.subr.bf16.mxu0 %v11193_v53 }
 0x235   : > { %5997 = vmatpush1.bf16.msra.mxu1 %v11188_v25  ;;  %v11252_v25 = vld [vmem:[%s15480_s1 + $0x16a0] ss:$16 sps:$4 sm:$0xff]  }
 0x236   : > { %5998 = vmatprep.subr.bf16.mxu1 %v11196_v27 }
 0x237   : > { %5958 = vmatpush1.bf16.msra.mxu0 %v11191_v46 }
 0x238   : > { %5959 = vmatprep.subr.bf16.mxu0 %v11199_v55  ;;  %v11255_v55 = vld [vmem:[%s15480_s1 + $0x14c0] ss:$16 sps:$4 sm:$0xff]  }
 0x239   : > { %5999 = vmatpush1.bf16.msra.mxu1 %v11194_v54  ;;  %v11260_v54 = vld [vmem:[%s15480_s1 + $0x16c4] ss:$16 sps:$4 sm:$0xff]  }
 0x23a   : > { %6000 = vmatprep.subr.bf16.mxu1 %v11202_v19  ;;  %v11263_v19 = vld [vmem:[%s15480_s1 + $0x14e4] ss:$16 sps:$4 sm:$0xff]  }
 0x23b   : > { %5960 = vmatpush1.bf16.msra.mxu0 %v11197_v57 }
 0x23c   : > { %5961 = vmatprep.subr.bf16.mxu0 %v11205_v28 }
 0x23d   : > { %6001 = vmatpush1.bf16.msra.mxu1 %v11200_v30 }
 0x23e   : > { %6002 = vmatprep.subr.bf16.mxu1 %v11208_v56  ;;  %v11258_v56 = vld [vmem:[%s15480_s1 + $0x16c0] ss:$16 sps:$4 sm:$0xff]  }
 0x23f   : > { %5962 = vmatpush1.bf16.msra.mxu0 %v11203_v6 }
 0x240   : > { %5963 = vmatprep.subr.bf16.mxu0 %v11211_v32 }
 0x241   : > { %6003 = vmatpush1.bf16.msra.mxu1 %v11206_v62  ;;  %v11261_v62 = vld [vmem:[%s15480_s1 + $0x14e0] ss:$16 sps:$4 sm:$0xff]  }
 0x242   : > { %6004 = vmatprep.subr.bf16.mxu1 %v11214_v0  ;;  %v11269_v0 = vld [vmem:[%s15480_s1 + $0x1504] ss:$16 sps:$4 sm:$0xff]  }
 0x243   : > { %5964 = vmatpush1.bf16.msra.mxu0 %v11209_v63  ;;  %v11266_v63 = vld [vmem:[%s15480_s1 + $0x16e4] ss:$16 sps:$4 sm:$0xff]  }
 0x244   : > { %6015 = vmatprep.subr.bf16.mxu0 %v11221_v1  ;;  %v11267_v1 = vld [vmem:[%s15480_s1 + $0x1500] ss:$16 sps:$4 sm:$0xff]  }
 0x245   : > { %6005 = vmatpush1.bf16.msra.mxu1 %v11212_v3  ;;  %v11272_v3 = vld [vmem:[%s15480_s1 + $0x1704] ss:$16 sps:$4 sm:$0xff]  }
 0x246   : > { %5966 = vmatmul.mubr.bf16.vlgmr.msra.gmra.mrb[32].mxu0 %v13927_v31  ;;  %6056 = vmatprep.subr.bf16.mxu1 %v11224_v8  ;;  %v11278_v8 = vld [vmem:[%s15480_s1 + $0x1724] ss:$16 sps:$4 sm:$0xff]  }
 0x247   : > { %6016 = vmatpush1.bf16.msra.mxu0 %v11219_v7  ;;  %6047 = vmatprep.mubr.bf16.mxu0 %v13943_v17  ;;  %v11273_v7 = vld [vmem:[%s15480_s1 + $0x1520] ss:$16 sps:$4 sm:$0xff]  }
 0x248   : > { %6017 = vmatprep.subr.bf16.mxu0 %v11227_v38  ;;  %6007 = vmatmul.mubr.bf16.vlgmr.msra.gmra.mrb[32].mxu1 %v13945_v59  ;;  %v11276_v38 = vld [vmem:[%s15480_s1 + $0x1720] ss:$16 sps:$4 sm:$0xff]  }
 0x249   : > { %6057 = vmatpush1.bf16.msra.mxu1 %v11222_v14  ;;  %6088 = vmatprep.mubr.bf16.mxu1 %v13948_v61  ;;  %v11279_v14 = vld [vmem:[%s15480_s1 + $0x1540] ss:$16 sps:$4 sm:$0xff]  }
 0x24a   : > { %6058 = vmatprep.subr.bf16.mxu1 %v11230_v23  ;;  %v11287_v23 = vld [vmem:[%s15480_s1 + $0x1564] ss:$16 sps:$4 sm:$0xff]  }
 0x24b   : > { %6018 = vmatpush1.bf16.msra.mxu0 %v11225_v10  ;;  %v11284_v10 = vld [vmem:[%s15480_s1 + $0x1744] ss:$16 sps:$4 sm:$0xff]  }
 0x24c   : > { %6019 = vmatprep.subr.bf16.mxu0 %v11233_v24  ;;  %v11282_v24 = vld [vmem:[%s15480_s1 + $0x1740] ss:$16 sps:$4 sm:$0xff]  }
 0x24d   : > { %6059 = vmatpush1.bf16.msra.mxu1 %v11228_v20  ;;  %v11285_v20 = vld [vmem:[%s15480_s1 + $0x1560] ss:$16 sps:$4 sm:$0xff]  }
 0x24e   : > { %6060 = vmatprep.subr.bf16.mxu1 %v11236_v16  ;;  %v11293_v16 = vld [vmem:[%s15480_s1 + $0x1584] ss:$16 sps:$4 sm:$0xff]  }
 0x24f   : > { %6020 = vmatpush1.bf16.msra.mxu0 %v11231_v21  ;;  %v11290_v21 = vld [vmem:[%s15480_s1 + $0x1764] ss:$16 sps:$4 sm:$0xff]  }
 0x250   : > { %6021 = vmatprep.subr.bf16.mxu0 %v11239_v22  ;;  %v11288_v22 = vld [vmem:[%s15480_s1 + $0x1760] ss:$16 sps:$4 sm:$0xff]  }
 0x251   : > { %6061 = vmatpush1.bf16.msra.mxu1 %v11234_v26  ;;  %v11291_v26 = vld [vmem:[%s15480_s1 + $0x1580] ss:$16 sps:$4 sm:$0xff]  }
 0x252   : > { %6062 = vmatprep.subr.bf16.mxu1 %v11242_v33  ;;  %v11299_v33 = vld [vmem:[%s15480_s1 + $0x15a4] ss:$16 sps:$4 sm:$0xff]  }
 0x253   : > { %6022 = vmatpush1.bf16.msra.mxu0 %v11237_v29  ;;  %v11296_v29 = vld [vmem:[%s15480_s1 + $0x1784] ss:$16 sps:$4 sm:$0xff]  }
 0x254   : > { %6023 = vmatprep.subr.bf16.mxu0 %v11245_v34  ;;  %v11294_v34 = vld [vmem:[%s15480_s1 + $0x1780] ss:$16 sps:$4 sm:$0xff]  }
 0x255   : > { %6063 = vmatpush1.bf16.msra.mxu1 %v11240_v35  ;;  %v11297_v35 = vld [vmem:[%s15480_s1 + $0x15a0] ss:$16 sps:$4 sm:$0xff]  }
 0x256   : > { %6064 = vmatprep.subr.bf16.mxu1 %v11248_v39  ;;  %v11305_v39 = vld [vmem:[%s15480_s1 + $0x15c4] ss:$16 sps:$4 sm:$0xff]  }
 0x257   : > { %6024 = vmatpush1.bf16.msra.mxu0 %v11243_v37  ;;  %v11302_v37 = vld [vmem:[%s15480_s1 + $0x17a4] ss:$16 sps:$4 sm:$0xff]  }
 0x258   : > { %6025 = vmatprep.subr.bf16.mxu0 %v11251_v41  ;;  %v11300_v41 = vld [vmem:[%s15480_s1 + $0x17a0] ss:$16 sps:$4 sm:$0xff]  }
 0x259   : > { %v4144_v45 = vpop.f32.mrb[20].mxu0  ;;  %6065 = vmatpush1.bf16.msra.mxu1 %v11246_v42  ;;  %v11303_v42 = vld [vmem:[%s15480_s1 + $0x15c0] ss:$16 sps:$4 sm:$0xff]  }
 0x25a   : > { %v4145_v51 = vadd.f32 %v4144_v45, %v13805_v18  ;;  %v4146_v53 = vpop.f32.mrb[21].mxu0  ;;  %6066 = vmatprep.subr.bf16.mxu1 %v11254_v44  ;;  %v11311_v44 = vld [vmem:[%s15480_s1 + $0x15e4] ss:$16 sps:$4 sm:$0xff]   ;;  %v9533_v45 = vcombine.low %v13902_v60, %v13902_v60  ;;  %v11312_v60 = vld [vmem:[%s15480_s1 + $0x17e0] ss:$16 sps:$4 sm:$0xff]  }
 0x25b   : > { %v4147_v46 = vadd.f32 %v4146_v53, %v13807_v13  ;;  %v4148_v27 = vpop.f32.mrb[22].mxu0  ;;  %6026 = vmatpush1.bf16.msra.mxu0 %v11249_v43  ;;  %v4185_v57 = vpop.f32.mrb[20].mxu1  ;;  %v11308_v43 = vld [vmem:[%s15480_s1 + $0x17c4] ss:$16 sps:$4 sm:$0xff]  }
 0x25c   : > { %v4149_v18 = vpop.f32.mrb[23].mxu0  ;;  %6027 = vmatprep.subr.bf16.mxu0 %v11257_v9  ;;  %v14024_v28 = vadd.f32 %v4185_v57, %v4145_v51  ;;  %v4187_v13 = vpop.f32.mrb[21].mxu1  ;;  %v11306_v9 = vld [vmem:[%s15480_s1 + $0x17c0] ss:$16 sps:$4 sm:$0xff]   ;;  %v11314_v53 = vld [vmem:[%s15480_s1 + $0x17e4] ss:$16 sps:$4 sm:$0xff]  }
 0x25d   : > { %v14026_v30 = vadd.f32 %v4187_v13, %v4147_v46  ;;  %v4189_v6 = vpop.f32.mrb[22].mxu1  ;;  %6067 = vmatpush1.bf16.msra.mxu1 %v11252_v25  ;;  %v11309_v51 = vld [vmem:[%s15480_s1 + $0x15e0] ss:$16 sps:$4 sm:$0xff]   ;;  %v11321_v25 = vld [vmem:[%s15480_s1 + $0x100c] ss:$16 sps:$4 sm:$0xff]   ;;  %v9535_v46 = vcombine.low %v13918_v2, %v13918_v2  ;;  %v14143_v27 = vrot.slane %v9533_v45, 1 }
 0x25e   : > { %v4190_v32 = vpop.f32.mrb[23].mxu1  ;;  %6068 = vmatprep.subr.bf16.mxu1 %v11260_v54  ;;  %v11324_v54 = vld [vmem:[%s15480_s1 + $0x120c] ss:$16 sps:$4 sm:$0xff]   ;;  %v11322_v18 = vld [vmem:[%s15480_s1 + $0x1208] ss:$16 sps:$4 sm:$0xff]  }
 0x25f   : > { %6028 = vmatpush1.bf16.msra.mxu0 %v11255_v55  ;;  %v11319_v55 = vld [vmem:[%s15480_s1 + $0x1008] ss:$16 sps:$4 sm:$0xff]   ;;  %v11327_v2 = vld [vmem:[%s15480_s1 + $0x102c] ss:$16 sps:$4 sm:$0xff]   ;;  %v14154_v57 = vrot.slane %v9535_v46, 1 }
 0x260   : > { %6029 = vmatprep.subr.bf16.mxu0 %v11263_v19  ;;  %v11325_v19 = vld [vmem:[%s15480_s1 + $0x1028] ss:$16 sps:$4 sm:$0xff]   ;;  %v11330_v13 = vld [vmem:[%s15480_s1 + $0x122c] ss:$16 sps:$4 sm:$0xff]  }
 0x261   : > { %6069 = vmatpush1.bf16.msra.mxu1 %v11258_v56  ;;  %v11333_v6 = vld [vmem:[%s15480_s1 + $0x104c] ss:$16 sps:$4 sm:$0xff]   ;;  %v11328_v56 = vld [vmem:[%s15480_s1 + $0x1228] ss:$16 sps:$4 sm:$0xff]  }
 0x262   : > { %6070 = vmatprep.subr.bf16.mxu1 %v11266_v63  ;;  %v11331_v32 = vld [vmem:[%s15480_s1 + $0x1048] ss:$16 sps:$4 sm:$0xff]   ;;  %v11372_v45 = vld [vmem:[%s15480_s1 + $0x130c] ss:$16 sps:$4 sm:$0xff]  }
 0x263   : > { %6030 = vmatpush1.bf16.msra.mxu0 %v11261_v62  ;;  %v11336_v62 = vld [vmem:[%s15480_s1 + $0x124c] ss:$16 sps:$4 sm:$0xff]   ;;  %v11337_v63 = vld [vmem:[%s15480_s1 + $0x1068] ss:$16 sps:$4 sm:$0xff]  }
 0x264   : > { %6031 = vmatprep.subr.bf16.mxu0 %v11269_v0  ;;  %v11342_v0 = vld [vmem:[%s15480_s1 + $0x126c] ss:$16 sps:$4 sm:$0xff]  }
 0x265   : > { %6071 = vmatpush1.bf16.msra.mxu1 %v11264_v36  ;;  %v11345_v36 = vld [vmem:[%s15480_s1 + $0x108c] ss:$16 sps:$4 sm:$0xff]  }
 0x266   : > { %6072 = vmatprep.subr.bf16.mxu1 %v11272_v3  ;;  %v11343_v3 = vld [vmem:[%s15480_s1 + $0x1088] ss:$16 sps:$4 sm:$0xff]   ;;  %v11378_v46 = vld [vmem:[%s15480_s1 + $0x132c] ss:$16 sps:$4 sm:$0xff]  }
 0x267   : > { %6032 = vmatpush1.bf16.msra.mxu0 %v11267_v1  ;;  %v11340_v1 = vld [vmem:[%s15480_s1 + $0x1268] ss:$16 sps:$4 sm:$0xff]  }
 0x268   : > { %6033 = vmatprep.subr.bf16.mxu0 %v11275_v4  ;;  %v11348_v4 = vld [vmem:[%s15480_s1 + $0x128c] ss:$16 sps:$4 sm:$0xff]  }
 0x269   : > { %6073 = vmatpush1.bf16.msra.mxu1 %v11270_v5  ;;  %v11351_v5 = vld [vmem:[%s15480_s1 + $0x10ac] ss:$16 sps:$4 sm:$0xff]  }
 0x26a   : > { %6074 = vmatprep.subr.bf16.mxu1 %v11278_v8  ;;  %v11349_v8 = vld [vmem:[%s15480_s1 + $0x10a8] ss:$16 sps:$4 sm:$0xff]  }
 0x26b   : > { %6034 = vmatpush1.bf16.msra.mxu0 %v11273_v7  ;;  %v11346_v7 = vld [vmem:[%s15480_s1 + $0x1288] ss:$16 sps:$4 sm:$0xff]  }
 0x26c   : > { %6035 = vmatprep.subr.bf16.mxu0 %v11281_v12  ;;  %v11354_v12 = vld [vmem:[%s15480_s1 + $0x12ac] ss:$16 sps:$4 sm:$0xff]  }
 0x26d   : > { %6075 = vmatpush1.bf16.msra.mxu1 %v11276_v38  ;;  %v11357_v38 = vld [vmem:[%s15480_s1 + $0x10cc] ss:$16 sps:$4 sm:$0xff]  }
 0x26e   : > { %6076 = vmatprep.subr.bf16.mxu1 %v11284_v10 }
 0x26f   : > { %6036 = vmatpush1.bf16.msra.mxu0 %v11279_v14 }
 0x270   : > { %6037 = vmatprep.subr.bf16.mxu0 %v11287_v23 }
 0x271   : > { %6077 = vmatpush1.bf16.msra.mxu1 %v11282_v24  ;;  %v11352_v24 = vld [vmem:[%s15480_s1 + $0x12a8] ss:$16 sps:$4 sm:$0xff]  }
 0x272   : > { %6078 = vmatprep.subr.bf16.mxu1 %v11290_v21 }
 0x273   : > { %6038 = vmatpush1.bf16.msra.mxu0 %v11285_v20 }
 0x274   : > { %6039 = vmatprep.subr.bf16.mxu0 %v11293_v16  ;;  %v11355_v16 = vld [vmem:[%s15480_s1 + $0x10c8] ss:$16 sps:$4 sm:$0xff]  }
 0x275   : > { %6079 = vmatpush1.bf16.msra.mxu1 %v11288_v22  ;;  %v11360_v22 = vld [vmem:[%s15480_s1 + $0x12cc] ss:$16 sps:$4 sm:$0xff]  }
 0x276   : > { %6080 = vmatprep.subr.bf16.mxu1 %v11296_v29  ;;  %v11363_v29 = vld [vmem:[%s15480_s1 + $0x10ec] ss:$16 sps:$4 sm:$0xff]  }
 0x277   : > { %6040 = vmatpush1.bf16.msra.mxu0 %v11291_v26 }
 0x278   : > { %6041 = vmatprep.subr.bf16.mxu0 %v11299_v33 }
 0x279   : > { %6081 = vmatpush1.bf16.msra.mxu1 %v11294_v34 }
 0x27a   : > { %6082 = vmatprep.subr.bf16.mxu1 %v11302_v37  ;;  %v11358_v37 = vld [vmem:[%s15480_s1 + $0x12c8] ss:$16 sps:$4 sm:$0xff]  }
 0x27b   : > { %6042 = vmatpush1.bf16.msra.mxu0 %v11297_v35 }
 0x27c   : > { %6043 = vmatprep.subr.bf16.mxu0 %v11305_v39 }
 0x27d   : > { %6083 = vmatpush1.bf16.msra.mxu1 %v11300_v41  ;;  %v11361_v41 = vld [vmem:[%s15480_s1 + $0x10e8] ss:$16 sps:$4 sm:$0xff]  }
 0x27e   : > { %6084 = vmatprep.subr.bf16.mxu1 %v11308_v43  ;;  %v11369_v43 = vld [vmem:[%s15480_s1 + $0x110c] ss:$16 sps:$4 sm:$0xff]  }
 0x27f   : > { %6044 = vmatpush1.bf16.msra.mxu0 %v11303_v42  ;;  %v11366_v42 = vld [vmem:[%s15480_s1 + $0x12ec] ss:$16 sps:$4 sm:$0xff]  }
 0x280   : > { %6045 = vmatprep.subr.bf16.mxu0 %v11311_v44  ;;  %v11364_v44 = vld [vmem:[%s15480_s1 + $0x12e8] ss:$16 sps:$4 sm:$0xff]  }
 0x281   : > { %6085 = vmatpush1.bf16.msra.mxu1 %v11306_v9  ;;  %v11367_v9 = vld [vmem:[%s15480_s1 + $0x1108] ss:$16 sps:$4 sm:$0xff]  }
 0x282   : > { %6086 = vmatprep.subr.bf16.mxu1 %v11314_v53  ;;  %v11370_v53 = vld [vmem:[%s15480_s1 + $0x1308] ss:$16 sps:$4 sm:$0xff]  }
 0x283   : > { %6046 = vmatpush1.bf16.msra.mxu0 %v11309_v51  ;;  %v11375_v51 = vld [vmem:[%s15480_s1 + $0x112c] ss:$16 sps:$4 sm:$0xff]  }
 0x284   : > { %6097 = vmatprep.subr.bf16.mxu0 %v11321_v25  ;;  %v11373_v25 = vld [vmem:[%s15480_s1 + $0x1128] ss:$16 sps:$4 sm:$0xff]  }
 0x285   : > { %6087 = vmatpush1.bf16.msra.mxu1 %v11312_v60  ;;  %v11381_v60 = vld [vmem:[%s15480_s1 + $0x114c] ss:$16 sps:$4 sm:$0xff]  }
 0x286   : > { %6048 = vmatmul.mubr.bf16.vlgmr.msra.gmra.mrb[36].mxu0 %v14143_v27  ;;  %6138 = vmatprep.subr.bf16.mxu1 %v11324_v54  ;;  %v11379_v54 = vld [vmem:[%s15480_s1 + $0x1148] ss:$16 sps:$4 sm:$0xff]  }
 0x287   : > { %6098 = vmatpush1.bf16.msra.mxu0 %v11319_v55  ;;  %6129 = vmatprep.mubr.bf16.mxu0 %v13723_v15  ;;  %v11339_v15 = vld [vmem:[%s15480_s1 + $0x106c] ss:$16 sps:$4 sm:$0xff]   ;;  %v11376_v55 = vld [vmem:[%s15480_s1 + $0x1328] ss:$16 sps:$4 sm:$0xff]  }
 0x288   : > { %6099 = vmatprep.subr.bf16.mxu0 %v11327_v2  ;;  %6089 = vmatmul.mubr.bf16.vlgmr.msra.gmra.mrb[36].mxu1 %v14154_v57  ;;  %v11384_v2 = vld [vmem:[%s15480_s1 + $0x134c] ss:$16 sps:$4 sm:$0xff]  }
 0x289   : > { %6139 = vmatpush1.bf16.msra.mxu1 %v11322_v18  ;;  %6170 = vmatprep.mubr.bf16.mxu1 %v13726_v49  ;;  %v11334_v49 = vld [vmem:[%s15480_s1 + $0x1248] ss:$16 sps:$4 sm:$0xff]   ;;  %v11387_v18 = vld [vmem:[%s15480_s1 + $0x116c] ss:$16 sps:$4 sm:$0xff]  }
 0x28a   : > { %6140 = vmatprep.subr.bf16.mxu1 %v11330_v13  ;;  %v11385_v13 = vld [vmem:[%s15480_s1 + $0x1168] ss:$16 sps:$4 sm:$0xff]  }
 0x28b   : > { %6100 = vmatpush1.bf16.msra.mxu0 %v11325_v19  ;;  %v11382_v19 = vld [vmem:[%s15480_s1 + $0x1348] ss:$16 sps:$4 sm:$0xff]  }
 0x28c   : > { %6101 = vmatprep.subr.bf16.mxu0 %v11333_v6  ;;  %v11390_v6 = vld [vmem:[%s15480_s1 + $0x136c] ss:$16 sps:$4 sm:$0xff]  }
 0x28d   : > { %6141 = vmatpush1.bf16.msra.mxu1 %v11328_v56  ;;  %v11393_v56 = vld [vmem:[%s15480_s1 + $0x118c] ss:$16 sps:$4 sm:$0xff]  }
 0x28e   : > { %6142 = vmatprep.subr.bf16.mxu1 %v11336_v62  ;;  %v11391_v62 = vld [vmem:[%s15480_s1 + $0x1188] ss:$16 sps:$4 sm:$0xff]  }
 0x28f   : > { %6102 = vmatpush1.bf16.msra.mxu0 %v11331_v32  ;;  %v11388_v32 = vld [vmem:[%s15480_s1 + $0x1368] ss:$16 sps:$4 sm:$0xff]  }
 0x290   : > { %6103 = vmatprep.subr.bf16.mxu0 %v11339_v15  ;;  %v11396_v15 = vld [vmem:[%s15480_s1 + $0x138c] ss:$16 sps:$4 sm:$0xff]  }
 0x291   : > { %6143 = vmatpush1.bf16.msra.mxu1 %v11334_v49  ;;  %v11399_v49 = vld [vmem:[%s15480_s1 + $0x11ac] ss:$16 sps:$4 sm:$0xff]  }
 0x292   : > { %6144 = vmatprep.subr.bf16.mxu1 %v11342_v0  ;;  %v11397_v0 = vld [vmem:[%s15480_s1 + $0x11a8] ss:$16 sps:$4 sm:$0xff]  }
 0x293   : > { %6104 = vmatpush1.bf16.msra.mxu0 %v11337_v63  ;;  %v11394_v63 = vld [vmem:[%s15480_s1 + $0x1388] ss:$16 sps:$4 sm:$0xff]  }
 0x294   : > { %6105 = vmatprep.subr.bf16.mxu0 %v11345_v36  ;;  %v11402_v36 = vld [vmem:[%s15480_s1 + $0x13ac] ss:$16 sps:$4 sm:$0xff]  }
 0x295   : > { %6145 = vmatpush1.bf16.msra.mxu1 %v11340_v1  ;;  %v11405_v1 = vld [vmem:[%s15480_s1 + $0x11cc] ss:$16 sps:$4 sm:$0xff]  }
 0x296   : > { %6146 = vmatprep.subr.bf16.mxu1 %v11348_v4  ;;  %v11403_v4 = vld [vmem:[%s15480_s1 + $0x11c8] ss:$16 sps:$4 sm:$0xff]  }
 0x297   : > { %6106 = vmatpush1.bf16.msra.mxu0 %v11343_v3  ;;  %v11400_v3 = vld [vmem:[%s15480_s1 + $0x13a8] ss:$16 sps:$4 sm:$0xff]  }
 0x298   : > { %6107 = vmatprep.subr.bf16.mxu0 %v11351_v5  ;;  %v11408_v5 = vld [vmem:[%s15480_s1 + $0x13cc] ss:$16 sps:$4 sm:$0xff]  }
 0x299   : > { %v4226_v14 = vpop.f32.mrb[24].mxu0  ;;  %6147 = vmatpush1.bf16.msra.mxu1 %v11346_v7  ;;  %v11411_v7 = vld [vmem:[%s15480_s1 + $0x11ec] ss:$16 sps:$4 sm:$0xff]  }
 0x29a   : > { %v4227_v10 = vadd.f32 %v4226_v14, %v13591_v11  ;;  %v4228_v23 = vpop.f32.mrb[25].mxu0  ;;  %6148 = vmatprep.subr.bf16.mxu1 %v11354_v12  ;;  %v11409_v12 = vld [vmem:[%s15480_s1 + $0x11e8] ss:$16 sps:$4 sm:$0xff]   ;;  %v11417_v14 = vld [vmem:[%s15480_s1 + $0x140c] ss:$16 sps:$4 sm:$0xff]  }
 0x29b   : > { %v4229_v20 = vadd.f32 %v4228_v23, %v13593_v58  ;;  %v4230_v21 = vpop.f32.mrb[26].mxu0  ;;  %6108 = vmatpush1.bf16.msra.mxu0 %v11349_v8  ;;  %v4267_v26 = vpop.f32.mrb[24].mxu1  ;;  %v11406_v8 = vld [vmem:[%s15480_s1 + $0x13c8] ss:$16 sps:$4 sm:$0xff]  }
 0x29c   : > { %v4231_v11 = vpop.f32.mrb[27].mxu0  ;;  %6109 = vmatprep.subr.bf16.mxu0 %v11357_v38  ;;  %v14234_v33 = vadd.f32 %v4267_v26, %v4227_v10  ;;  %v4269_v58 = vpop.f32.mrb[25].mxu1  ;;  %v11414_v38 = vld [vmem:[%s15480_s1 + $0x13ec] ss:$16 sps:$4 sm:$0xff]   ;;  %v11412_v10 = vld [vmem:[%s15480_s1 + $0x13e8] ss:$16 sps:$4 sm:$0xff]  }
 0x29d   : > { %v14236_v34 = vadd.f32 %v4269_v58, %v4229_v20  ;;  %v4271_v35 = vpop.f32.mrb[26].mxu1  ;;  %6149 = vmatpush1.bf16.msra.mxu1 %v11352_v24  ;;  %v11415_v23 = vld [vmem:[%s15480_s1 + $0x1408] ss:$16 sps:$4 sm:$0xff]   ;;  %v11420_v24 = vld [vmem:[%s15480_s1 + $0x160c] ss:$16 sps:$4 sm:$0xff]  }
 0x29e   : > { %v4272_v39 = vpop.f32.mrb[27].mxu1  ;;  %6150 = vmatprep.subr.bf16.mxu1 %v11360_v22  ;;  %v11423_v20 = vld [vmem:[%s15480_s1 + $0x142c] ss:$16 sps:$4 sm:$0xff]   ;;  %v11418_v21 = vld [vmem:[%s15480_s1 + $0x1608] ss:$16 sps:$4 sm:$0xff]  }
 0x29f   : > { %6110 = vmatpush1.bf16.msra.mxu0 %v11355_v16  ;;  %v11421_v16 = vld [vmem:[%s15480_s1 + $0x1428] ss:$16 sps:$4 sm:$0xff]   ;;  %v11426_v22 = vld [vmem:[%s15480_s1 + $0x162c] ss:$16 sps:$4 sm:$0xff]  }
 0x2a0   : > { %6111 = vmatprep.subr.bf16.mxu0 %v11363_v29  ;;  %v11429_v26 = vld [vmem:[%s15480_s1 + $0x144c] ss:$16 sps:$4 sm:$0xff]   ;;  %v11427_v11 = vld [vmem:[%s15480_s1 + $0x1448] ss:$16 sps:$4 sm:$0xff]  }
 0x2a1   : > { %6151 = vmatpush1.bf16.msra.mxu1 %v11358_v37  ;;  %v11432_v29 = vld [vmem:[%s15480_s1 + $0x164c] ss:$16 sps:$4 sm:$0xff]   ;;  %v11436_v37 = vld [vmem:[%s15480_s1 + $0x1668] ss:$16 sps:$4 sm:$0xff]  }
 0x2a2   : > { %6152 = vmatprep.subr.bf16.mxu1 %v11366_v42  ;;  %v11438_v58 = vld [vmem:[%s15480_s1 + $0x166c] ss:$16 sps:$4 sm:$0xff]   ;;  %v11439_v39 = vld [vmem:[%s15480_s1 + $0x1488] ss:$16 sps:$4 sm:$0xff]  }
 0x2a3   : > { %6112 = vmatpush1.bf16.msra.mxu0 %v11361_v41  ;;  %v11441_v35 = vld [vmem:[%s15480_s1 + $0x148c] ss:$16 sps:$4 sm:$0xff]  }
 0x2a4   : > { %6113 = vmatprep.subr.bf16.mxu0 %v11369_v43  ;;  %v11444_v41 = vld [vmem:[%s15480_s1 + $0x168c] ss:$16 sps:$4 sm:$0xff]   ;;  %v11442_v43 = vld [vmem:[%s15480_s1 + $0x1688] ss:$16 sps:$4 sm:$0xff]  }
 0x2a5   : > { %6153 = vmatpush1.bf16.msra.mxu1 %v11364_v44  ;;  %v11447_v42 = vld [vmem:[%s15480_s1 + $0x14ac] ss:$16 sps:$4 sm:$0xff]   ;;  %v11445_v44 = vld [vmem:[%s15480_s1 + $0x14a8] ss:$16 sps:$4 sm:$0xff]  }
 0x2a6   : > { %6154 = vmatprep.subr.bf16.mxu1 %v11372_v45  ;;  %v11453_v45 = vld [vmem:[%s15480_s1 + $0x14cc] ss:$16 sps:$4 sm:$0xff]  }
 0x2a7   : > { %6114 = vmatpush1.bf16.msra.mxu0 %v11367_v9  ;;  %v11450_v9 = vld [vmem:[%s15480_s1 + $0x16ac] ss:$16 sps:$4 sm:$0xff]  }
 0x2a8   : > { %6115 = vmatprep.subr.bf16.mxu0 %v11375_v51 }
 0x2a9   : > { %6155 = vmatpush1.bf16.msra.mxu1 %v11370_v53 }
 0x2aa   : > { %6156 = vmatprep.subr.bf16.mxu1 %v11378_v46  ;;  %v11448_v46 = vld [vmem:[%s15480_s1 + $0x16a8] ss:$16 sps:$4 sm:$0xff]  }
 0x2ab   : > { %6116 = vmatpush1.bf16.msra.mxu0 %v11373_v25 }
 0x2ac   : > { %6117 = vmatprep.subr.bf16.mxu0 %v11381_v60 }
 0x2ad   : > { %6157 = vmatpush1.bf16.msra.mxu1 %v11376_v55 }
 0x2ae   : > { %6158 = vmatprep.subr.bf16.mxu1 %v11384_v2  ;;  %v11456_v2 = vld [vmem:[%s15480_s1 + $0x16cc] ss:$16 sps:$4 sm:$0xff]  }
 0x2af   : > { %6118 = vmatpush1.bf16.msra.mxu0 %v11379_v54  ;;  %v11451_v54 = vld [vmem:[%s15480_s1 + $0x14c8] ss:$16 sps:$4 sm:$0xff]  }
 0x2b0   : > { %6119 = vmatprep.subr.bf16.mxu0 %v11387_v18 }
 0x2b1   : > { %6159 = vmatpush1.bf16.msra.mxu1 %v11382_v19  ;;  %v11459_v19 = vld [vmem:[%s15480_s1 + $0x14ec] ss:$16 sps:$4 sm:$0xff]  }
 0x2b2   : > { %6160 = vmatprep.subr.bf16.mxu1 %v11390_v6 }
 0x2b3   : > { %6120 = vmatpush1.bf16.msra.mxu0 %v11385_v13 }
 0x2b4   : > { %6121 = vmatprep.subr.bf16.mxu0 %v11393_v56 }
 0x2b5   : > { %6161 = vmatpush1.bf16.msra.mxu1 %v11388_v32  ;;  %v11454_v32 = vld [vmem:[%s15480_s1 + $0x16c8] ss:$16 sps:$4 sm:$0xff]  }
 0x2b6   : > { %6162 = vmatprep.subr.bf16.mxu1 %v11396_v15  ;;  %v11457_v15 = vld [vmem:[%s15480_s1 + $0x14e8] ss:$16 sps:$4 sm:$0xff]  }
 0x2b7   : > { %6122 = vmatpush1.bf16.msra.mxu0 %v11391_v62 }
 0x2b8   : > { %6123 = vmatprep.subr.bf16.mxu0 %v11399_v49  ;;  %v11462_v49 = vld [vmem:[%s15480_s1 + $0x16ec] ss:$16 sps:$4 sm:$0xff]  }
 0x2b9   : > { %6163 = vmatpush1.bf16.msra.mxu1 %v11394_v63  ;;  %v11465_v63 = vld [vmem:[%s15480_s1 + $0x150c] ss:$16 sps:$4 sm:$0xff]  }
 0x2ba   : > { %6164 = vmatprep.subr.bf16.mxu1 %v11402_v36  ;;  %v11463_v36 = vld [vmem:[%s15480_s1 + $0x1508] ss:$16 sps:$4 sm:$0xff]  }
 0x2bb   : > { %6124 = vmatpush1.bf16.msra.mxu0 %v11397_v0  ;;  %v11460_v0 = vld [vmem:[%s15480_s1 + $0x16e8] ss:$16 sps:$4 sm:$0xff]  }
 0x2bc   : > { %6125 = vmatprep.subr.bf16.mxu0 %v11405_v1  ;;  %v11468_v1 = vld [vmem:[%s15480_s1 + $0x170c] ss:$16 sps:$4 sm:$0xff]  }
 0x2bd   : > { %6165 = vmatpush1.bf16.msra.mxu1 %v11400_v3  ;;  %v11471_v3 = vld [vmem:[%s15480_s1 + $0x152c] ss:$16 sps:$4 sm:$0xff]  }
 0x2be   : > { %6166 = vmatprep.subr.bf16.mxu1 %v11408_v5  ;;  %v11469_v5 = vld [vmem:[%s15480_s1 + $0x1528] ss:$16 sps:$4 sm:$0xff]  }
 0x2bf   : > { %6126 = vmatpush1.bf16.msra.mxu0 %v11403_v4  ;;  %v11466_v4 = vld [vmem:[%s15480_s1 + $0x1708] ss:$16 sps:$4 sm:$0xff]  }
 0x2c0   : > { %6127 = vmatprep.subr.bf16.mxu0 %v11411_v7  ;;  %v11474_v7 = vld [vmem:[%s15480_s1 + $0x172c] ss:$16 sps:$4 sm:$0xff]  }
 0x2c1   : > { %6167 = vmatpush1.bf16.msra.mxu1 %v11406_v8  ;;  %v11477_v8 = vld [vmem:[%s15480_s1 + $0x154c] ss:$16 sps:$4 sm:$0xff]  }
 0x2c2   : > { %6168 = vmatprep.subr.bf16.mxu1 %v11414_v38  ;;  %v11475_v38 = vld [vmem:[%s15480_s1 + $0x1548] ss:$16 sps:$4 sm:$0xff]  }
 0x2c3   : > { %6128 = vmatpush1.bf16.msra.mxu0 %v11409_v12  ;;  %v11472_v12 = vld [vmem:[%s15480_s1 + $0x1728] ss:$16 sps:$4 sm:$0xff]  }
 0x2c4   : > { %6179 = vmatprep.subr.bf16.mxu0 %v11417_v14  ;;  %v11480_v14 = vld [vmem:[%s15480_s1 + $0x174c] ss:$16 sps:$4 sm:$0xff]  }
 0x2c5   : > { %6169 = vmatpush1.bf16.msra.mxu1 %v11412_v10  ;;  %v11483_v10 = vld [vmem:[%s15480_s1 + $0x156c] ss:$16 sps:$4 sm:$0xff]  }
 0x2c6   : > { %6130 = vmatmul.mubr.bf16.vlgmr.msra.gmra.mrb[40].mxu0 %v13927_v31  ;;  %6220 = vmatprep.subr.bf16.mxu1 %v11420_v24  ;;  %v11424_v31 = vld [vmem:[%s15480_s1 + $0x1628] ss:$16 sps:$4 sm:$0xff]  }
 0x2c7   : > { %6180 = vmatpush1.bf16.msra.mxu0 %v11415_v23  ;;  %6211 = vmatprep.mubr.bf16.mxu0 %v13943_v17  ;;  %v11435_v17 = vld [vmem:[%s15480_s1 + $0x146c] ss:$16 sps:$4 sm:$0xff]   ;;  %v11478_v23 = vld [vmem:[%s15480_s1 + $0x1748] ss:$16 sps:$4 sm:$0xff]  }
 0x2c8   : > { %6181 = vmatprep.subr.bf16.mxu0 %v11423_v20  ;;  %6171 = vmatmul.mubr.bf16.vlgmr.msra.gmra.mrb[40].mxu1 %v13945_v59  ;;  %v11430_v59 = vld [vmem:[%s15480_s1 + $0x1648] ss:$16 sps:$4 sm:$0xff]   ;;  %v11486_v20 = vld [vmem:[%s15480_s1 + $0x176c] ss:$16 sps:$4 sm:$0xff]  }
 0x2c9   : > { %6221 = vmatpush1.bf16.msra.mxu1 %v11418_v21  ;;  %6252 = vmatprep.mubr.bf16.mxu1 %v13948_v61  ;;  %v11433_v61 = vld [vmem:[%s15480_s1 + $0x1468] ss:$16 sps:$4 sm:$0xff]   ;;  %v11489_v21 = vld [vmem:[%s15480_s1 + $0x158c] ss:$16 sps:$4 sm:$0xff]  }
 0x2ca   : > { %6222 = vmatprep.subr.bf16.mxu1 %v11426_v22  ;;  %v11481_v24 = vld [vmem:[%s15480_s1 + $0x1568] ss:$16 sps:$4 sm:$0xff]  }
 0x2cb   : > { %6182 = vmatpush1.bf16.msra.mxu0 %v11421_v16  ;;  %v11484_v16 = vld [vmem:[%s15480_s1 + $0x1768] ss:$16 sps:$4 sm:$0xff]  }
 0x2cc   : > { %6183 = vmatprep.subr.bf16.mxu0 %v11429_v26  ;;  %v11487_v22 = vld [vmem:[%s15480_s1 + $0x1588] ss:$16 sps:$4 sm:$0xff]   ;;  %v11492_v26 = vld [vmem:[%s15480_s1 + $0x178c] ss:$16 sps:$4 sm:$0xff]  }
 0x2cd   : > { %6223 = vmatpush1.bf16.msra.mxu1 %v11424_v31  ;;  %v11495_v31 = vld [vmem:[%s15480_s1 + $0x15ac] ss:$16 sps:$4 sm:$0xff]  }
 0x2ce   : > { %6224 = vmatprep.subr.bf16.mxu1 %v11432_v29  ;;  %v11490_v29 = vld [vmem:[%s15480_s1 + $0x1788] ss:$16 sps:$4 sm:$0xff]  }
 0x2cf   : > { %6184 = vmatpush1.bf16.msra.mxu0 %v11427_v11  ;;  %v14512_v11 = vld [vmem:[#allocation2] sm:$0xee] }
 0x2d0   : > { %6185 = vmatprep.subr.bf16.mxu0 %v11435_v17  ;;  %v11493_v17 = vld [vmem:[%s15480_s1 + $0x15a8] ss:$16 sps:$4 sm:$0xff]  }
 0x2d1   : > { %6225 = vmatpush1.bf16.msra.mxu1 %v11430_v59  ;;  %v11498_v59 = vld [vmem:[%s15480_s1 + $0x17ac] ss:$16 sps:$4 sm:$0xff]  }
 0x2d2   : > { %6226 = vmatprep.subr.bf16.mxu1 %v11438_v58  ;;  %v11501_v58 = vld [vmem:[%s15480_s1 + $0x15cc] ss:$16 sps:$4 sm:$0xff]  }
 0x2d3   : > { %6186 = vmatpush1.bf16.msra.mxu0 %v11433_v61  ;;  %v14523_v61 = vld [vmem:[#allocation2 + $0x8] sm:$0xee] }
 0x2d4   : > { %6187 = vmatprep.subr.bf16.mxu0 %v11441_v35  ;;  %v10050_v35 = vcombine.high %v14512_v11, %v14512_v11 }
 0x2d5   : > { %6227 = vmatpush1.bf16.msra.mxu1 %v11436_v37  ;;  %v11496_v37 = vld [vmem:[%s15480_s1 + $0x17a8] ss:$16 sps:$4 sm:$0xff]  }
 0x2d6   : > { %6228 = vmatprep.subr.bf16.mxu1 %v11444_v41  ;;  %v11499_v41 = vld [vmem:[%s15480_s1 + $0x15c8] ss:$16 sps:$4 sm:$0xff]  }
 0x2d7   : > { %6188 = vmatpush1.bf16.msra.mxu0 %v11439_v39  ;;  %v10052_v39 = vcombine.high %v14523_v61, %v14523_v61 }
 0x2d8   : > { %6189 = vmatprep.subr.bf16.mxu0 %v11447_v42  ;;  %v11504_v42 = vld [vmem:[%s15480_s1 + $0x17cc] ss:$16 sps:$4 sm:$0xff]  }
 0x2d9   : > { %v4308_v51 = vpop.f32.mrb[28].mxu0  ;;  %6229 = vmatpush1.bf16.msra.mxu1 %v11442_v43  ;;  %v11507_v43 = vld [vmem:[%s15480_s1 + $0x15ec] ss:$16 sps:$4 sm:$0xff]  }
 0x2da   : > { %v4309_v53 = vadd.f32 %v4308_v51, %v14234_v33  ;;  %v4310_v25 = vpop.f32.mrb[29].mxu0  ;;  %6230 = vmatprep.subr.bf16.mxu1 %v11450_v9  ;;  %v6558_v9 = vshll.u32 %v10050_v35, 16  ;;  %v6571_v51 = vshrl.u32 %v10052_v39, 16 }
 0x2db   : > { %v4311_v60 = vadd.f32 %v4310_v25, %v14236_v34  ;;  %v4312_v55 = vpop.f32.mrb[30].mxu0  ;;  %6190 = vmatpush1.bf16.msra.mxu0 %v11445_v44  ;;  %v4349_v18 = vpop.f32.mrb[28].mxu1  ;;  %v6555_v44 = vshrl.u32 %v10050_v35, 16  ;;  %v11505_v25 = vld [vmem:[%s15480_s1 + $0x15e8] ss:$16 sps:$4 sm:$0xff]  }
 0x2dc   : > { %v4313_v33 = vpop.f32.mrb[31].mxu0  ;;  %6191 = vmatprep.subr.bf16.mxu0 %v11453_v45  ;;  %v14436_v13 = vadd.f32 %v4349_v18, %v4309_v53  ;;  %v4351_v34 = vpop.f32.mrb[29].mxu1  ;;  %v11502_v45 = vld [vmem:[%s15480_s1 + $0x17c8] ss:$16 sps:$4 sm:$0xff]   ;;  %v6574_v53 = vshll.u32 %v10052_v39, 16  ;;  %v6573_v18 = vrot.slane %v6571_v51, 1 }
 0x2dd   : > { %v14438_v6 = vadd.f32 %v4351_v34, %v4311_v60  ;;  %v4353_v56 = vpop.f32.mrb[30].mxu1  ;;  %6231 = vmatpush1.bf16.msra.mxu1 %v11448_v46  ;;  %v11510_v46 = vld [vmem:[%s15480_s1 + $0x17ec] ss:$16 sps:$4 sm:$0xff]   ;;  %v11513_v60 = vld [vmem:[%s15480_s1 + $0x1804] ss:$16 sps:$4 sm:$0xff]   ;;  %v6557_v55 = vrot.slane %v6555_v44, 1 }
 0x2de   : > { %v4354_v62 = vpop.f32.mrb[31].mxu1  ;;  %6232 = vmatprep.subr.bf16.mxu1 %v11456_v2  ;;  %v11508_v2 = vld [vmem:[%s15480_s1 + $0x17e8] ss:$16 sps:$4 sm:$0xff]   ;;  %v6576_v33 = vrot.slane %v6574_v53, 2  ;;  %v11516_v34 = vld [vmem:[%s15480_s1 + $0x1a04] ss:$16 sps:$4 sm:$0xff]  }
 0x2df   : > { %6192 = vmatpush1.bf16.msra.mxu0 %v11451_v54  ;;  %v6560_v54 = vrot.slane %v6558_v9, 2  ;;  %v11519_v56 = vld [vmem:[%s15480_s1 + $0x1824] ss:$16 sps:$4 sm:$0xff]   ;;  %v11514_v62 = vld [vmem:[%s15480_s1 + $0x1a00] ss:$16 sps:$4 sm:$0xff]  }
 0x2e0   : > { %6193 = vmatprep.subr.bf16.mxu0 %v11459_v19  ;;  %v11511_v19 = vld [vmem:[%s15480_s1 + $0x1800] ss:$16 sps:$4 sm:$0xff]   ;;  %v11558_v9 = vld [vmem:[%s15480_s1 + $0x1ae4] ss:$16 sps:$4 sm:$0xff]  }
 0x2e1   : > { %6233 = vmatpush1.bf16.msra.mxu1 %v11454_v32  ;;  %v14568_v32 = vor.u32 %v6560_v54, %v6557_v55  ;;  %v11553_v44 = vld [vmem:[%s15480_s1 + $0x18e0] ss:$16 sps:$4 sm:$0xff]   ;;  %v11570_v54 = vld [vmem:[%s15480_s1 + $0x1b24] ss:$16 sps:$4 sm:$0xff]  }
 0x2e2   : > { %6234 = vmatprep.subr.bf16.mxu1 %v11462_v49  ;;  %v11517_v49 = vld [vmem:[%s15480_s1 + $0x1820] ss:$16 sps:$4 sm:$0xff]  }
 0x2e3   : > { %6194 = vmatpush1.bf16.msra.mxu0 %v11457_v15  ;;  %v14574_v15 = vor.u32 %v6576_v33, %v6573_v18  ;;  %v11556_v51 = vld [vmem:[%s15480_s1 + $0x1ae0] ss:$16 sps:$4 sm:$0xff]  }
 0x2e4   : > { %6195 = vmatprep.subr.bf16.mxu0 %v11465_v63  ;;  %v11522_v63 = vld [vmem:[%s15480_s1 + $0x1a24] ss:$16 sps:$4 sm:$0xff]   ;;  %v11559_v53 = vld [vmem:[%s15480_s1 + $0x1900] ss:$16 sps:$4 sm:$0xff]  }
 0x2e5   : > { %6235 = vmatpush1.bf16.msra.mxu1 %v11460_v0  ;;  %v11520_v0 = vld [vmem:[%s15480_s1 + $0x1a20] ss:$16 sps:$4 sm:$0xff]  }
 0x2e6   : > { %6236 = vmatprep.subr.bf16.mxu1 %v11468_v1  ;;  %v11528_v1 = vld [vmem:[%s15480_s1 + $0x1a44] ss:$16 sps:$4 sm:$0xff]   ;;  %v11565_v55 = vld [vmem:[%s15480_s1 + $0x1920] ss:$16 sps:$4 sm:$0xff]  }
 0x2e7   : > { %6196 = vmatpush1.bf16.msra.mxu0 %v11463_v36  ;;  %v11523_v36 = vld [vmem:[%s15480_s1 + $0x1840] ss:$16 sps:$4 sm:$0xff]  }
 0x2e8   : > { %6197 = vmatprep.subr.bf16.mxu0 %v11471_v3  ;;  %v11526_v3 = vld [vmem:[%s15480_s1 + $0x1a40] ss:$16 sps:$4 sm:$0xff]  }
 0x2e9   : > { %6237 = vmatpush1.bf16.msra.mxu1 %v11466_v4  ;;  %v11529_v4 = vld [vmem:[%s15480_s1 + $0x1860] ss:$16 sps:$4 sm:$0xff]  }
 0x2ea   : > { %6238 = vmatprep.subr.bf16.mxu1 %v11474_v7  ;;  %v11537_v7 = vld [vmem:[%s15480_s1 + $0x1884] ss:$16 sps:$4 sm:$0xff]   ;;  %v11568_v18 = vld [vmem:[%s15480_s1 + $0x1b20] ss:$16 sps:$4 sm:$0xff]  }
 0x2eb   : > { %6198 = vmatpush1.bf16.msra.mxu0 %v11469_v5  ;;  %v11534_v5 = vld [vmem:[%s15480_s1 + $0x1a64] ss:$16 sps:$4 sm:$0xff]   ;;  %v11571_v33 = vld [vmem:[%s15480_s1 + $0x1940] ss:$16 sps:$4 sm:$0xff]  }
 0x2ec   : > { %6199 = vmatprep.subr.bf16.mxu0 %v11477_v8  ;;  %v11532_v8 = vld [vmem:[%s15480_s1 + $0x1a60] ss:$16 sps:$4 sm:$0xff]  }
 0x2ed   : > { %6239 = vmatpush1.bf16.msra.mxu1 %v11472_v12  ;;  %v11535_v12 = vld [vmem:[%s15480_s1 + $0x1880] ss:$16 sps:$4 sm:$0xff]  }
 0x2ee   : > { %6240 = vmatprep.subr.bf16.mxu1 %v11480_v14  ;;  %v11543_v14 = vld [vmem:[%s15480_s1 + $0x18a4] ss:$16 sps:$4 sm:$0xff]  }
 0x2ef   : > { %6200 = vmatpush1.bf16.msra.mxu0 %v11475_v38  ;;  %v11540_v38 = vld [vmem:[%s15480_s1 + $0x1a84] ss:$16 sps:$4 sm:$0xff]  }
 0x2f0   : > { %6201 = vmatprep.subr.bf16.mxu0 %v11483_v10  ;;  %v11538_v10 = vld [vmem:[%s15480_s1 + $0x1a80] ss:$16 sps:$4 sm:$0xff]  }
 0x2f1   : > { %6241 = vmatpush1.bf16.msra.mxu1 %v11478_v23  ;;  %v11541_v23 = vld [vmem:[%s15480_s1 + $0x18a0] ss:$16 sps:$4 sm:$0xff]  }
 0x2f2   : > { %6242 = vmatprep.subr.bf16.mxu1 %v11486_v20  ;;  %v11549_v20 = vld [vmem:[%s15480_s1 + $0x18c4] ss:$16 sps:$4 sm:$0xff]  }
 0x2f3   : > { %6202 = vmatpush1.bf16.msra.mxu0 %v11481_v24  ;;  %v11546_v24 = vld [vmem:[%s15480_s1 + $0x1aa4] ss:$16 sps:$4 sm:$0xff]  }
 0x2f4   : > { %6203 = vmatprep.subr.bf16.mxu0 %v11489_v21 }
 0x2f5   : > { %6243 = vmatpush1.bf16.msra.mxu1 %v11484_v16 }
 0x2f6   : > { %6244 = vmatprep.subr.bf16.mxu1 %v11492_v26 }
 0x2f7   : > { %6204 = vmatpush1.bf16.msra.mxu0 %v11487_v22  ;;  %v11544_v22 = vld [vmem:[%s15480_s1 + $0x1aa0] ss:$16 sps:$4 sm:$0xff]  }
 0x2f8   : > { %6205 = vmatprep.subr.bf16.mxu0 %v11495_v31  ;;  %v11547_v31 = vld [vmem:[%s15480_s1 + $0x18c0] ss:$16 sps:$4 sm:$0xff]  }
 0x2f9   : > { %6245 = vmatpush1.bf16.msra.mxu1 %v11490_v29  ;;  %v11552_v29 = vld [vmem:[%s15480_s1 + $0x1ac4] ss:$16 sps:$4 sm:$0xff]  }
 0x2fa   : > { %6246 = vmatprep.subr.bf16.mxu1 %v11498_v59 }
 0x2fb   : > { %6206 = vmatpush1.bf16.msra.mxu0 %v11493_v17 }
 0x2fc   : > { %6207 = vmatprep.subr.bf16.mxu0 %v11501_v58  ;;  %v11555_v58 = vld [vmem:[%s15480_s1 + $0x18e4] ss:$16 sps:$4 sm:$0xff]  }
 0x2fd   : > { %6247 = vmatpush1.bf16.msra.mxu1 %v11496_v37 }
 0x2fe   : > { %6248 = vmatprep.subr.bf16.mxu1 %v11504_v42  ;;  %v11550_v42 = vld [vmem:[%s15480_s1 + $0x1ac0] ss:$16 sps:$4 sm:$0xff]  }
 0x2ff   : > { %6208 = vmatpush1.bf16.msra.mxu0 %v11499_v41 }
 0x300   : > { %6209 = vmatprep.subr.bf16.mxu0 %v11507_v43 }
 0x301   : > { %6249 = vmatpush1.bf16.msra.mxu1 %v11502_v45  ;;  %v11561_v45 = vld [vmem:[%s15480_s1 + $0x1904] ss:$16 sps:$4 sm:$0xff]  }
 0x302   : > { %6250 = vmatprep.subr.bf16.mxu1 %v11510_v46  ;;  %v11567_v46 = vld [vmem:[%s15480_s1 + $0x1924] ss:$16 sps:$4 sm:$0xff]  }
 0x303   : > { %6210 = vmatpush1.bf16.msra.mxu0 %v11505_v25  ;;  %v11564_v25 = vld [vmem:[%s15480_s1 + $0x1b04] ss:$16 sps:$4 sm:$0xff]  }
 0x304   : > { %7898 = vmatprep.subr.bf16.mxu0 %v11513_v60  ;;  %v11562_v60 = vld [vmem:[%s15480_s1 + $0x1b00] ss:$16 sps:$4 sm:$0xff]  }
 0x305   : > { %6251 = vmatpush1.bf16.msra.mxu1 %v11508_v2  ;;  %v11573_v2 = vld [vmem:[%s15480_s1 + $0x1944] ss:$16 sps:$4 sm:$0xff]  }
 0x306   : > { %6212 = vmatmul.mubr.bf16.vlgmr.msra.gmra.mrb[44].mxu0 %v14143_v27  ;;  %7939 = vmatprep.subr.bf16.mxu1 %v11516_v34  ;;  %v11525_v27 = vld [vmem:[%s15480_s1 + $0x1844] ss:$16 sps:$4 sm:$0xff]  }
 0x307   : > { %7899 = vmatpush1.bf16.msra.mxu0 %v11511_v19  ;;  %7930 = vmatprep.mubr.bf16.mxu0 %v14568_v32  ;;  %v11576_v19 = vld [vmem:[%s15480_s1 + $0x1b44] ss:$16 sps:$4 sm:$0xff]  }
 0x308   : > { %7900 = vmatprep.subr.bf16.mxu0 %v11519_v56  ;;  %6253 = vmatmul.mubr.bf16.vlgmr.msra.gmra.mrb[44].mxu1 %v14154_v57  ;;  %v11531_v57 = vld [vmem:[%s15480_s1 + $0x1864] ss:$16 sps:$4 sm:$0xff]   ;;  %v11574_v56 = vld [vmem:[%s15480_s1 + $0x1b40] ss:$16 sps:$4 sm:$0xff]  }
 0x309   : > { %7940 = vmatpush1.bf16.msra.mxu1 %v11514_v62  ;;  %7971 = vmatprep.mubr.bf16.mxu1 %v14574_v15  ;;  %v11579_v34 = vld [vmem:[%s15480_s1 + $0x1964] ss:$16 sps:$4 sm:$0xff]   ;;  %v11577_v62 = vld [vmem:[%s15480_s1 + $0x1960] ss:$16 sps:$4 sm:$0xff]  }
 0x30a   : > { %7941 = vmatprep.subr.bf16.mxu1 %v11522_v63  ;;  %v11585_v63 = vld [vmem:[%s15480_s1 + $0x1984] ss:$16 sps:$4 sm:$0xff]  }
 0x30b   : > { %7901 = vmatpush1.bf16.msra.mxu0 %v11517_v49  ;;  %v11582_v49 = vld [vmem:[%s15480_s1 + $0x1b64] ss:$16 sps:$4 sm:$0xff]  }
 0x30c   : > { %7902 = vmatprep.subr.bf16.mxu0 %v11525_v27  ;;  %v11580_v27 = vld [vmem:[%s15480_s1 + $0x1b60] ss:$16 sps:$4 sm:$0xff]  }
 0x30d   : > { %7942 = vmatpush1.bf16.msra.mxu1 %v11520_v0  ;;  %v11583_v0 = vld [vmem:[%s15480_s1 + $0x1980] ss:$16 sps:$4 sm:$0xff]  }
 0x30e   : > { %7943 = vmatprep.subr.bf16.mxu1 %v11528_v1  ;;  %v11591_v1 = vld [vmem:[%s15480_s1 + $0x19a4] ss:$16 sps:$4 sm:$0xff]  }
 0x30f   : > { %7903 = vmatpush1.bf16.msra.mxu0 %v11523_v36  ;;  %v11588_v36 = vld [vmem:[%s15480_s1 + $0x1b84] ss:$16 sps:$4 sm:$0xff]  }
 0x310   : > { %7904 = vmatprep.subr.bf16.mxu0 %v11531_v57  ;;  %v14724_v57 = vld [vmem:[#allocation2 + $0x10] sm:$0xee] }
 0x311   : > { %7944 = vmatpush1.bf16.msra.mxu1 %v11526_v3  ;;  %v11586_v3 = vld [vmem:[%s15480_s1 + $0x1b80] ss:$16 sps:$4 sm:$0xff]  }
 0x312   : > { %7945 = vmatprep.subr.bf16.mxu1 %v11534_v5  ;;  %v11589_v5 = vld [vmem:[%s15480_s1 + $0x19a0] ss:$16 sps:$4 sm:$0xff]  }
 0x313   : > { %7905 = vmatpush1.bf16.msra.mxu0 %v11529_v4  ;;  %v10049_v4 = vcombine.low %v14512_v11, %v14512_v11  ;;  %v10054_v11 = vcombine.high %v14724_v57, %v14724_v57 }
 0x314   : > { %7906 = vmatprep.subr.bf16.mxu0 %v11537_v7  ;;  %v11594_v7 = vld [vmem:[%s15480_s1 + $0x1ba4] ss:$16 sps:$4 sm:$0xff]  }
 0x315   : > { %7946 = vmatpush1.bf16.msra.mxu1 %v11532_v8  ;;  %v14737_v8 = vld [vmem:[#allocation2 + $0x18] sm:$0xee] }
 0x316   : > { %7947 = vmatprep.subr.bf16.mxu1 %v11540_v38  ;;  %v10051_v38 = vcombine.low %v14523_v61, %v14523_v61  ;;  %v11600_v61 = vld [vmem:[%s15480_s1 + $0x1bc4] ss:$16 sps:$4 sm:$0xff]  }
 0x317   : > { %7907 = vmatpush1.bf16.msra.mxu0 %v11535_v12  ;;  %v11597_v12 = vld [vmem:[%s15480_s1 + $0x19c4] ss:$16 sps:$4 sm:$0xff]  }
 0x318   : > { %7908 = vmatprep.subr.bf16.mxu0 %v11543_v14  ;;  %v11592_v14 = vld [vmem:[%s15480_s1 + $0x1ba0] ss:$16 sps:$4 sm:$0xff]  }
 0x319   : > { %v5967_v21 = vpop.f32.mrb[32].mxu0  ;;  %7948 = vmatpush1.bf16.msra.mxu1 %v11538_v10  ;;  %v6547_v10 = vshrl.u32 %v10049_v4, 16 }
 0x31a   : > { %v5969_v16 = vpop.f32.mrb[33].mxu0  ;;  %7949 = vmatprep.subr.bf16.mxu1 %v11546_v24  ;;  %v10056_v24 = vcombine.high %v14737_v8, %v14737_v8 }
 0x31b   : > { %v5971_v26 = vpop.f32.mrb[34].mxu0  ;;  %7909 = vmatpush1.bf16.msra.mxu0 %v11541_v23  ;;  %v6008_v17 = vpop.f32.mrb[32].mxu1  ;;  %v6550_v23 = vshll.u32 %v10049_v4, 16  ;;  %v11634_v4 = vld [vmem:[%s15480_s1 + $0x1e64] ss:$16 sps:$4 sm:$0xff]  }
 0x31c   : > { %v5972_v59 = vpop.f32.mrb[35].mxu0  ;;  %7910 = vmatprep.subr.bf16.mxu0 %v11549_v20  ;;  %v14648_v35 = vadd.f32 %v6008_v17, %v5967_v21  ;;  %v6010_v37 = vpop.f32.mrb[33].mxu1  ;;  %v11595_v20 = vld [vmem:[%s15480_s1 + $0x19c0] ss:$16 sps:$4 sm:$0xff]   ;;  %v11603_v21 = vld [vmem:[%s15480_s1 + $0x19e4] ss:$16 sps:$4 sm:$0xff]  }
 0x31d   : > { %v14650_v39 = vadd.f32 %v6010_v37, %v5969_v16  ;;  %v6012_v41 = vpop.f32.mrb[34].mxu1  ;;  %7950 = vmatpush1.bf16.msra.mxu1 %v11544_v22  ;;  %v6587_v16 = vshrl.u32 %v10054_v11, 16  ;;  %v6590_v22 = vshll.u32 %v10054_v11, 16  ;;  %v6563_v26 = vshrl.u32 %v10051_v38, 16  ;;  %v11640_v11 = vld [vmem:[%s15480_s1 + $0x1e84] ss:$16 sps:$4 sm:$0xff]  }
 0x31e   : > { %v6013_v43 = vpop.f32.mrb[35].mxu1  ;;  %7951 = vmatprep.subr.bf16.mxu1 %v11552_v29  ;;  %v11598_v29 = vld [vmem:[%s15480_s1 + $0x1bc0] ss:$16 sps:$4 sm:$0xff]   ;;  %v6549_v17 = vrot.slane %v6547_v10, 1  ;;  %v6552_v59 = vrot.slane %v6550_v23, 2  ;;  %v6606_v37 = vshll.u32 %v10056_v24, 16 }
 0x31f   : > { %7911 = vmatpush1.bf16.msra.mxu0 %v11547_v31  ;;  %v6566_v31 = vshll.u32 %v10051_v38, 16  ;;  %v11601_v41 = vld [vmem:[%s15480_s1 + $0x19e0] ss:$16 sps:$4 sm:$0xff]   ;;  %v11613_v43 = vld [vmem:[%s15480_s1 + $0x1c04] ss:$16 sps:$4 sm:$0xff]  }
 0x320   : > { %7912 = vmatprep.subr.bf16.mxu0 %v11555_v58  ;;  %v6603_v58 = vshrl.u32 %v10056_v24, 16  ;;  %v11643_v38 = vld [vmem:[%s15480_s1 + $0x1ca4] ss:$16 sps:$4 sm:$0xff]   ;;  %v11641_v10 = vld [vmem:[%s15480_s1 + $0x1ca0] ss:$16 sps:$4 sm:$0xff]  }
 0x321   : > { %7952 = vmatpush1.bf16.msra.mxu1 %v11550_v42  ;;  %v11606_v42 = vld [vmem:[%s15480_s1 + $0x1be4] ss:$16 sps:$4 sm:$0xff]  }
 0x322   : > { %7953 = vmatprep.subr.bf16.mxu1 %v11558_v9  ;;  %v6592_v9 = vrot.slane %v6590_v22, 2  ;;  %v11646_v23 = vld [vmem:[%s15480_s1 + $0x1ea4] ss:$16 sps:$4 sm:$0xff]  }
 0x323   : > { %7913 = vmatpush1.bf16.msra.mxu0 %v11553_v44  ;;  %v6589_v44 = vrot.slane %v6587_v16, 1  ;;  %v11649_v24 = vld [vmem:[%s15480_s1 + $0x1cc4] ss:$16 sps:$4 sm:$0xff]   ;;  %v11644_v16 = vld [vmem:[%s15480_s1 + $0x1ea0] ss:$16 sps:$4 sm:$0xff]  }
 0x324   : > { %7914 = vmatprep.subr.bf16.mxu0 %v11561_v45  ;;  %v6565_v45 = vrot.slane %v6563_v26, 1 }
 0x325   : > { %7954 = vmatpush1.bf16.msra.mxu1 %v11556_v51  ;;  %v6568_v51 = vrot.slane %v6566_v31, 2  ;;  %v11647_v31 = vld [vmem:[%s15480_s1 + $0x1cc0] ss:$16 sps:$4 sm:$0xff]  }
 0x326   : > { %7955 = vmatprep.subr.bf16.mxu1 %v11564_v25  ;;  %v14775_v25 = vor.u32 %v6552_v59, %v6549_v17  ;;  %v11655_v59 = vld [vmem:[%s15480_s1 + $0x1ce4] ss:$16 sps:$4 sm:$0xff]  }
 0x327   : > { %7915 = vmatpush1.bf16.msra.mxu0 %v11559_v53  ;;  %v11604_v53 = vld [vmem:[%s15480_s1 + $0x1be0] ss:$16 sps:$4 sm:$0xff]  }
 0x328   : > { %7916 = vmatprep.subr.bf16.mxu0 %v11567_v46  ;;  %v6605_v46 = vrot.slane %v6603_v58, 1 }
 0x329   : > { %7956 = vmatpush1.bf16.msra.mxu1 %v11562_v60  ;;  %v6608_v60 = vrot.slane %v6606_v37, 2 }
 0x32a   : > { %7957 = vmatprep.subr.bf16.mxu1 %v11570_v54  ;;  %v11616_v54 = vld [vmem:[%s15480_s1 + $0x1e04] ss:$16 sps:$4 sm:$0xff]  }
 0x32b   : > { %7917 = vmatpush1.bf16.msra.mxu0 %v11565_v55  ;;  %v11611_v55 = vld [vmem:[%s15480_s1 + $0x1c00] ss:$16 sps:$4 sm:$0xff]  }
 0x32c   : > { %7918 = vmatprep.subr.bf16.mxu0 %v11573_v2  ;;  %v11619_v2 = vld [vmem:[%s15480_s1 + $0x1c24] ss:$16 sps:$4 sm:$0xff]  }
 0x32d   : > { %7958 = vmatpush1.bf16.msra.mxu1 %v11568_v18  ;;  %v14786_v18 = vor.u32 %v6592_v9, %v6589_v44  ;;  %v11653_v9 = vld [vmem:[%s15480_s1 + $0x1ce0] ss:$16 sps:$4 sm:$0xff]  }
 0x32e   : > { %7959 = vmatprep.subr.bf16.mxu1 %v11576_v19  ;;  %v11614_v19 = vld [vmem:[%s15480_s1 + $0x1e00] ss:$16 sps:$4 sm:$0xff]  }
 0x32f   : > { %7919 = vmatpush1.bf16.msra.mxu0 %v11571_v33  ;;  %v14788_v33 = vor.u32 %v6568_v51, %v6565_v45  ;;  %v11658_v45 = vld [vmem:[%s15480_s1 + $0x1ee4] ss:$16 sps:$4 sm:$0xff]  }
 0x330   : > { %7920 = vmatprep.subr.bf16.mxu0 %v11579_v34  ;;  %v14794_v34 = vor.u32 %v6608_v60, %v6605_v46  ;;  %v8283_v46 = vld [vmem:[%s15485_s6] sm:$0xf]  ;;  %v11664_v60 = vld [vmem:[%s15480_s1 + $0x1f04] ss:$16 sps:$4 sm:$0xff]  }
 0x331   : > { %7960 = vmatpush1.bf16.msra.mxu1 %v11574_v56  ;;  %v11617_v56 = vld [vmem:[%s15480_s1 + $0x1c20] ss:$16 sps:$4 sm:$0xff]  }
 0x332   : > { %7961 = vmatprep.subr.bf16.mxu1 %v11582_v49  ;;  %v11625_v49 = vld [vmem:[%s15480_s1 + $0x1c44] ss:$16 sps:$4 sm:$0xff]  }
 0x333   : > { %7921 = vmatpush1.bf16.msra.mxu0 %v11577_v62  ;;  %v11622_v62 = vld [vmem:[%s15480_s1 + $0x1e24] ss:$16 sps:$4 sm:$0xff]  }
 0x334   : > { %7922 = vmatprep.subr.bf16.mxu0 %v11585_v63  ;;  %v11620_v63 = vld [vmem:[%s15480_s1 + $0x1e20] ss:$16 sps:$4 sm:$0xff]  }
 0x335   : > { %7962 = vmatpush1.bf16.msra.mxu1 %v11580_v27  ;;  %v11623_v27 = vld [vmem:[%s15480_s1 + $0x1c40] ss:$16 sps:$4 sm:$0xff]  }
 0x336   : > { %7963 = vmatprep.subr.bf16.mxu1 %v11588_v36  ;;  %v11631_v36 = vld [vmem:[%s15480_s1 + $0x1c64] ss:$16 sps:$4 sm:$0xff]  }
 0x337   : > { %7923 = vmatpush1.bf16.msra.mxu0 %v11583_v0  ;;  %v11628_v0 = vld [vmem:[%s15480_s1 + $0x1e44] ss:$16 sps:$4 sm:$0xff]  }
 0x338   : > { %7924 = vmatprep.subr.bf16.mxu0 %v11591_v1  ;;  %v11626_v1 = vld [vmem:[%s15480_s1 + $0x1e40] ss:$16 sps:$4 sm:$0xff]  }
 0x339   : > { %7964 = vmatpush1.bf16.msra.mxu1 %v11586_v3  ;;  %v11629_v3 = vld [vmem:[%s15480_s1 + $0x1c60] ss:$16 sps:$4 sm:$0xff]  }
 0x33a   : > { %7965 = vmatprep.subr.bf16.mxu1 %v11594_v7  ;;  %v11632_v7 = vld [vmem:[%s15480_s1 + $0x1e60] ss:$16 sps:$4 sm:$0xff]  }
 0x33b   : > { %7925 = vmatpush1.bf16.msra.mxu0 %v11589_v5  ;;  %v11637_v5 = vld [vmem:[%s15480_s1 + $0x1c84] ss:$16 sps:$4 sm:$0xff]  }
 0x33c   : > { %7926 = vmatprep.subr.bf16.mxu0 %v11597_v12  ;;  %v11635_v12 = vld [vmem:[%s15480_s1 + $0x1c80] ss:$16 sps:$4 sm:$0xff]  }
 0x33d   : > { %7966 = vmatpush1.bf16.msra.mxu1 %v11592_v14  ;;  %v11638_v14 = vld [vmem:[%s15480_s1 + $0x1e80] ss:$16 sps:$4 sm:$0xff]  }
 0x33e   : > { %7967 = vmatprep.subr.bf16.mxu1 %v11600_v61 }
 0x33f   : > { %7927 = vmatpush1.bf16.msra.mxu0 %v11595_v20 }
 0x340   : > { %7928 = vmatprep.subr.bf16.mxu0 %v11603_v21 }
 0x341   : > { %7968 = vmatpush1.bf16.msra.mxu1 %v11598_v29  ;;  %v11652_v29 = vld [vmem:[%s15480_s1 + $0x1ec4] ss:$16 sps:$4 sm:$0xff]  }
 0x342   : > { %7969 = vmatprep.subr.bf16.mxu1 %v11606_v42  ;;  %v11650_v42 = vld [vmem:[%s15480_s1 + $0x1ec0] ss:$16 sps:$4 sm:$0xff]  }
 0x343   : > { %7929 = vmatpush1.bf16.msra.mxu0 %v11601_v41 }
 0x344   : > { %7980 = vmatprep.subr.bf16.mxu0 %v11613_v43 }
 0x345   : > { %7970 = vmatpush1.bf16.msra.mxu1 %v11604_v53  ;;  %v11656_v53 = vld [vmem:[%s15480_s1 + $0x1ee0] ss:$16 sps:$4 sm:$0xff]  }
 0x346   : > { %7931 = vmatmul.mubr.bf16.vlgmr.msra.gmra.mrb[48].mxu0 %v14775_v25  ;;  %8021 = vmatprep.subr.bf16.mxu1 %v11616_v54  ;;  %v11911_v54 = vmov 0  }
 0x347   : > { %7981 = vmatpush1.bf16.msra.mxu0 %v11611_v55  ;;  %8012 = vmatprep.mubr.bf16.mxu0 %v14786_v18  ;;  %v11667_v55 = vld [vmem:[%s15480_s1 + $0x1d24] ss:$16 sps:$4 sm:$0xff]  }
 0x348   : > { %7982 = vmatprep.subr.bf16.mxu0 %v11619_v2  ;;  %7972 = vmatmul.mubr.bf16.vlgmr.msra.gmra.mrb[48].mxu1 %v14788_v33  ;;  %v11662_v2 = vld [vmem:[%s15480_s1 + $0x1f00] ss:$16 sps:$4 sm:$0xff]  }
 0x349   : > { %8022 = vmatpush1.bf16.msra.mxu1 %v11614_v19  ;;  %8053 = vmatprep.mubr.bf16.mxu1 %v14794_v34  ;;  %v11665_v19 = vld [vmem:[%s15480_s1 + $0x1d20] ss:$16 sps:$4 sm:$0xff]  }
 0x34a   : > { %8023 = vmatprep.subr.bf16.mxu1 %v11622_v62  ;;  %10334 = vset.pattern.permute.xlu0 %v11911_v54  ;;  %v11673_v62 = vld [vmem:[%s15480_s1 + $0x1d44] ss:$16 sps:$4 sm:$0xff]   ;;  %v11720_v54 = vld [vmem:[%s15480_s1 + $0x1a28] ss:$16 sps:$4 sm:$0xff]  }
 0x34b   : > { %7983 = vmatpush1.bf16.msra.mxu0 %v11617_v56  ;;  %8286 = vperm.xlu0 %10334, %v8283_v46   ;;  %v11670_v56 = vld [vmem:[%s15480_s1 + $0x1f24] ss:$16 sps:$4 sm:$0xff]   ;;  %v11714_v46 = vld [vmem:[%s15480_s1 + $0x1a08] ss:$16 sps:$4 sm:$0xff]  }
 0x34c   : > { %7984 = vmatprep.subr.bf16.mxu0 %v11625_v49  ;;  %v11668_v49 = vld [vmem:[%s15480_s1 + $0x1f20] ss:$16 sps:$4 sm:$0xff]  }
 0x34d   : > { %8024 = vmatpush1.bf16.msra.mxu1 %v11620_v63  ;;  %v11671_v63 = vld [vmem:[%s15480_s1 + $0x1d40] ss:$16 sps:$4 sm:$0xff]  }
 0x34e   : > { %8025 = vmatprep.subr.bf16.mxu1 %v11628_v0  ;;  %v11679_v0 = vld [vmem:[%s15480_s1 + $0x1d64] ss:$16 sps:$4 sm:$0xff]  }
 0x34f   : > { %7985 = vmatpush1.bf16.msra.mxu0 %v11623_v27  ;;  %v11676_v27 = vld [vmem:[%s15480_s1 + $0x1f44] ss:$16 sps:$4 sm:$0xff]  }
 0x350   : > { %7986 = vmatprep.subr.bf16.mxu0 %v11631_v36  ;;  %v11674_v36 = vld [vmem:[%s15480_s1 + $0x1f40] ss:$16 sps:$4 sm:$0xff]  }
 0x351   : > { %8026 = vmatpush1.bf16.msra.mxu1 %v11626_v1  ;;  %v11677_v1 = vld [vmem:[%s15480_s1 + $0x1d60] ss:$16 sps:$4 sm:$0xff]  }
 0x352   : > { %8027 = vmatprep.subr.bf16.mxu1 %v11634_v4  ;;  %v11685_v4 = vld [vmem:[%s15480_s1 + $0x1d84] ss:$16 sps:$4 sm:$0xff]  }
 0x353   : > { %7987 = vmatpush1.bf16.msra.mxu0 %v11629_v3  ;;  %v11682_v3 = vld [vmem:[%s15480_s1 + $0x1f64] ss:$16 sps:$4 sm:$0xff]  }
 0x354   : > { %7988 = vmatprep.subr.bf16.mxu0 %v11637_v5  ;;  %v11680_v5 = vld [vmem:[%s15480_s1 + $0x1f60] ss:$16 sps:$4 sm:$0xff]  }
 0x355   : > { %8028 = vmatpush1.bf16.msra.mxu1 %v11632_v7  ;;  %v11683_v7 = vld [vmem:[%s15480_s1 + $0x1d80] ss:$16 sps:$4 sm:$0xff]  }
 0x356   : > { %8029 = vmatprep.subr.bf16.mxu1 %v11640_v11  ;;  %v11691_v11 = vld [vmem:[%s15480_s1 + $0x1da4] ss:$16 sps:$4 sm:$0xff]  }
 0x357   : > { %7989 = vmatpush1.bf16.msra.mxu0 %v11635_v12  ;;  %v11688_v12 = vld [vmem:[%s15480_s1 + $0x1f84] ss:$16 sps:$4 sm:$0xff]  }
 0x358   : > { %7990 = vmatprep.subr.bf16.mxu0 %v11643_v38  ;;  %v11686_v38 = vld [vmem:[%s15480_s1 + $0x1f80] ss:$16 sps:$4 sm:$0xff]  }
 0x359   : > { %v6049_v20 = vpop.f32.mrb[36].mxu0  ;;  %8030 = vmatpush1.bf16.msra.mxu1 %v11638_v14  ;;  %v10053_v14 = vcombine.low %v14724_v57, %v14724_v57  ;;  %v11692_v57 = vld [vmem:[%s15480_s1 + $0x1fa0] ss:$16 sps:$4 sm:$0xff]  }
 0x35a   : > { %v6050_v61 = vadd.f32 %v6049_v20, %v14648_v35  ;;  %v6051_v21 = vpop.f32.mrb[37].mxu0  ;;  %8031 = vmatprep.subr.bf16.mxu1 %v11646_v23  ;;  %v11694_v23 = vld [vmem:[%s15480_s1 + $0x1fa4] ss:$16 sps:$4 sm:$0xff]   ;;  %v10055_v20 = vcombine.low %v14737_v8, %v14737_v8 }
 0x35b   : > { %v6052_v22 = vadd.f32 %v6051_v21, %v14650_v39  ;;  %v6053_v26 = vpop.f32.mrb[38].mxu0  ;;  %7991 = vmatpush1.bf16.msra.mxu0 %v11641_v10  ;;  %v6090_v17 = vpop.f32.mrb[36].mxu1  ;;  %v11689_v10 = vld [vmem:[%s15480_s1 + $0x1da0] ss:$16 sps:$4 sm:$0xff]   ;;  %v6582_v21 = vshll.u32 %v10053_v14, 16 }
 0x35c   : > { %v6054_v35 = vpop.f32.mrb[39].mxu0  ;;  %7992 = vmatprep.subr.bf16.mxu0 %v11649_v24  ;;  %v6091_v58 = vadd.f32 %v6090_v17, %v6050_v61  ;;  %v6092_v39 = vpop.f32.mrb[37].mxu1  ;;  %v11697_v24 = vld [vmem:[%s15480_s1 + $0x1dc4] ss:$16 sps:$4 sm:$0xff]   ;;  %v6579_v61 = vshrl.u32 %v10053_v14, 16  ;;  %v6595_v26 = vshrl.u32 %v10055_v20, 16 }
 0x35d   : > { %v6093_v37 = vadd.f32 %v6092_v39, %v6052_v22  ;;  %v6094_v41 = vpop.f32.mrb[38].mxu1  ;;  %8032 = vmatpush1.bf16.msra.mxu1 %v11644_v16  ;;  %v11695_v16 = vld [vmem:[%s15480_s1 + $0x1dc0] ss:$16 sps:$4 sm:$0xff]   ;;  %v11700_v22 = vld [vmem:[%s15480_s1 + $0x1fc4] ss:$16 sps:$4 sm:$0xff]   ;;  %v6584_v35 = vrot.slane %v6582_v21, 2 }
 0x35e   : > { %v14874_v43 = vadd.f32 %v6091_v58, %v14024_v28  ;;  %v6095_v44 = vpop.f32.mrb[39].mxu1  ;;  %8033 = vmatprep.subr.bf16.mxu1 %v11652_v29  ;;  %v11661_v28 = vld [vmem:[%s15480_s1 + $0x1d04] ss:$16 sps:$4 sm:$0xff]   ;;  %v11698_v29 = vld [vmem:[%s15480_s1 + $0x1fc0] ss:$16 sps:$4 sm:$0xff]   ;;  %v6581_v17 = vrot.slane %v6579_v61, 1 }
 0x35f   : > { %7993 = vmatpush1.bf16.msra.mxu0 %v11647_v31  ;;  %v14883_v51 = vadd.f32 %v6093_v37, %v14026_v30  ;;  %v11659_v30 = vld [vmem:[%s15480_s1 + $0x1d00] ss:$16 sps:$4 sm:$0xff]   ;;  %v11703_v8 = vld [vmem:[%s15480_s1 + $0x1de4] ss:$16 sps:$4 sm:$0xff]   ;;  %v6598_v31 = vshll.u32 %v10055_v20, 16  ;;  %v6597_v37 = vrot.slane %v6595_v26, 1 }
 0x360   : > { %7994 = vmatprep.subr.bf16.mxu0 %v11655_v59  ;;  %v11701_v59 = vld [vmem:[%s15480_s1 + $0x1de0] ss:$16 sps:$4 sm:$0xff]   ;;  %v11706_v58 = vld [vmem:[%s15480_s1 + $0x1fe4] ss:$16 sps:$4 sm:$0xff]   ;;  %v11713_v39 = vld [vmem:[%s15480_s1 + $0x180c] ss:$16 sps:$4 sm:$0xff]   ;;  %v14994_v44 = vor.u32 %v6584_v35, %v6581_v17 }
 0x361   : > { %8034 = vmatpush1.bf16.msra.mxu1 %v11650_v42  ;;  %v6600_v41 = vrot.slane %v6598_v31, 2  ;;  %v11704_v42 = vld [vmem:[%s15480_s1 + $0x1fe0] ss:$16 sps:$4 sm:$0xff]   ;;  %v11747_v14 = vld [vmem:[%s15480_s1 + $0x18c8] ss:$16 sps:$4 sm:$0xff]  }
 0x362   : > { %8035 = vmatprep.subr.bf16.mxu1 %v11658_v45  ;;  %v11716_v45 = vld [vmem:[%s15480_s1 + $0x1a0c] ss:$16 sps:$4 sm:$0xff]   ;;  %v11753_v26 = vld [vmem:[%s15480_s1 + $0x18e8] ss:$16 sps:$4 sm:$0xff]  }
 0x363   : > { %7995 = vmatpush1.bf16.msra.mxu0 %v11653_v9  ;;  %v11711_v9 = vld [vmem:[%s15480_s1 + $0x1808] ss:$16 sps:$4 sm:$0xff]   ;;  %v11755_v20 = vld [vmem:[%s15480_s1 + $0x18ec] ss:$16 sps:$4 sm:$0xff]  }
 0x364   : > { %7996 = vmatprep.subr.bf16.mxu0 %v11661_v28  ;;  %v11719_v28 = vld [vmem:[%s15480_s1 + $0x182c] ss:$16 sps:$4 sm:$0xff]   ;;  %v11756_v17 = vld [vmem:[%s15480_s1 + $0x1ae8] ss:$16 sps:$4 sm:$0xff]  }
 0x365   : > { %8036 = vmatpush1.bf16.msra.mxu1 %v11656_v53  ;;  %v15005_v53 = vor.u32 %v6600_v41, %v6597_v37  ;;  %v11758_v31 = vld [vmem:[%s15480_s1 + $0x1aec] ss:$16 sps:$4 sm:$0xff]   ;;  %v11759_v35 = vld [vmem:[%s15480_s1 + $0x1908] ss:$16 sps:$4 sm:$0xff]  }
 0x366   : > { %8037 = vmatprep.subr.bf16.mxu1 %v11664_v60  ;;  %v11722_v60 = vld [vmem:[%s15480_s1 + $0x1a2c] ss:$16 sps:$4 sm:$0xff]   ;;  %v11765_v37 = vld [vmem:[%s15480_s1 + $0x1928] ss:$16 sps:$4 sm:$0xff]  }
 0x367   : > { %7997 = vmatpush1.bf16.msra.mxu0 %v11659_v30  ;;  %v11717_v30 = vld [vmem:[%s15480_s1 + $0x1828] ss:$16 sps:$4 sm:$0xff]   ;;  %v11770_v41 = vld [vmem:[%s15480_s1 + $0x1b2c] ss:$16 sps:$4 sm:$0xff]  }
 0x368   : > { %7998 = vmatprep.subr.bf16.mxu0 %v11667_v55  ;;  %v11725_v55 = vld [vmem:[%s15480_s1 + $0x184c] ss:$16 sps:$4 sm:$0xff]  }
 0x369   : > { %8038 = vmatpush1.bf16.msra.mxu1 %v11662_v2  ;;  %v11723_v2 = vld [vmem:[%s15480_s1 + $0x1848] ss:$16 sps:$4 sm:$0xff]  }
 0x36a   : > { %8039 = vmatprep.subr.bf16.mxu1 %v11670_v56  ;;  %v11729_v56 = vld [vmem:[%s15480_s1 + $0x1868] ss:$16 sps:$4 sm:$0xff]  }
 0x36b   : > { %7999 = vmatpush1.bf16.msra.mxu0 %v11665_v19  ;;  %v11728_v19 = vld [vmem:[%s15480_s1 + $0x1a4c] ss:$16 sps:$4 sm:$0xff]  }
 0x36c   : > { %8000 = vmatprep.subr.bf16.mxu0 %v11673_v62  ;;  %v11734_v62 = vld [vmem:[%s15480_s1 + $0x1a6c] ss:$16 sps:$4 sm:$0xff]  }
 0x36d   : > { %8040 = vmatpush1.bf16.msra.mxu1 %v11668_v49  ;;  %v11737_v49 = vld [vmem:[%s15480_s1 + $0x188c] ss:$16 sps:$4 sm:$0xff]  }
 0x36e   : > { %8041 = vmatprep.subr.bf16.mxu1 %v11676_v27  ;;  %v11735_v27 = vld [vmem:[%s15480_s1 + $0x1888] ss:$16 sps:$4 sm:$0xff]  }
 0x36f   : > { %8001 = vmatpush1.bf16.msra.mxu0 %v11671_v63  ;;  %v11732_v63 = vld [vmem:[%s15480_s1 + $0x1a68] ss:$16 sps:$4 sm:$0xff]  }
 0x370   : > { %8002 = vmatprep.subr.bf16.mxu0 %v11679_v0  ;;  %v11740_v0 = vld [vmem:[%s15480_s1 + $0x1a8c] ss:$16 sps:$4 sm:$0xff]  }
 0x371   : > { %8042 = vmatpush1.bf16.msra.mxu1 %v11674_v36  ;;  %v11743_v36 = vld [vmem:[%s15480_s1 + $0x18ac] ss:$16 sps:$4 sm:$0xff]  }
 0x372   : > { %8043 = vmatprep.subr.bf16.mxu1 %v11682_v3  ;;  %v11741_v3 = vld [vmem:[%s15480_s1 + $0x18a8] ss:$16 sps:$4 sm:$0xff]  }
 0x373   : > { %8003 = vmatpush1.bf16.msra.mxu0 %v11677_v1  ;;  %v11738_v1 = vld [vmem:[%s15480_s1 + $0x1a88] ss:$16 sps:$4 sm:$0xff]  }
 0x374   : > { %8004 = vmatprep.subr.bf16.mxu0 %v11685_v4  ;;  %v11746_v4 = vld [vmem:[%s15480_s1 + $0x1aac] ss:$16 sps:$4 sm:$0xff]  }
 0x375   : > { %8044 = vmatpush1.bf16.msra.mxu1 %v11680_v5  ;;  %v11749_v5 = vld [vmem:[%s15480_s1 + $0x18cc] ss:$16 sps:$4 sm:$0xff]  }
 0x376   : > { %8045 = vmatprep.subr.bf16.mxu1 %v11688_v12 }
 0x377   : > { %8005 = vmatpush1.bf16.msra.mxu0 %v11683_v7 }
 0x378   : > { %8006 = vmatprep.subr.bf16.mxu0 %v11691_v11  ;;  %v11744_v11 = vld [vmem:[%s15480_s1 + $0x1aa8] ss:$16 sps:$4 sm:$0xff]  }
 0x379   : > { %8046 = vmatpush1.bf16.msra.mxu1 %v11686_v38 }
 0x37a   : > { %8047 = vmatprep.subr.bf16.mxu1 %v11694_v23 }
 0x37b   : > { %8007 = vmatpush1.bf16.msra.mxu0 %v11689_v10  ;;  %v11752_v10 = vld [vmem:[%s15480_s1 + $0x1acc] ss:$16 sps:$4 sm:$0xff]  }
 0x37c   : > { %8008 = vmatprep.subr.bf16.mxu0 %v11697_v24 }
 0x37d   : > { %8048 = vmatpush1.bf16.msra.mxu1 %v11692_v57 }
 0x37e   : > { %8049 = vmatprep.subr.bf16.mxu1 %v11700_v22  ;;  %v11750_v22 = vld [vmem:[%s15480_s1 + $0x1ac8] ss:$16 sps:$4 sm:$0xff]  }
 0x37f   : > { %8009 = vmatpush1.bf16.msra.mxu0 %v11695_v16 }
 0x380   : > { %8010 = vmatprep.subr.bf16.mxu0 %v11703_v8 }
 0x381   : > { %8050 = vmatpush1.bf16.msra.mxu1 %v11698_v29  ;;  %v11761_v29 = vld [vmem:[%s15480_s1 + $0x190c] ss:$16 sps:$4 sm:$0xff]  }
 0x382   : > { %8051 = vmatprep.subr.bf16.mxu1 %v11706_v58  ;;  %v11767_v58 = vld [vmem:[%s15480_s1 + $0x192c] ss:$16 sps:$4 sm:$0xff]  }
 0x383   : > { %8011 = vmatpush1.bf16.msra.mxu0 %v11701_v59  ;;  %v11764_v59 = vld [vmem:[%s15480_s1 + $0x1b0c] ss:$16 sps:$4 sm:$0xff]  }
 0x384   : > { %8062 = vmatprep.subr.bf16.mxu0 %v11713_v39  ;;  %v11762_v39 = vld [vmem:[%s15480_s1 + $0x1b08] ss:$16 sps:$4 sm:$0xff]  }
 0x385   : > { %8052 = vmatpush1.bf16.msra.mxu1 %v11704_v42  ;;  %v11773_v42 = vld [vmem:[%s15480_s1 + $0x194c] ss:$16 sps:$4 sm:$0xff]  }
 0x386   : > { %8013 = vmatmul.mubr.bf16.vlgmr.msra.gmra.mrb[52].mxu0 %v14994_v44  ;;  %8103 = vmatprep.subr.bf16.mxu1 %v11716_v45  ;;  %v11771_v45 = vld [vmem:[%s15480_s1 + $0x1948] ss:$16 sps:$4 sm:$0xff]  }
 0x387   : > { %8063 = vmatpush1.bf16.msra.mxu0 %v11711_v9  ;;  %8094 = vmatprep.mubr.bf16.mxu0 %v14568_v32  ;;  %v11731_v32 = vld [vmem:[%s15480_s1 + $0x186c] ss:$16 sps:$4 sm:$0xff]   ;;  %v11768_v9 = vld [vmem:[%s15480_s1 + $0x1b28] ss:$16 sps:$4 sm:$0xff]  }
 0x388   : > { %8064 = vmatprep.subr.bf16.mxu0 %v11719_v28  ;;  %8054 = vmatmul.mubr.bf16.vlgmr.msra.gmra.mrb[52].mxu1 %v15005_v53  ;;  %v11776_v28 = vld [vmem:[%s15480_s1 + $0x1b4c] ss:$16 sps:$4 sm:$0xff]  }
 0x389   : > { %8104 = vmatpush1.bf16.msra.mxu1 %v11714_v46  ;;  %8135 = vmatprep.mubr.bf16.mxu1 %v14574_v15  ;;  %v11726_v15 = vld [vmem:[%s15480_s1 + $0x1a48] ss:$16 sps:$4 sm:$0xff]   ;;  %v11779_v46 = vld [vmem:[%s15480_s1 + $0x196c] ss:$16 sps:$4 sm:$0xff]  }
 0x38a   : > { %8105 = vmatprep.subr.bf16.mxu1 %v11722_v60  ;;  %v11777_v60 = vld [vmem:[%s15480_s1 + $0x1968] ss:$16 sps:$4 sm:$0xff]  }
 0x38b   : > { %8065 = vmatpush1.bf16.msra.mxu0 %v11717_v30  ;;  %v11774_v30 = vld [vmem:[%s15480_s1 + $0x1b48] ss:$16 sps:$4 sm:$0xff]  }
 0x38c   : > { %8066 = vmatprep.subr.bf16.mxu0 %v11725_v55  ;;  %v11782_v55 = vld [vmem:[%s15480_s1 + $0x1b6c] ss:$16 sps:$4 sm:$0xff]  }
 0x38d   : > { %8106 = vmatpush1.bf16.msra.mxu1 %v11720_v54  ;;  %v11785_v54 = vld [vmem:[%s15480_s1 + $0x198c] ss:$16 sps:$4 sm:$0xff]  }
 0x38e   : > { %8107 = vmatprep.subr.bf16.mxu1 %v11728_v19  ;;  %v11783_v19 = vld [vmem:[%s15480_s1 + $0x1988] ss:$16 sps:$4 sm:$0xff]  }
 0x38f   : > { %8067 = vmatpush1.bf16.msra.mxu0 %v11723_v2  ;;  %v11780_v2 = vld [vmem:[%s15480_s1 + $0x1b68] ss:$16 sps:$4 sm:$0xff]  }
 0x390   : > { %8068 = vmatprep.subr.bf16.mxu0 %v11731_v32  ;;  %v11788_v32 = vld [vmem:[%s15480_s1 + $0x1b8c] ss:$16 sps:$4 sm:$0xff]  }
 0x391   : > { %8108 = vmatpush1.bf16.msra.mxu1 %v11726_v15  ;;  %v11791_v15 = vld [vmem:[%s15480_s1 + $0x19ac] ss:$16 sps:$4 sm:$0xff]  }
 0x392   : > { %8109 = vmatprep.subr.bf16.mxu1 %v11734_v62  ;;  %v11789_v62 = vld [vmem:[%s15480_s1 + $0x19a8] ss:$16 sps:$4 sm:$0xff]  }
 0x393   : > { %8069 = vmatpush1.bf16.msra.mxu0 %v11729_v56  ;;  %v11786_v56 = vld [vmem:[%s15480_s1 + $0x1b88] ss:$16 sps:$4 sm:$0xff]  }
 0x394   : > { %8070 = vmatprep.subr.bf16.mxu0 %v11737_v49  ;;  %v11794_v49 = vld [vmem:[%s15480_s1 + $0x1bac] ss:$16 sps:$4 sm:$0xff]  }
 0x395   : > { %8110 = vmatpush1.bf16.msra.mxu1 %v11732_v63  ;;  %v11797_v63 = vld [vmem:[%s15480_s1 + $0x19cc] ss:$16 sps:$4 sm:$0xff]  }
 0x396   : > { %8111 = vmatprep.subr.bf16.mxu1 %v11740_v0  ;;  %v11795_v0 = vld [vmem:[%s15480_s1 + $0x19c8] ss:$16 sps:$4 sm:$0xff]  }
 0x397   : > { %8071 = vmatpush1.bf16.msra.mxu0 %v11735_v27  ;;  %v11792_v27 = vld [vmem:[%s15480_s1 + $0x1ba8] ss:$16 sps:$4 sm:$0xff]  }
 0x398   : > { %8072 = vmatprep.subr.bf16.mxu0 %v11743_v36  ;;  %v11800_v36 = vld [vmem:[%s15480_s1 + $0x1bcc] ss:$16 sps:$4 sm:$0xff]  }
 0x399   : > { %v6131_v7 = vpop.f32.mrb[40].mxu0  ;;  %8112 = vmatpush1.bf16.msra.mxu1 %v11738_v1  ;;  %v11803_v1 = vld [vmem:[%s15480_s1 + $0x19ec] ss:$16 sps:$4 sm:$0xff]  }
 0x39a   : > { %v6133_v12 = vpop.f32.mrb[41].mxu0  ;;  %8113 = vmatprep.subr.bf16.mxu1 %v11746_v4  ;;  %v11801_v4 = vld [vmem:[%s15480_s1 + $0x19e8] ss:$16 sps:$4 sm:$0xff]  }
 0x39b   : > { %v6135_v38 = vpop.f32.mrb[42].mxu0  ;;  %8073 = vmatpush1.bf16.msra.mxu0 %v11741_v3  ;;  %v6172_v23 = vpop.f32.mrb[40].mxu1  ;;  %v11798_v3 = vld [vmem:[%s15480_s1 + $0x1bc8] ss:$16 sps:$4 sm:$0xff]  }
 0x39c   : > { %v6136_v24 = vpop.f32.mrb[43].mxu0  ;;  %8074 = vmatprep.subr.bf16.mxu0 %v11749_v5  ;;  %v15083_v57 = vadd.f32 %v6172_v23, %v6131_v7  ;;  %v6174_v61 = vpop.f32.mrb[41].mxu1  ;;  %v11806_v5 = vld [vmem:[%s15480_s1 + $0x1bec] ss:$16 sps:$4 sm:$0xff]   ;;  %v11813_v23 = vld [vmem:[%s15480_s1 + $0x1c28] ss:$16 sps:$4 sm:$0xff]  }
 0x39d   : > { %v15085_v21 = vadd.f32 %v6174_v61, %v6133_v12  ;;  %v6176_v16 = vpop.f32.mrb[42].mxu1  ;;  %8114 = vmatpush1.bf16.msra.mxu1 %v11744_v11  ;;  %v11809_v7 = vld [vmem:[%s15480_s1 + $0x1c0c] ss:$16 sps:$4 sm:$0xff]   ;;  %v11804_v12 = vld [vmem:[%s15480_s1 + $0x1be8] ss:$16 sps:$4 sm:$0xff]  }
 0x39e   : > { %v6177_v8 = vpop.f32.mrb[43].mxu1  ;;  %8115 = vmatprep.subr.bf16.mxu1 %v11752_v10  ;;  %v11807_v11 = vld [vmem:[%s15480_s1 + $0x1c08] ss:$16 sps:$4 sm:$0xff]   ;;  %v11812_v38 = vld [vmem:[%s15480_s1 + $0x1e0c] ss:$16 sps:$4 sm:$0xff]  }
 0x39f   : > { %8075 = vmatpush1.bf16.msra.mxu0 %v11747_v14  ;;  %v11815_v14 = vld [vmem:[%s15480_s1 + $0x1c2c] ss:$16 sps:$4 sm:$0xff]   ;;  %v11810_v10 = vld [vmem:[%s15480_s1 + $0x1e08] ss:$16 sps:$4 sm:$0xff]  }
 0x3a0   : > { %8076 = vmatprep.subr.bf16.mxu0 %v11755_v20  ;;  %v11818_v24 = vld [vmem:[%s15480_s1 + $0x1e2c] ss:$16 sps:$4 sm:$0xff]   ;;  %v11819_v61 = vld [vmem:[%s15480_s1 + $0x1c48] ss:$16 sps:$4 sm:$0xff]  }
 0x3a1   : > { %8116 = vmatpush1.bf16.msra.mxu1 %v11750_v22  ;;  %v11821_v20 = vld [vmem:[%s15480_s1 + $0x1c4c] ss:$16 sps:$4 sm:$0xff]  }
 0x3a2   : > { %8117 = vmatprep.subr.bf16.mxu1 %v11758_v31  ;;  %v11824_v16 = vld [vmem:[%s15480_s1 + $0x1e4c] ss:$16 sps:$4 sm:$0xff]   ;;  %v11831_v31 = vld [vmem:[%s15480_s1 + $0x1c88] ss:$16 sps:$4 sm:$0xff]  }
 0x3a3   : > { %8077 = vmatpush1.bf16.msra.mxu0 %v11753_v26  ;;  %v11830_v22 = vld [vmem:[%s15480_s1 + $0x1e6c] ss:$16 sps:$4 sm:$0xff]   ;;  %v11828_v26 = vld [vmem:[%s15480_s1 + $0x1e68] ss:$16 sps:$4 sm:$0xff]  }
 0x3a4   : > { %8078 = vmatprep.subr.bf16.mxu0 %v11761_v29  ;;  %v11833_v8 = vld [vmem:[%s15480_s1 + $0x1c8c] ss:$16 sps:$4 sm:$0xff]  }
 0x3a5   : > { %8118 = vmatpush1.bf16.msra.mxu1 %v11756_v17  ;;  %v11836_v29 = vld [vmem:[%s15480_s1 + $0x1e8c] ss:$16 sps:$4 sm:$0xff]  }
 0x3a6   : > { %8119 = vmatprep.subr.bf16.mxu1 %v11764_v59  ;;  %v11839_v17 = vld [vmem:[%s15480_s1 + $0x1cac] ss:$16 sps:$4 sm:$0xff]   ;;  %v11837_v59 = vld [vmem:[%s15480_s1 + $0x1ca8] ss:$16 sps:$4 sm:$0xff]  }
 0x3a7   : > { %8079 = vmatpush1.bf16.msra.mxu0 %v11759_v35  ;;  %v11834_v35 = vld [vmem:[%s15480_s1 + $0x1e88] ss:$16 sps:$4 sm:$0xff]  }
 0x3a8   : > { %8080 = vmatprep.subr.bf16.mxu0 %v11767_v58  ;;  %v11842_v58 = vld [vmem:[%s15480_s1 + $0x1eac] ss:$16 sps:$4 sm:$0xff]  }
 0x3a9   : > { %8120 = vmatpush1.bf16.msra.mxu1 %v11762_v39  ;;  %v11845_v39 = vld [vmem:[%s15480_s1 + $0x1ccc] ss:$16 sps:$4 sm:$0xff]  }
 0x3aa   : > { %8121 = vmatprep.subr.bf16.mxu1 %v11770_v41 }
 0x3ab   : > { %8081 = vmatpush1.bf16.msra.mxu0 %v11765_v37 }
 0x3ac   : > { %8082 = vmatprep.subr.bf16.mxu0 %v11773_v42 }
 0x3ad   : > { %8122 = vmatpush1.bf16.msra.mxu1 %v11768_v9  ;;  %v11840_v9 = vld [vmem:[%s15480_s1 + $0x1ea8] ss:$16 sps:$4 sm:$0xff]  }
 0x3ae   : > { %8123 = vmatprep.subr.bf16.mxu1 %v11776_v28 }
 0x3af   : > { %8083 = vmatpush1.bf16.msra.mxu0 %v11771_v45 }
 0x3b0   : > { %8084 = vmatprep.subr.bf16.mxu0 %v11779_v46  ;;  %v11843_v46 = vld [vmem:[%s15480_s1 + $0x1cc8] ss:$16 sps:$4 sm:$0xff]  }
 0x3b1   : > { %8124 = vmatpush1.bf16.msra.mxu1 %v11774_v30  ;;  %v11848_v30 = vld [vmem:[%s15480_s1 + $0x1ecc] ss:$16 sps:$4 sm:$0xff]  }
 0x3b2   : > { %8125 = vmatprep.subr.bf16.mxu1 %v11782_v55  ;;  %v11851_v55 = vld [vmem:[%s15480_s1 + $0x1cec] ss:$16 sps:$4 sm:$0xff]  }
 0x3b3   : > { %8085 = vmatpush1.bf16.msra.mxu0 %v11777_v60 }
 0x3b4   : > { %8086 = vmatprep.subr.bf16.mxu0 %v11785_v54 }
 0x3b5   : > { %8126 = vmatpush1.bf16.msra.mxu1 %v11780_v2 }
 0x3b6   : > { %8127 = vmatprep.subr.bf16.mxu1 %v11788_v32  ;;  %v11846_v32 = vld [vmem:[%s15480_s1 + $0x1ec8] ss:$16 sps:$4 sm:$0xff]  }
 0x3b7   : > { %8087 = vmatpush1.bf16.msra.mxu0 %v11783_v19 }
 0x3b8   : > { %8088 = vmatprep.subr.bf16.mxu0 %v11791_v15 }
 0x3b9   : > { %8128 = vmatpush1.bf16.msra.mxu1 %v11786_v56 }
 0x3ba   : > { %8129 = vmatprep.subr.bf16.mxu1 %v11794_v49  ;;  %v11854_v49 = vld [vmem:[%s15480_s1 + $0x1eec] ss:$16 sps:$4 sm:$0xff]  }
 0x3bb   : > { %8089 = vmatpush1.bf16.msra.mxu0 %v11789_v62  ;;  %v11849_v62 = vld [vmem:[%s15480_s1 + $0x1ce8] ss:$16 sps:$4 sm:$0xff]  }
 0x3bc   : > { %8090 = vmatprep.subr.bf16.mxu0 %v11797_v63 }
 0x3bd   : > { %8130 = vmatpush1.bf16.msra.mxu1 %v11792_v27  ;;  %v11852_v27 = vld [vmem:[%s15480_s1 + $0x1ee8] ss:$16 sps:$4 sm:$0xff]  }
 0x3be   : > { %8131 = vmatprep.subr.bf16.mxu1 %v11800_v36  ;;  %v11863_v36 = vld [vmem:[%s15480_s1 + $0x1d2c] ss:$16 sps:$4 sm:$0xff]  }
 0x3bf   : > { %8091 = vmatpush1.bf16.msra.mxu0 %v11795_v0  ;;  %v11855_v0 = vld [vmem:[%s15480_s1 + $0x1d08] ss:$16 sps:$4 sm:$0xff]  }
 0x3c0   : > { %8092 = vmatprep.subr.bf16.mxu0 %v11803_v1  ;;  %v11858_v1 = vld [vmem:[%s15480_s1 + $0x1f08] ss:$16 sps:$4 sm:$0xff]  }
 0x3c1   : > { %8132 = vmatpush1.bf16.msra.mxu1 %v11798_v3  ;;  %v11861_v3 = vld [vmem:[%s15480_s1 + $0x1d28] ss:$16 sps:$4 sm:$0xff]  }
 0x3c2   : > { %8133 = vmatprep.subr.bf16.mxu1 %v11806_v5  ;;  %v11869_v5 = vld [vmem:[%s15480_s1 + $0x1d4c] ss:$16 sps:$4 sm:$0xff]  }
 0x3c3   : > { %8093 = vmatpush1.bf16.msra.mxu0 %v11801_v4  ;;  %v11866_v4 = vld [vmem:[%s15480_s1 + $0x1f2c] ss:$16 sps:$4 sm:$0xff]  }
 0x3c4   : > { %8144 = vmatprep.subr.bf16.mxu0 %v11809_v7  ;;  %v11864_v7 = vld [vmem:[%s15480_s1 + $0x1f28] ss:$16 sps:$4 sm:$0xff]  }
 0x3c5   : > { %8134 = vmatpush1.bf16.msra.mxu1 %v11804_v12  ;;  %v11867_v12 = vld [vmem:[%s15480_s1 + $0x1d48] ss:$16 sps:$4 sm:$0xff]  }
 0x3c6   : > { %8095 = vmatmul.mubr.bf16.vlgmr.msra.gmra.mrb[56].mxu0 %v14775_v25  ;;  %8185 = vmatprep.subr.bf16.mxu1 %v11812_v38  ;;  %v11816_v25 = vld [vmem:[%s15480_s1 + $0x1e28] ss:$16 sps:$4 sm:$0xff]   ;;  %v11875_v38 = vld [vmem:[%s15480_s1 + $0x1d6c] ss:$16 sps:$4 sm:$0xff]  }
 0x3c7   : > { %8145 = vmatpush1.bf16.msra.mxu0 %v11807_v11  ;;  %8176 = vmatprep.mubr.bf16.mxu0 %v14786_v18  ;;  %v11827_v18 = vld [vmem:[%s15480_s1 + $0x1c6c] ss:$16 sps:$4 sm:$0xff]  }
 0x3c8   : > { %8146 = vmatprep.subr.bf16.mxu0 %v11815_v14  ;;  %8136 = vmatmul.mubr.bf16.vlgmr.msra.gmra.mrb[56].mxu1 %v14788_v33  ;;  %v11822_v33 = vld [vmem:[%s15480_s1 + $0x1e48] ss:$16 sps:$4 sm:$0xff]   ;;  %v11872_v11 = vld [vmem:[%s15480_s1 + $0x1f4c] ss:$16 sps:$4 sm:$0xff]  }
 0x3c9   : > { %8186 = vmatpush1.bf16.msra.mxu1 %v11810_v10  ;;  %8217 = vmatprep.mubr.bf16.mxu1 %v14794_v34  ;;  %v11825_v34 = vld [vmem:[%s15480_s1 + $0x1c68] ss:$16 sps:$4 sm:$0xff]  }
 0x3ca   : > { %8187 = vmatprep.subr.bf16.mxu1 %v11818_v24  ;;  %v11870_v14 = vld [vmem:[%s15480_s1 + $0x1f48] ss:$16 sps:$4 sm:$0xff]   ;;  %v11881_v24 = vld [vmem:[%s15480_s1 + $0x1d8c] ss:$16 sps:$4 sm:$0xff]  }
 0x3cb   : > { %8147 = vmatpush1.bf16.msra.mxu0 %v11813_v23  ;;  %v11873_v10 = vld [vmem:[%s15480_s1 + $0x1d68] ss:$16 sps:$4 sm:$0xff]   ;;  %v11878_v23 = vld [vmem:[%s15480_s1 + $0x1f6c] ss:$16 sps:$4 sm:$0xff]  }
 0x3cc   : > { %8148 = vmatprep.subr.bf16.mxu0 %v11821_v20  ;;  %v11876_v20 = vld [vmem:[%s15480_s1 + $0x1f68] ss:$16 sps:$4 sm:$0xff]  }
 0x3cd   : > { %8188 = vmatpush1.bf16.msra.mxu1 %v11816_v25  ;;  %v11879_v25 = vld [vmem:[%s15480_s1 + $0x1d88] ss:$16 sps:$4 sm:$0xff]  }
 0x3ce   : > { %8189 = vmatprep.subr.bf16.mxu1 %v11824_v16  ;;  %v11887_v16 = vld [vmem:[%s15480_s1 + $0x1dac] ss:$16 sps:$4 sm:$0xff]  }
 0x3cf   : > { %8149 = vmatpush1.bf16.msra.mxu0 %v11819_v61  ;;  %v11884_v61 = vld [vmem:[%s15480_s1 + $0x1f8c] ss:$16 sps:$4 sm:$0xff]  }
 0x3d0   : > { %8150 = vmatprep.subr.bf16.mxu0 %v11827_v18  ;;  %v11882_v18 = vld [vmem:[%s15480_s1 + $0x1f88] ss:$16 sps:$4 sm:$0xff]  }
 0x3d1   : > { %8190 = vmatpush1.bf16.msra.mxu1 %v11822_v33  ;;  %v11885_v33 = vld [vmem:[%s15480_s1 + $0x1da8] ss:$16 sps:$4 sm:$0xff]  }
 0x3d2   : > { %8191 = vmatprep.subr.bf16.mxu1 %v11830_v22  ;;  %v11893_v22 = vld [vmem:[%s15480_s1 + $0x1dcc] ss:$16 sps:$4 sm:$0xff]  }
 0x3d3   : > { %8151 = vmatpush1.bf16.msra.mxu0 %v11825_v34  ;;  %v11890_v34 = vld [vmem:[%s15480_s1 + $0x1fac] ss:$16 sps:$4 sm:$0xff]  }
 0x3d4   : > { %8152 = vmatprep.subr.bf16.mxu0 %v11833_v8  ;;  %v11888_v8 = vld [vmem:[%s15480_s1 + $0x1fa8] ss:$16 sps:$4 sm:$0xff]  }
 0x3d5   : > { %8192 = vmatpush1.bf16.msra.mxu1 %v11828_v26  ;;  %v11891_v26 = vld [vmem:[%s15480_s1 + $0x1dc8] ss:$16 sps:$4 sm:$0xff]  }
 0x3d6   : > { %8193 = vmatprep.subr.bf16.mxu1 %v11836_v29  ;;  %v11899_v29 = vld [vmem:[%s15480_s1 + $0x1dec] ss:$16 sps:$4 sm:$0xff]  }
 0x3d7   : > { %8153 = vmatpush1.bf16.msra.mxu0 %v11831_v31  ;;  %v11896_v31 = vld [vmem:[%s15480_s1 + $0x1fcc] ss:$16 sps:$4 sm:$0xff]  }
 0x3d8   : > { %8154 = vmatprep.subr.bf16.mxu0 %v11839_v17  ;;  %v11894_v17 = vld [vmem:[%s15480_s1 + $0x1fc8] ss:$16 sps:$4 sm:$0xff]  }
 0x3d9   : > { %v6213_v37 = vpop.f32.mrb[44].mxu0  ;;  %8194 = vmatpush1.bf16.msra.mxu1 %v11834_v35  ;;  %v11897_v35 = vld [vmem:[%s15480_s1 + $0x1de8] ss:$16 sps:$4 sm:$0xff]  }
 0x3da   : > { %v6214_v41 = vadd.f32 %v6213_v37, %v15083_v57  ;;  %v6215_v42 = vpop.f32.mrb[45].mxu0  ;;  %8195 = vmatprep.subr.bf16.mxu1 %v11842_v58  ;;  %v11900_v58 = vld [vmem:[%s15480_s1 + $0x1fe8] ss:$16 sps:$4 sm:$0xff]  }
 0x3db   : > { %v6216_v45 = vadd.f32 %v6215_v42, %v15085_v21  ;;  %v6217_v28 = vpop.f32.mrb[46].mxu0  ;;  %8155 = vmatpush1.bf16.msra.mxu0 %v11837_v59  ;;  %v6254_v60 = vpop.f32.mrb[44].mxu1  ;;  %v11902_v59 = vld [vmem:[%s15480_s1 + $0x1fec] ss:$16 sps:$4 sm:$0xff]  }
 0x3dc   : > { %v6218_v57 = vpop.f32.mrb[47].mxu0  ;;  %8156 = vmatprep.subr.bf16.mxu0 %v11845_v39  ;;  %v6255_v54 = vadd.f32 %v6254_v60, %v6214_v41  ;;  %v6256_v21 = vpop.f32.mrb[45].mxu1 }
 0x3dd   : > { %v6257_v2 = vadd.f32 %v6256_v21, %v6216_v45  ;;  %v6258_v19 = vpop.f32.mrb[46].mxu1  ;;  %8196 = vmatpush1.bf16.msra.mxu1 %v11840_v9 }
 0x3de   : > { %v15289_v15 = vadd.f32 %v6255_v54, %v14436_v13  ;;  %v6259_v56 = vpop.f32.mrb[47].mxu1  ;;  %8197 = vmatprep.subr.bf16.mxu1 %v11848_v30  ;;  %v11857_v13 = vld [vmem:[%s15480_s1 + $0x1d0c] ss:$16 sps:$4 sm:$0xff]   ;;  %v15404_v54 = vld [vmem:[%s15481_s2] sm:$0xf] }
 0x3df   : > { %8157 = vmatpush1.bf16.msra.mxu0 %v11843_v46  ;;  %v15298_v63 = vadd.f32 %v6257_v2, %v14438_v6  ;;  %v11860_v6 = vld [vmem:[%s15480_s1 + $0x1f0c] ss:$16 sps:$4 sm:$0xff]   ;;  %v8235_v56 = vrot.slane %v15404_v54, %v12116_v47 }
 0x3e0   : > { %8158 = vmatprep.subr.bf16.mxu0 %v11851_v55 }
 0x3e1   : > { %8198 = vmatpush1.bf16.msra.mxu1 %v11846_v32 }
 0x3e2   : > { %8199 = vmatprep.subr.bf16.mxu1 %v11854_v49 }
 0x3e3   : > { %8159 = vmatpush1.bf16.msra.mxu0 %v11849_v62 }
 0x3e4   : > { %8160 = vmatprep.subr.bf16.mxu0 %v11857_v13  ;;  %v8239_v13 = vrot.slane %v15404_v54, %v12119_v48 }
 0x3e5   : > { %8200 = vmatpush1.bf16.msra.mxu1 %v11852_v27 }
 0x3e6   : > { %8201 = vmatprep.subr.bf16.mxu1 %v11860_v6 }
 0x3e7   : > { %8161 = vmatpush1.bf16.msra.mxu0 %v11855_v0 }
 0x3e8   : > { %8162 = vmatprep.subr.bf16.mxu0 %v11863_v36 }
 0x3e9   : > { %8202 = vmatpush1.bf16.msra.mxu1 %v11858_v1  ;;  %v15412_v1 = vpop.permute.xlu0 %8286 }
 0x3ea   : > { %8203 = vmatprep.subr.bf16.mxu1 %v11866_v4 }
 0x3eb   : > { %8163 = vmatpush1.bf16.msra.mxu0 %v11861_v3 }
 0x3ec   : > { %8164 = vmatprep.subr.bf16.mxu0 %v11869_v5 }
 0x3ed   : > { %8204 = vmatpush1.bf16.msra.mxu1 %v11864_v7 }
 0x3ee   : > { %8205 = vmatprep.subr.bf16.mxu1 %v11872_v11 }
 0x3ef   : > { %8165 = vmatpush1.bf16.msra.mxu0 %v11867_v12 }
 0x3f0   : > { %8166 = vmatprep.subr.bf16.mxu0 %v11875_v38 }
 0x3f1   : > { %8206 = vmatpush1.bf16.msra.mxu1 %v11870_v14 }
 0x3f2   : > { %8207 = vmatprep.subr.bf16.mxu1 %v11878_v23 }
 0x3f3   : > { %8167 = vmatpush1.bf16.msra.mxu0 %v11873_v10 }
 0x3f4   : > { %8168 = vmatprep.subr.bf16.mxu0 %v11881_v24 }
 0x3f5   : > { %8208 = vmatpush1.bf16.msra.mxu1 %v11876_v20 }
 0x3f6   : > { %8209 = vmatprep.subr.bf16.mxu1 %v11884_v61 }
 0x3f7   : > { %8169 = vmatpush1.bf16.msra.mxu0 %v11879_v25 }
 0x3f8   : > { %8170 = vmatprep.subr.bf16.mxu0 %v11887_v16 }
 0x3f9   : > { %8210 = vmatpush1.bf16.msra.mxu1 %v11882_v18 }
 0x3fa   : > { %8211 = vmatprep.subr.bf16.mxu1 %v11890_v34 }
 0x3fb   : > { %8171 = vmatpush1.bf16.msra.mxu0 %v11885_v33 }
 0x3fc   : > { %8172 = vmatprep.subr.bf16.mxu0 %v11893_v22 }
 0x3fd   : > { %8212 = vmatpush1.bf16.msra.mxu1 %v11888_v8 }
 0x3fe   : > { %8213 = vmatprep.subr.bf16.mxu1 %v11896_v31 }
 0x3ff   : > { %8173 = vmatpush1.bf16.msra.mxu0 %v11891_v26 }
 0x400   : > { %8174 = vmatprep.subr.bf16.mxu0 %v11899_v29 }
 0x401   : > { %8214 = vmatpush1.bf16.msra.mxu1 %v11894_v17 }
 0x402   : > { %8215 = vmatprep.subr.bf16.mxu1 %v11902_v59 }
 0x403   : > { %8175 = vmatpush1.bf16.msra.mxu0 %v11897_v35 }
 0x405   : > { %8216 = vmatpush1.bf16.msra.mxu1 %v11900_v58 }
 0x406   : > { %8177 = vmatmul.mubr.bf16.vlgmr.msra.gmra.mrb[60].mxu0 %v14994_v44 }
 0x408   : > { %8218 = vmatmul.mubr.bf16.vlgmr.msra.gmra.mrb[60].mxu1 %v15005_v53 }
 0x419   : > { %v7932_v39 = vpop.f32.mrb[48].mxu0 }
 0x41a   : > { %v7934_v37 = vpop.f32.mrb[49].mxu0 }
 0x41b   : > { %v7936_v41 = vpop.f32.mrb[50].mxu0  ;;  %v7973_v42 = vpop.f32.mrb[48].mxu1 }
 0x41c   : > { %v7937_v9 = vpop.f32.mrb[51].mxu0  ;;  %v7974_v45 = vadd.f32 %v7973_v42, %v7932_v39  ;;  %v7975_v28 = vpop.f32.mrb[49].mxu1 }
 0x41d   : > { %v7976_v46 = vadd.f32 %v7975_v28, %v7934_v37  ;;  %v7977_v30 = vpop.f32.mrb[50].mxu1 }
 0x41e   : > { %v7978_v60 = vpop.f32.mrb[51].mxu1 }
 0x459   : > { %v8014_v57 = vpop.f32.mrb[52].mxu0 }
 0x45a   : > { %v8015_v55 = vadd.f32 %v8014_v57, %v7974_v45  ;;  %v8016_v44 = vpop.f32.mrb[53].mxu0 }
 0x45b   : > { %v8017_v21 = vadd.f32 %v8016_v44, %v7976_v46  ;;  %v8018_v53 = vpop.f32.mrb[54].mxu0  ;;  %v8055_v2 = vpop.f32.mrb[52].mxu1 }
 0x45c   : > { %v8019_v19 = vpop.f32.mrb[55].mxu0  ;;  %v8056_v32 = vadd.f32 %v8055_v2, %v8015_v55  ;;  %v8057_v62 = vpop.f32.mrb[53].mxu1 }
 0x45d   : > { %v8058_v49 = vadd.f32 %v8057_v62, %v8017_v21  ;;  %v8059_v27 = vpop.f32.mrb[54].mxu1  ;;  %v11912_v62 = vmov 1983009808  }
 0x45e   : > { %v8226_v0 = vadd.f32 %v8056_v32, %v14874_v43  ;;  %v8060_v6 = vpop.f32.mrb[55].mxu1 }
 0x45f   : > { %v8227_v36 = vadd.f32 %v8058_v49, %v14883_v51  ;;  %v8267_v49 = vunpack.c.l.s4 %v11912_v62 }
 0x460   : > { %v15414_v3 = vadd.f32 %v8235_v56, %v8226_v0 }
 0x461   : > { %v15416_v4 = vadd.f32 %v8239_v13, %v8227_v36 }
 0x462   : > { %v8322_v47 = vmul.f32 %v15414_v3, %v15414_v3  ;;  %v8289_v5 = vmul.f32 %v15412_v1, %v15414_v3 }
 0x463   : > { %v10313_v48 = vpack.c.bf16 %v15416_v4, %v15414_v3  ;;  %v8323_v43 = vmul.f32 %v15416_v4, %v15416_v4  ;;  %v8290_v51 = vmul.f32 %v15412_v1, %v15416_v4 }
 0x464   : > { %v8294_v7 = vsel %vm8293_vm8, %v8289_v5, 0.0  ;;  %v8326_v12 = vmul.f32 %v8322_v47, %v15412_v1 }
 0x465   : > { %v8295_v11 = vrot.slane %v8294_v7, 4  ;;  %v8301_v38 = vsel %vm8293_vm8, %v8290_v51, 0.0  ;;  %v8327_v14 = vmul.f32 %v8323_v43, %v15412_v1  ;;  %v8268_v43 = vunpack.c.0.s8 %v8267_v49 }
 0x466   : > { %v8302_v10 = vrot.slane %v8301_v38, 4  ;;  %v8330_v23 = vsel %vm8293_vm8, %v8326_v12, 0.0 }
 0x467   : > { %v8296_v24 = vadd.f32 %v8295_v11, %v8294_v7  ;;  %v8331_v20 = vrot.slane %v8330_v23, 4  ;;  %v8337_v25 = vsel %vm8293_vm8, %v8327_v14, 0.0  ;;  %v8243_v7 = vrot.slane %v15404_v54, %v12125_v50 }
 0x468   : > { %v8303_v61 = vadd.f32 %v8302_v10, %v8301_v38  ;;  %v8338_v16 = vrot.slane %v8337_v25, 4  ;;  %v8247_v38 = vrot.slane %v15404_v54, %v12129_v52 }
 0x469   : > { %v8297_v18 = vrot.slane %v8296_v24, 2  ;;  %v8332_v33 = vadd.f32 %v8331_v20, %v8330_v23  ;;  %v8271_v20 = vsub.s32 %v8268_v43, %v12089_v40 }
 0x46a   : > { %v8304_v34 = vrot.slane %v8303_v61, 2  ;;  %v8339_v22 = vadd.f32 %v8338_v16, %v8337_v25 }
 0x46b   : > { %v8298_v8 = vadd.f32 %v8297_v18, %v8296_v24  ;;  %v8333_v26 = vrot.slane %v8332_v33, 2  ;;  %v8272_v52 = vrot.slane %v10313_v48, %v8271_v20 }
 0x46c   : > { %v8305_v31 = vadd.f32 %v8304_v34, %v8303_v61  ;;  %v8340_v29 = vrot.slane %v8339_v22, 2 }
 0x46d   : > { %v8299_v17 = vrot.slane %v8298_v8, 1  ;;  %v8334_v35 = vadd.f32 %v8333_v26, %v8332_v33 }
 0x46e   : > { %v8306_v59 = vrot.slane %v8305_v31, 1  ;;  %v8341_v58 = vadd.f32 %v8340_v29, %v8339_v22 }
 0x46f   : > { %v8335_v39 = vrot.slane %v8334_v35, 1  ;;  %v8300_v41 = vadd.f32 %v8299_v17, %v8298_v8 }
 0x470   : > { %v8342_v37 = vrot.slane %v8341_v58, 1  ;;  %v8307_v9 = vadd.f32 %v8306_v59, %v8305_v31 }
 0x471   : > { %v8336_v42 = vadd.f32 %v8335_v39, %v8334_v35 }
 0x472   : > { %v8343_v45 = vadd.f32 %v8342_v37, %v8341_v58 }
 0x473   : > { %v15435_v28 = vsel %vm8358_vm9, %v8300_v41, %v8336_v42 }
 0x474   : > { %v15438_v46 = vsel %vm8358_vm9, %v8307_v9, %v8343_v45 }
 0x475   : > { %v8367_v30 = vcombine.low %v15435_v28, %v15438_v46 }
 0x499   : > { %v8096_v60 = vpop.f32.mrb[56].mxu0 }
 0x49a   : > { %v8098_v57 = vpop.f32.mrb[57].mxu0 }
 0x49b   : > { %v8100_v55 = vpop.f32.mrb[58].mxu0  ;;  %v8137_v44 = vpop.f32.mrb[56].mxu1 }
 0x49c   : > { %v8101_v21 = vpop.f32.mrb[59].mxu0  ;;  %v8138_v53 = vadd.f32 %v8137_v44, %v8096_v60  ;;  %v8139_v2 = vpop.f32.mrb[57].mxu1 }
 0x49d   : > { %v8140_v19 = vadd.f32 %v8139_v2, %v8098_v57  ;;  %v8141_v32 = vpop.f32.mrb[58].mxu1 }
 0x49e   : > { %v8142_v56 = vpop.f32.mrb[59].mxu1 }
 0x4d9   : > { %v8178_v13 = vpop.f32.mrb[60].mxu0 }
 0x4da   : > { %v8179_v27 = vadd.f32 %v8178_v13, %v8138_v53  ;;  %v8180_v0 = vpop.f32.mrb[61].mxu0  ;;  %v8375_v13 = vrot.slane %v8367_v30, %v8271_v20 }
 0x4db   : > { %v8181_v6 = vadd.f32 %v8180_v0, %v8140_v19  ;;  %v8182_v36 = vpop.f32.mrb[62].mxu0  ;;  %v8219_v47 = vpop.f32.mrb[60].mxu1 }
 0x4dc   : > { %v8183_v5 = vpop.f32.mrb[63].mxu0  ;;  %v8220_v51 = vadd.f32 %v8219_v47, %v8179_v27  ;;  %v8221_v12 = vpop.f32.mrb[61].mxu1 }
 0x4dd   : > { %v8222_v11 = vadd.f32 %v8221_v12, %v8181_v6  ;;  %v8223_v14 = vpop.f32.mrb[62].mxu1 }
 0x4de   : > { %v8228_v10 = vadd.f32 %v8220_v51, %v15289_v15  ;;  %v8224_v23 = vpop.f32.mrb[63].mxu1 }
 0x4df   : > { %v8229_v24 = vadd.f32 %v8222_v11, %v15298_v63 }
 0x4e0   : > { %v8254_v25 = vadd.f32 %v8243_v7, %v8228_v10 }
 0x4e1   : > { %v8255_v61 = vadd.f32 %v8247_v38, %v8229_v24 }
 0x4e2   : > { %v8291_v16 = vmul.f32 %v15412_v1, %v8254_v25  ;;  %v8324_v18 = vmul.f32 %v8254_v25, %v8254_v25 }
 0x4e3   : > { %v10314_v50 = vpack.c.bf16 %v8255_v61, %v8254_v25  ;;  %v8292_v33 = vmul.f32 %v15412_v1, %v8255_v61  ;;  %v8325_v34 = vmul.f32 %v8255_v61, %v8255_v61 }
 0x4e4   : > { %v8308_v15 = vsel %vm8293_vm8, %v8291_v16, 0.0  ;;  %v8328_v63 = vmul.f32 %v8324_v18, %v15412_v1 }
 0x4e5   : > { %v8309_v40 = vrot.slane %v8308_v15, 4  ;;  %v8279_v54 = vrot.slane %v10314_v50, %v8271_v20  ;;  %v8315_v22 = vsel %vm8293_vm8, %v8292_v33, 0.0  ;;  %v8329_v8 = vmul.f32 %v8325_v34, %v15412_v1 }
 0x4e6   : > { %v8344_v26 = vsel %vm8293_vm8, %v8328_v63, 0.0  ;;  %v8316_v31 = vrot.slane %v8315_v22, 4 }
 0x4e7   : > { %v8310_v3 = vadd.f32 %v8309_v40, %v8308_v15  ;;  %v8345_v4 = vrot.slane %v8344_v26, 4  ;;  %v8280_v48 = vcombine.low %v8272_v52, %v8279_v54  ;;  %v8351_v29 = vsel %vm8293_vm8, %v8329_v8, 0.0 }
 0x4e8   : > { %v8317_v17 = vadd.f32 %v8316_v31, %v8315_v22  ;;  %v8352_v35 = vrot.slane %v8351_v29, 4 }
 0x4e9   : > { %v8311_v59 = vrot.slane %v8310_v3, 2  ;;  %v8346_v58 = vadd.f32 %v8345_v4, %v8344_v26  ;;  %8282 = vst [vmem:[%s313_s10] sm:$0xff] %v8280_v48 }
 0x4ea   : > { %v8318_v39 = vrot.slane %v8317_v17, 2  ;;  %v8353_v1 = vadd.f32 %v8352_v35, %v8351_v29 }
 0x4eb   : > { %v8312_v37 = vadd.f32 %v8311_v59, %v8310_v3  ;;  %v8347_v41 = vrot.slane %v8346_v58, 2 }
 0x4ec   : > { %v8319_v42 = vadd.f32 %v8318_v39, %v8317_v17  ;;  %v8354_v9 = vrot.slane %v8353_v1, 2 }
 0x4ed   : > { %v8313_v45 = vrot.slane %v8312_v37, 1  ;;  %v8348_v60 = vadd.f32 %v8347_v41, %v8346_v58 }
 0x4ee   : > { %v8320_v57 = vrot.slane %v8319_v42, 1  ;;  %v8355_v55 = vadd.f32 %v8354_v9, %v8353_v1 }
 0x4ef   : > { %v8349_v44 = vrot.slane %v8348_v60, 1  ;;  %v8314_v53 = vadd.f32 %v8313_v45, %v8312_v37 }
 0x4f0   : > { %v8356_v21 = vrot.slane %v8355_v55, 1  ;;  %v8321_v19 = vadd.f32 %v8320_v57, %v8319_v42 }
 0x4f1   : > { %v8350_v2 = vadd.f32 %v8349_v44, %v8348_v60 }
 0x4f2   : > { %v8357_v32 = vadd.f32 %v8356_v21, %v8355_v55 }
 0x4f3   : > { %v8361_v56 = vsel %vm8358_vm9, %v8314_v53, %v8350_v2 }
 0x4f4   : > { %v8362_v62 = vsel %vm8358_vm9, %v8321_v19, %v8357_v32 }
 0x4f5   : > { %v8368_v49 = vcombine.low %v8361_v56, %v8362_v62 }
 0x4f7   : > { %v8382_v27 = vrot.slane %v8368_v49, %v8271_v20 }
 0x4f9   : > { %v8383_v0 = vcombine.low %v8375_v13, %v8382_v27 }
 0x4fb   : > { %8385 = vst [vmem:[%s318_s13] sm:$0xff] %v8383_v0 }
 0x4fc PF: > { %s19_s27 = sadd.s32 1, %s11909_s27  }
 0x4fd   : > { %p16_p4 = scmp.ge.s32.totalorder %s19_s27, 4  }
 0x4ff   :  { %18 = sbr.rel (!%p16_p4) target bundleno = 1 (0x1), region = 93 }

</bundles_post_ra>
